<compile_context>
chip_gen: v5e
topology: v5e:2x2
jax: 0.10.0
libtpu: 0.0.40
codegen_flags: <defaults>
</compile_context>

<pallas_src>
import jax
import jax.numpy as jnp
from jax.experimental import pallas as pl
from jax.experimental.pallas import tpu as pltpu

LATENT_DIM = 100
C0, H0, W0 = 128, 7, 7          # fc output, Unflatten(1, (C, H, W))
C1 = 64                         # deconv1 output channels
FC_DIM = C0 * H0 * W0           # 6272
DIN_PAD = 128                   # latent contraction dim padded 100 -> 128 (zeros)
_TAPS = ((0, 0), (0, 1), (1, 0), (1, 1))   # (dy, dx) tap order (shared w/ packing)


def _batch_block(B, max_blk=32):
    """Largest divisor of B <= max_blk, keeping >=2 grid steps when B >= 2
    (so both v7x TensorCores get a share of the parallel batch grid)."""
    best = 1
    for cand in range(1, min(B, max_blk) + 1):
        if B % cand == 0 and (B // cand) >= min(2, B):
            best = cand
    return best


# ---------------------------------------------------------------------------
# Fused forward kernel: fc+ReLU -> deconv1+ReLU -> deconv2+Tanh.
# ---------------------------------------------------------------------------
def _make_generator_kernel(bblk):
    def kernel(z_ref, wfc_ref, bfc_ref, w1_ref, b1_ref, w2_ref, b2_ref,
               o_ref, xp_ref, y1p_ref):
        # Zero the padded scratches every step: interiors are fully rewritten
        # below and the halos must be zero.  (Batch axis is "parallel", so a
        # program_id==0-only init would miss the second core's scratch.)
        xp_ref[...] = jnp.zeros_like(xp_ref)
        y1p_ref[...] = jnp.zeros_like(y1p_ref)

        # ----------------------- fc + ReLU (MXU) --------------------------
        # Columns of wfc are pre-permuted to NHWC order, so the 128-wide chunk
        # (h0, w0) of the matmul output is exactly pixel (h0, w0) of the
        # unflattened feature map -- stored straight into the padded scratch
        # with lane-aligned slices (no in-kernel mega-reshape).
        h = jnp.dot(z_ref[:, 0, :], wfc_ref[...],
                    preferred_element_type=jnp.float32)            # (bblk, 6272)
        h = jnp.maximum(h + bfc_ref[...], 0.0)
        for h0 in range(H0):
            for w0 in range(W0):
                col = (h0 * W0 + w0) * C0
                xp_ref[:, 1 + h0, 1 + w0, :] = h[:, col:col + C0]

        # ---------- ConvTranspose2d(128->64, k4 s2 p1) + ReLU (MXU) --------
        # Sub-pixel decomposition: output parity (r1, c1), tap (dy, dx) reads
        # x_pad[m + r1 + dy, n + c1 + dx] against kernel element
        # (3-2*dy-r1, 3-2*dx-c1).  Patches are built 8x8 (sublane-aligned view
        # into the MXU); row/col 7 of each 8x8 result is garbage and dropped.
        b1 = b1_ref[...]                                           # (1, 64)
        for r1 in range(2):
            for c1 in range(2):
                patch = jnp.concatenate(
                    [xp_ref[:, r1 + dy:r1 + dy + 8, c1 + dx:c1 + dx + 8, :]
                     for dy, dx in _TAPS], axis=-1)                # (bblk,8,8,512)
                acc = jnp.dot(patch.reshape(bblk * 64, 4 * C0),
                              w1_ref[r1, c1],
                              preferred_element_type=jnp.float32)  # (bblk*64, 64)
                y1 = jnp.maximum(acc + b1, 0.0).reshape(bblk, 8, 8, C1)
                y1p_ref[r1, c1, :, 1:8, 1:8, :] = y1[:, :7, :7, :]

        # ------- ConvTranspose2d(64->1, k4 s2 p1) + Tanh (VPU/XLU) ---------
        # Applied directly to the four parity planes of layer 1 (each kept
        # with a 1-px zero halo), so the interleaved 14x14x64 activation is
        # never materialised.  The final 28x28 image decomposes into a 4x4
        # grid of 7x7 parity planes: pixel (4u + 2v + r2, 4uu + 2w + c2).
        bias2 = b2_ref[0]
        for v in range(2):
            for r2 in range(2):
                for w in range(2):
                    for c2 in range(2):
                        pieces = []
                        for dy2, dx2 in _TAPS:
                            a_r = v + r2 + dy2 - 1        # in {-1, 0, 1, 2}
                            a_c = w + c2 + dx2 - 1
                            r1 = a_r % 2                  # source row parity
                            c1 = a_c % 2                  # source col parity
                            sr = (a_r - r1) // 2 + 1      # start in padded plane
                            sc = (a_c - c1) // 2 + 1
                            pieces.append(
                                y1p_ref[r1, c1, :, sr:sr + 8, sc:sc + 8, :])
                        patch2 = jnp.concatenate(pieces, axis=-1)  # (bblk,8,8,256)
                        # Cout == 1: keep it off the MXU (no N=1 matmul).
                        acc2 = jnp.sum(patch2 * w2_ref[r2, c2], axis=-1) + bias2
                        plane = jnp.tanh(acc2)                     # (bblk, 8, 8)
                        o_ref[:, 2 * v + r2, 2 * w + c2] = plane[:, :7, :7]

    return kernel


def _generator_pallas(zp, prepped, bblk):
    """zp: (B, 1, 128).  Returns parity-major images (B, 4, 4, 7, 7)."""
    B = zp.shape[0]
    kernel = _make_generator_kernel(bblk)
    return pl.pallas_call(
        kernel,
        out_shape=jax.ShapeDtypeStruct((B, 4, 4, H0, W0), jnp.float32),
        grid=(B // bblk,),
        in_specs=[
            pl.BlockSpec((bblk, 1, DIN_PAD), lambda i: (i, 0, 0)),
            pl.BlockSpec((DIN_PAD, FC_DIM), lambda i: (0, 0)),       # resident
            pl.BlockSpec((1, FC_DIM), lambda i: (0, 0)),
            pl.BlockSpec((2, 2, 4 * C0, C1), lambda i: (0, 0, 0, 0)),
            pl.BlockSpec((1, C1), lambda i: (0, 0)),
            pl.BlockSpec((2, 2, 4 * C1), lambda i: (0, 0, 0)),
            pl.BlockSpec(memory_space=pltpu.MemorySpace.SMEM),       # scalar bias
        ],
        out_specs=pl.BlockSpec((bblk, 4, 4, H0, W0),
                               lambda i: (i, 0, 0, 0, 0)),
        scratch_shapes=[
            pltpu.VMEM((bblk, H0 + 3, W0 + 3, C0), jnp.float32),         # padded x
            pltpu.VMEM((2, 2, bblk, H0 + 3, W0 + 3, C1), jnp.float32),   # padded y1
        ],
        compiler_params=pltpu.CompilerParams(
            dimension_semantics=("parallel",),
            vmem_limit_bytes=48 * 1024 * 1024,
        ),
    )(zp, prepped["fc_w"], prepped["fc_b"], prepped["w1"], prepped["b1"],
      prepped["w2"], prepped["b2"])


@jax.jit
def generator_forward(prepped, z):
    """Matches PyTorch Generator.forward: z (B, 100) -> img (B, 1, 28, 28)."""
    B = z.shape[0]
    bblk = _batch_block(B)
    zp = jnp.pad(z.astype(jnp.float32),
                 ((0, 0), (0, DIN_PAD - z.shape[1])))[:, None, :]    # (B, 1, 128)
    out = _generator_pallas(zp, prepped, bblk)                       # (B,4,4,7,7)
    # TODO(synk): the final 4x4-parity -> raster interleave stays as one tiny
    # XLA transpose; strided in-kernel stores to a (28,28) block were avoided
    # for lowering robustness.
    img = out.transpose(0, 3, 1, 4, 2).reshape(B, 1, 4 * H0, 4 * W0)
    return img


# ---------------------------------------------------------------------------
# One-time parameter re-layout (hoisted out of the forward path).
# ---------------------------------------------------------------------------
def _pack_subpixel_weight(w_pt):
    """(Cin, Cout, 4, 4) ConvTranspose2d weight -> (2, 2, 4*Cin, Cout).

    Row blocks are stacked in the same (dy, dx) order the kernel uses to build
    its input patches; tap (dy, dx) of sub-grid (r, c) uses kernel element
    (3 - 2*dy - r, 3 - 2*dx - c)."""
    rows = []
    for r in range(2):
        cols = []
        for c in range(2):
            blocks = [w_pt[:, :, 3 - 2 * dy - r, 3 - 2 * dx - c]
                      for dy, dx in _TAPS]
            cols.append(jnp.concatenate(blocks, axis=0))             # (4*Cin, Cout)
        rows.append(jnp.stack(cols, axis=0))
    return jnp.stack(rows, axis=0)                                    # (2,2,4Cin,Cout)


def prepare_generator_params(params):
    """One-time re-layout of PyTorch-layout params into kernel-friendly form."""
    f32 = jnp.float32
    # fc: fold Unflatten(128,7,7) + NCHW->NHWC into a column permutation,
    # pre-transpose to (Din, Dout), zero-pad contraction dim 100 -> 128.
    w_fc = params["fc_w"].astype(f32)                                 # (6272, 100)
    w_fc = w_fc.reshape(C0, H0, W0, LATENT_DIM).transpose(1, 2, 0, 3)
    w_fc = w_fc.reshape(FC_DIM, LATENT_DIM).T                         # (100, 6272)
    w_fc = jnp.pad(w_fc, ((0, DIN_PAD - LATENT_DIM), (0, 0)))         # (128, 6272)
    b_fc = params["fc_b"].astype(f32).reshape(C0, H0, W0)
    b_fc = b_fc.transpose(1, 2, 0).reshape(1, FC_DIM)

    w1 = _pack_subpixel_weight(params["w1"].astype(f32))              # (2,2,512,64)
    b1 = params["b1"].astype(f32).reshape(1, -1)                      # (1, 64)

    w2 = _pack_subpixel_weight(params["w2"].astype(f32))[:, :, :, 0]  # (2, 2, 256)
    b2 = params["b2"].astype(f32).reshape(1)                          # (1,) -> SMEM

    return {"fc_w": w_fc, "fc_b": b_fc, "w1": w1, "b1": b1, "w2": w2, "b2": b2}


def init_generator_params(key, latent_dim=LATENT_DIM, fc_out=(C0, H0, W0),
                          deconv_params=((128, 64, 4, 2, 1), (64, 1, 4, 2, 1))):
    """PyTorch-layout parameters (deterministic, PyTorch-default-style bounds)."""
    c0, h0, w0 = fc_out
    fc_dim = c0 * h0 * w0
    k_fc_w, k_fc_b, k1w, k1b, k2w, k2b = jax.random.split(key, 6)

    bound_fc = 1.0 / jnp.sqrt(latent_dim)
    params = {
        "fc_w": jax.random.uniform(k_fc_w, (fc_dim, latent_dim), jnp.float32,
                                   -bound_fc, bound_fc),
        "fc_b": jax.random.uniform(k_fc_b, (fc_dim,), jnp.float32,
                                   -bound_fc, bound_fc),
    }
    (cin1, cout1, k1, _, _), (cin2, cout2, k2, _, _) = deconv_params
    b1 = 1.0 / jnp.sqrt(cin1 * k1 * k1)
    b2 = 1.0 / jnp.sqrt(cin2 * k2 * k2)
    params["w1"] = jax.random.uniform(k1w, (cin1, cout1, k1, k1), jnp.float32, -b1, b1)
    params["b1"] = jax.random.uniform(k1b, (cout1,), jnp.float32, -b1, b1)
    params["w2"] = jax.random.uniform(k2w, (cin2, cout2, k2, k2), jnp.float32, -b2, b2)
    params["b2"] = jax.random.uniform(k2b, (cout2,), jnp.float32, -b2, b2)
    return params


# ---------------------------------------------------------------------------
# Plain-JAX/XLA reference (validated dilate+flip formulation) for self-check.
# ---------------------------------------------------------------------------
def _reference_deconv(x_nchw, w_pt, b, *, stride=2, padding=1):
    k = w_pt.shape[2]
    w_corr = jnp.transpose(jnp.flip(w_pt, axis=(2, 3)), (1, 0, 2, 3))  # (Cout,Cin,k,k)
    y = jax.lax.conv_general_dilated(
        x_nchw, w_corr, window_strides=(1, 1),
        padding=[(k - 1 - padding,) * 2] * 2,
        lhs_dilation=(stride, stride),
        dimension_numbers=("NCHW", "OIHW", "NCHW"))
    return y + b.reshape(1, -1, 1, 1)


def _reference_forward(params, z):
    h = jnp.maximum(z @ params["fc_w"].T + params["fc_b"], 0.0)
    x = h.reshape(z.shape[0], C0, H0, W0)
    x = jnp.maximum(_reference_deconv(x, params["w1"], params["b1"]), 0.0)
    x = _reference_deconv(x, params["w2"], params["b2"])
    return jnp.tanh(x)


if __name__ == "__main__":
    key = jax.random.PRNGKey(0)
    k_params, k_z = jax.random.split(key)

    params = init_generator_params(k_params)
    prepped = prepare_generator_params(params)    # one-time re-layout, not per-call

    for batch in (2, 8):                          # exercises bblk=1 and bblk>1 paths
        z = jax.random.normal(jax.random.fold_in(k_z, batch),
                              (batch, LATENT_DIM), dtype=jnp.float32)

        img = jax.block_until_ready(generator_forward(prepped, z))

        assert img.shape == (batch, 1, 28, 28), img.shape
        assert img.dtype == jnp.float32
        assert bool(jnp.all(jnp.isfinite(img)))
        assert bool(jnp.all(jnp.abs(img) <= 1.0 + 1e-6))     # tanh output range

        ref = _reference_forward(params, z)
        max_err = float(jnp.max(jnp.abs(img - ref)))
        assert max_err < 2e-4, f"B={batch}: mismatch vs XLA reference, {max_err}"

    print("KERNEL_OK")
</pallas_src>

<mosaic_0001>
module attributes {stable_mosaic.version = 11 : i64} {
  func.func @kernel(%arg0: i32, %arg1: memref<1x1x128xf32, #tpu.memory_space<vmem>>, %arg2: memref<128x6272xf32, #tpu.memory_space<vmem>>, %arg3: memref<1x6272xf32, #tpu.memory_space<vmem>>, %arg4: memref<2x2x512x64xf32, #tpu.memory_space<vmem>>, %arg5: memref<1x64xf32, #tpu.memory_space<vmem>>, %arg6: memref<2x2x256xf32, #tpu.memory_space<vmem>>, %arg7: memref<1xf32, #tpu.memory_space<smem>>, %arg8: memref<1x4x4x7x7xf32, #tpu.memory_space<vmem>>, %arg9: memref<1x10x10x128xf32, #tpu.memory_space<vmem>>, %arg10: memref<2x2x1x10x10x64xf32, #tpu.memory_space<vmem>>) attributes {dimension_semantics = [#tpu.dimension_semantics<parallel>], iteration_bounds = array<i64: 2>, scalar_prefetch = 0 : i64, scratch_operands = 2 : i64, tpu.core_type = #tpu.core_type<tc>, window_params = [{transform_indices = @transform_0, window_bounds = array<i64: 1, 1, 128>}, {pipeline_mode = #tpu.pipeline_mode<synchronous>, transform_indices = @transform_1, window_bounds = array<i64: 128, 6272>}, {pipeline_mode = #tpu.pipeline_mode<synchronous>, transform_indices = @transform_2, window_bounds = array<i64: 1, 6272>}, {pipeline_mode = #tpu.pipeline_mode<synchronous>, transform_indices = @transform_3, window_bounds = array<i64: 2, 2, 512, 64>}, {pipeline_mode = #tpu.pipeline_mode<synchronous>, transform_indices = @transform_4, window_bounds = array<i64: 1, 64>}, {pipeline_mode = #tpu.pipeline_mode<synchronous>, transform_indices = @transform_5, window_bounds = array<i64: 2, 2, 256>}, {transform_indices = @transform_6, window_bounds = array<i64: 1>}, {transform_indices = @transform_7, window_bounds = array<i64: 1, 4, 4, 7, 7>}]} {
    %cst = arith.constant 0.000000e+00 : f32
    %0 = vector.broadcast %cst : f32 to vector<1x10x10x128xf32>
    %c0 = arith.constant 0 : index
    %c0_0 = arith.constant 0 : index
    %c0_1 = arith.constant 0 : index
    %c0_2 = arith.constant 0 : index
    %1 = vector.load %arg9[%c0, %c0_0, %c0_1, %c0_2] : memref<1x10x10x128xf32, #tpu.memory_space<vmem>>, vector<1x10x10x128xf32>
    tpu.vector_store %arg9[%c0, %c0_0, %c0_1, %c0_2], %0 {strides = array<i32>} : memref<1x10x10x128xf32, #tpu.memory_space<vmem>>, vector<1x10x10x128xf32>,
    %cst_3 = arith.constant 0.000000e+00 : f32
    %2 = vector.broadcast %cst_3 : f32 to vector<2x2x1x10x10x64xf32>
    %c0_4 = arith.constant 0 : index
    %c0_5 = arith.constant 0 : index
    %c0_6 = arith.constant 0 : index
    %c0_7 = arith.constant 0 : index
    %c0_8 = arith.constant 0 : index
    %c0_9 = arith.constant 0 : index
    %3 = vector.load %arg10[%c0_4, %c0_5, %c0_6, %c0_7, %c0_8, %c0_9] : memref<2x2x1x10x10x64xf32, #tpu.memory_space<vmem>>, vector<2x2x1x10x10x64xf32>
    tpu.vector_store %arg10[%c0_4, %c0_5, %c0_6, %c0_7, %c0_8, %c0_9], %2 {strides = array<i32>} : memref<2x2x1x10x10x64xf32, #tpu.memory_space<vmem>>, vector<2x2x1x10x10x64xf32>,
    %c0_10 = arith.constant 0 : index
    %c0_11 = arith.constant 0 : index
    %c0_12 = arith.constant 0 : index
    %4 = vector.load %arg1[%c0_10, %c0_11, %c0_12] : memref<1x1x128xf32, #tpu.memory_space<vmem>>, vector<1x1x128xf32>
    %5 = vector.shape_cast %4 : vector<1x1x128xf32> to vector<1x128xf32>
    %c0_13 = arith.constant 0 : index
    %c0_14 = arith.constant 0 : index
    %6 = vector.load %arg2[%c0_13, %c0_14] : memref<128x6272xf32, #tpu.memory_space<vmem>>, vector<128x6272xf32>
    %cst_15 = arith.constant dense<0.000000e+00> : vector<1x6272xf32>
    %7 = tpu.matmul %5, %6, %cst_15 {dimension_numbers = #tpu.dot_dimension_numbers<[1], [0], [0], [1], [0, 0, 1, 1], [], []>} : vector<1x128xf32>, vector<128x6272xf32>, vector<1x6272xf32> -> vector<1x6272xf32>
    %c0_16 = arith.constant 0 : index
    %c0_17 = arith.constant 0 : index
    %8 = vector.load %arg3[%c0_16, %c0_17] : memref<1x6272xf32, #tpu.memory_space<vmem>>, vector<1x6272xf32>
    %9 = arith.addf %7, %8 : vector<1x6272xf32>
    %cst_18 = arith.constant 0.000000e+00 : f32
    %10 = vector.broadcast %cst_18 : f32 to vector<1x6272xf32>
    %11 = arith.maximumf %9, %10 : vector<1x6272xf32>
    %12 = vector.extract_strided_slice %11 {offsets = [0, 0], sizes = [1, 128], strides = [1, 1]} : vector<1x6272xf32> to vector<1x128xf32>
    %c0_19 = arith.constant 0 : index
    %c1 = arith.constant 1 : index
    %c1_20 = arith.constant 1 : index
    %c0_21 = arith.constant 0 : index
    %13 = vector.load %arg9[%c0_19, %c1, %c1_20, %c0_21] : memref<1x10x10x128xf32, #tpu.memory_space<vmem>>, vector<1x1x1x128xf32>
    %14 = vector.shape_cast %13 : vector<1x1x1x128xf32> to vector<1x128xf32>
    %15 = vector.shape_cast %12 : vector<1x128xf32> to vector<1x1x1x128xf32>
    tpu.vector_store %arg9[%c0_19, %c1, %c1_20, %c0_21], %15 {strides = array<i32>} : memref<1x10x10x128xf32, #tpu.memory_space<vmem>>, vector<1x1x1x128xf32>,
    %16 = vector.extract_strided_slice %11 {offsets = [0, 128], sizes = [1, 128], strides = [1, 1]} : vector<1x6272xf32> to vector<1x128xf32>
    %c0_22 = arith.constant 0 : index
    %c1_23 = arith.constant 1 : index
    %c2 = arith.constant 2 : index
    %c0_24 = arith.constant 0 : index
    %17 = vector.load %arg9[%c0_22, %c1_23, %c2, %c0_24] : memref<1x10x10x128xf32, #tpu.memory_space<vmem>>, vector<1x1x1x128xf32>
    %18 = vector.shape_cast %17 : vector<1x1x1x128xf32> to vector<1x128xf32>
    %19 = vector.shape_cast %16 : vector<1x128xf32> to vector<1x1x1x128xf32>
    tpu.vector_store %arg9[%c0_22, %c1_23, %c2, %c0_24], %19 {strides = array<i32>} : memref<1x10x10x128xf32, #tpu.memory_space<vmem>>, vector<1x1x1x128xf32>,
    %20 = vector.extract_strided_slice %11 {offsets = [0, 256], sizes = [1, 128], strides = [1, 1]} : vector<1x6272xf32> to vector<1x128xf32>
    %c0_25 = arith.constant 0 : index
    %c1_26 = arith.constant 1 : index
    %c3 = arith.constant 3 : index
    %c0_27 = arith.constant 0 : index
    %21 = vector.load %arg9[%c0_25, %c1_26, %c3, %c0_27] : memref<1x10x10x128xf32, #tpu.memory_space<vmem>>, vector<1x1x1x128xf32>
    %22 = vector.shape_cast %21 : vector<1x1x1x128xf32> to vector<1x128xf32>
    %23 = vector.shape_cast %20 : vector<1x128xf32> to vector<1x1x1x128xf32>
    tpu.vector_store %arg9[%c0_25, %c1_26, %c3, %c0_27], %23 {strides = array<i32>} : memref<1x10x10x128xf32, #tpu.memory_space<vmem>>, vector<1x1x1x128xf32>,
    %24 = vector.extract_strided_slice %11 {offsets = [0, 384], sizes = [1, 128], strides = [1, 1]} : vector<1x6272xf32> to vector<1x128xf32>
    %c0_28 = arith.constant 0 : index
    %c1_29 = arith.constant 1 : index
    %c4 = arith.constant 4 : index
    %c0_30 = arith.constant 0 : index
    %25 = vector.load %arg9[%c0_28, %c1_29, %c4, %c0_30] : memref<1x10x10x128xf32, #tpu.memory_space<vmem>>, vector<1x1x1x128xf32>
    %26 = vector.shape_cast %25 : vector<1x1x1x128xf32> to vector<1x128xf32>
    %27 = vector.shape_cast %24 : vector<1x128xf32> to vector<1x1x1x128xf32>
    tpu.vector_store %arg9[%c0_28, %c1_29, %c4, %c0_30], %27 {strides = array<i32>} : memref<1x10x10x128xf32, #tpu.memory_space<vmem>>, vector<1x1x1x128xf32>,
    %28 = vector.extract_strided_slice %11 {offsets = [0, 512], sizes = [1, 128], strides = [1, 1]} : vector<1x6272xf32> to vector<1x128xf32>
    %c0_31 = arith.constant 0 : index
    %c1_32 = arith.constant 1 : index
    %c5 = arith.constant 5 : index
    %c0_33 = arith.constant 0 : index
    %29 = vector.load %arg9[%c0_31, %c1_32, %c5, %c0_33] : memref<1x10x10x128xf32, #tpu.memory_space<vmem>>, vector<1x1x1x128xf32>
    %30 = vector.shape_cast %29 : vector<1x1x1x128xf32> to vector<1x128xf32>
    %31 = vector.shape_cast %28 : vector<1x128xf32> to vector<1x1x1x128xf32>
    tpu.vector_store %arg9[%c0_31, %c1_32, %c5, %c0_33], %31 {strides = array<i32>} : memref<1x10x10x128xf32, #tpu.memory_space<vmem>>, vector<1x1x1x128xf32>,
    %32 = vector.extract_strided_slice %11 {offsets = [0, 640], sizes = [1, 128], strides = [1, 1]} : vector<1x6272xf32> to vector<1x128xf32>
    %c0_34 = arith.constant 0 : index
    %c1_35 = arith.constant 1 : index
    %c6 = arith.constant 6 : index
    %c0_36 = arith.constant 0 : index
    %33 = vector.load %arg9[%c0_34, %c1_35, %c6, %c0_36] : memref<1x10x10x128xf32, #tpu.memory_space<vmem>>, vector<1x1x1x128xf32>
    %34 = vector.shape_cast %33 : vector<1x1x1x128xf32> to vector<1x128xf32>
    %35 = vector.shape_cast %32 : vector<1x128xf32> to vector<1x1x1x128xf32>
    tpu.vector_store %arg9[%c0_34, %c1_35, %c6, %c0_36], %35 {strides = array<i32>} : memref<1x10x10x128xf32, #tpu.memory_space<vmem>>, vector<1x1x1x128xf32>,
    %36 = vector.extract_strided_slice %11 {offsets = [0, 768], sizes = [1, 128], strides = [1, 1]} : vector<1x6272xf32> to vector<1x128xf32>
    %c0_37 = arith.constant 0 : index
    %c1_38 = arith.constant 1 : index
    %c7 = arith.constant 7 : index
    %c0_39 = arith.constant 0 : index
    %37 = vector.load %arg9[%c0_37, %c1_38, %c7, %c0_39] : memref<1x10x10x128xf32, #tpu.memory_space<vmem>>, vector<1x1x1x128xf32>
    %38 = vector.shape_cast %37 : vector<1x1x1x128xf32> to vector<1x128xf32>
    %39 = vector.shape_cast %36 : vector<1x128xf32> to vector<1x1x1x128xf32>
    tpu.vector_store %arg9[%c0_37, %c1_38, %c7, %c0_39], %39 {strides = array<i32>} : memref<1x10x10x128xf32, #tpu.memory_space<vmem>>, vector<1x1x1x128xf32>,
    %40 = vector.extract_strided_slice %11 {offsets = [0, 896], sizes = [1, 128], strides = [1, 1]} : vector<1x6272xf32> to vector<1x128xf32>
    %c0_40 = arith.constant 0 : index
    %c2_41 = arith.constant 2 : index
    %c1_42 = arith.constant 1 : index
    %c0_43 = arith.constant 0 : index
    %41 = vector.load %arg9[%c0_40, %c2_41, %c1_42, %c0_43] : memref<1x10x10x128xf32, #tpu.memory_space<vmem>>, vector<1x1x1x128xf32>
    %42 = vector.shape_cast %41 : vector<1x1x1x128xf32> to vector<1x128xf32>
    %43 = vector.shape_cast %40 : vector<1x128xf32> to vector<1x1x1x128xf32>
    tpu.vector_store %arg9[%c0_40, %c2_41, %c1_42, %c0_43], %43 {strides = array<i32>} : memref<1x10x10x128xf32, #tpu.memory_space<vmem>>, vector<1x1x1x128xf32>,
    %44 = vector.extract_strided_slice %11 {offsets = [0, 1024], sizes = [1, 128], strides = [1, 1]} : vector<1x6272xf32> to vector<1x128xf32>
    %c0_44 = arith.constant 0 : index
    %c2_45 = arith.constant 2 : index
    %c2_46 = arith.constant 2 : index
    %c0_47 = arith.constant 0 : index
    %45 = vector.load %arg9[%c0_44, %c2_45, %c2_46, %c0_47] : memref<1x10x10x128xf32, #tpu.memory_space<vmem>>, vector<1x1x1x128xf32>
    %46 = vector.shape_cast %45 : vector<1x1x1x128xf32> to vector<1x128xf32>
    %47 = vector.shape_cast %44 : vector<1x128xf32> to vector<1x1x1x128xf32>
    tpu.vector_store %arg9[%c0_44, %c2_45, %c2_46, %c0_47], %47 {strides = array<i32>} : memref<1x10x10x128xf32, #tpu.memory_space<vmem>>, vector<1x1x1x128xf32>,
    %48 = vector.extract_strided_slice %11 {offsets = [0, 1152], sizes = [1, 128], strides = [1, 1]} : vector<1x6272xf32> to vector<1x128xf32>
    %c0_48 = arith.constant 0 : index
    %c2_49 = arith.constant 2 : index
    %c3_50 = arith.constant 3 : index
    %c0_51 = arith.constant 0 : index
    %49 = vector.load %arg9[%c0_48, %c2_49, %c3_50, %c0_51] : memref<1x10x10x128xf32, #tpu.memory_space<vmem>>, vector<1x1x1x128xf32>
    %50 = vector.shape_cast %49 : vector<1x1x1x128xf32> to vector<1x128xf32>
    %51 = vector.shape_cast %48 : vector<1x128xf32> to vector<1x1x1x128xf32>
    tpu.vector_store %arg9[%c0_48, %c2_49, %c3_50, %c0_51], %51 {strides = array<i32>} : memref<1x10x10x128xf32, #tpu.memory_space<vmem>>, vector<1x1x1x128xf32>,
    %52 = vector.extract_strided_slice %11 {offsets = [0, 1280], sizes = [1, 128], strides = [1, 1]} : vector<1x6272xf32> to vector<1x128xf32>
    %c0_52 = arith.constant 0 : index
    %c2_53 = arith.constant 2 : index
    %c4_54 = arith.constant 4 : index
    %c0_55 = arith.constant 0 : index
    %53 = vector.load %arg9[%c0_52, %c2_53, %c4_54, %c0_55] : memref<1x10x10x128xf32, #tpu.memory_space<vmem>>, vector<1x1x1x128xf32>
    %54 = vector.shape_cast %53 : vector<1x1x1x128xf32> to vector<1x128xf32>
    %55 = vector.shape_cast %52 : vector<1x128xf32> to vector<1x1x1x128xf32>
    tpu.vector_store %arg9[%c0_52, %c2_53, %c4_54, %c0_55], %55 {strides = array<i32>} : memref<1x10x10x128xf32, #tpu.memory_space<vmem>>, vector<1x1x1x128xf32>,
    %56 = vector.extract_strided_slice %11 {offsets = [0, 1408], sizes = [1, 128], strides = [1, 1]} : vector<1x6272xf32> to vector<1x128xf32>
    %c0_56 = arith.constant 0 : index
    %c2_57 = arith.constant 2 : index
    %c5_58 = arith.constant 5 : index
    %c0_59 = arith.constant 0 : index
    %57 = vector.load %arg9[%c0_56, %c2_57, %c5_58, %c0_59] : memref<1x10x10x128xf32, #tpu.memory_space<vmem>>, vector<1x1x1x128xf32>
    %58 = vector.shape_cast %57 : vector<1x1x1x128xf32> to vector<1x128xf32>
    %59 = vector.shape_cast %56 : vector<1x128xf32> to vector<1x1x1x128xf32>
    tpu.vector_store %arg9[%c0_56, %c2_57, %c5_58, %c0_59], %59 {strides = array<i32>} : memref<1x10x10x128xf32, #tpu.memory_space<vmem>>, vector<1x1x1x128xf32>,
    %60 = vector.extract_strided_slice %11 {offsets = [0, 1536], sizes = [1, 128], strides = [1, 1]} : vector<1x6272xf32> to vector<1x128xf32>
    %c0_60 = arith.constant 0 : index
    %c2_61 = arith.constant 2 : index
    %c6_62 = arith.constant 6 : index
    %c0_63 = arith.constant 0 : index
    %61 = vector.load %arg9[%c0_60, %c2_61, %c6_62, %c0_63] : memref<1x10x10x128xf32, #tpu.memory_space<vmem>>, vector<1x1x1x128xf32>
    %62 = vector.shape_cast %61 : vector<1x1x1x128xf32> to vector<1x128xf32>
    %63 = vector.shape_cast %60 : vector<1x128xf32> to vector<1x1x1x128xf32>
    tpu.vector_store %arg9[%c0_60, %c2_61, %c6_62, %c0_63], %63 {strides = array<i32>} : memref<1x10x10x128xf32, #tpu.memory_space<vmem>>, vector<1x1x1x128xf32>,
    %64 = vector.extract_strided_slice %11 {offsets = [0, 1664], sizes = [1, 128], strides = [1, 1]} : vector<1x6272xf32> to vector<1x128xf32>
    %c0_64 = arith.constant 0 : index
    %c2_65 = arith.constant 2 : index
    %c7_66 = arith.constant 7 : index
    %c0_67 = arith.constant 0 : index
    %65 = vector.load %arg9[%c0_64, %c2_65, %c7_66, %c0_67] : memref<1x10x10x128xf32, #tpu.memory_space<vmem>>, vector<1x1x1x128xf32>
    %66 = vector.shape_cast %65 : vector<1x1x1x128xf32> to vector<1x128xf32>
    %67 = vector.shape_cast %64 : vector<1x128xf32> to vector<1x1x1x128xf32>
    tpu.vector_store %arg9[%c0_64, %c2_65, %c7_66, %c0_67], %67 {strides = array<i32>} : memref<1x10x10x128xf32, #tpu.memory_space<vmem>>, vector<1x1x1x128xf32>,
    %68 = vector.extract_strided_slice %11 {offsets = [0, 1792], sizes = [1, 128], strides = [1, 1]} : vector<1x6272xf32> to vector<1x128xf32>
    %c0_68 = arith.constant 0 : index
    %c3_69 = arith.constant 3 : index
    %c1_70 = arith.constant 1 : index
    %c0_71 = arith.constant 0 : index
    %69 = vector.load %arg9[%c0_68, %c3_69, %c1_70, %c0_71] : memref<1x10x10x128xf32, #tpu.memory_space<vmem>>, vector<1x1x1x128xf32>
    %70 = vector.shape_cast %69 : vector<1x1x1x128xf32> to vector<1x128xf32>
    %71 = vector.shape_cast %68 : vector<1x128xf32> to vector<1x1x1x128xf32>
    tpu.vector_store %arg9[%c0_68, %c3_69, %c1_70, %c0_71], %71 {strides = array<i32>} : memref<1x10x10x128xf32, #tpu.memory_space<vmem>>, vector<1x1x1x128xf32>,
    %72 = vector.extract_strided_slice %11 {offsets = [0, 1920], sizes = [1, 128], strides = [1, 1]} : vector<1x6272xf32> to vector<1x128xf32>
    %c0_72 = arith.constant 0 : index
    %c3_73 = arith.constant 3 : index
    %c2_74 = arith.constant 2 : index
    %c0_75 = arith.constant 0 : index
    %73 = vector.load %arg9[%c0_72, %c3_73, %c2_74, %c0_75] : memref<1x10x10x128xf32, #tpu.memory_space<vmem>>, vector<1x1x1x128xf32>
    %74 = vector.shape_cast %73 : vector<1x1x1x128xf32> to vector<1x128xf32>
    %75 = vector.shape_cast %72 : vector<1x128xf32> to vector<1x1x1x128xf32>
    tpu.vector_store %arg9[%c0_72, %c3_73, %c2_74, %c0_75], %75 {strides = array<i32>} : memref<1x10x10x128xf32, #tpu.memory_space<vmem>>, vector<1x1x1x128xf32>,
    %76 = vector.extract_strided_slice %11 {offsets = [0, 2048], sizes = [1, 128], strides = [1, 1]} : vector<1x6272xf32> to vector<1x128xf32>
    %c0_76 = arith.constant 0 : index
    %c3_77 = arith.constant 3 : index
    %c3_78 = arith.constant 3 : index
    %c0_79 = arith.constant 0 : index
    %77 = vector.load %arg9[%c0_76, %c3_77, %c3_78, %c0_79] : memref<1x10x10x128xf32, #tpu.memory_space<vmem>>, vector<1x1x1x128xf32>
    %78 = vector.shape_cast %77 : vector<1x1x1x128xf32> to vector<1x128xf32>
    %79 = vector.shape_cast %76 : vector<1x128xf32> to vector<1x1x1x128xf32>
    tpu.vector_store %arg9[%c0_76, %c3_77, %c3_78, %c0_79], %79 {strides = array<i32>} : memref<1x10x10x128xf32, #tpu.memory_space<vmem>>, vector<1x1x1x128xf32>,
    %80 = vector.extract_strided_slice %11 {offsets = [0, 2176], sizes = [1, 128], strides = [1, 1]} : vector<1x6272xf32> to vector<1x128xf32>
    %c0_80 = arith.constant 0 : index
    %c3_81 = arith.constant 3 : index
    %c4_82 = arith.constant 4 : index
    %c0_83 = arith.constant 0 : index
    %81 = vector.load %arg9[%c0_80, %c3_81, %c4_82, %c0_83] : memref<1x10x10x128xf32, #tpu.memory_space<vmem>>, vector<1x1x1x128xf32>
    %82 = vector.shape_cast %81 : vector<1x1x1x128xf32> to vector<1x128xf32>
    %83 = vector.shape_cast %80 : vector<1x128xf32> to vector<1x1x1x128xf32>
    tpu.vector_store %arg9[%c0_80, %c3_81, %c4_82, %c0_83], %83 {strides = array<i32>} : memref<1x10x10x128xf32, #tpu.memory_space<vmem>>, vector<1x1x1x128xf32>,
    %84 = vector.extract_strided_slice %11 {offsets = [0, 2304], sizes = [1, 128], strides = [1, 1]} : vector<1x6272xf32> to vector<1x128xf32>
    %c0_84 = arith.constant 0 : index
    %c3_85 = arith.constant 3 : index
    %c5_86 = arith.constant 5 : index
    %c0_87 = arith.constant 0 : index
    %85 = vector.load %arg9[%c0_84, %c3_85, %c5_86, %c0_87] : memref<1x10x10x128xf32, #tpu.memory_space<vmem>>, vector<1x1x1x128xf32>
    %86 = vector.shape_cast %85 : vector<1x1x1x128xf32> to vector<1x128xf32>
    %87 = vector.shape_cast %84 : vector<1x128xf32> to vector<1x1x1x128xf32>
    tpu.vector_store %arg9[%c0_84, %c3_85, %c5_86, %c0_87], %87 {strides = array<i32>} : memref<1x10x10x128xf32, #tpu.memory_space<vmem>>, vector<1x1x1x128xf32>,
    %88 = vector.extract_strided_slice %11 {offsets = [0, 2432], sizes = [1, 128], strides = [1, 1]} : vector<1x6272xf32> to vector<1x128xf32>
    %c0_88 = arith.constant 0 : index
    %c3_89 = arith.constant 3 : index
    %c6_90 = arith.constant 6 : index
    %c0_91 = arith.constant 0 : index
    %89 = vector.load %arg9[%c0_88, %c3_89, %c6_90, %c0_91] : memref<1x10x10x128xf32, #tpu.memory_space<vmem>>, vector<1x1x1x128xf32>
    %90 = vector.shape_cast %89 : vector<1x1x1x128xf32> to vector<1x128xf32>
    %91 = vector.shape_cast %88 : vector<1x128xf32> to vector<1x1x1x128xf32>
    tpu.vector_store %arg9[%c0_88, %c3_89, %c6_90, %c0_91], %91 {strides = array<i32>} : memref<1x10x10x128xf32, #tpu.memory_space<vmem>>, vector<1x1x1x128xf32>,
    %92 = vector.extract_strided_slice %11 {offsets = [0, 2560], sizes = [1, 128], strides = [1, 1]} : vector<1x6272xf32> to vector<1x128xf32>
    %c0_92 = arith.constant 0 : index
    %c3_93 = arith.constant 3 : index
    %c7_94 = arith.constant 7 : index
    %c0_95 = arith.constant 0 : index
    %93 = vector.load %arg9[%c0_92, %c3_93, %c7_94, %c0_95] : memref<1x10x10x128xf32, #tpu.memory_space<vmem>>, vector<1x1x1x128xf32>
    %94 = vector.shape_cast %93 : vector<1x1x1x128xf32> to vector<1x128xf32>
    %95 = vector.shape_cast %92 : vector<1x128xf32> to vector<1x1x1x128xf32>
    tpu.vector_store %arg9[%c0_92, %c3_93, %c7_94, %c0_95], %95 {strides = array<i32>} : memref<1x10x10x128xf32, #tpu.memory_space<vmem>>, vector<1x1x1x128xf32>,
    %96 = vector.extract_strided_slice %11 {offsets = [0, 2688], sizes = [1, 128], strides = [1, 1]} : vector<1x6272xf32> to vector<1x128xf32>
    %c0_96 = arith.constant 0 : index
    %c4_97 = arith.constant 4 : index
    %c1_98 = arith.constant 1 : index
    %c0_99 = arith.constant 0 : index
    %97 = vector.load %arg9[%c0_96, %c4_97, %c1_98, %c0_99] : memref<1x10x10x128xf32, #tpu.memory_space<vmem>>, vector<1x1x1x128xf32>
    %98 = vector.shape_cast %97 : vector<1x1x1x128xf32> to vector<1x128xf32>
    %99 = vector.shape_cast %96 : vector<1x128xf32> to vector<1x1x1x128xf32>
    tpu.vector_store %arg9[%c0_96, %c4_97, %c1_98, %c0_99], %99 {strides = array<i32>} : memref<1x10x10x128xf32, #tpu.memory_space<vmem>>, vector<1x1x1x128xf32>,
    %100 = vector.extract_strided_slice %11 {offsets = [0, 2816], sizes = [1, 128], strides = [1, 1]} : vector<1x6272xf32> to vector<1x128xf32>
    %c0_100 = arith.constant 0 : index
    %c4_101 = arith.constant 4 : index
    %c2_102 = arith.constant 2 : index
    %c0_103 = arith.constant 0 : index
    %101 = vector.load %arg9[%c0_100, %c4_101, %c2_102, %c0_103] : memref<1x10x10x128xf32, #tpu.memory_space<vmem>>, vector<1x1x1x128xf32>
    %102 = vector.shape_cast %101 : vector<1x1x1x128xf32> to vector<1x128xf32>
    %103 = vector.shape_cast %100 : vector<1x128xf32> to vector<1x1x1x128xf32>
    tpu.vector_store %arg9[%c0_100, %c4_101, %c2_102, %c0_103], %103 {strides = array<i32>} : memref<1x10x10x128xf32, #tpu.memory_space<vmem>>, vector<1x1x1x128xf32>,
    %104 = vector.extract_strided_slice %11 {offsets = [0, 2944], sizes = [1, 128], strides = [1, 1]} : vector<1x6272xf32> to vector<1x128xf32>
    %c0_104 = arith.constant 0 : index
    %c4_105 = arith.constant 4 : index
    %c3_106 = arith.constant 3 : index
    %c0_107 = arith.constant 0 : index
    %105 = vector.load %arg9[%c0_104, %c4_105, %c3_106, %c0_107] : memref<1x10x10x128xf32, #tpu.memory_space<vmem>>, vector<1x1x1x128xf32>
    %106 = vector.shape_cast %105 : vector<1x1x1x128xf32> to vector<1x128xf32>
    %107 = vector.shape_cast %104 : vector<1x128xf32> to vector<1x1x1x128xf32>
    tpu.vector_store %arg9[%c0_104, %c4_105, %c3_106, %c0_107], %107 {strides = array<i32>} : memref<1x10x10x128xf32, #tpu.memory_space<vmem>>, vector<1x1x1x128xf32>,
    %108 = vector.extract_strided_slice %11 {offsets = [0, 3072], sizes = [1, 128], strides = [1, 1]} : vector<1x6272xf32> to vector<1x128xf32>
    %c0_108 = arith.constant 0 : index
    %c4_109 = arith.constant 4 : index
    %c4_110 = arith.constant 4 : index
    %c0_111 = arith.constant 0 : index
    %109 = vector.load %arg9[%c0_108, %c4_109, %c4_110, %c0_111] : memref<1x10x10x128xf32, #tpu.memory_space<vmem>>, vector<1x1x1x128xf32>
    %110 = vector.shape_cast %109 : vector<1x1x1x128xf32> to vector<1x128xf32>
    %111 = vector.shape_cast %108 : vector<1x128xf32> to vector<1x1x1x128xf32>
    tpu.vector_store %arg9[%c0_108, %c4_109, %c4_110, %c0_111], %111 {strides = array<i32>} : memref<1x10x10x128xf32, #tpu.memory_space<vmem>>, vector<1x1x1x128xf32>,
    %112 = vector.extract_strided_slice %11 {offsets = [0, 3200], sizes = [1, 128], strides = [1, 1]} : vector<1x6272xf32> to vector<1x128xf32>
    %c0_112 = arith.constant 0 : index
    %c4_113 = arith.constant 4 : index
    %c5_114 = arith.constant 5 : index
    %c0_115 = arith.constant 0 : index
    %113 = vector.load %arg9[%c0_112, %c4_113, %c5_114, %c0_115] : memref<1x10x10x128xf32, #tpu.memory_space<vmem>>, vector<1x1x1x128xf32>
    %114 = vector.shape_cast %113 : vector<1x1x1x128xf32> to vector<1x128xf32>
    %115 = vector.shape_cast %112 : vector<1x128xf32> to vector<1x1x1x128xf32>
    tpu.vector_store %arg9[%c0_112, %c4_113, %c5_114, %c0_115], %115 {strides = array<i32>} : memref<1x10x10x128xf32, #tpu.memory_space<vmem>>, vector<1x1x1x128xf32>,
    %116 = vector.extract_strided_slice %11 {offsets = [0, 3328], sizes = [1, 128], strides = [1, 1]} : vector<1x6272xf32> to vector<1x128xf32>
    %c0_116 = arith.constant 0 : index
    %c4_117 = arith.constant 4 : index
    %c6_118 = arith.constant 6 : index
    %c0_119 = arith.constant 0 : index
    %117 = vector.load %arg9[%c0_116, %c4_117, %c6_118, %c0_119] : memref<1x10x10x128xf32, #tpu.memory_space<vmem>>, vector<1x1x1x128xf32>
    %118 = vector.shape_cast %117 : vector<1x1x1x128xf32> to vector<1x128xf32>
    %119 = vector.shape_cast %116 : vector<1x128xf32> to vector<1x1x1x128xf32>
    tpu.vector_store %arg9[%c0_116, %c4_117, %c6_118, %c0_119], %119 {strides = array<i32>} : memref<1x10x10x128xf32, #tpu.memory_space<vmem>>, vector<1x1x1x128xf32>,
    %120 = vector.extract_strided_slice %11 {offsets = [0, 3456], sizes = [1, 128], strides = [1, 1]} : vector<1x6272xf32> to vector<1x128xf32>
    %c0_120 = arith.constant 0 : index
    %c4_121 = arith.constant 4 : index
    %c7_122 = arith.constant 7 : index
    %c0_123 = arith.constant 0 : index
    %121 = vector.load %arg9[%c0_120, %c4_121, %c7_122, %c0_123] : memref<1x10x10x128xf32, #tpu.memory_space<vmem>>, vector<1x1x1x128xf32>
    %122 = vector.shape_cast %121 : vector<1x1x1x128xf32> to vector<1x128xf32>
    %123 = vector.shape_cast %120 : vector<1x128xf32> to vector<1x1x1x128xf32>
    tpu.vector_store %arg9[%c0_120, %c4_121, %c7_122, %c0_123], %123 {strides = array<i32>} : memref<1x10x10x128xf32, #tpu.memory_space<vmem>>, vector<1x1x1x128xf32>,
    %124 = vector.extract_strided_slice %11 {offsets = [0, 3584], sizes = [1, 128], strides = [1, 1]} : vector<1x6272xf32> to vector<1x128xf32>
    %c0_124 = arith.constant 0 : index
    %c5_125 = arith.constant 5 : index
    %c1_126 = arith.constant 1 : index
    %c0_127 = arith.constant 0 : index
    %125 = vector.load %arg9[%c0_124, %c5_125, %c1_126, %c0_127] : memref<1x10x10x128xf32, #tpu.memory_space<vmem>>, vector<1x1x1x128xf32>
    %126 = vector.shape_cast %125 : vector<1x1x1x128xf32> to vector<1x128xf32>
    %127 = vector.shape_cast %124 : vector<1x128xf32> to vector<1x1x1x128xf32>
    tpu.vector_store %arg9[%c0_124, %c5_125, %c1_126, %c0_127], %127 {strides = array<i32>} : memref<1x10x10x128xf32, #tpu.memory_space<vmem>>, vector<1x1x1x128xf32>,
    %128 = vector.extract_strided_slice %11 {offsets = [0, 3712], sizes = [1, 128], strides = [1, 1]} : vector<1x6272xf32> to vector<1x128xf32>
    %c0_128 = arith.constant 0 : index
    %c5_129 = arith.constant 5 : index
    %c2_130 = arith.constant 2 : index
    %c0_131 = arith.constant 0 : index
    %129 = vector.load %arg9[%c0_128, %c5_129, %c2_130, %c0_131] : memref<1x10x10x128xf32, #tpu.memory_space<vmem>>, vector<1x1x1x128xf32>
    %130 = vector.shape_cast %129 : vector<1x1x1x128xf32> to vector<1x128xf32>
    %131 = vector.shape_cast %128 : vector<1x128xf32> to vector<1x1x1x128xf32>
    tpu.vector_store %arg9[%c0_128, %c5_129, %c2_130, %c0_131], %131 {strides = array<i32>} : memref<1x10x10x128xf32, #tpu.memory_space<vmem>>, vector<1x1x1x128xf32>,
    %132 = vector.extract_strided_slice %11 {offsets = [0, 3840], sizes = [1, 128], strides = [1, 1]} : vector<1x6272xf32> to vector<1x128xf32>
    %c0_132 = arith.constant 0 : index
    %c5_133 = arith.constant 5 : index
    %c3_134 = arith.constant 3 : index
    %c0_135 = arith.constant 0 : index
    %133 = vector.load %arg9[%c0_132, %c5_133, %c3_134, %c0_135] : memref<1x10x10x128xf32, #tpu.memory_space<vmem>>, vector<1x1x1x128xf32>
    %134 = vector.shape_cast %133 : vector<1x1x1x128xf32> to vector<1x128xf32>
    %135 = vector.shape_cast %132 : vector<1x128xf32> to vector<1x1x1x128xf32>
    tpu.vector_store %arg9[%c0_132, %c5_133, %c3_134, %c0_135], %135 {strides = array<i32>} : memref<1x10x10x128xf32, #tpu.memory_space<vmem>>, vector<1x1x1x128xf32>,
    %136 = vector.extract_strided_slice %11 {offsets = [0, 3968], sizes = [1, 128], strides = [1, 1]} : vector<1x6272xf32> to vector<1x128xf32>
    %c0_136 = arith.constant 0 : index
    %c5_137 = arith.constant 5 : index
    %c4_138 = arith.constant 4 : index
    %c0_139 = arith.constant 0 : index
    %137 = vector.load %arg9[%c0_136, %c5_137, %c4_138, %c0_139] : memref<1x10x10x128xf32, #tpu.memory_space<vmem>>, vector<1x1x1x128xf32>
    %138 = vector.shape_cast %137 : vector<1x1x1x128xf32> to vector<1x128xf32>
    %139 = vector.shape_cast %136 : vector<1x128xf32> to vector<1x1x1x128xf32>
    tpu.vector_store %arg9[%c0_136, %c5_137, %c4_138, %c0_139], %139 {strides = array<i32>} : memref<1x10x10x128xf32, #tpu.memory_space<vmem>>, vector<1x1x1x128xf32>,
    %140 = vector.extract_strided_slice %11 {offsets = [0, 4096], sizes = [1, 128], strides = [1, 1]} : vector<1x6272xf32> to vector<1x128xf32>
    %c0_140 = arith.constant 0 : index
    %c5_141 = arith.constant 5 : index
    %c5_142 = arith.constant 5 : index
    %c0_143 = arith.constant 0 : index
    %141 = vector.load %arg9[%c0_140, %c5_141, %c5_142, %c0_143] : memref<1x10x10x128xf32, #tpu.memory_space<vmem>>, vector<1x1x1x128xf32>
    %142 = vector.shape_cast %141 : vector<1x1x1x128xf32> to vector<1x128xf32>
    %143 = vector.shape_cast %140 : vector<1x128xf32> to vector<1x1x1x128xf32>
    tpu.vector_store %arg9[%c0_140, %c5_141, %c5_142, %c0_143], %143 {strides = array<i32>} : memref<1x10x10x128xf32, #tpu.memory_space<vmem>>, vector<1x1x1x128xf32>,
    %144 = vector.extract_strided_slice %11 {offsets = [0, 4224], sizes = [1, 128], strides = [1, 1]} : vector<1x6272xf32> to vector<1x128xf32>
    %c0_144 = arith.constant 0 : index
    %c5_145 = arith.constant 5 : index
    %c6_146 = arith.constant 6 : index
    %c0_147 = arith.constant 0 : index
    %145 = vector.load %arg9[%c0_144, %c5_145, %c6_146, %c0_147] : memref<1x10x10x128xf32, #tpu.memory_space<vmem>>, vector<1x1x1x128xf32>
    %146 = vector.shape_cast %145 : vector<1x1x1x128xf32> to vector<1x128xf32>
    %147 = vector.shape_cast %144 : vector<1x128xf32> to vector<1x1x1x128xf32>
    tpu.vector_store %arg9[%c0_144, %c5_145, %c6_146, %c0_147], %147 {strides = array<i32>} : memref<1x10x10x128xf32, #tpu.memory_space<vmem>>, vector<1x1x1x128xf32>,
    %148 = vector.extract_strided_slice %11 {offsets = [0, 4352], sizes = [1, 128], strides = [1, 1]} : vector<1x6272xf32> to vector<1x128xf32>
    %c0_148 = arith.constant 0 : index
    %c5_149 = arith.constant 5 : index
    %c7_150 = arith.constant 7 : index
    %c0_151 = arith.constant 0 : index
    %149 = vector.load %arg9[%c0_148, %c5_149, %c7_150, %c0_151] : memref<1x10x10x128xf32, #tpu.memory_space<vmem>>, vector<1x1x1x128xf32>
    %150 = vector.shape_cast %149 : vector<1x1x1x128xf32> to vector<1x128xf32>
    %151 = vector.shape_cast %148 : vector<1x128xf32> to vector<1x1x1x128xf32>
    tpu.vector_store %arg9[%c0_148, %c5_149, %c7_150, %c0_151], %151 {strides = array<i32>} : memref<1x10x10x128xf32, #tpu.memory_space<vmem>>, vector<1x1x1x128xf32>,
    %152 = vector.extract_strided_slice %11 {offsets = [0, 4480], sizes = [1, 128], strides = [1, 1]} : vector<1x6272xf32> to vector<1x128xf32>
    %c0_152 = arith.constant 0 : index
    %c6_153 = arith.constant 6 : index
    %c1_154 = arith.constant 1 : index
    %c0_155 = arith.constant 0 : index
    %153 = vector.load %arg9[%c0_152, %c6_153, %c1_154, %c0_155] : memref<1x10x10x128xf32, #tpu.memory_space<vmem>>, vector<1x1x1x128xf32>
    %154 = vector.shape_cast %153 : vector<1x1x1x128xf32> to vector<1x128xf32>
    %155 = vector.shape_cast %152 : vector<1x128xf32> to vector<1x1x1x128xf32>
    tpu.vector_store %arg9[%c0_152, %c6_153, %c1_154, %c0_155], %155 {strides = array<i32>} : memref<1x10x10x128xf32, #tpu.memory_space<vmem>>, vector<1x1x1x128xf32>,
    %156 = vector.extract_strided_slice %11 {offsets = [0, 4608], sizes = [1, 128], strides = [1, 1]} : vector<1x6272xf32> to vector<1x128xf32>
    %c0_156 = arith.constant 0 : index
    %c6_157 = arith.constant 6 : index
    %c2_158 = arith.constant 2 : index
    %c0_159 = arith.constant 0 : index
    %157 = vector.load %arg9[%c0_156, %c6_157, %c2_158, %c0_159] : memref<1x10x10x128xf32, #tpu.memory_space<vmem>>, vector<1x1x1x128xf32>
    %158 = vector.shape_cast %157 : vector<1x1x1x128xf32> to vector<1x128xf32>
    %159 = vector.shape_cast %156 : vector<1x128xf32> to vector<1x1x1x128xf32>
    tpu.vector_store %arg9[%c0_156, %c6_157, %c2_158, %c0_159], %159 {strides = array<i32>} : memref<1x10x10x128xf32, #tpu.memory_space<vmem>>, vector<1x1x1x128xf32>,
    %160 = vector.extract_strided_slice %11 {offsets = [0, 4736], sizes = [1, 128], strides = [1, 1]} : vector<1x6272xf32> to vector<1x128xf32>
    %c0_160 = arith.constant 0 : index
    %c6_161 = arith.constant 6 : index
    %c3_162 = arith.constant 3 : index
    %c0_163 = arith.constant 0 : index
    %161 = vector.load %arg9[%c0_160, %c6_161, %c3_162, %c0_163] : memref<1x10x10x128xf32, #tpu.memory_space<vmem>>, vector<1x1x1x128xf32>
    %162 = vector.shape_cast %161 : vector<1x1x1x128xf32> to vector<1x128xf32>
    %163 = vector.shape_cast %160 : vector<1x128xf32> to vector<1x1x1x128xf32>
    tpu.vector_store %arg9[%c0_160, %c6_161, %c3_162, %c0_163], %163 {strides = array<i32>} : memref<1x10x10x128xf32, #tpu.memory_space<vmem>>, vector<1x1x1x128xf32>,
    %164 = vector.extract_strided_slice %11 {offsets = [0, 4864], sizes = [1, 128], strides = [1, 1]} : vector<1x6272xf32> to vector<1x128xf32>
    %c0_164 = arith.constant 0 : index
    %c6_165 = arith.constant 6 : index
    %c4_166 = arith.constant 4 : index
    %c0_167 = arith.constant 0 : index
    %165 = vector.load %arg9[%c0_164, %c6_165, %c4_166, %c0_167] : memref<1x10x10x128xf32, #tpu.memory_space<vmem>>, vector<1x1x1x128xf32>
    %166 = vector.shape_cast %165 : vector<1x1x1x128xf32> to vector<1x128xf32>
    %167 = vector.shape_cast %164 : vector<1x128xf32> to vector<1x1x1x128xf32>
    tpu.vector_store %arg9[%c0_164, %c6_165, %c4_166, %c0_167], %167 {strides = array<i32>} : memref<1x10x10x128xf32, #tpu.memory_space<vmem>>, vector<1x1x1x128xf32>,
    %168 = vector.extract_strided_slice %11 {offsets = [0, 4992], sizes = [1, 128], strides = [1, 1]} : vector<1x6272xf32> to vector<1x128xf32>
    %c0_168 = arith.constant 0 : index
    %c6_169 = arith.constant 6 : index
    %c5_170 = arith.constant 5 : index
    %c0_171 = arith.constant 0 : index
    %169 = vector.load %arg9[%c0_168, %c6_169, %c5_170, %c0_171] : memref<1x10x10x128xf32, #tpu.memory_space<vmem>>, vector<1x1x1x128xf32>
    %170 = vector.shape_cast %169 : vector<1x1x1x128xf32> to vector<1x128xf32>
    %171 = vector.shape_cast %168 : vector<1x128xf32> to vector<1x1x1x128xf32>
    tpu.vector_store %arg9[%c0_168, %c6_169, %c5_170, %c0_171], %171 {strides = array<i32>} : memref<1x10x10x128xf32, #tpu.memory_space<vmem>>, vector<1x1x1x128xf32>,
    %172 = vector.extract_strided_slice %11 {offsets = [0, 5120], sizes = [1, 128], strides = [1, 1]} : vector<1x6272xf32> to vector<1x128xf32>
    %c0_172 = arith.constant 0 : index
    %c6_173 = arith.constant 6 : index
    %c6_174 = arith.constant 6 : index
    %c0_175 = arith.constant 0 : index
    %173 = vector.load %arg9[%c0_172, %c6_173, %c6_174, %c0_175] : memref<1x10x10x128xf32, #tpu.memory_space<vmem>>, vector<1x1x1x128xf32>
    %174 = vector.shape_cast %173 : vector<1x1x1x128xf32> to vector<1x128xf32>
    %175 = vector.shape_cast %172 : vector<1x128xf32> to vector<1x1x1x128xf32>
    tpu.vector_store %arg9[%c0_172, %c6_173, %c6_174, %c0_175], %175 {strides = array<i32>} : memref<1x10x10x128xf32, #tpu.memory_space<vmem>>, vector<1x1x1x128xf32>,
    %176 = vector.extract_strided_slice %11 {offsets = [0, 5248], sizes = [1, 128], strides = [1, 1]} : vector<1x6272xf32> to vector<1x128xf32>
    %c0_176 = arith.constant 0 : index
    %c6_177 = arith.constant 6 : index
    %c7_178 = arith.constant 7 : index
    %c0_179 = arith.constant 0 : index
    %177 = vector.load %arg9[%c0_176, %c6_177, %c7_178, %c0_179] : memref<1x10x10x128xf32, #tpu.memory_space<vmem>>, vector<1x1x1x128xf32>
    %178 = vector.shape_cast %177 : vector<1x1x1x128xf32> to vector<1x128xf32>
    %179 = vector.shape_cast %176 : vector<1x128xf32> to vector<1x1x1x128xf32>
    tpu.vector_store %arg9[%c0_176, %c6_177, %c7_178, %c0_179], %179 {strides = array<i32>} : memref<1x10x10x128xf32, #tpu.memory_space<vmem>>, vector<1x1x1x128xf32>,
    %180 = vector.extract_strided_slice %11 {offsets = [0, 5376], sizes = [1, 128], strides = [1, 1]} : vector<1x6272xf32> to vector<1x128xf32>
    %c0_180 = arith.constant 0 : index
    %c7_181 = arith.constant 7 : index
    %c1_182 = arith.constant 1 : index
    %c0_183 = arith.constant 0 : index
    %181 = vector.load %arg9[%c0_180, %c7_181, %c1_182, %c0_183] : memref<1x10x10x128xf32, #tpu.memory_space<vmem>>, vector<1x1x1x128xf32>
    %182 = vector.shape_cast %181 : vector<1x1x1x128xf32> to vector<1x128xf32>
    %183 = vector.shape_cast %180 : vector<1x128xf32> to vector<1x1x1x128xf32>
    tpu.vector_store %arg9[%c0_180, %c7_181, %c1_182, %c0_183], %183 {strides = array<i32>} : memref<1x10x10x128xf32, #tpu.memory_space<vmem>>, vector<1x1x1x128xf32>,
    %184 = vector.extract_strided_slice %11 {offsets = [0, 5504], sizes = [1, 128], strides = [1, 1]} : vector<1x6272xf32> to vector<1x128xf32>
    %c0_184 = arith.constant 0 : index
    %c7_185 = arith.constant 7 : index
    %c2_186 = arith.constant 2 : index
    %c0_187 = arith.constant 0 : index
    %185 = vector.load %arg9[%c0_184, %c7_185, %c2_186, %c0_187] : memref<1x10x10x128xf32, #tpu.memory_space<vmem>>, vector<1x1x1x128xf32>
    %186 = vector.shape_cast %185 : vector<1x1x1x128xf32> to vector<1x128xf32>
    %187 = vector.shape_cast %184 : vector<1x128xf32> to vector<1x1x1x128xf32>
    tpu.vector_store %arg9[%c0_184, %c7_185, %c2_186, %c0_187], %187 {strides = array<i32>} : memref<1x10x10x128xf32, #tpu.memory_space<vmem>>, vector<1x1x1x128xf32>,
    %188 = vector.extract_strided_slice %11 {offsets = [0, 5632], sizes = [1, 128], strides = [1, 1]} : vector<1x6272xf32> to vector<1x128xf32>
    %c0_188 = arith.constant 0 : index
    %c7_189 = arith.constant 7 : index
    %c3_190 = arith.constant 3 : index
    %c0_191 = arith.constant 0 : index
    %189 = vector.load %arg9[%c0_188, %c7_189, %c3_190, %c0_191] : memref<1x10x10x128xf32, #tpu.memory_space<vmem>>, vector<1x1x1x128xf32>
    %190 = vector.shape_cast %189 : vector<1x1x1x128xf32> to vector<1x128xf32>
    %191 = vector.shape_cast %188 : vector<1x128xf32> to vector<1x1x1x128xf32>
    tpu.vector_store %arg9[%c0_188, %c7_189, %c3_190, %c0_191], %191 {strides = array<i32>} : memref<1x10x10x128xf32, #tpu.memory_space<vmem>>, vector<1x1x1x128xf32>,
    %192 = vector.extract_strided_slice %11 {offsets = [0, 5760], sizes = [1, 128], strides = [1, 1]} : vector<1x6272xf32> to vector<1x128xf32>
    %c0_192 = arith.constant 0 : index
    %c7_193 = arith.constant 7 : index
    %c4_194 = arith.constant 4 : index
    %c0_195 = arith.constant 0 : index
    %193 = vector.load %arg9[%c0_192, %c7_193, %c4_194, %c0_195] : memref<1x10x10x128xf32, #tpu.memory_space<vmem>>, vector<1x1x1x128xf32>
    %194 = vector.shape_cast %193 : vector<1x1x1x128xf32> to vector<1x128xf32>
    %195 = vector.shape_cast %192 : vector<1x128xf32> to vector<1x1x1x128xf32>
    tpu.vector_store %arg9[%c0_192, %c7_193, %c4_194, %c0_195], %195 {strides = array<i32>} : memref<1x10x10x128xf32, #tpu.memory_space<vmem>>, vector<1x1x1x128xf32>,
    %196 = vector.extract_strided_slice %11 {offsets = [0, 5888], sizes = [1, 128], strides = [1, 1]} : vector<1x6272xf32> to vector<1x128xf32>
    %c0_196 = arith.constant 0 : index
    %c7_197 = arith.constant 7 : index
    %c5_198 = arith.constant 5 : index
    %c0_199 = arith.constant 0 : index
    %197 = vector.load %arg9[%c0_196, %c7_197, %c5_198, %c0_199] : memref<1x10x10x128xf32, #tpu.memory_space<vmem>>, vector<1x1x1x128xf32>
    %198 = vector.shape_cast %197 : vector<1x1x1x128xf32> to vector<1x128xf32>
    %199 = vector.shape_cast %196 : vector<1x128xf32> to vector<1x1x1x128xf32>
    tpu.vector_store %arg9[%c0_196, %c7_197, %c5_198, %c0_199], %199 {strides = array<i32>} : memref<1x10x10x128xf32, #tpu.memory_space<vmem>>, vector<1x1x1x128xf32>,
    %200 = vector.extract_strided_slice %11 {offsets = [0, 6016], sizes = [1, 128], strides = [1, 1]} : vector<1x6272xf32> to vector<1x128xf32>
    %c0_200 = arith.constant 0 : index
    %c7_201 = arith.constant 7 : index
    %c6_202 = arith.constant 6 : index
    %c0_203 = arith.constant 0 : index
    %201 = vector.load %arg9[%c0_200, %c7_201, %c6_202, %c0_203] : memref<1x10x10x128xf32, #tpu.memory_space<vmem>>, vector<1x1x1x128xf32>
    %202 = vector.shape_cast %201 : vector<1x1x1x128xf32> to vector<1x128xf32>
    %203 = vector.shape_cast %200 : vector<1x128xf32> to vector<1x1x1x128xf32>
    tpu.vector_store %arg9[%c0_200, %c7_201, %c6_202, %c0_203], %203 {strides = array<i32>} : memref<1x10x10x128xf32, #tpu.memory_space<vmem>>, vector<1x1x1x128xf32>,
    %204 = vector.extract_strided_slice %11 {offsets = [0, 6144], sizes = [1, 128], strides = [1, 1]} : vector<1x6272xf32> to vector<1x128xf32>
    %c0_204 = arith.constant 0 : index
    %c7_205 = arith.constant 7 : index
    %c7_206 = arith.constant 7 : index
    %c0_207 = arith.constant 0 : index
    %205 = vector.load %arg9[%c0_204, %c7_205, %c7_206, %c0_207] : memref<1x10x10x128xf32, #tpu.memory_space<vmem>>, vector<1x1x1x128xf32>
    %206 = vector.shape_cast %205 : vector<1x1x1x128xf32> to vector<1x128xf32>
    %207 = vector.shape_cast %204 : vector<1x128xf32> to vector<1x1x1x128xf32>
    tpu.vector_store %arg9[%c0_204, %c7_205, %c7_206, %c0_207], %207 {strides = array<i32>} : memref<1x10x10x128xf32, #tpu.memory_space<vmem>>, vector<1x1x1x128xf32>,
    %c0_208 = arith.constant 0 : index
    %c0_209 = arith.constant 0 : index
    %208 = vector.load %arg5[%c0_208, %c0_209] : memref<1x64xf32, #tpu.memory_space<vmem>>, vector<1x64xf32>
    %c0_210 = arith.constant 0 : index
    %c0_211 = arith.constant 0 : index
    %c0_212 = arith.constant 0 : index
    %c0_213 = arith.constant 0 : index
    %209 = vector.load %arg9[%c0_210, %c0_211, %c0_212, %c0_213] : memref<1x10x10x128xf32, #tpu.memory_space<vmem>>, vector<1x8x8x128xf32>
    %c0_214 = arith.constant 0 : index
    %c0_215 = arith.constant 0 : index
    %c1_216 = arith.constant 1 : index
    %c0_217 = arith.constant 0 : index
    %210 = vector.load %arg9[%c0_214, %c0_215, %c1_216, %c0_217] : memref<1x10x10x128xf32, #tpu.memory_space<vmem>>, vector<1x8x8x128xf32>
    %c0_218 = arith.constant 0 : index
    %c1_219 = arith.constant 1 : index
    %c0_220 = arith.constant 0 : index
    %c0_221 = arith.constant 0 : index
    %211 = vector.load %arg9[%c0_218, %c1_219, %c0_220, %c0_221] : memref<1x10x10x128xf32, #tpu.memory_space<vmem>>, vector<1x8x8x128xf32>
    %c0_222 = arith.constant 0 : index
    %c1_223 = arith.constant 1 : index
    %c1_224 = arith.constant 1 : index
    %c0_225 = arith.constant 0 : index
    %212 = vector.load %arg9[%c0_222, %c1_223, %c1_224, %c0_225] : memref<1x10x10x128xf32, #tpu.memory_space<vmem>>, vector<1x8x8x128xf32>
    %213 = tpu.concatenate %209, %210, %211, %212 in 3 : vector<1x8x8x128xf32>, vector<1x8x8x128xf32>, vector<1x8x8x128xf32>, vector<1x8x8x128xf32> -> vector<1x8x8x512xf32>
    %214 = vector.shape_cast %213 : vector<1x8x8x512xf32> to vector<64x512xf32>
    %c0_226 = arith.constant 0 : index
    %c0_227 = arith.constant 0 : index
    %c0_228 = arith.constant 0 : index
    %c0_229 = arith.constant 0 : index
    %215 = vector.load %arg4[%c0_226, %c0_227, %c0_228, %c0_229] : memref<2x2x512x64xf32, #tpu.memory_space<vmem>>, vector<1x1x512x64xf32>
    %216 = vector.shape_cast %215 : vector<1x1x512x64xf32> to vector<512x64xf32>
    %cst_230 = arith.constant dense<0.000000e+00> : vector<64x64xf32>
    %217 = tpu.matmul %214, %216, %cst_230 {dimension_numbers = #tpu.dot_dimension_numbers<[1], [0], [0], [1], [0, 0, 1, 1], [], []>} : vector<64x512xf32>, vector<512x64xf32>, vector<64x64xf32> -> vector<64x64xf32>
    %218 = vector.broadcast %208 : vector<1x64xf32> to vector<64x64xf32>
    %219 = arith.addf %217, %218 : vector<64x64xf32>
    %cst_231 = arith.constant 0.000000e+00 : f32
    %220 = vector.broadcast %cst_231 : f32 to vector<64x64xf32>
    %221 = arith.maximumf %219, %220 : vector<64x64xf32>
    %222 = vector.shape_cast %221 : vector<64x64xf32> to vector<1x8x8x64xf32>
    %223 = vector.extract_strided_slice %222 {offsets = [0, 0, 0, 0], sizes = [1, 7, 7, 64], strides = [1, 1, 1, 1]} : vector<1x8x8x64xf32> to vector<1x7x7x64xf32>
    %c0_232 = arith.constant 0 : index
    %c0_233 = arith.constant 0 : index
    %c0_234 = arith.constant 0 : index
    %c1_235 = arith.constant 1 : index
    %c1_236 = arith.constant 1 : index
    %c0_237 = arith.constant 0 : index
    %224 = vector.load %arg10[%c0_232, %c0_233, %c0_234, %c1_235, %c1_236, %c0_237] : memref<2x2x1x10x10x64xf32, #tpu.memory_space<vmem>>, vector<1x1x1x7x7x64xf32>
    %225 = vector.shape_cast %224 : vector<1x1x1x7x7x64xf32> to vector<1x7x7x64xf32>
    %226 = vector.shape_cast %223 : vector<1x7x7x64xf32> to vector<1x1x1x7x7x64xf32>
    tpu.vector_store %arg10[%c0_232, %c0_233, %c0_234, %c1_235, %c1_236, %c0_237], %226 {strides = array<i32>} : memref<2x2x1x10x10x64xf32, #tpu.memory_space<vmem>>, vector<1x1x1x7x7x64xf32>,
    %c0_238 = arith.constant 0 : index
    %c0_239 = arith.constant 0 : index
    %c1_240 = arith.constant 1 : index
    %c0_241 = arith.constant 0 : index
    %227 = vector.load %arg9[%c0_238, %c0_239, %c1_240, %c0_241] : memref<1x10x10x128xf32, #tpu.memory_space<vmem>>, vector<1x8x8x128xf32>
    %c0_242 = arith.constant 0 : index
    %c0_243 = arith.constant 0 : index
    %c2_244 = arith.constant 2 : index
    %c0_245 = arith.constant 0 : index
    %228 = vector.load %arg9[%c0_242, %c0_243, %c2_244, %c0_245] : memref<1x10x10x128xf32, #tpu.memory_space<vmem>>, vector<1x8x8x128xf32>
    %c0_246 = arith.constant 0 : index
    %c1_247 = arith.constant 1 : index
    %c1_248 = arith.constant 1 : index
    %c0_249 = arith.constant 0 : index
    %229 = vector.load %arg9[%c0_246, %c1_247, %c1_248, %c0_249] : memref<1x10x10x128xf32, #tpu.memory_space<vmem>>, vector<1x8x8x128xf32>
    %c0_250 = arith.constant 0 : index
    %c1_251 = arith.constant 1 : index
    %c2_252 = arith.constant 2 : index
    %c0_253 = arith.constant 0 : index
    %230 = vector.load %arg9[%c0_250, %c1_251, %c2_252, %c0_253] : memref<1x10x10x128xf32, #tpu.memory_space<vmem>>, vector<1x8x8x128xf32>
    %231 = tpu.concatenate %227, %228, %229, %230 in 3 : vector<1x8x8x128xf32>, vector<1x8x8x128xf32>, vector<1x8x8x128xf32>, vector<1x8x8x128xf32> -> vector<1x8x8x512xf32>
    %232 = vector.shape_cast %231 : vector<1x8x8x512xf32> to vector<64x512xf32>
    %c0_254 = arith.constant 0 : index
    %c1_255 = arith.constant 1 : index
    %c0_256 = arith.constant 0 : index
    %c0_257 = arith.constant 0 : index
    %233 = vector.load %arg4[%c0_254, %c1_255, %c0_256, %c0_257] : memref<2x2x512x64xf32, #tpu.memory_space<vmem>>, vector<1x1x512x64xf32>
    %234 = vector.shape_cast %233 : vector<1x1x512x64xf32> to vector<512x64xf32>
    %cst_258 = arith.constant dense<0.000000e+00> : vector<64x64xf32>
    %235 = tpu.matmul %232, %234, %cst_258 {dimension_numbers = #tpu.dot_dimension_numbers<[1], [0], [0], [1], [0, 0, 1, 1], [], []>} : vector<64x512xf32>, vector<512x64xf32>, vector<64x64xf32> -> vector<64x64xf32>
    %236 = vector.broadcast %208 : vector<1x64xf32> to vector<64x64xf32>
    %237 = arith.addf %235, %236 : vector<64x64xf32>
    %cst_259 = arith.constant 0.000000e+00 : f32
    %238 = vector.broadcast %cst_259 : f32 to vector<64x64xf32>
    %239 = arith.maximumf %237, %238 : vector<64x64xf32>
    %240 = vector.shape_cast %239 : vector<64x64xf32> to vector<1x8x8x64xf32>
    %241 = vector.extract_strided_slice %240 {offsets = [0, 0, 0, 0], sizes = [1, 7, 7, 64], strides = [1, 1, 1, 1]} : vector<1x8x8x64xf32> to vector<1x7x7x64xf32>
    %c0_260 = arith.constant 0 : index
    %c1_261 = arith.constant 1 : index
    %c0_262 = arith.constant 0 : index
    %c1_263 = arith.constant 1 : index
    %c1_264 = arith.constant 1 : index
    %c0_265 = arith.constant 0 : index
    %242 = vector.load %arg10[%c0_260, %c1_261, %c0_262, %c1_263, %c1_264, %c0_265] : memref<2x2x1x10x10x64xf32, #tpu.memory_space<vmem>>, vector<1x1x1x7x7x64xf32>
    %243 = vector.shape_cast %242 : vector<1x1x1x7x7x64xf32> to vector<1x7x7x64xf32>
    %244 = vector.shape_cast %241 : vector<1x7x7x64xf32> to vector<1x1x1x7x7x64xf32>
    tpu.vector_store %arg10[%c0_260, %c1_261, %c0_262, %c1_263, %c1_264, %c0_265], %244 {strides = array<i32>} : memref<2x2x1x10x10x64xf32, #tpu.memory_space<vmem>>, vector<1x1x1x7x7x64xf32>,
    %c0_266 = arith.constant 0 : index
    %c1_267 = arith.constant 1 : index
    %c0_268 = arith.constant 0 : index
    %c0_269 = arith.constant 0 : index
    %245 = vector.load %arg9[%c0_266, %c1_267, %c0_268, %c0_269] : memref<1x10x10x128xf32, #tpu.memory_space<vmem>>, vector<1x8x8x128xf32>
    %c0_270 = arith.constant 0 : index
    %c1_271 = arith.constant 1 : index
    %c1_272 = arith.constant 1 : index
    %c0_273 = arith.constant 0 : index
    %246 = vector.load %arg9[%c0_270, %c1_271, %c1_272, %c0_273] : memref<1x10x10x128xf32, #tpu.memory_space<vmem>>, vector<1x8x8x128xf32>
    %c0_274 = arith.constant 0 : index
    %c2_275 = arith.constant 2 : index
    %c0_276 = arith.constant 0 : index
    %c0_277 = arith.constant 0 : index
    %247 = vector.load %arg9[%c0_274, %c2_275, %c0_276, %c0_277] : memref<1x10x10x128xf32, #tpu.memory_space<vmem>>, vector<1x8x8x128xf32>
    %c0_278 = arith.constant 0 : index
    %c2_279 = arith.constant 2 : index
    %c1_280 = arith.constant 1 : index
    %c0_281 = arith.constant 0 : index
    %248 = vector.load %arg9[%c0_278, %c2_279, %c1_280, %c0_281] : memref<1x10x10x128xf32, #tpu.memory_space<vmem>>, vector<1x8x8x128xf32>
    %249 = tpu.concatenate %245, %246, %247, %248 in 3 : vector<1x8x8x128xf32>, vector<1x8x8x128xf32>, vector<1x8x8x128xf32>, vector<1x8x8x128xf32> -> vector<1x8x8x512xf32>
    %250 = vector.shape_cast %249 : vector<1x8x8x512xf32> to vector<64x512xf32>
    %c1_282 = arith.constant 1 : index
    %c0_283 = arith.constant 0 : index
    %c0_284 = arith.constant 0 : index
    %c0_285 = arith.constant 0 : index
    %251 = vector.load %arg4[%c1_282, %c0_283, %c0_284, %c0_285] : memref<2x2x512x64xf32, #tpu.memory_space<vmem>>, vector<1x1x512x64xf32>
    %252 = vector.shape_cast %251 : vector<1x1x512x64xf32> to vector<512x64xf32>
    %cst_286 = arith.constant dense<0.000000e+00> : vector<64x64xf32>
    %253 = tpu.matmul %250, %252, %cst_286 {dimension_numbers = #tpu.dot_dimension_numbers<[1], [0], [0], [1], [0, 0, 1, 1], [], []>} : vector<64x512xf32>, vector<512x64xf32>, vector<64x64xf32> -> vector<64x64xf32>
    %254 = vector.broadcast %208 : vector<1x64xf32> to vector<64x64xf32>
    %255 = arith.addf %253, %254 : vector<64x64xf32>
    %cst_287 = arith.constant 0.000000e+00 : f32
    %256 = vector.broadcast %cst_287 : f32 to vector<64x64xf32>
    %257 = arith.maximumf %255, %256 : vector<64x64xf32>
    %258 = vector.shape_cast %257 : vector<64x64xf32> to vector<1x8x8x64xf32>
    %259 = vector.extract_strided_slice %258 {offsets = [0, 0, 0, 0], sizes = [1, 7, 7, 64], strides = [1, 1, 1, 1]} : vector<1x8x8x64xf32> to vector<1x7x7x64xf32>
    %c1_288 = arith.constant 1 : index
    %c0_289 = arith.constant 0 : index
    %c0_290 = arith.constant 0 : index
    %c1_291 = arith.constant 1 : index
    %c1_292 = arith.constant 1 : index
    %c0_293 = arith.constant 0 : index
    %260 = vector.load %arg10[%c1_288, %c0_289, %c0_290, %c1_291, %c1_292, %c0_293] : memref<2x2x1x10x10x64xf32, #tpu.memory_space<vmem>>, vector<1x1x1x7x7x64xf32>
    %261 = vector.shape_cast %260 : vector<1x1x1x7x7x64xf32> to vector<1x7x7x64xf32>
    %262 = vector.shape_cast %259 : vector<1x7x7x64xf32> to vector<1x1x1x7x7x64xf32>
    tpu.vector_store %arg10[%c1_288, %c0_289, %c0_290, %c1_291, %c1_292, %c0_293], %262 {strides = array<i32>} : memref<2x2x1x10x10x64xf32, #tpu.memory_space<vmem>>, vector<1x1x1x7x7x64xf32>,
    %c0_294 = arith.constant 0 : index
    %c1_295 = arith.constant 1 : index
    %c1_296 = arith.constant 1 : index
    %c0_297 = arith.constant 0 : index
    %263 = vector.load %arg9[%c0_294, %c1_295, %c1_296, %c0_297] : memref<1x10x10x128xf32, #tpu.memory_space<vmem>>, vector<1x8x8x128xf32>
    %c0_298 = arith.constant 0 : index
    %c1_299 = arith.constant 1 : index
    %c2_300 = arith.constant 2 : index
    %c0_301 = arith.constant 0 : index
    %264 = vector.load %arg9[%c0_298, %c1_299, %c2_300, %c0_301] : memref<1x10x10x128xf32, #tpu.memory_space<vmem>>, vector<1x8x8x128xf32>
    %c0_302 = arith.constant 0 : index
    %c2_303 = arith.constant 2 : index
    %c1_304 = arith.constant 1 : index
    %c0_305 = arith.constant 0 : index
    %265 = vector.load %arg9[%c0_302, %c2_303, %c1_304, %c0_305] : memref<1x10x10x128xf32, #tpu.memory_space<vmem>>, vector<1x8x8x128xf32>
    %c0_306 = arith.constant 0 : index
    %c2_307 = arith.constant 2 : index
    %c2_308 = arith.constant 2 : index
    %c0_309 = arith.constant 0 : index
    %266 = vector.load %arg9[%c0_306, %c2_307, %c2_308, %c0_309] : memref<1x10x10x128xf32, #tpu.memory_space<vmem>>, vector<1x8x8x128xf32>
    %267 = tpu.concatenate %263, %264, %265, %266 in 3 : vector<1x8x8x128xf32>, vector<1x8x8x128xf32>, vector<1x8x8x128xf32>, vector<1x8x8x128xf32> -> vector<1x8x8x512xf32>
    %268 = vector.shape_cast %267 : vector<1x8x8x512xf32> to vector<64x512xf32>
    %c1_310 = arith.constant 1 : index
    %c1_311 = arith.constant 1 : index
    %c0_312 = arith.constant 0 : index
    %c0_313 = arith.constant 0 : index
    %269 = vector.load %arg4[%c1_310, %c1_311, %c0_312, %c0_313] : memref<2x2x512x64xf32, #tpu.memory_space<vmem>>, vector<1x1x512x64xf32>
    %270 = vector.shape_cast %269 : vector<1x1x512x64xf32> to vector<512x64xf32>
    %cst_314 = arith.constant dense<0.000000e+00> : vector<64x64xf32>
    %271 = tpu.matmul %268, %270, %cst_314 {dimension_numbers = #tpu.dot_dimension_numbers<[1], [0], [0], [1], [0, 0, 1, 1], [], []>} : vector<64x512xf32>, vector<512x64xf32>, vector<64x64xf32> -> vector<64x64xf32>
    %272 = vector.broadcast %208 : vector<1x64xf32> to vector<64x64xf32>
    %273 = arith.addf %271, %272 : vector<64x64xf32>
    %cst_315 = arith.constant 0.000000e+00 : f32
    %274 = vector.broadcast %cst_315 : f32 to vector<64x64xf32>
    %275 = arith.maximumf %273, %274 : vector<64x64xf32>
    %276 = vector.shape_cast %275 : vector<64x64xf32> to vector<1x8x8x64xf32>
    %277 = vector.extract_strided_slice %276 {offsets = [0, 0, 0, 0], sizes = [1, 7, 7, 64], strides = [1, 1, 1, 1]} : vector<1x8x8x64xf32> to vector<1x7x7x64xf32>
    %c1_316 = arith.constant 1 : index
    %c1_317 = arith.constant 1 : index
    %c0_318 = arith.constant 0 : index
    %c1_319 = arith.constant 1 : index
    %c1_320 = arith.constant 1 : index
    %c0_321 = arith.constant 0 : index
    %278 = vector.load %arg10[%c1_316, %c1_317, %c0_318, %c1_319, %c1_320, %c0_321] : memref<2x2x1x10x10x64xf32, #tpu.memory_space<vmem>>, vector<1x1x1x7x7x64xf32>
    %279 = vector.shape_cast %278 : vector<1x1x1x7x7x64xf32> to vector<1x7x7x64xf32>
    %280 = vector.shape_cast %277 : vector<1x7x7x64xf32> to vector<1x1x1x7x7x64xf32>
    tpu.vector_store %arg10[%c1_316, %c1_317, %c0_318, %c1_319, %c1_320, %c0_321], %280 {strides = array<i32>} : memref<2x2x1x10x10x64xf32, #tpu.memory_space<vmem>>, vector<1x1x1x7x7x64xf32>,
    %c0_322 = arith.constant 0 : index
    %281 = memref.load %arg7[%c0_322] : memref<1xf32, #tpu.memory_space<smem>>
    %c1_323 = arith.constant 1 : index
    %c1_324 = arith.constant 1 : index
    %c0_325 = arith.constant 0 : index
    %c0_326 = arith.constant 0 : index
    %c0_327 = arith.constant 0 : index
    %c0_328 = arith.constant 0 : index
    %282 = vector.load %arg10[%c1_323, %c1_324, %c0_325, %c0_326, %c0_327, %c0_328] : memref<2x2x1x10x10x64xf32, #tpu.memory_space<vmem>>, vector<1x1x1x8x8x64xf32>
    %283 = vector.shape_cast %282 : vector<1x1x1x8x8x64xf32> to vector<1x8x8x64xf32>
    %c1_329 = arith.constant 1 : index
    %c0_330 = arith.constant 0 : index
    %c0_331 = arith.constant 0 : index
    %c0_332 = arith.constant 0 : index
    %c1_333 = arith.constant 1 : index
    %c0_334 = arith.constant 0 : index
    %284 = vector.load %arg10[%c1_329, %c0_330, %c0_331, %c0_332, %c1_333, %c0_334] : memref<2x2x1x10x10x64xf32, #tpu.memory_space<vmem>>, vector<1x1x1x8x8x64xf32>
    %285 = vector.shape_cast %284 : vector<1x1x1x8x8x64xf32> to vector<1x8x8x64xf32>
    %c0_335 = arith.constant 0 : index
    %c1_336 = arith.constant 1 : index
    %c0_337 = arith.constant 0 : index
    %c1_338 = arith.constant 1 : index
    %c0_339 = arith.constant 0 : index
    %c0_340 = arith.constant 0 : index
    %286 = vector.load %arg10[%c0_335, %c1_336, %c0_337, %c1_338, %c0_339, %c0_340] : memref<2x2x1x10x10x64xf32, #tpu.memory_space<vmem>>, vector<1x1x1x8x8x64xf32>
    %287 = vector.shape_cast %286 : vector<1x1x1x8x8x64xf32> to vector<1x8x8x64xf32>
    %c0_341 = arith.constant 0 : index
    %c0_342 = arith.constant 0 : index
    %c0_343 = arith.constant 0 : index
    %c1_344 = arith.constant 1 : index
    %c1_345 = arith.constant 1 : index
    %c0_346 = arith.constant 0 : index
    %288 = vector.load %arg10[%c0_341, %c0_342, %c0_343, %c1_344, %c1_345, %c0_346] : memref<2x2x1x10x10x64xf32, #tpu.memory_space<vmem>>, vector<1x1x1x8x8x64xf32>
    %289 = vector.shape_cast %288 : vector<1x1x1x8x8x64xf32> to vector<1x8x8x64xf32>
    %290 = tpu.concatenate %283, %285, %287, %289 in 3 : vector<1x8x8x64xf32>, vector<1x8x8x64xf32>, vector<1x8x8x64xf32>, vector<1x8x8x64xf32> -> vector<1x8x8x256xf32>
    %c0_347 = arith.constant 0 : index
    %c0_348 = arith.constant 0 : index
    %c0_349 = arith.constant 0 : index
    %291 = vector.load %arg6[%c0_347, %c0_348, %c0_349] : memref<2x2x256xf32, #tpu.memory_space<vmem>>, vector<1x1x256xf32>
    %292 = vector.shape_cast %291 : vector<1x1x256xf32> to vector<256xf32>
    %293 = vector.shape_cast %292 : vector<256xf32> to vector<1x1x1x256xf32>
    %294 = vector.broadcast %293 : vector<1x1x1x256xf32> to vector<1x8x8x256xf32>
    %295 = arith.mulf %290, %294 : vector<1x8x8x256xf32>
    %cst_350 = arith.constant dense<0.000000e+00> : vector<1x8x8xf32>
    %296 = vector.multi_reduction <add>, %295, %cst_350 [3] : vector<1x8x8x256xf32> to vector<1x8x8xf32>
    %297 = vector.broadcast %281 : f32 to vector<1x8x8xf32>
    %298 = arith.addf %296, %297 : vector<1x8x8xf32>
    %299 = math.tanh %298 : vector<1x8x8xf32>
    %300 = vector.extract_strided_slice %299 {offsets = [0, 0, 0], sizes = [1, 7, 7], strides = [1, 1, 1]} : vector<1x8x8xf32> to vector<1x7x7xf32>
    %c0_351 = arith.constant 0 : index
    %c0_352 = arith.constant 0 : index
    %c0_353 = arith.constant 0 : index
    %c0_354 = arith.constant 0 : index
    %c0_355 = arith.constant 0 : index
    %301 = vector.load %arg8[%c0_351, %c0_352, %c0_353, %c0_354, %c0_355] : memref<1x4x4x7x7xf32, #tpu.memory_space<vmem>>, vector<1x1x1x7x7xf32>
    %302 = vector.shape_cast %301 : vector<1x1x1x7x7xf32> to vector<1x7x7xf32>
    %303 = vector.shape_cast %300 : vector<1x7x7xf32> to vector<1x1x1x7x7xf32>
    tpu.vector_store %arg8[%c0_351, %c0_352, %c0_353, %c0_354, %c0_355], %303 {strides = array<i32>} : memref<1x4x4x7x7xf32, #tpu.memory_space<vmem>>, vector<1x1x1x7x7xf32>,
    %c1_356 = arith.constant 1 : index
    %c0_357 = arith.constant 0 : index
    %c0_358 = arith.constant 0 : index
    %c0_359 = arith.constant 0 : index
    %c1_360 = arith.constant 1 : index
    %c0_361 = arith.constant 0 : index
    %304 = vector.load %arg10[%c1_356, %c0_357, %c0_358, %c0_359, %c1_360, %c0_361] : memref<2x2x1x10x10x64xf32, #tpu.memory_space<vmem>>, vector<1x1x1x8x8x64xf32>
    %305 = vector.shape_cast %304 : vector<1x1x1x8x8x64xf32> to vector<1x8x8x64xf32>
    %c1_362 = arith.constant 1 : index
    %c1_363 = arith.constant 1 : index
    %c0_364 = arith.constant 0 : index
    %c0_365 = arith.constant 0 : index
    %c1_366 = arith.constant 1 : index
    %c0_367 = arith.constant 0 : index
    %306 = vector.load %arg10[%c1_362, %c1_363, %c0_364, %c0_365, %c1_366, %c0_367] : memref<2x2x1x10x10x64xf32, #tpu.memory_space<vmem>>, vector<1x1x1x8x8x64xf32>
    %307 = vector.shape_cast %306 : vector<1x1x1x8x8x64xf32> to vector<1x8x8x64xf32>
    %c0_368 = arith.constant 0 : index
    %c0_369 = arith.constant 0 : index
    %c0_370 = arith.constant 0 : index
    %c1_371 = arith.constant 1 : index
    %c1_372 = arith.constant 1 : index
    %c0_373 = arith.constant 0 : index
    %308 = vector.load %arg10[%c0_368, %c0_369, %c0_370, %c1_371, %c1_372, %c0_373] : memref<2x2x1x10x10x64xf32, #tpu.memory_space<vmem>>, vector<1x1x1x8x8x64xf32>
    %309 = vector.shape_cast %308 : vector<1x1x1x8x8x64xf32> to vector<1x8x8x64xf32>
    %c0_374 = arith.constant 0 : index
    %c1_375 = arith.constant 1 : index
    %c0_376 = arith.constant 0 : index
    %c1_377 = arith.constant 1 : index
    %c1_378 = arith.constant 1 : index
    %c0_379 = arith.constant 0 : index
    %310 = vector.load %arg10[%c0_374, %c1_375, %c0_376, %c1_377, %c1_378, %c0_379] : memref<2x2x1x10x10x64xf32, #tpu.memory_space<vmem>>, vector<1x1x1x8x8x64xf32>
    %311 = vector.shape_cast %310 : vector<1x1x1x8x8x64xf32> to vector<1x8x8x64xf32>
    %312 = tpu.concatenate %305, %307, %309, %311 in 3 : vector<1x8x8x64xf32>, vector<1x8x8x64xf32>, vector<1x8x8x64xf32>, vector<1x8x8x64xf32> -> vector<1x8x8x256xf32>
    %c0_380 = arith.constant 0 : index
    %c1_381 = arith.constant 1 : index
    %c0_382 = arith.constant 0 : index
    %313 = vector.load %arg6[%c0_380, %c1_381, %c0_382] : memref<2x2x256xf32, #tpu.memory_space<vmem>>, vector<1x1x256xf32>
    %314 = vector.shape_cast %313 : vector<1x1x256xf32> to vector<256xf32>
    %315 = vector.shape_cast %314 : vector<256xf32> to vector<1x1x1x256xf32>
    %316 = vector.broadcast %315 : vector<1x1x1x256xf32> to vector<1x8x8x256xf32>
    %317 = arith.mulf %312, %316 : vector<1x8x8x256xf32>
    %cst_383 = arith.constant dense<0.000000e+00> : vector<1x8x8xf32>
    %318 = vector.multi_reduction <add>, %317, %cst_383 [3] : vector<1x8x8x256xf32> to vector<1x8x8xf32>
    %319 = vector.broadcast %281 : f32 to vector<1x8x8xf32>
    %320 = arith.addf %318, %319 : vector<1x8x8xf32>
    %321 = math.tanh %320 : vector<1x8x8xf32>
    %322 = vector.extract_strided_slice %321 {offsets = [0, 0, 0], sizes = [1, 7, 7], strides = [1, 1, 1]} : vector<1x8x8xf32> to vector<1x7x7xf32>
    %c0_384 = arith.constant 0 : index
    %c0_385 = arith.constant 0 : index
    %c1_386 = arith.constant 1 : index
    %c0_387 = arith.constant 0 : index
    %c0_388 = arith.constant 0 : index
    %323 = vector.load %arg8[%c0_384, %c0_385, %c1_386, %c0_387, %c0_388] : memref<1x4x4x7x7xf32, #tpu.memory_space<vmem>>, vector<1x1x1x7x7xf32>
    %324 = vector.shape_cast %323 : vector<1x1x1x7x7xf32> to vector<1x7x7xf32>
    %325 = vector.shape_cast %322 : vector<1x7x7xf32> to vector<1x1x1x7x7xf32>
    tpu.vector_store %arg8[%c0_384, %c0_385, %c1_386, %c0_387, %c0_388], %325 {strides = array<i32>} : memref<1x4x4x7x7xf32, #tpu.memory_space<vmem>>, vector<1x1x1x7x7xf32>,
    %c1_389 = arith.constant 1 : index
    %c0_390 = arith.constant 0 : index
    %c0_391 = arith.constant 0 : index
    %c0_392 = arith.constant 0 : index
    %c1_393 = arith.constant 1 : index
    %c0_394 = arith.constant 0 : index
    %326 = vector.load %arg10[%c1_389, %c0_390, %c0_391, %c0_392, %c1_393, %c0_394] : memref<2x2x1x10x10x64xf32, #tpu.memory_space<vmem>>, vector<1x1x1x8x8x64xf32>
    %327 = vector.shape_cast %326 : vector<1x1x1x8x8x64xf32> to vector<1x8x8x64xf32>
    %c1_395 = arith.constant 1 : index
    %c1_396 = arith.constant 1 : index
    %c0_397 = arith.constant 0 : index
    %c0_398 = arith.constant 0 : index
    %c1_399 = arith.constant 1 : index
    %c0_400 = arith.constant 0 : index
    %328 = vector.load %arg10[%c1_395, %c1_396, %c0_397, %c0_398, %c1_399, %c0_400] : memref<2x2x1x10x10x64xf32, #tpu.memory_space<vmem>>, vector<1x1x1x8x8x64xf32>
    %329 = vector.shape_cast %328 : vector<1x1x1x8x8x64xf32> to vector<1x8x8x64xf32>
    %c0_401 = arith.constant 0 : index
    %c0_402 = arith.constant 0 : index
    %c0_403 = arith.constant 0 : index
    %c1_404 = arith.constant 1 : index
    %c1_405 = arith.constant 1 : index
    %c0_406 = arith.constant 0 : index
    %330 = vector.load %arg10[%c0_401, %c0_402, %c0_403, %c1_404, %c1_405, %c0_406] : memref<2x2x1x10x10x64xf32, #tpu.memory_space<vmem>>, vector<1x1x1x8x8x64xf32>
    %331 = vector.shape_cast %330 : vector<1x1x1x8x8x64xf32> to vector<1x8x8x64xf32>
    %c0_407 = arith.constant 0 : index
    %c1_408 = arith.constant 1 : index
    %c0_409 = arith.constant 0 : index
    %c1_410 = arith.constant 1 : index
    %c1_411 = arith.constant 1 : index
    %c0_412 = arith.constant 0 : index
    %332 = vector.load %arg10[%c0_407, %c1_408, %c0_409, %c1_410, %c1_411, %c0_412] : memref<2x2x1x10x10x64xf32, #tpu.memory_space<vmem>>, vector<1x1x1x8x8x64xf32>
    %333 = vector.shape_cast %332 : vector<1x1x1x8x8x64xf32> to vector<1x8x8x64xf32>
    %334 = tpu.concatenate %327, %329, %331, %333 in 3 : vector<1x8x8x64xf32>, vector<1x8x8x64xf32>, vector<1x8x8x64xf32>, vector<1x8x8x64xf32> -> vector<1x8x8x256xf32>
    %c0_413 = arith.constant 0 : index
    %c0_414 = arith.constant 0 : index
    %c0_415 = arith.constant 0 : index
    %335 = vector.load %arg6[%c0_413, %c0_414, %c0_415] : memref<2x2x256xf32, #tpu.memory_space<vmem>>, vector<1x1x256xf32>
    %336 = vector.shape_cast %335 : vector<1x1x256xf32> to vector<256xf32>
    %337 = vector.shape_cast %336 : vector<256xf32> to vector<1x1x1x256xf32>
    %338 = vector.broadcast %337 : vector<1x1x1x256xf32> to vector<1x8x8x256xf32>
    %339 = arith.mulf %334, %338 : vector<1x8x8x256xf32>
    %cst_416 = arith.constant dense<0.000000e+00> : vector<1x8x8xf32>
    %340 = vector.multi_reduction <add>, %339, %cst_416 [3] : vector<1x8x8x256xf32> to vector<1x8x8xf32>
    %341 = vector.broadcast %281 : f32 to vector<1x8x8xf32>
    %342 = arith.addf %340, %341 : vector<1x8x8xf32>
    %343 = math.tanh %342 : vector<1x8x8xf32>
    %344 = vector.extract_strided_slice %343 {offsets = [0, 0, 0], sizes = [1, 7, 7], strides = [1, 1, 1]} : vector<1x8x8xf32> to vector<1x7x7xf32>
    %c0_417 = arith.constant 0 : index
    %c0_418 = arith.constant 0 : index
    %c2_419 = arith.constant 2 : index
    %c0_420 = arith.constant 0 : index
    %c0_421 = arith.constant 0 : index
    %345 = vector.load %arg8[%c0_417, %c0_418, %c2_419, %c0_420, %c0_421] : memref<1x4x4x7x7xf32, #tpu.memory_space<vmem>>, vector<1x1x1x7x7xf32>
    %346 = vector.shape_cast %345 : vector<1x1x1x7x7xf32> to vector<1x7x7xf32>
    %347 = vector.shape_cast %344 : vector<1x7x7xf32> to vector<1x1x1x7x7xf32>
    tpu.vector_store %arg8[%c0_417, %c0_418, %c2_419, %c0_420, %c0_421], %347 {strides = array<i32>} : memref<1x4x4x7x7xf32, #tpu.memory_space<vmem>>, vector<1x1x1x7x7xf32>,
    %c1_422 = arith.constant 1 : index
    %c1_423 = arith.constant 1 : index
    %c0_424 = arith.constant 0 : index
    %c0_425 = arith.constant 0 : index
    %c1_426 = arith.constant 1 : index
    %c0_427 = arith.constant 0 : index
    %348 = vector.load %arg10[%c1_422, %c1_423, %c0_424, %c0_425, %c1_426, %c0_427] : memref<2x2x1x10x10x64xf32, #tpu.memory_space<vmem>>, vector<1x1x1x8x8x64xf32>
    %349 = vector.shape_cast %348 : vector<1x1x1x8x8x64xf32> to vector<1x8x8x64xf32>
    %c1_428 = arith.constant 1 : index
    %c0_429 = arith.constant 0 : index
    %c0_430 = arith.constant 0 : index
    %c0_431 = arith.constant 0 : index
    %c2_432 = arith.constant 2 : index
    %c0_433 = arith.constant 0 : index
    %350 = vector.load %arg10[%c1_428, %c0_429, %c0_430, %c0_431, %c2_432, %c0_433] : memref<2x2x1x10x10x64xf32, #tpu.memory_space<vmem>>, vector<1x1x1x8x8x64xf32>
    %351 = vector.shape_cast %350 : vector<1x1x1x8x8x64xf32> to vector<1x8x8x64xf32>
    %c0_434 = arith.constant 0 : index
    %c1_435 = arith.constant 1 : index
    %c0_436 = arith.constant 0 : index
    %c1_437 = arith.constant 1 : index
    %c1_438 = arith.constant 1 : index
    %c0_439 = arith.constant 0 : index
    %352 = vector.load %arg10[%c0_434, %c1_435, %c0_436, %c1_437, %c1_438, %c0_439] : memref<2x2x1x10x10x64xf32, #tpu.memory_space<vmem>>, vector<1x1x1x8x8x64xf32>
    %353 = vector.shape_cast %352 : vector<1x1x1x8x8x64xf32> to vector<1x8x8x64xf32>
    %c0_440 = arith.constant 0 : index
    %c0_441 = arith.constant 0 : index
    %c0_442 = arith.constant 0 : index
    %c1_443 = arith.constant 1 : index
    %c2_444 = arith.constant 2 : index
    %c0_445 = arith.constant 0 : index
    %354 = vector.load %arg10[%c0_440, %c0_441, %c0_442, %c1_443, %c2_444, %c0_445] : memref<2x2x1x10x10x64xf32, #tpu.memory_space<vmem>>, vector<1x1x1x8x8x64xf32>
    %355 = vector.shape_cast %354 : vector<1x1x1x8x8x64xf32> to vector<1x8x8x64xf32>
    %356 = tpu.concatenate %349, %351, %353, %355 in 3 : vector<1x8x8x64xf32>, vector<1x8x8x64xf32>, vector<1x8x8x64xf32>, vector<1x8x8x64xf32> -> vector<1x8x8x256xf32>
    %c0_446 = arith.constant 0 : index
    %c1_447 = arith.constant 1 : index
    %c0_448 = arith.constant 0 : index
    %357 = vector.load %arg6[%c0_446, %c1_447, %c0_448] : memref<2x2x256xf32, #tpu.memory_space<vmem>>, vector<1x1x256xf32>
    %358 = vector.shape_cast %357 : vector<1x1x256xf32> to vector<256xf32>
    %359 = vector.shape_cast %358 : vector<256xf32> to vector<1x1x1x256xf32>
    %360 = vector.broadcast %359 : vector<1x1x1x256xf32> to vector<1x8x8x256xf32>
    %361 = arith.mulf %356, %360 : vector<1x8x8x256xf32>
    %cst_449 = arith.constant dense<0.000000e+00> : vector<1x8x8xf32>
    %362 = vector.multi_reduction <add>, %361, %cst_449 [3] : vector<1x8x8x256xf32> to vector<1x8x8xf32>
    %363 = vector.broadcast %281 : f32 to vector<1x8x8xf32>
    %364 = arith.addf %362, %363 : vector<1x8x8xf32>
    %365 = math.tanh %364 : vector<1x8x8xf32>
    %366 = vector.extract_strided_slice %365 {offsets = [0, 0, 0], sizes = [1, 7, 7], strides = [1, 1, 1]} : vector<1x8x8xf32> to vector<1x7x7xf32>
    %c0_450 = arith.constant 0 : index
    %c0_451 = arith.constant 0 : index
    %c3_452 = arith.constant 3 : index
    %c0_453 = arith.constant 0 : index
    %c0_454 = arith.constant 0 : index
    %367 = vector.load %arg8[%c0_450, %c0_451, %c3_452, %c0_453, %c0_454] : memref<1x4x4x7x7xf32, #tpu.memory_space<vmem>>, vector<1x1x1x7x7xf32>
    %368 = vector.shape_cast %367 : vector<1x1x1x7x7xf32> to vector<1x7x7xf32>
    %369 = vector.shape_cast %366 : vector<1x7x7xf32> to vector<1x1x1x7x7xf32>
    tpu.vector_store %arg8[%c0_450, %c0_451, %c3_452, %c0_453, %c0_454], %369 {strides = array<i32>} : memref<1x4x4x7x7xf32, #tpu.memory_space<vmem>>, vector<1x1x1x7x7xf32>,
    %c0_455 = arith.constant 0 : index
    %c1_456 = arith.constant 1 : index
    %c0_457 = arith.constant 0 : index
    %c1_458 = arith.constant 1 : index
    %c0_459 = arith.constant 0 : index
    %c0_460 = arith.constant 0 : index
    %370 = vector.load %arg10[%c0_455, %c1_456, %c0_457, %c1_458, %c0_459, %c0_460] : memref<2x2x1x10x10x64xf32, #tpu.memory_space<vmem>>, vector<1x1x1x8x8x64xf32>
    %371 = vector.shape_cast %370 : vector<1x1x1x8x8x64xf32> to vector<1x8x8x64xf32>
    %c0_461 = arith.constant 0 : index
    %c0_462 = arith.constant 0 : index
    %c0_463 = arith.constant 0 : index
    %c1_464 = arith.constant 1 : index
    %c1_465 = arith.constant 1 : index
    %c0_466 = arith.constant 0 : index
    %372 = vector.load %arg10[%c0_461, %c0_462, %c0_463, %c1_464, %c1_465, %c0_466] : memref<2x2x1x10x10x64xf32, #tpu.memory_space<vmem>>, vector<1x1x1x8x8x64xf32>
    %373 = vector.shape_cast %372 : vector<1x1x1x8x8x64xf32> to vector<1x8x8x64xf32>
    %c1_467 = arith.constant 1 : index
    %c1_468 = arith.constant 1 : index
    %c0_469 = arith.constant 0 : index
    %c1_470 = arith.constant 1 : index
    %c0_471 = arith.constant 0 : index
    %c0_472 = arith.constant 0 : index
    %374 = vector.load %arg10[%c1_467, %c1_468, %c0_469, %c1_470, %c0_471, %c0_472] : memref<2x2x1x10x10x64xf32, #tpu.memory_space<vmem>>, vector<1x1x1x8x8x64xf32>
    %375 = vector.shape_cast %374 : vector<1x1x1x8x8x64xf32> to vector<1x8x8x64xf32>
    %c1_473 = arith.constant 1 : index
    %c0_474 = arith.constant 0 : index
    %c0_475 = arith.constant 0 : index
    %c1_476 = arith.constant 1 : index
    %c1_477 = arith.constant 1 : index
    %c0_478 = arith.constant 0 : index
    %376 = vector.load %arg10[%c1_473, %c0_474, %c0_475, %c1_476, %c1_477, %c0_478] : memref<2x2x1x10x10x64xf32, #tpu.memory_space<vmem>>, vector<1x1x1x8x8x64xf32>
    %377 = vector.shape_cast %376 : vector<1x1x1x8x8x64xf32> to vector<1x8x8x64xf32>
    %378 = tpu.concatenate %371, %373, %375, %377 in 3 : vector<1x8x8x64xf32>, vector<1x8x8x64xf32>, vector<1x8x8x64xf32>, vector<1x8x8x64xf32> -> vector<1x8x8x256xf32>
    %c1_479 = arith.constant 1 : index
    %c0_480 = arith.constant 0 : index
    %c0_481 = arith.constant 0 : index
    %379 = vector.load %arg6[%c1_479, %c0_480, %c0_481] : memref<2x2x256xf32, #tpu.memory_space<vmem>>, vector<1x1x256xf32>
    %380 = vector.shape_cast %379 : vector<1x1x256xf32> to vector<256xf32>
    %381 = vector.shape_cast %380 : vector<256xf32> to vector<1x1x1x256xf32>
    %382 = vector.broadcast %381 : vector<1x1x1x256xf32> to vector<1x8x8x256xf32>
    %383 = arith.mulf %378, %382 : vector<1x8x8x256xf32>
    %cst_482 = arith.constant dense<0.000000e+00> : vector<1x8x8xf32>
    %384 = vector.multi_reduction <add>, %383, %cst_482 [3] : vector<1x8x8x256xf32> to vector<1x8x8xf32>
    %385 = vector.broadcast %281 : f32 to vector<1x8x8xf32>
    %386 = arith.addf %384, %385 : vector<1x8x8xf32>
    %387 = math.tanh %386 : vector<1x8x8xf32>
    %388 = vector.extract_strided_slice %387 {offsets = [0, 0, 0], sizes = [1, 7, 7], strides = [1, 1, 1]} : vector<1x8x8xf32> to vector<1x7x7xf32>
    %c0_483 = arith.constant 0 : index
    %c1_484 = arith.constant 1 : index
    %c0_485 = arith.constant 0 : index
    %c0_486 = arith.constant 0 : index
    %c0_487 = arith.constant 0 : index
    %389 = vector.load %arg8[%c0_483, %c1_484, %c0_485, %c0_486, %c0_487] : memref<1x4x4x7x7xf32, #tpu.memory_space<vmem>>, vector<1x1x1x7x7xf32>
    %390 = vector.shape_cast %389 : vector<1x1x1x7x7xf32> to vector<1x7x7xf32>
    %391 = vector.shape_cast %388 : vector<1x7x7xf32> to vector<1x1x1x7x7xf32>
    tpu.vector_store %arg8[%c0_483, %c1_484, %c0_485, %c0_486, %c0_487], %391 {strides = array<i32>} : memref<1x4x4x7x7xf32, #tpu.memory_space<vmem>>, vector<1x1x1x7x7xf32>,
    %c0_488 = arith.constant 0 : index
    %c0_489 = arith.constant 0 : index
    %c0_490 = arith.constant 0 : index
    %c1_491 = arith.constant 1 : index
    %c1_492 = arith.constant 1 : index
    %c0_493 = arith.constant 0 : index
    %392 = vector.load %arg10[%c0_488, %c0_489, %c0_490, %c1_491, %c1_492, %c0_493] : memref<2x2x1x10x10x64xf32, #tpu.memory_space<vmem>>, vector<1x1x1x8x8x64xf32>
    %393 = vector.shape_cast %392 : vector<1x1x1x8x8x64xf32> to vector<1x8x8x64xf32>
    %c0_494 = arith.constant 0 : index
    %c1_495 = arith.constant 1 : index
    %c0_496 = arith.constant 0 : index
    %c1_497 = arith.constant 1 : index
    %c1_498 = arith.constant 1 : index
    %c0_499 = arith.constant 0 : index
    %394 = vector.load %arg10[%c0_494, %c1_495, %c0_496, %c1_497, %c1_498, %c0_499] : memref<2x2x1x10x10x64xf32, #tpu.memory_space<vmem>>, vector<1x1x1x8x8x64xf32>
    %395 = vector.shape_cast %394 : vector<1x1x1x8x8x64xf32> to vector<1x8x8x64xf32>
    %c1_500 = arith.constant 1 : index
    %c0_501 = arith.constant 0 : index
    %c0_502 = arith.constant 0 : index
    %c1_503 = arith.constant 1 : index
    %c1_504 = arith.constant 1 : index
    %c0_505 = arith.constant 0 : index
    %396 = vector.load %arg10[%c1_500, %c0_501, %c0_502, %c1_503, %c1_504, %c0_505] : memref<2x2x1x10x10x64xf32, #tpu.memory_space<vmem>>, vector<1x1x1x8x8x64xf32>
    %397 = vector.shape_cast %396 : vector<1x1x1x8x8x64xf32> to vector<1x8x8x64xf32>
    %c1_506 = arith.constant 1 : index
    %c1_507 = arith.constant 1 : index
    %c0_508 = arith.constant 0 : index
    %c1_509 = arith.constant 1 : index
    %c1_510 = arith.constant 1 : index
    %c0_511 = arith.constant 0 : index
    %398 = vector.load %arg10[%c1_506, %c1_507, %c0_508, %c1_509, %c1_510, %c0_511] : memref<2x2x1x10x10x64xf32, #tpu.memory_space<vmem>>, vector<1x1x1x8x8x64xf32>
    %399 = vector.shape_cast %398 : vector<1x1x1x8x8x64xf32> to vector<1x8x8x64xf32>
    %400 = tpu.concatenate %393, %395, %397, %399 in 3 : vector<1x8x8x64xf32>, vector<1x8x8x64xf32>, vector<1x8x8x64xf32>, vector<1x8x8x64xf32> -> vector<1x8x8x256xf32>
    %c1_512 = arith.constant 1 : index
    %c1_513 = arith.constant 1 : index
    %c0_514 = arith.constant 0 : index
    %401 = vector.load %arg6[%c1_512, %c1_513, %c0_514] : memref<2x2x256xf32, #tpu.memory_space<vmem>>, vector<1x1x256xf32>
    %402 = vector.shape_cast %401 : vector<1x1x256xf32> to vector<256xf32>
    %403 = vector.shape_cast %402 : vector<256xf32> to vector<1x1x1x256xf32>
    %404 = vector.broadcast %403 : vector<1x1x1x256xf32> to vector<1x8x8x256xf32>
    %405 = arith.mulf %400, %404 : vector<1x8x8x256xf32>
    %cst_515 = arith.constant dense<0.000000e+00> : vector<1x8x8xf32>
    %406 = vector.multi_reduction <add>, %405, %cst_515 [3] : vector<1x8x8x256xf32> to vector<1x8x8xf32>
    %407 = vector.broadcast %281 : f32 to vector<1x8x8xf32>
    %408 = arith.addf %406, %407 : vector<1x8x8xf32>
    %409 = math.tanh %408 : vector<1x8x8xf32>
    %410 = vector.extract_strided_slice %409 {offsets = [0, 0, 0], sizes = [1, 7, 7], strides = [1, 1, 1]} : vector<1x8x8xf32> to vector<1x7x7xf32>
    %c0_516 = arith.constant 0 : index
    %c1_517 = arith.constant 1 : index
    %c1_518 = arith.constant 1 : index
    %c0_519 = arith.constant 0 : index
    %c0_520 = arith.constant 0 : index
    %411 = vector.load %arg8[%c0_516, %c1_517, %c1_518, %c0_519, %c0_520] : memref<1x4x4x7x7xf32, #tpu.memory_space<vmem>>, vector<1x1x1x7x7xf32>
    %412 = vector.shape_cast %411 : vector<1x1x1x7x7xf32> to vector<1x7x7xf32>
    %413 = vector.shape_cast %410 : vector<1x7x7xf32> to vector<1x1x1x7x7xf32>
    tpu.vector_store %arg8[%c0_516, %c1_517, %c1_518, %c0_519, %c0_520], %413 {strides = array<i32>} : memref<1x4x4x7x7xf32, #tpu.memory_space<vmem>>, vector<1x1x1x7x7xf32>,
    %c0_521 = arith.constant 0 : index
    %c0_522 = arith.constant 0 : index
    %c0_523 = arith.constant 0 : index
    %c1_524 = arith.constant 1 : index
    %c1_525 = arith.constant 1 : index
    %c0_526 = arith.constant 0 : index
    %414 = vector.load %arg10[%c0_521, %c0_522, %c0_523, %c1_524, %c1_525, %c0_526] : memref<2x2x1x10x10x64xf32, #tpu.memory_space<vmem>>, vector<1x1x1x8x8x64xf32>
    %415 = vector.shape_cast %414 : vector<1x1x1x8x8x64xf32> to vector<1x8x8x64xf32>
    %c0_527 = arith.constant 0 : index
    %c1_528 = arith.constant 1 : index
    %c0_529 = arith.constant 0 : index
    %c1_530 = arith.constant 1 : index
    %c1_531 = arith.constant 1 : index
    %c0_532 = arith.constant 0 : index
    %416 = vector.load %arg10[%c0_527, %c1_528, %c0_529, %c1_530, %c1_531, %c0_532] : memref<2x2x1x10x10x64xf32, #tpu.memory_space<vmem>>, vector<1x1x1x8x8x64xf32>
    %417 = vector.shape_cast %416 : vector<1x1x1x8x8x64xf32> to vector<1x8x8x64xf32>
    %c1_533 = arith.constant 1 : index
    %c0_534 = arith.constant 0 : index
    %c0_535 = arith.constant 0 : index
    %c1_536 = arith.constant 1 : index
    %c1_537 = arith.constant 1 : index
    %c0_538 = arith.constant 0 : index
    %418 = vector.load %arg10[%c1_533, %c0_534, %c0_535, %c1_536, %c1_537, %c0_538] : memref<2x2x1x10x10x64xf32, #tpu.memory_space<vmem>>, vector<1x1x1x8x8x64xf32>
    %419 = vector.shape_cast %418 : vector<1x1x1x8x8x64xf32> to vector<1x8x8x64xf32>
    %c1_539 = arith.constant 1 : index
    %c1_540 = arith.constant 1 : index
    %c0_541 = arith.constant 0 : index
    %c1_542 = arith.constant 1 : index
    %c1_543 = arith.constant 1 : index
    %c0_544 = arith.constant 0 : index
    %420 = vector.load %arg10[%c1_539, %c1_540, %c0_541, %c1_542, %c1_543, %c0_544] : memref<2x2x1x10x10x64xf32, #tpu.memory_space<vmem>>, vector<1x1x1x8x8x64xf32>
    %421 = vector.shape_cast %420 : vector<1x1x1x8x8x64xf32> to vector<1x8x8x64xf32>
    %422 = tpu.concatenate %415, %417, %419, %421 in 3 : vector<1x8x8x64xf32>, vector<1x8x8x64xf32>, vector<1x8x8x64xf32>, vector<1x8x8x64xf32> -> vector<1x8x8x256xf32>
    %c1_545 = arith.constant 1 : index
    %c0_546 = arith.constant 0 : index
    %c0_547 = arith.constant 0 : index
    %423 = vector.load %arg6[%c1_545, %c0_546, %c0_547] : memref<2x2x256xf32, #tpu.memory_space<vmem>>, vector<1x1x256xf32>
    %424 = vector.shape_cast %423 : vector<1x1x256xf32> to vector<256xf32>
    %425 = vector.shape_cast %424 : vector<256xf32> to vector<1x1x1x256xf32>
    %426 = vector.broadcast %425 : vector<1x1x1x256xf32> to vector<1x8x8x256xf32>
    %427 = arith.mulf %422, %426 : vector<1x8x8x256xf32>
    %cst_548 = arith.constant dense<0.000000e+00> : vector<1x8x8xf32>
    %428 = vector.multi_reduction <add>, %427, %cst_548 [3] : vector<1x8x8x256xf32> to vector<1x8x8xf32>
    %429 = vector.broadcast %281 : f32 to vector<1x8x8xf32>
    %430 = arith.addf %428, %429 : vector<1x8x8xf32>
    %431 = math.tanh %430 : vector<1x8x8xf32>
    %432 = vector.extract_strided_slice %431 {offsets = [0, 0, 0], sizes = [1, 7, 7], strides = [1, 1, 1]} : vector<1x8x8xf32> to vector<1x7x7xf32>
    %c0_549 = arith.constant 0 : index
    %c1_550 = arith.constant 1 : index
    %c2_551 = arith.constant 2 : index
    %c0_552 = arith.constant 0 : index
    %c0_553 = arith.constant 0 : index
    %433 = vector.load %arg8[%c0_549, %c1_550, %c2_551, %c0_552, %c0_553] : memref<1x4x4x7x7xf32, #tpu.memory_space<vmem>>, vector<1x1x1x7x7xf32>
    %434 = vector.shape_cast %433 : vector<1x1x1x7x7xf32> to vector<1x7x7xf32>
    %435 = vector.shape_cast %432 : vector<1x7x7xf32> to vector<1x1x1x7x7xf32>
    tpu.vector_store %arg8[%c0_549, %c1_550, %c2_551, %c0_552, %c0_553], %435 {strides = array<i32>} : memref<1x4x4x7x7xf32, #tpu.memory_space<vmem>>, vector<1x1x1x7x7xf32>,
    %c0_554 = arith.constant 0 : index
    %c1_555 = arith.constant 1 : index
    %c0_556 = arith.constant 0 : index
    %c1_557 = arith.constant 1 : index
    %c1_558 = arith.constant 1 : index
    %c0_559 = arith.constant 0 : index
    %436 = vector.load %arg10[%c0_554, %c1_555, %c0_556, %c1_557, %c1_558, %c0_559] : memref<2x2x1x10x10x64xf32, #tpu.memory_space<vmem>>, vector<1x1x1x8x8x64xf32>
    %437 = vector.shape_cast %436 : vector<1x1x1x8x8x64xf32> to vector<1x8x8x64xf32>
    %c0_560 = arith.constant 0 : index
    %c0_561 = arith.constant 0 : index
    %c0_562 = arith.constant 0 : index
    %c1_563 = arith.constant 1 : index
    %c2_564 = arith.constant 2 : index
    %c0_565 = arith.constant 0 : index
    %438 = vector.load %arg10[%c0_560, %c0_561, %c0_562, %c1_563, %c2_564, %c0_565] : memref<2x2x1x10x10x64xf32, #tpu.memory_space<vmem>>, vector<1x1x1x8x8x64xf32>
    %439 = vector.shape_cast %438 : vector<1x1x1x8x8x64xf32> to vector<1x8x8x64xf32>
    %c1_566 = arith.constant 1 : index
    %c1_567 = arith.constant 1 : index
    %c0_568 = arith.constant 0 : index
    %c1_569 = arith.constant 1 : index
    %c1_570 = arith.constant 1 : index
    %c0_571 = arith.constant 0 : index
    %440 = vector.load %arg10[%c1_566, %c1_567, %c0_568, %c1_569, %c1_570, %c0_571] : memref<2x2x1x10x10x64xf32, #tpu.memory_space<vmem>>, vector<1x1x1x8x8x64xf32>
    %441 = vector.shape_cast %440 : vector<1x1x1x8x8x64xf32> to vector<1x8x8x64xf32>
    %c1_572 = arith.constant 1 : index
    %c0_573 = arith.constant 0 : index
    %c0_574 = arith.constant 0 : index
    %c1_575 = arith.constant 1 : index
    %c2_576 = arith.constant 2 : index
    %c0_577 = arith.constant 0 : index
    %442 = vector.load %arg10[%c1_572, %c0_573, %c0_574, %c1_575, %c2_576, %c0_577] : memref<2x2x1x10x10x64xf32, #tpu.memory_space<vmem>>, vector<1x1x1x8x8x64xf32>
    %443 = vector.shape_cast %442 : vector<1x1x1x8x8x64xf32> to vector<1x8x8x64xf32>
    %444 = tpu.concatenate %437, %439, %441, %443 in 3 : vector<1x8x8x64xf32>, vector<1x8x8x64xf32>, vector<1x8x8x64xf32>, vector<1x8x8x64xf32> -> vector<1x8x8x256xf32>
    %c1_578 = arith.constant 1 : index
    %c1_579 = arith.constant 1 : index
    %c0_580 = arith.constant 0 : index
    %445 = vector.load %arg6[%c1_578, %c1_579, %c0_580] : memref<2x2x256xf32, #tpu.memory_space<vmem>>, vector<1x1x256xf32>
    %446 = vector.shape_cast %445 : vector<1x1x256xf32> to vector<256xf32>
    %447 = vector.shape_cast %446 : vector<256xf32> to vector<1x1x1x256xf32>
    %448 = vector.broadcast %447 : vector<1x1x1x256xf32> to vector<1x8x8x256xf32>
    %449 = arith.mulf %444, %448 : vector<1x8x8x256xf32>
    %cst_581 = arith.constant dense<0.000000e+00> : vector<1x8x8xf32>
    %450 = vector.multi_reduction <add>, %449, %cst_581 [3] : vector<1x8x8x256xf32> to vector<1x8x8xf32>
    %451 = vector.broadcast %281 : f32 to vector<1x8x8xf32>
    %452 = arith.addf %450, %451 : vector<1x8x8xf32>
    %453 = math.tanh %452 : vector<1x8x8xf32>
    %454 = vector.extract_strided_slice %453 {offsets = [0, 0, 0], sizes = [1, 7, 7], strides = [1, 1, 1]} : vector<1x8x8xf32> to vector<1x7x7xf32>
    %c0_582 = arith.constant 0 : index
    %c1_583 = arith.constant 1 : index
    %c3_584 = arith.constant 3 : index
    %c0_585 = arith.constant 0 : index
    %c0_586 = arith.constant 0 : index
    %455 = vector.load %arg8[%c0_582, %c1_583, %c3_584, %c0_585, %c0_586] : memref<1x4x4x7x7xf32, #tpu.memory_space<vmem>>, vector<1x1x1x7x7xf32>
    %456 = vector.shape_cast %455 : vector<1x1x1x7x7xf32> to vector<1x7x7xf32>
    %457 = vector.shape_cast %454 : vector<1x7x7xf32> to vector<1x1x1x7x7xf32>
    tpu.vector_store %arg8[%c0_582, %c1_583, %c3_584, %c0_585, %c0_586], %457 {strides = array<i32>} : memref<1x4x4x7x7xf32, #tpu.memory_space<vmem>>, vector<1x1x1x7x7xf32>,
    %c0_587 = arith.constant 0 : index
    %c1_588 = arith.constant 1 : index
    %c0_589 = arith.constant 0 : index
    %c1_590 = arith.constant 1 : index
    %c0_591 = arith.constant 0 : index
    %c0_592 = arith.constant 0 : index
    %458 = vector.load %arg10[%c0_587, %c1_588, %c0_589, %c1_590, %c0_591, %c0_592] : memref<2x2x1x10x10x64xf32, #tpu.memory_space<vmem>>, vector<1x1x1x8x8x64xf32>
    %459 = vector.shape_cast %458 : vector<1x1x1x8x8x64xf32> to vector<1x8x8x64xf32>
    %c0_593 = arith.constant 0 : index
    %c0_594 = arith.constant 0 : index
    %c0_595 = arith.constant 0 : index
    %c1_596 = arith.constant 1 : index
    %c1_597 = arith.constant 1 : index
    %c0_598 = arith.constant 0 : index
    %460 = vector.load %arg10[%c0_593, %c0_594, %c0_595, %c1_596, %c1_597, %c0_598] : memref<2x2x1x10x10x64xf32, #tpu.memory_space<vmem>>, vector<1x1x1x8x8x64xf32>
    %461 = vector.shape_cast %460 : vector<1x1x1x8x8x64xf32> to vector<1x8x8x64xf32>
    %c1_599 = arith.constant 1 : index
    %c1_600 = arith.constant 1 : index
    %c0_601 = arith.constant 0 : index
    %c1_602 = arith.constant 1 : index
    %c0_603 = arith.constant 0 : index
    %c0_604 = arith.constant 0 : index
    %462 = vector.load %arg10[%c1_599, %c1_600, %c0_601, %c1_602, %c0_603, %c0_604] : memref<2x2x1x10x10x64xf32, #tpu.memory_space<vmem>>, vector<1x1x1x8x8x64xf32>
    %463 = vector.shape_cast %462 : vector<1x1x1x8x8x64xf32> to vector<1x8x8x64xf32>
    %c1_605 = arith.constant 1 : index
    %c0_606 = arith.constant 0 : index
    %c0_607 = arith.constant 0 : index
    %c1_608 = arith.constant 1 : index
    %c1_609 = arith.constant 1 : index
    %c0_610 = arith.constant 0 : index
    %464 = vector.load %arg10[%c1_605, %c0_606, %c0_607, %c1_608, %c1_609, %c0_610] : memref<2x2x1x10x10x64xf32, #tpu.memory_space<vmem>>, vector<1x1x1x8x8x64xf32>
    %465 = vector.shape_cast %464 : vector<1x1x1x8x8x64xf32> to vector<1x8x8x64xf32>
    %466 = tpu.concatenate %459, %461, %463, %465 in 3 : vector<1x8x8x64xf32>, vector<1x8x8x64xf32>, vector<1x8x8x64xf32>, vector<1x8x8x64xf32> -> vector<1x8x8x256xf32>
    %c0_611 = arith.constant 0 : index
    %c0_612 = arith.constant 0 : index
    %c0_613 = arith.constant 0 : index
    %467 = vector.load %arg6[%c0_611, %c0_612, %c0_613] : memref<2x2x256xf32, #tpu.memory_space<vmem>>, vector<1x1x256xf32>
    %468 = vector.shape_cast %467 : vector<1x1x256xf32> to vector<256xf32>
    %469 = vector.shape_cast %468 : vector<256xf32> to vector<1x1x1x256xf32>
    %470 = vector.broadcast %469 : vector<1x1x1x256xf32> to vector<1x8x8x256xf32>
    %471 = arith.mulf %466, %470 : vector<1x8x8x256xf32>
    %cst_614 = arith.constant dense<0.000000e+00> : vector<1x8x8xf32>
    %472 = vector.multi_reduction <add>, %471, %cst_614 [3] : vector<1x8x8x256xf32> to vector<1x8x8xf32>
    %473 = vector.broadcast %281 : f32 to vector<1x8x8xf32>
    %474 = arith.addf %472, %473 : vector<1x8x8xf32>
    %475 = math.tanh %474 : vector<1x8x8xf32>
    %476 = vector.extract_strided_slice %475 {offsets = [0, 0, 0], sizes = [1, 7, 7], strides = [1, 1, 1]} : vector<1x8x8xf32> to vector<1x7x7xf32>
    %c0_615 = arith.constant 0 : index
    %c2_616 = arith.constant 2 : index
    %c0_617 = arith.constant 0 : index
    %c0_618 = arith.constant 0 : index
    %c0_619 = arith.constant 0 : index
    %477 = vector.load %arg8[%c0_615, %c2_616, %c0_617, %c0_618, %c0_619] : memref<1x4x4x7x7xf32, #tpu.memory_space<vmem>>, vector<1x1x1x7x7xf32>
    %478 = vector.shape_cast %477 : vector<1x1x1x7x7xf32> to vector<1x7x7xf32>
    %479 = vector.shape_cast %476 : vector<1x7x7xf32> to vector<1x1x1x7x7xf32>
    tpu.vector_store %arg8[%c0_615, %c2_616, %c0_617, %c0_618, %c0_619], %479 {strides = array<i32>} : memref<1x4x4x7x7xf32, #tpu.memory_space<vmem>>, vector<1x1x1x7x7xf32>,
    %c0_620 = arith.constant 0 : index
    %c0_621 = arith.constant 0 : index
    %c0_622 = arith.constant 0 : index
    %c1_623 = arith.constant 1 : index
    %c1_624 = arith.constant 1 : index
    %c0_625 = arith.constant 0 : index
    %480 = vector.load %arg10[%c0_620, %c0_621, %c0_622, %c1_623, %c1_624, %c0_625] : memref<2x2x1x10x10x64xf32, #tpu.memory_space<vmem>>, vector<1x1x1x8x8x64xf32>
    %481 = vector.shape_cast %480 : vector<1x1x1x8x8x64xf32> to vector<1x8x8x64xf32>
    %c0_626 = arith.constant 0 : index
    %c1_627 = arith.constant 1 : index
    %c0_628 = arith.constant 0 : index
    %c1_629 = arith.constant 1 : index
    %c1_630 = arith.constant 1 : index
    %c0_631 = arith.constant 0 : index
    %482 = vector.load %arg10[%c0_626, %c1_627, %c0_628, %c1_629, %c1_630, %c0_631] : memref<2x2x1x10x10x64xf32, #tpu.memory_space<vmem>>, vector<1x1x1x8x8x64xf32>
    %483 = vector.shape_cast %482 : vector<1x1x1x8x8x64xf32> to vector<1x8x8x64xf32>
    %c1_632 = arith.constant 1 : index
    %c0_633 = arith.constant 0 : index
    %c0_634 = arith.constant 0 : index
    %c1_635 = arith.constant 1 : index
    %c1_636 = arith.constant 1 : index
    %c0_637 = arith.constant 0 : index
    %484 = vector.load %arg10[%c1_632, %c0_633, %c0_634, %c1_635, %c1_636, %c0_637] : memref<2x2x1x10x10x64xf32, #tpu.memory_space<vmem>>, vector<1x1x1x8x8x64xf32>
    %485 = vector.shape_cast %484 : vector<1x1x1x8x8x64xf32> to vector<1x8x8x64xf32>
    %c1_638 = arith.constant 1 : index
    %c1_639 = arith.constant 1 : index
    %c0_640 = arith.constant 0 : index
    %c1_641 = arith.constant 1 : index
    %c1_642 = arith.constant 1 : index
    %c0_643 = arith.constant 0 : index
    %486 = vector.load %arg10[%c1_638, %c1_639, %c0_640, %c1_641, %c1_642, %c0_643] : memref<2x2x1x10x10x64xf32, #tpu.memory_space<vmem>>, vector<1x1x1x8x8x64xf32>
    %487 = vector.shape_cast %486 : vector<1x1x1x8x8x64xf32> to vector<1x8x8x64xf32>
    %488 = tpu.concatenate %481, %483, %485, %487 in 3 : vector<1x8x8x64xf32>, vector<1x8x8x64xf32>, vector<1x8x8x64xf32>, vector<1x8x8x64xf32> -> vector<1x8x8x256xf32>
    %c0_644 = arith.constant 0 : index
    %c1_645 = arith.constant 1 : index
    %c0_646 = arith.constant 0 : index
    %489 = vector.load %arg6[%c0_644, %c1_645, %c0_646] : memref<2x2x256xf32, #tpu.memory_space<vmem>>, vector<1x1x256xf32>
    %490 = vector.shape_cast %489 : vector<1x1x256xf32> to vector<256xf32>
    %491 = vector.shape_cast %490 : vector<256xf32> to vector<1x1x1x256xf32>
    %492 = vector.broadcast %491 : vector<1x1x1x256xf32> to vector<1x8x8x256xf32>
    %493 = arith.mulf %488, %492 : vector<1x8x8x256xf32>
    %cst_647 = arith.constant dense<0.000000e+00> : vector<1x8x8xf32>
    %494 = vector.multi_reduction <add>, %493, %cst_647 [3] : vector<1x8x8x256xf32> to vector<1x8x8xf32>
    %495 = vector.broadcast %281 : f32 to vector<1x8x8xf32>
    %496 = arith.addf %494, %495 : vector<1x8x8xf32>
    %497 = math.tanh %496 : vector<1x8x8xf32>
    %498 = vector.extract_strided_slice %497 {offsets = [0, 0, 0], sizes = [1, 7, 7], strides = [1, 1, 1]} : vector<1x8x8xf32> to vector<1x7x7xf32>
    %c0_648 = arith.constant 0 : index
    %c2_649 = arith.constant 2 : index
    %c1_650 = arith.constant 1 : index
    %c0_651 = arith.constant 0 : index
    %c0_652 = arith.constant 0 : index
    %499 = vector.load %arg8[%c0_648, %c2_649, %c1_650, %c0_651, %c0_652] : memref<1x4x4x7x7xf32, #tpu.memory_space<vmem>>, vector<1x1x1x7x7xf32>
    %500 = vector.shape_cast %499 : vector<1x1x1x7x7xf32> to vector<1x7x7xf32>
    %501 = vector.shape_cast %498 : vector<1x7x7xf32> to vector<1x1x1x7x7xf32>
    tpu.vector_store %arg8[%c0_648, %c2_649, %c1_650, %c0_651, %c0_652], %501 {strides = array<i32>} : memref<1x4x4x7x7xf32, #tpu.memory_space<vmem>>, vector<1x1x1x7x7xf32>,
    %c0_653 = arith.constant 0 : index
    %c0_654 = arith.constant 0 : index
    %c0_655 = arith.constant 0 : index
    %c1_656 = arith.constant 1 : index
    %c1_657 = arith.constant 1 : index
    %c0_658 = arith.constant 0 : index
    %502 = vector.load %arg10[%c0_653, %c0_654, %c0_655, %c1_656, %c1_657, %c0_658] : memref<2x2x1x10x10x64xf32, #tpu.memory_space<vmem>>, vector<1x1x1x8x8x64xf32>
    %503 = vector.shape_cast %502 : vector<1x1x1x8x8x64xf32> to vector<1x8x8x64xf32>
    %c0_659 = arith.constant 0 : index
    %c1_660 = arith.constant 1 : index
    %c0_661 = arith.constant 0 : index
    %c1_662 = arith.constant 1 : index
    %c1_663 = arith.constant 1 : index
    %c0_664 = arith.constant 0 : index
    %504 = vector.load %arg10[%c0_659, %c1_660, %c0_661, %c1_662, %c1_663, %c0_664] : memref<2x2x1x10x10x64xf32, #tpu.memory_space<vmem>>, vector<1x1x1x8x8x64xf32>
    %505 = vector.shape_cast %504 : vector<1x1x1x8x8x64xf32> to vector<1x8x8x64xf32>
    %c1_665 = arith.constant 1 : index
    %c0_666 = arith.constant 0 : index
    %c0_667 = arith.constant 0 : index
    %c1_668 = arith.constant 1 : index
    %c1_669 = arith.constant 1 : index
    %c0_670 = arith.constant 0 : index
    %506 = vector.load %arg10[%c1_665, %c0_666, %c0_667, %c1_668, %c1_669, %c0_670] : memref<2x2x1x10x10x64xf32, #tpu.memory_space<vmem>>, vector<1x1x1x8x8x64xf32>
    %507 = vector.shape_cast %506 : vector<1x1x1x8x8x64xf32> to vector<1x8x8x64xf32>
    %c1_671 = arith.constant 1 : index
    %c1_672 = arith.constant 1 : index
    %c0_673 = arith.constant 0 : index
    %c1_674 = arith.constant 1 : index
    %c1_675 = arith.constant 1 : index
    %c0_676 = arith.constant 0 : index
    %508 = vector.load %arg10[%c1_671, %c1_672, %c0_673, %c1_674, %c1_675, %c0_676] : memref<2x2x1x10x10x64xf32, #tpu.memory_space<vmem>>, vector<1x1x1x8x8x64xf32>
    %509 = vector.shape_cast %508 : vector<1x1x1x8x8x64xf32> to vector<1x8x8x64xf32>
    %510 = tpu.concatenate %503, %505, %507, %509 in 3 : vector<1x8x8x64xf32>, vector<1x8x8x64xf32>, vector<1x8x8x64xf32>, vector<1x8x8x64xf32> -> vector<1x8x8x256xf32>
    %c0_677 = arith.constant 0 : index
    %c0_678 = arith.constant 0 : index
    %c0_679 = arith.constant 0 : index
    %511 = vector.load %arg6[%c0_677, %c0_678, %c0_679] : memref<2x2x256xf32, #tpu.memory_space<vmem>>, vector<1x1x256xf32>
    %512 = vector.shape_cast %511 : vector<1x1x256xf32> to vector<256xf32>
    %513 = vector.shape_cast %512 : vector<256xf32> to vector<1x1x1x256xf32>
    %514 = vector.broadcast %513 : vector<1x1x1x256xf32> to vector<1x8x8x256xf32>
    %515 = arith.mulf %510, %514 : vector<1x8x8x256xf32>
    %cst_680 = arith.constant dense<0.000000e+00> : vector<1x8x8xf32>
    %516 = vector.multi_reduction <add>, %515, %cst_680 [3] : vector<1x8x8x256xf32> to vector<1x8x8xf32>
    %517 = vector.broadcast %281 : f32 to vector<1x8x8xf32>
    %518 = arith.addf %516, %517 : vector<1x8x8xf32>
    %519 = math.tanh %518 : vector<1x8x8xf32>
    %520 = vector.extract_strided_slice %519 {offsets = [0, 0, 0], sizes = [1, 7, 7], strides = [1, 1, 1]} : vector<1x8x8xf32> to vector<1x7x7xf32>
    %c0_681 = arith.constant 0 : index
    %c2_682 = arith.constant 2 : index
    %c2_683 = arith.constant 2 : index
    %c0_684 = arith.constant 0 : index
    %c0_685 = arith.constant 0 : index
    %521 = vector.load %arg8[%c0_681, %c2_682, %c2_683, %c0_684, %c0_685] : memref<1x4x4x7x7xf32, #tpu.memory_space<vmem>>, vector<1x1x1x7x7xf32>
    %522 = vector.shape_cast %521 : vector<1x1x1x7x7xf32> to vector<1x7x7xf32>
    %523 = vector.shape_cast %520 : vector<1x7x7xf32> to vector<1x1x1x7x7xf32>
    tpu.vector_store %arg8[%c0_681, %c2_682, %c2_683, %c0_684, %c0_685], %523 {strides = array<i32>} : memref<1x4x4x7x7xf32, #tpu.memory_space<vmem>>, vector<1x1x1x7x7xf32>,
    %c0_686 = arith.constant 0 : index
    %c1_687 = arith.constant 1 : index
    %c0_688 = arith.constant 0 : index
    %c1_689 = arith.constant 1 : index
    %c1_690 = arith.constant 1 : index
    %c0_691 = arith.constant 0 : index
    %524 = vector.load %arg10[%c0_686, %c1_687, %c0_688, %c1_689, %c1_690, %c0_691] : memref<2x2x1x10x10x64xf32, #tpu.memory_space<vmem>>, vector<1x1x1x8x8x64xf32>
    %525 = vector.shape_cast %524 : vector<1x1x1x8x8x64xf32> to vector<1x8x8x64xf32>
    %c0_692 = arith.constant 0 : index
    %c0_693 = arith.constant 0 : index
    %c0_694 = arith.constant 0 : index
    %c1_695 = arith.constant 1 : index
    %c2_696 = arith.constant 2 : index
    %c0_697 = arith.constant 0 : index
    %526 = vector.load %arg10[%c0_692, %c0_693, %c0_694, %c1_695, %c2_696, %c0_697] : memref<2x2x1x10x10x64xf32, #tpu.memory_space<vmem>>, vector<1x1x1x8x8x64xf32>
    %527 = vector.shape_cast %526 : vector<1x1x1x8x8x64xf32> to vector<1x8x8x64xf32>
    %c1_698 = arith.constant 1 : index
    %c1_699 = arith.constant 1 : index
    %c0_700 = arith.constant 0 : index
    %c1_701 = arith.constant 1 : index
    %c1_702 = arith.constant 1 : index
    %c0_703 = arith.constant 0 : index
    %528 = vector.load %arg10[%c1_698, %c1_699, %c0_700, %c1_701, %c1_702, %c0_703] : memref<2x2x1x10x10x64xf32, #tpu.memory_space<vmem>>, vector<1x1x1x8x8x64xf32>
    %529 = vector.shape_cast %528 : vector<1x1x1x8x8x64xf32> to vector<1x8x8x64xf32>
    %c1_704 = arith.constant 1 : index
    %c0_705 = arith.constant 0 : index
    %c0_706 = arith.constant 0 : index
    %c1_707 = arith.constant 1 : index
    %c2_708 = arith.constant 2 : index
    %c0_709 = arith.constant 0 : index
    %530 = vector.load %arg10[%c1_704, %c0_705, %c0_706, %c1_707, %c2_708, %c0_709] : memref<2x2x1x10x10x64xf32, #tpu.memory_space<vmem>>, vector<1x1x1x8x8x64xf32>
    %531 = vector.shape_cast %530 : vector<1x1x1x8x8x64xf32> to vector<1x8x8x64xf32>
    %532 = tpu.concatenate %525, %527, %529, %531 in 3 : vector<1x8x8x64xf32>, vector<1x8x8x64xf32>, vector<1x8x8x64xf32>, vector<1x8x8x64xf32> -> vector<1x8x8x256xf32>
    %c0_710 = arith.constant 0 : index
    %c1_711 = arith.constant 1 : index
    %c0_712 = arith.constant 0 : index
    %533 = vector.load %arg6[%c0_710, %c1_711, %c0_712] : memref<2x2x256xf32, #tpu.memory_space<vmem>>, vector<1x1x256xf32>
    %534 = vector.shape_cast %533 : vector<1x1x256xf32> to vector<256xf32>
    %535 = vector.shape_cast %534 : vector<256xf32> to vector<1x1x1x256xf32>
    %536 = vector.broadcast %535 : vector<1x1x1x256xf32> to vector<1x8x8x256xf32>
    %537 = arith.mulf %532, %536 : vector<1x8x8x256xf32>
    %cst_713 = arith.constant dense<0.000000e+00> : vector<1x8x8xf32>
    %538 = vector.multi_reduction <add>, %537, %cst_713 [3] : vector<1x8x8x256xf32> to vector<1x8x8xf32>
    %539 = vector.broadcast %281 : f32 to vector<1x8x8xf32>
    %540 = arith.addf %538, %539 : vector<1x8x8xf32>
    %541 = math.tanh %540 : vector<1x8x8xf32>
    %542 = vector.extract_strided_slice %541 {offsets = [0, 0, 0], sizes = [1, 7, 7], strides = [1, 1, 1]} : vector<1x8x8xf32> to vector<1x7x7xf32>
    %c0_714 = arith.constant 0 : index
    %c2_715 = arith.constant 2 : index
    %c3_716 = arith.constant 3 : index
    %c0_717 = arith.constant 0 : index
    %c0_718 = arith.constant 0 : index
    %543 = vector.load %arg8[%c0_714, %c2_715, %c3_716, %c0_717, %c0_718] : memref<1x4x4x7x7xf32, #tpu.memory_space<vmem>>, vector<1x1x1x7x7xf32>
    %544 = vector.shape_cast %543 : vector<1x1x1x7x7xf32> to vector<1x7x7xf32>
    %545 = vector.shape_cast %542 : vector<1x7x7xf32> to vector<1x1x1x7x7xf32>
    tpu.vector_store %arg8[%c0_714, %c2_715, %c3_716, %c0_717, %c0_718], %545 {strides = array<i32>} : memref<1x4x4x7x7xf32, #tpu.memory_space<vmem>>, vector<1x1x1x7x7xf32>,
    %c1_719 = arith.constant 1 : index
    %c1_720 = arith.constant 1 : index
    %c0_721 = arith.constant 0 : index
    %c1_722 = arith.constant 1 : index
    %c0_723 = arith.constant 0 : index
    %c0_724 = arith.constant 0 : index
    %546 = vector.load %arg10[%c1_719, %c1_720, %c0_721, %c1_722, %c0_723, %c0_724] : memref<2x2x1x10x10x64xf32, #tpu.memory_space<vmem>>, vector<1x1x1x8x8x64xf32>
    %547 = vector.shape_cast %546 : vector<1x1x1x8x8x64xf32> to vector<1x8x8x64xf32>
    %c1_725 = arith.constant 1 : index
    %c0_726 = arith.constant 0 : index
    %c0_727 = arith.constant 0 : index
    %c1_728 = arith.constant 1 : index
    %c1_729 = arith.constant 1 : index
    %c0_730 = arith.constant 0 : index
    %548 = vector.load %arg10[%c1_725, %c0_726, %c0_727, %c1_728, %c1_729, %c0_730] : memref<2x2x1x10x10x64xf32, #tpu.memory_space<vmem>>, vector<1x1x1x8x8x64xf32>
    %549 = vector.shape_cast %548 : vector<1x1x1x8x8x64xf32> to vector<1x8x8x64xf32>
    %c0_731 = arith.constant 0 : index
    %c1_732 = arith.constant 1 : index
    %c0_733 = arith.constant 0 : index
    %c2_734 = arith.constant 2 : index
    %c0_735 = arith.constant 0 : index
    %c0_736 = arith.constant 0 : index
    %550 = vector.load %arg10[%c0_731, %c1_732, %c0_733, %c2_734, %c0_735, %c0_736] : memref<2x2x1x10x10x64xf32, #tpu.memory_space<vmem>>, vector<1x1x1x8x8x64xf32>
    %551 = vector.shape_cast %550 : vector<1x1x1x8x8x64xf32> to vector<1x8x8x64xf32>
    %c0_737 = arith.constant 0 : index
    %c0_738 = arith.constant 0 : index
    %c0_739 = arith.constant 0 : index
    %c2_740 = arith.constant 2 : index
    %c1_741 = arith.constant 1 : index
    %c0_742 = arith.constant 0 : index
    %552 = vector.load %arg10[%c0_737, %c0_738, %c0_739, %c2_740, %c1_741, %c0_742] : memref<2x2x1x10x10x64xf32, #tpu.memory_space<vmem>>, vector<1x1x1x8x8x64xf32>
    %553 = vector.shape_cast %552 : vector<1x1x1x8x8x64xf32> to vector<1x8x8x64xf32>
    %554 = tpu.concatenate %547, %549, %551, %553 in 3 : vector<1x8x8x64xf32>, vector<1x8x8x64xf32>, vector<1x8x8x64xf32>, vector<1x8x8x64xf32> -> vector<1x8x8x256xf32>
    %c1_743 = arith.constant 1 : index
    %c0_744 = arith.constant 0 : index
    %c0_745 = arith.constant 0 : index
    %555 = vector.load %arg6[%c1_743, %c0_744, %c0_745] : memref<2x2x256xf32, #tpu.memory_space<vmem>>, vector<1x1x256xf32>
    %556 = vector.shape_cast %555 : vector<1x1x256xf32> to vector<256xf32>
    %557 = vector.shape_cast %556 : vector<256xf32> to vector<1x1x1x256xf32>
    %558 = vector.broadcast %557 : vector<1x1x1x256xf32> to vector<1x8x8x256xf32>
    %559 = arith.mulf %554, %558 : vector<1x8x8x256xf32>
    %cst_746 = arith.constant dense<0.000000e+00> : vector<1x8x8xf32>
    %560 = vector.multi_reduction <add>, %559, %cst_746 [3] : vector<1x8x8x256xf32> to vector<1x8x8xf32>
    %561 = vector.broadcast %281 : f32 to vector<1x8x8xf32>
    %562 = arith.addf %560, %561 : vector<1x8x8xf32>
    %563 = math.tanh %562 : vector<1x8x8xf32>
    %564 = vector.extract_strided_slice %563 {offsets = [0, 0, 0], sizes = [1, 7, 7], strides = [1, 1, 1]} : vector<1x8x8xf32> to vector<1x7x7xf32>
    %c0_747 = arith.constant 0 : index
    %c3_748 = arith.constant 3 : index
    %c0_749 = arith.constant 0 : index
    %c0_750 = arith.constant 0 : index
    %c0_751 = arith.constant 0 : index
    %565 = vector.load %arg8[%c0_747, %c3_748, %c0_749, %c0_750, %c0_751] : memref<1x4x4x7x7xf32, #tpu.memory_space<vmem>>, vector<1x1x1x7x7xf32>
    %566 = vector.shape_cast %565 : vector<1x1x1x7x7xf32> to vector<1x7x7xf32>
    %567 = vector.shape_cast %564 : vector<1x7x7xf32> to vector<1x1x1x7x7xf32>
    tpu.vector_store %arg8[%c0_747, %c3_748, %c0_749, %c0_750, %c0_751], %567 {strides = array<i32>} : memref<1x4x4x7x7xf32, #tpu.memory_space<vmem>>, vector<1x1x1x7x7xf32>,
    %c1_752 = arith.constant 1 : index
    %c0_753 = arith.constant 0 : index
    %c0_754 = arith.constant 0 : index
    %c1_755 = arith.constant 1 : index
    %c1_756 = arith.constant 1 : index
    %c0_757 = arith.constant 0 : index
    %568 = vector.load %arg10[%c1_752, %c0_753, %c0_754, %c1_755, %c1_756, %c0_757] : memref<2x2x1x10x10x64xf32, #tpu.memory_space<vmem>>, vector<1x1x1x8x8x64xf32>
    %569 = vector.shape_cast %568 : vector<1x1x1x8x8x64xf32> to vector<1x8x8x64xf32>
    %c1_758 = arith.constant 1 : index
    %c1_759 = arith.constant 1 : index
    %c0_760 = arith.constant 0 : index
    %c1_761 = arith.constant 1 : index
    %c1_762 = arith.constant 1 : index
    %c0_763 = arith.constant 0 : index
    %570 = vector.load %arg10[%c1_758, %c1_759, %c0_760, %c1_761, %c1_762, %c0_763] : memref<2x2x1x10x10x64xf32, #tpu.memory_space<vmem>>, vector<1x1x1x8x8x64xf32>
    %571 = vector.shape_cast %570 : vector<1x1x1x8x8x64xf32> to vector<1x8x8x64xf32>
    %c0_764 = arith.constant 0 : index
    %c0_765 = arith.constant 0 : index
    %c0_766 = arith.constant 0 : index
    %c2_767 = arith.constant 2 : index
    %c1_768 = arith.constant 1 : index
    %c0_769 = arith.constant 0 : index
    %572 = vector.load %arg10[%c0_764, %c0_765, %c0_766, %c2_767, %c1_768, %c0_769] : memref<2x2x1x10x10x64xf32, #tpu.memory_space<vmem>>, vector<1x1x1x8x8x64xf32>
    %573 = vector.shape_cast %572 : vector<1x1x1x8x8x64xf32> to vector<1x8x8x64xf32>
    %c0_770 = arith.constant 0 : index
    %c1_771 = arith.constant 1 : index
    %c0_772 = arith.constant 0 : index
    %c2_773 = arith.constant 2 : index
    %c1_774 = arith.constant 1 : index
    %c0_775 = arith.constant 0 : index
    %574 = vector.load %arg10[%c0_770, %c1_771, %c0_772, %c2_773, %c1_774, %c0_775] : memref<2x2x1x10x10x64xf32, #tpu.memory_space<vmem>>, vector<1x1x1x8x8x64xf32>
    %575 = vector.shape_cast %574 : vector<1x1x1x8x8x64xf32> to vector<1x8x8x64xf32>
    %576 = tpu.concatenate %569, %571, %573, %575 in 3 : vector<1x8x8x64xf32>, vector<1x8x8x64xf32>, vector<1x8x8x64xf32>, vector<1x8x8x64xf32> -> vector<1x8x8x256xf32>
    %c1_776 = arith.constant 1 : index
    %c1_777 = arith.constant 1 : index
    %c0_778 = arith.constant 0 : index
    %577 = vector.load %arg6[%c1_776, %c1_777, %c0_778] : memref<2x2x256xf32, #tpu.memory_space<vmem>>, vector<1x1x256xf32>
    %578 = vector.shape_cast %577 : vector<1x1x256xf32> to vector<256xf32>
    %579 = vector.shape_cast %578 : vector<256xf32> to vector<1x1x1x256xf32>
    %580 = vector.broadcast %579 : vector<1x1x1x256xf32> to vector<1x8x8x256xf32>
    %581 = arith.mulf %576, %580 : vector<1x8x8x256xf32>
    %cst_779 = arith.constant dense<0.000000e+00> : vector<1x8x8xf32>
    %582 = vector.multi_reduction <add>, %581, %cst_779 [3] : vector<1x8x8x256xf32> to vector<1x8x8xf32>
    %583 = vector.broadcast %281 : f32 to vector<1x8x8xf32>
    %584 = arith.addf %582, %583 : vector<1x8x8xf32>
    %585 = math.tanh %584 : vector<1x8x8xf32>
    %586 = vector.extract_strided_slice %585 {offsets = [0, 0, 0], sizes = [1, 7, 7], strides = [1, 1, 1]} : vector<1x8x8xf32> to vector<1x7x7xf32>
    %c0_780 = arith.constant 0 : index
    %c3_781 = arith.constant 3 : index
    %c1_782 = arith.constant 1 : index
    %c0_783 = arith.constant 0 : index
    %c0_784 = arith.constant 0 : index
    %587 = vector.load %arg8[%c0_780, %c3_781, %c1_782, %c0_783, %c0_784] : memref<1x4x4x7x7xf32, #tpu.memory_space<vmem>>, vector<1x1x1x7x7xf32>
    %588 = vector.shape_cast %587 : vector<1x1x1x7x7xf32> to vector<1x7x7xf32>
    %589 = vector.shape_cast %586 : vector<1x7x7xf32> to vector<1x1x1x7x7xf32>
    tpu.vector_store %arg8[%c0_780, %c3_781, %c1_782, %c0_783, %c0_784], %589 {strides = array<i32>} : memref<1x4x4x7x7xf32, #tpu.memory_space<vmem>>, vector<1x1x1x7x7xf32>,
    %c1_785 = arith.constant 1 : index
    %c0_786 = arith.constant 0 : index
    %c0_787 = arith.constant 0 : index
    %c1_788 = arith.constant 1 : index
    %c1_789 = arith.constant 1 : index
    %c0_790 = arith.constant 0 : index
    %590 = vector.load %arg10[%c1_785, %c0_786, %c0_787, %c1_788, %c1_789, %c0_790] : memref<2x2x1x10x10x64xf32, #tpu.memory_space<vmem>>, vector<1x1x1x8x8x64xf32>
    %591 = vector.shape_cast %590 : vector<1x1x1x8x8x64xf32> to vector<1x8x8x64xf32>
    %c1_791 = arith.constant 1 : index
    %c1_792 = arith.constant 1 : index
    %c0_793 = arith.constant 0 : index
    %c1_794 = arith.constant 1 : index
    %c1_795 = arith.constant 1 : index
    %c0_796 = arith.constant 0 : index
    %592 = vector.load %arg10[%c1_791, %c1_792, %c0_793, %c1_794, %c1_795, %c0_796] : memref<2x2x1x10x10x64xf32, #tpu.memory_space<vmem>>, vector<1x1x1x8x8x64xf32>
    %593 = vector.shape_cast %592 : vector<1x1x1x8x8x64xf32> to vector<1x8x8x64xf32>
    %c0_797 = arith.constant 0 : index
    %c0_798 = arith.constant 0 : index
    %c0_799 = arith.constant 0 : index
    %c2_800 = arith.constant 2 : index
    %c1_801 = arith.constant 1 : index
    %c0_802 = arith.constant 0 : index
    %594 = vector.load %arg10[%c0_797, %c0_798, %c0_799, %c2_800, %c1_801, %c0_802] : memref<2x2x1x10x10x64xf32, #tpu.memory_space<vmem>>, vector<1x1x1x8x8x64xf32>
    %595 = vector.shape_cast %594 : vector<1x1x1x8x8x64xf32> to vector<1x8x8x64xf32>
    %c0_803 = arith.constant 0 : index
    %c1_804 = arith.constant 1 : index
    %c0_805 = arith.constant 0 : index
    %c2_806 = arith.constant 2 : index
    %c1_807 = arith.constant 1 : index
    %c0_808 = arith.constant 0 : index
    %596 = vector.load %arg10[%c0_803, %c1_804, %c0_805, %c2_806, %c1_807, %c0_808] : memref<2x2x1x10x10x64xf32, #tpu.memory_space<vmem>>, vector<1x1x1x8x8x64xf32>
    %597 = vector.shape_cast %596 : vector<1x1x1x8x8x64xf32> to vector<1x8x8x64xf32>
    %598 = tpu.concatenate %591, %593, %595, %597 in 3 : vector<1x8x8x64xf32>, vector<1x8x8x64xf32>, vector<1x8x8x64xf32>, vector<1x8x8x64xf32> -> vector<1x8x8x256xf32>
    %c1_809 = arith.constant 1 : index
    %c0_810 = arith.constant 0 : index
    %c0_811 = arith.constant 0 : index
    %599 = vector.load %arg6[%c1_809, %c0_810, %c0_811] : memref<2x2x256xf32, #tpu.memory_space<vmem>>, vector<1x1x256xf32>
    %600 = vector.shape_cast %599 : vector<1x1x256xf32> to vector<256xf32>
    %601 = vector.shape_cast %600 : vector<256xf32> to vector<1x1x1x256xf32>
    %602 = vector.broadcast %601 : vector<1x1x1x256xf32> to vector<1x8x8x256xf32>
    %603 = arith.mulf %598, %602 : vector<1x8x8x256xf32>
    %cst_812 = arith.constant dense<0.000000e+00> : vector<1x8x8xf32>
    %604 = vector.multi_reduction <add>, %603, %cst_812 [3] : vector<1x8x8x256xf32> to vector<1x8x8xf32>
    %605 = vector.broadcast %281 : f32 to vector<1x8x8xf32>
    %606 = arith.addf %604, %605 : vector<1x8x8xf32>
    %607 = math.tanh %606 : vector<1x8x8xf32>
    %608 = vector.extract_strided_slice %607 {offsets = [0, 0, 0], sizes = [1, 7, 7], strides = [1, 1, 1]} : vector<1x8x8xf32> to vector<1x7x7xf32>
    %c0_813 = arith.constant 0 : index
    %c3_814 = arith.constant 3 : index
    %c2_815 = arith.constant 2 : index
    %c0_816 = arith.constant 0 : index
    %c0_817 = arith.constant 0 : index
    %609 = vector.load %arg8[%c0_813, %c3_814, %c2_815, %c0_816, %c0_817] : memref<1x4x4x7x7xf32, #tpu.memory_space<vmem>>, vector<1x1x1x7x7xf32>
    %610 = vector.shape_cast %609 : vector<1x1x1x7x7xf32> to vector<1x7x7xf32>
    %611 = vector.shape_cast %608 : vector<1x7x7xf32> to vector<1x1x1x7x7xf32>
    tpu.vector_store %arg8[%c0_813, %c3_814, %c2_815, %c0_816, %c0_817], %611 {strides = array<i32>} : memref<1x4x4x7x7xf32, #tpu.memory_space<vmem>>, vector<1x1x1x7x7xf32>,
    %c1_818 = arith.constant 1 : index
    %c1_819 = arith.constant 1 : index
    %c0_820 = arith.constant 0 : index
    %c1_821 = arith.constant 1 : index
    %c1_822 = arith.constant 1 : index
    %c0_823 = arith.constant 0 : index
    %612 = vector.load %arg10[%c1_818, %c1_819, %c0_820, %c1_821, %c1_822, %c0_823] : memref<2x2x1x10x10x64xf32, #tpu.memory_space<vmem>>, vector<1x1x1x8x8x64xf32>
    %613 = vector.shape_cast %612 : vector<1x1x1x8x8x64xf32> to vector<1x8x8x64xf32>
    %c1_824 = arith.constant 1 : index
    %c0_825 = arith.constant 0 : index
    %c0_826 = arith.constant 0 : index
    %c1_827 = arith.constant 1 : index
    %c2_828 = arith.constant 2 : index
    %c0_829 = arith.constant 0 : index
    %614 = vector.load %arg10[%c1_824, %c0_825, %c0_826, %c1_827, %c2_828, %c0_829] : memref<2x2x1x10x10x64xf32, #tpu.memory_space<vmem>>, vector<1x1x1x8x8x64xf32>
    %615 = vector.shape_cast %614 : vector<1x1x1x8x8x64xf32> to vector<1x8x8x64xf32>
    %c0_830 = arith.constant 0 : index
    %c1_831 = arith.constant 1 : index
    %c0_832 = arith.constant 0 : index
    %c2_833 = arith.constant 2 : index
    %c1_834 = arith.constant 1 : index
    %c0_835 = arith.constant 0 : index
    %616 = vector.load %arg10[%c0_830, %c1_831, %c0_832, %c2_833, %c1_834, %c0_835] : memref<2x2x1x10x10x64xf32, #tpu.memory_space<vmem>>, vector<1x1x1x8x8x64xf32>
    %617 = vector.shape_cast %616 : vector<1x1x1x8x8x64xf32> to vector<1x8x8x64xf32>
    %c0_836 = arith.constant 0 : index
    %c0_837 = arith.constant 0 : index
    %c0_838 = arith.constant 0 : index
    %c2_839 = arith.constant 2 : index
    %c2_840 = arith.constant 2 : index
    %c0_841 = arith.constant 0 : index
    %618 = vector.load %arg10[%c0_836, %c0_837, %c0_838, %c2_839, %c2_840, %c0_841] : memref<2x2x1x10x10x64xf32, #tpu.memory_space<vmem>>, vector<1x1x1x8x8x64xf32>
    %619 = vector.shape_cast %618 : vector<1x1x1x8x8x64xf32> to vector<1x8x8x64xf32>
    %620 = tpu.concatenate %613, %615, %617, %619 in 3 : vector<1x8x8x64xf32>, vector<1x8x8x64xf32>, vector<1x8x8x64xf32>, vector<1x8x8x64xf32> -> vector<1x8x8x256xf32>
    %c1_842 = arith.constant 1 : index
    %c1_843 = arith.constant 1 : index
    %c0_844 = arith.constant 0 : index
    %621 = vector.load %arg6[%c1_842, %c1_843, %c0_844] : memref<2x2x256xf32, #tpu.memory_space<vmem>>, vector<1x1x256xf32>
    %622 = vector.shape_cast %621 : vector<1x1x256xf32> to vector<256xf32>
    %623 = vector.shape_cast %622 : vector<256xf32> to vector<1x1x1x256xf32>
    %624 = vector.broadcast %623 : vector<1x1x1x256xf32> to vector<1x8x8x256xf32>
    %625 = arith.mulf %620, %624 : vector<1x8x8x256xf32>
    %cst_845 = arith.constant dense<0.000000e+00> : vector<1x8x8xf32>
    %626 = vector.multi_reduction <add>, %625, %cst_845 [3] : vector<1x8x8x256xf32> to vector<1x8x8xf32>
    %627 = vector.broadcast %281 : f32 to vector<1x8x8xf32>
    %628 = arith.addf %626, %627 : vector<1x8x8xf32>
    %629 = math.tanh %628 : vector<1x8x8xf32>
    %630 = vector.extract_strided_slice %629 {offsets = [0, 0, 0], sizes = [1, 7, 7], strides = [1, 1, 1]} : vector<1x8x8xf32> to vector<1x7x7xf32>
    %c0_846 = arith.constant 0 : index
    %c3_847 = arith.constant 3 : index
    %c3_848 = arith.constant 3 : index
    %c0_849 = arith.constant 0 : index
    %c0_850 = arith.constant 0 : index
    %631 = vector.load %arg8[%c0_846, %c3_847, %c3_848, %c0_849, %c0_850] : memref<1x4x4x7x7xf32, #tpu.memory_space<vmem>>, vector<1x1x1x7x7xf32>
    %632 = vector.shape_cast %631 : vector<1x1x1x7x7xf32> to vector<1x7x7xf32>
    %633 = vector.shape_cast %630 : vector<1x7x7xf32> to vector<1x1x1x7x7xf32>
    tpu.vector_store %arg8[%c0_846, %c3_847, %c3_848, %c0_849, %c0_850], %633 {strides = array<i32>} : memref<1x4x4x7x7xf32, #tpu.memory_space<vmem>>, vector<1x1x1x7x7xf32>,
    return
  }
  func.func @transform_0(%arg0: i32) -> (i32, i32, i32) {
    %c0_i32 = arith.constant 0 : i32
    %c0_i32_0 = arith.constant 0 : i32
    %c0_i32_1 = arith.constant 0 : i32
    return %arg0, %c0_i32, %c0_i32_0 : i32, i32, i32
  }
  func.func @transform_1(%arg0: i32) -> (i32, i32) {
    %c0_i32 = arith.constant 0 : i32
    %c0_i32_0 = arith.constant 0 : i32
    %c0_i32_1 = arith.constant 0 : i32
    return %c0_i32, %c0_i32_0 : i32, i32
  }
  func.func @transform_2(%arg0: i32) -> (i32, i32) {
    %c0_i32 = arith.constant 0 : i32
    %c0_i32_0 = arith.constant 0 : i32
    %c0_i32_1 = arith.constant 0 : i32
    return %c0_i32, %c0_i32_0 : i32, i32
  }
  func.func @transform_3(%arg0: i32) -> (i32, i32, i32, i32) {
    %c0_i32 = arith.constant 0 : i32
    %c0_i32_0 = arith.constant 0 : i32
    %c0_i32_1 = arith.constant 0 : i32
    %c0_i32_2 = arith.constant 0 : i32
    %c0_i32_3 = arith.constant 0 : i32
    return %c0_i32, %c0_i32_0, %c0_i32_1, %c0_i32_2 : i32, i32, i32, i32
  }
  func.func @transform_4(%arg0: i32) -> (i32, i32) {
    %c0_i32 = arith.constant 0 : i32
    %c0_i32_0 = arith.constant 0 : i32
    %c0_i32_1 = arith.constant 0 : i32
    return %c0_i32, %c0_i32_0 : i32, i32
  }
  func.func @transform_5(%arg0: i32) -> (i32, i32, i32) {
    %c0_i32 = arith.constant 0 : i32
    %c0_i32_0 = arith.constant 0 : i32
    %c0_i32_1 = arith.constant 0 : i32
    %c0_i32_2 = arith.constant 0 : i32
    return %c0_i32, %c0_i32_0, %c0_i32_1 : i32, i32, i32
  }
  func.func @transform_6(%arg0: i32) -> i32 {
    %c0_i32 = arith.constant 0 : i32
    %c0_i32_0 = arith.constant 0 : i32
    return %c0_i32 : i32
  }
  func.func @transform_7(%arg0: i32) -> (i32, i32, i32, i32, i32) {
    %c0_i32 = arith.constant 0 : i32
    %c0_i32_0 = arith.constant 0 : i32
    %c0_i32_1 = arith.constant 0 : i32
    %c0_i32_2 = arith.constant 0 : i32
    %c0_i32_3 = arith.constant 0 : i32
    return %arg0, %c0_i32, %c0_i32_0, %c0_i32_1, %c0_i32_2 : i32, i32, i32, i32, i32
  }
}

</mosaic_0001>

<bundles_post_ra>
// kernel: generator_forward.1
= control target key start
LH: loop header
LB: loop body
LE: loop exit
PB: predicated region body
PF: predicated region fallthrough
CT: control target
= control target key end

     0   :  { %s10567_s0 = inlined_call_operand.vmem [shape: f32[2,1,128], index: 0, kind: input, shape index: {}]   ;;  %s10568_s1 = inlined_call_operand.hbm [shape: f32[128,6272], index: 1, kind: input, shape index: {}]   ;;  %s10569_s2 = inlined_call_operand.hbm [shape: f32[1,6272], index: 2, kind: input, shape index: {}]   ;;  %s10570_s3 = inlined_call_operand.vmem [shape: f32[2,2,512,64], index: 3, kind: input, shape index: {}]   ;;  %s10571_s4 = inlined_call_operand.hbm [shape: f32[1,64], index: 4, kind: input, shape index: {}]   ;;  %s10572_s5 = inlined_call_operand.hbm [shape: f32[2,2,256], index: 5, kind: input, shape index: {}]   ;;  %s10573_s6 = inlined_call_operand.<no memory space> [shape: f32[1], index: 6, kind: input, shape index: {}]   ;;  %s10574_s7 = inlined_call_operand.vmem [shape: f32[2,4,4,7,7], index: 7, kind: output, shape index: {}]  }
   0x1   :  { %12 = sst [smem:[#allocation4]] %s10573_s6 }
   0x2   :  { %13 = vsyncpa [#allocation6], 0 }
   0x3   :  { %14 = vsyncpa [#allocation8], 0 }
   0x4   :  { %15 = vsyncpa [#allocation11], 0  ;;  %s7213_s26 = smov 0  }
   0x5 LB: > { %s230_s29 = sshll.u32 %s10569_s2, 4  ;;  %s7222_s30 = sadd.s32 4294967295, %s7158_s26   ;;  %s7158_s26 = sphi %s7213_s26, %s21_s26   ;;  %s231_s29 = int_to_ptr.hbm [resolvable:$true] %s230_s29 }
   0x6   : > { %p6442_p0 = scmp.ge.s32.totalorder %s7158_s26, 1  ;;  %p204_p1 = scmp.lt.s32.totalorder %s7158_s26, 3 }
   0x7   : > { %p6742_p2 = scmp.eq.s32.totalorder %s7222_s30, 0  ;;  %s7160_s8 = smov [#allocation7]  }
   0x8   : > { %p7227_p3 = pnand %p6442_p0, %p204_p1  ;;  %s232_s9 = sshll.u32 %s7160_s8, 4  ;;  %s233_s9 = int_to_ptr.vmem [resolvable:$true] %s232_s9 }
   0x9   : > { %s215_s12 = sshll.u32 %s10568_s1, 4  ;;  %s7161_s14 = smov [#allocation5]   ;;  %s216_s12 = int_to_ptr.hbm [resolvable:$true] %s215_s12 }
   0xa   : > { %p6729_p4 = pneg %p7227_p3  ;;  %s217_s15 = sshll.u32 %s7161_s14, 4  ;;  %s218_s15 = int_to_ptr.vmem [resolvable:$true] %s217_s15 }
   0xb   : > { %s245_s18 = sshll.u32 %s10571_s4, 4  ;;  %s7162_s19 = smov 6272   ;;  %s246_s18 = int_to_ptr.hbm [resolvable:$true] %s245_s18 }
   0xc   : > { %p7238_p5 = pnand %p6742_p2, %p6729_p4  ;;  %s7163_s20 = smov 392  }
   0xd   : > { %s7164_s21 = smov [#allocation9]   ;;  %s256_s25 = sshll.u32 %s10572_s5, 4  ;;  %s257_s25 = int_to_ptr.hbm [resolvable:$true] %s256_s25 }
   0xe   : > { %6735 = dma.hbm_to_vmem [thread:$0]  (!%p7238_p5), %s231_s29, 784, %s233_s9, [#allocation8]  }
   0xf   : > { %6732 = dma.hbm_to_vmem [thread:$0]  (!%p7238_p5), %s216_s12, 100352, %s218_s15, [#allocation6], %s7162_s19, %s7162_s19, %s7163_s20  }
  0x10   : > { %s247_s22 = sshll.u32 %s7164_s21, 4  ;;  %s7165_s27 = smov [#allocation10]   ;;  %s248_s22 = int_to_ptr.vmem [resolvable:$true] %s247_s22 }
  0x11   : > { %6738 = dma.hbm_to_vmem [thread:$0]  (!%p7238_p5), %s246_s18, 16, %s248_s22, [#allocation8]  }
  0x12   : > { %s258_s28 = sshll.u32 %s7165_s27, 4  ;;  %s7166_s29 = smov 64   ;;  %s259_s28 = int_to_ptr.vmem [resolvable:$true] %s258_s28 }
  0x13   : > { %s7167_s8 = smov 4   ;;  %283 = sbr.rel (%p7227_p3) target bundleno = 2705 (0xa91), region = 48 }
  0x14   : > { %6741 = dma.hbm_to_vmem [thread:$0]  (!%p7238_p5), %s257_s25, 128, %s259_s28, [#allocation11], %s7166_s29, %s7166_s29, %s7167_s8  }
  0x18   : > { %7145 = dma.done.wait (%p6742_p2), [#allocation6], 100352  }
  0x19   : > { %7147 = vsyncadd (%p6742_p2), [#allocation6], 4294866944 }
  0x1a   : > { %7149 = dma.done.wait (%p6742_p2), [#allocation8], 800  }
  0x1b   : > { %7151 = vsyncadd (%p6742_p2), [#allocation8], 4294966496 }
  0x1c   : > { %7153 = dma.done.wait (%p6742_p2), [#allocation11], 128  }
  0x1d   : > { %7155 = vsyncadd (%p6742_p2), [#allocation11], 4294967168  ;;  %vm357_vm0 = vcmask 523264   ;;  %vm359_vm1 = vcmask 517120   ;;  %v1175_v0 = vld [vmem:[#allocation5 + $0x16f8] sm:$0xff]  ;;  %v1176_v1 = vld [vmem:[#allocation5 + $0x1700] sm:$0xff] }
  0x1e   : > { %v1177_v2 = vld [vmem:[#allocation5 + $0x1708] sm:$0xff]  ;;  %1336 = vmatpush.msra.mxu0 %v1175_v0  ;;  %1356 = vmatpush.msra.mxu1 %v1176_v1  ;;  %v1178_v3 = vld [vmem:[#allocation5 + $0x1710] sm:$0xff]  ;;  %v1127_v5 = vld [vmem:[#allocation5 + $0x1578] sm:$0xff]  ;;  %v7168_v24 = vmov 0.0   ;;  %p329_p6 = scmp.lt.s32.totalorder %s7222_s30, 1  ;;  %vm2689_vm2 = vcmask 522240  }
  0x1f   : > { %v1126_v4 = vld [vmem:[#allocation5 + $0x1570] sm:$0xff]  ;;  %1376 = vmatpush.msra.mxu2 %v1177_v2  ;;  %1396 = vmatpush.msra.mxu3 %v1178_v3  ;;  %v1128_v6 = vld [vmem:[#allocation5 + $0x1580] sm:$0xff]  ;;  %v1129_v7 = vld [vmem:[#allocation5 + $0x1588] sm:$0xff]  ;;  %337 = vst [vmem:[#allocation2] sm:$0xff] %v7168_v24  ;;  %s3513_s11 = sld [smem:[#allocation4]]  ;;  %vm3686_vm3 = vcmask 1041409  }
  0x20   : > { %v1077_v8 = vld [vmem:[#allocation5 + $0x13e8] sm:$0xff]  ;;  %1337 = vmatpush.msra.mxu0 %v1126_v4  ;;  %1357 = vmatpush.msra.mxu1 %v1127_v5  ;;  %v1078_v9 = vld [vmem:[#allocation5 + $0x13f0] sm:$0xff]  ;;  %v1079_v10 = vld [vmem:[#allocation5 + $0x13f8] sm:$0xff]  ;;  %338 = vst [vmem:[#allocation2 + $0x8] sm:$0x3] %v7168_v24  ;;  %s10704_s30 = smov (!%p329_p6, %s7222_s30), 1 }
  0x21   : > { %v1080_v11 = vld [vmem:[#allocation5 + $0x1400] sm:$0xff]  ;;  %1377 = vmatpush.msra.mxu2 %v1128_v6  ;;  %1397 = vmatpush.msra.mxu3 %v1129_v7  ;;  %v1029_v13 = vld [vmem:[#allocation5 + $0x1268] sm:$0xff]  ;;  %v1030_v14 = vld [vmem:[#allocation5 + $0x1270] sm:$0xff]  ;;  %339 = vst [vmem:[#allocation2 + $0x10] sm:$0xff] %v7168_v24  ;;  %s7344_s10 = scalar_lea.vmem %s10567_s0, %s10704_s30  ;;  %vm3688_vm4 = vcmask 1042434   ;;  %vm3690_vm5 = vcmask 1043459  }
  0x22   : > { %v1028_v12 = vld [vmem:[#allocation5 + $0x1260] sm:$0xff]  ;;  %1338 = vmatpush.msra.mxu0 %v1077_v8  ;;  %1358 = vmatpush.msra.mxu1 %v1078_v9  ;;  %v1031_v15 = vld [vmem:[#allocation5 + $0x1278] sm:$0xff]  ;;  %v981_v18 = vld [vmem:[#allocation5 + $0x10e8] sm:$0xff]  ;;  %340 = vst [vmem:[#allocation2 + $0x18] sm:$0x3] %v7168_v24  ;;  %vm3692_vm6 = vcmask 1044484  }
  0x23   : > { %1378 = vmatpush.msra.mxu2 %v1079_v10  ;;  %1398 = vmatpush.msra.mxu3 %v1080_v11  ;;  %v979_v16 = vld [vmem:[#allocation5 + $0x10d8] sm:$0xff]  ;;  %v980_v17 = vld [vmem:[#allocation5 + $0x10e0] sm:$0xff]  ;;  %v982_v19 = vld [vmem:[#allocation5 + $0x10f0] sm:$0xff]  ;;  %341 = vst [vmem:[#allocation2 + $0x20] sm:$0xff] %v7168_v24  ;;  %s6664_s12 = sshll.u32 %s10704_s30, 7  ;;  %vm3694_vm7 = vcmask 1045509  }
  0x24   : > { %1339 = vmatpush.msra.mxu0 %v1028_v12  ;;  %1359 = vmatpush.msra.mxu1 %v1029_v13  ;;  %v930_v20 = vld [vmem:[#allocation5 + $0xf50] sm:$0xff]  ;;  %v931_v21 = vld [vmem:[#allocation5 + $0xf58] sm:$0xff]  ;;  %v932_v22 = vld [vmem:[#allocation5 + $0xf60] sm:$0xff]  ;;  %342 = vst [vmem:[#allocation2 + $0x28] sm:$0x3] %v7168_v24  ;;  %vm3696_vm8 = vcmask 1046534   ;;  %s9556_s14 = scalar_lea.vmem %s10574_s7, %s6664_s12 }
  0x25   : > { %1379 = vmatpush.msra.mxu2 %v1030_v14  ;;  %1399 = vmatpush.msra.mxu3 %v1031_v15  ;;  %v933_v23 = vld [vmem:[#allocation5 + $0xf68] sm:$0xff]  ;;  %v882_v26 = vld [vmem:[#allocation5 + $0xdd0] sm:$0xff]  ;;  %v883_v27 = vld [vmem:[#allocation5 + $0xdd8] sm:$0xff]  ;;  %343 = vst [vmem:[#allocation2 + $0x30] sm:$0xff] %v7168_v24  ;;  %vm3699_vm9 = vcmask 55296  }
  0x26   : > { %1340 = vmatpush.msra.mxu0 %v979_v16  ;;  %1360 = vmatpush.msra.mxu1 %v980_v17  ;;  %v881_v25 = vld [vmem:[#allocation5 + $0xdc8] sm:$0xff]  ;;  %v884_v28 = vld [vmem:[#allocation5 + $0xde0] sm:$0xff]  ;;  %v834_v31 = vld [vmem:[#allocation5 + $0xc50] sm:$0xff]  ;;  %344 = vst [vmem:[#allocation2 + $0x38] sm:$0x3] %v7168_v24 }
  0x27   : > { %1380 = vmatpush.msra.mxu2 %v981_v18  ;;  %1400 = vmatpush.msra.mxu3 %v982_v19  ;;  %v832_v29 = vld [vmem:[#allocation5 + $0xc40] sm:$0xff]  ;;  %v833_v30 = vld [vmem:[#allocation5 + $0xc48] sm:$0xff]  ;;  %v835_v32 = vld [vmem:[#allocation5 + $0xc58] sm:$0xff]  ;;  %345 = vst [vmem:[#allocation2 + $0x40] sm:$0xff] %v7168_v24 }
  0x28   : > { %1341 = vmatpush.msra.mxu0 %v930_v20  ;;  %1361 = vmatpush.msra.mxu1 %v931_v21  ;;  %v783_v33 = vld [vmem:[#allocation5 + $0xab8] sm:$0xff]  ;;  %v784_v34 = vld [vmem:[#allocation5 + $0xac0] sm:$0xff]  ;;  %v785_v35 = vld [vmem:[#allocation5 + $0xac8] sm:$0xff]  ;;  %346 = vst [vmem:[#allocation2 + $0x48] sm:$0x3] %v7168_v24 }
  0x29   : > { %1381 = vmatpush.msra.mxu2 %v932_v22  ;;  %1401 = vmatpush.msra.mxu3 %v933_v23  ;;  %v786_v36 = vld [vmem:[#allocation5 + $0xad0] sm:$0xff]  ;;  %v735_v38 = vld [vmem:[#allocation5 + $0x938] sm:$0xff]  ;;  %v736_v39 = vld [vmem:[#allocation5 + $0x940] sm:$0xff]  ;;  %347 = vst [vmem:[#allocation2 + $0x50] sm:$0xff] %v7168_v24 }
  0x2a   : > { %1342 = vmatpush.msra.mxu0 %v881_v25  ;;  %1362 = vmatpush.msra.mxu1 %v882_v26  ;;  %v734_v37 = vld [vmem:[#allocation5 + $0x930] sm:$0xff]  ;;  %v737_v40 = vld [vmem:[#allocation5 + $0x948] sm:$0xff]  ;;  %v687_v43 = vld [vmem:[#allocation5 + $0x7b8] sm:$0xff]  ;;  %348 = vst [vmem:[#allocation2 + $0x58] sm:$0x3] %v7168_v24 }
  0x2b   : > { %1382 = vmatpush.msra.mxu2 %v883_v27  ;;  %1402 = vmatpush.msra.mxu3 %v884_v28  ;;  %v685_v41 = vld [vmem:[#allocation5 + $0x7a8] sm:$0xff]  ;;  %v686_v42 = vld [vmem:[#allocation5 + $0x7b0] sm:$0xff]  ;;  %v688_v44 = vld [vmem:[#allocation5 + $0x7c0] sm:$0xff]  ;;  %349 = vst [vmem:[#allocation2 + $0x60] sm:$0xff] %v7168_v24 }
  0x2c   : > { %1343 = vmatpush.msra.mxu0 %v832_v29  ;;  %1363 = vmatpush.msra.mxu1 %v833_v30  ;;  %v636_v45 = vld [vmem:[#allocation5 + $0x620] sm:$0xff]  ;;  %v637_v46 = vld [vmem:[#allocation5 + $0x628] sm:$0xff]  ;;  %v638_v47 = vld [vmem:[#allocation5 + $0x630] sm:$0xff]  ;;  %350 = vst [vmem:[#allocation2 + $0x68] sm:$0x3] %v7168_v24 }
  0x2d   : > { %1383 = vmatpush.msra.mxu2 %v834_v31  ;;  %1403 = vmatpush.msra.mxu3 %v835_v32  ;;  %v639_v48 = vld [vmem:[#allocation5 + $0x638] sm:$0xff]  ;;  %v588_v50 = vld [vmem:[#allocation5 + $0x4a0] sm:$0xff]  ;;  %v589_v51 = vld [vmem:[#allocation5 + $0x4a8] sm:$0xff]  ;;  %351 = vst [vmem:[#allocation2 + $0x70] sm:$0xff] %v7168_v24 }
  0x2e   : > { %1344 = vmatpush.msra.mxu0 %v783_v33  ;;  %1364 = vmatpush.msra.mxu1 %v784_v34  ;;  %v587_v49 = vld [vmem:[#allocation5 + $0x498] sm:$0xff]  ;;  %v590_v52 = vld [vmem:[#allocation5 + $0x4b0] sm:$0xff]  ;;  %352 = vst [vmem:[#allocation2 + $0x78] sm:$0x3] %v7168_v24  ;;  %v540_v55 = vld [vmem:[#allocation5 + $0x320] sm:$0xff] }
  0x2f   : > { %1384 = vmatpush.msra.mxu2 %v785_v35  ;;  %1404 = vmatpush.msra.mxu3 %v786_v36  ;;  %v538_v53 = vld [vmem:[#allocation5 + $0x310] sm:$0xff]  ;;  %v539_v54 = vld [vmem:[#allocation5 + $0x318] sm:$0xff]  ;;  %v541_v56 = vld [vmem:[#allocation5 + $0x328] sm:$0xff]  ;;  %353 = vst [vmem:[#allocation2 + $0x80] sm:$0xff] %v7168_v24 }
  0x30   : > { %1345 = vmatpush.msra.mxu0 %v734_v37  ;;  %1365 = vmatpush.msra.mxu1 %v735_v38  ;;  %v489_v57 = vld [vmem:[#allocation5 + $0x188] sm:$0xff]  ;;  %v490_v58 = vld [vmem:[#allocation5 + $0x190] sm:$0xff]  ;;  %354 = vst [vmem:[#allocation2 + $0x88] sm:$0x3] %v7168_v24  ;;  %v491_v59 = vld [vmem:[#allocation5 + $0x198] sm:$0xff] }
  0x31   : > { %1385 = vmatpush.msra.mxu2 %v736_v39  ;;  %1405 = vmatpush.msra.mxu3 %v737_v40  ;;  %v492_v60 = vld [vmem:[#allocation5 + $0x1a0] sm:$0xff]  ;;  %355 = vst [vmem:[#allocation2 + $0x90] sm:$0xff] %v7168_v24  ;;  %v441_v62 = vld [vmem:[#allocation5 + $0x8] sm:$0xff]  ;;  %v442_v63 = vld [vmem:[#allocation5 + $0x10] sm:$0xff] }
  0x32   : > { %1346 = vmatpush.msra.mxu0 %v685_v41  ;;  %1366 = vmatpush.msra.mxu1 %v686_v42  ;;  %v440_v61 = vld [vmem:[#allocation5] sm:$0xff]  ;;  %356 = vst [vmem:[#allocation2 + $0x98] sm:$0x3] %v7168_v24  ;;  %v443_v0 = vld [vmem:[#allocation5 + $0x18] sm:$0xff]  ;;  %v1181_v3 = vld [vmem:[#allocation5 + $0x1728] sm:$0xff] }
  0x33   : > { %1386 = vmatpush.msra.mxu2 %v687_v43  ;;  %1406 = vmatpush.msra.mxu3 %v688_v44  ;;  %361 = vst.msk [vmem:[#allocation3 + $0x10] sm:$0xff] %vm357_vm0, %v7168_v24  ;;  %v1179_v1 = vld [vmem:[#allocation5 + $0x1718] sm:$0xff]  ;;  %v1180_v2 = vld [vmem:[#allocation5 + $0x1720] sm:$0xff]  ;;  %v1182_v4 = vld [vmem:[#allocation5 + $0x1730] sm:$0xff] }
  0x34   : > { %1347 = vmatpush.msra.mxu0 %v636_v45  ;;  %1367 = vmatpush.msra.mxu1 %v637_v46  ;;  %362 = vst.msk [vmem:[#allocation3 + $0x18] sm:$0x3] %vm359_vm1, %v7168_v24  ;;  %v1130_v5 = vld [vmem:[#allocation5 + $0x1590] sm:$0xff]  ;;  %v1131_v6 = vld [vmem:[#allocation5 + $0x1598] sm:$0xff]  ;;  %v1132_v7 = vld [vmem:[#allocation5 + $0x15a0] sm:$0xff] }
  0x35   : > { %1387 = vmatpush.msra.mxu2 %v638_v47  ;;  %1407 = vmatpush.msra.mxu3 %v639_v48  ;;  %363 = vst.msk [vmem:[#allocation3 + $0x20] sm:$0xff] %vm357_vm0, %v7168_v24  ;;  %v1133_v8 = vld [vmem:[#allocation5 + $0x15a8] sm:$0xff]  ;;  %v1082_v10 = vld [vmem:[#allocation5 + $0x1410] sm:$0xff]  ;;  %v1083_v11 = vld [vmem:[#allocation5 + $0x1418] sm:$0xff] }
  0x36   : > { %1348 = vmatpush.msra.mxu0 %v587_v49  ;;  %1368 = vmatpush.msra.mxu1 %v588_v50  ;;  %364 = vst.msk [vmem:[#allocation3 + $0x28] sm:$0x3] %vm359_vm1, %v7168_v24  ;;  %v1081_v9 = vld [vmem:[#allocation5 + $0x1408] sm:$0xff]  ;;  %v1084_v12 = vld [vmem:[#allocation5 + $0x1420] sm:$0xff]  ;;  %v1034_v15 = vld [vmem:[#allocation5 + $0x1290] sm:$0xff] }
  0x37   : > { %1388 = vmatpush.msra.mxu2 %v589_v51  ;;  %1408 = vmatpush.msra.mxu3 %v590_v52  ;;  %365 = vst.msk [vmem:[#allocation3 + $0x30] sm:$0xff] %vm357_vm0, %v7168_v24  ;;  %v1032_v13 = vld [vmem:[#allocation5 + $0x1280] sm:$0xff]  ;;  %v1033_v14 = vld [vmem:[#allocation5 + $0x1288] sm:$0xff]  ;;  %v1035_v16 = vld [vmem:[#allocation5 + $0x1298] sm:$0xff] }
  0x38   : > { %1349 = vmatpush.msra.mxu0 %v538_v53  ;;  %1369 = vmatpush.msra.mxu1 %v539_v54  ;;  %366 = vst.msk [vmem:[#allocation3 + $0x38] sm:$0x3] %vm359_vm1, %v7168_v24  ;;  %v983_v17 = vld [vmem:[#allocation5 + $0x10f8] sm:$0xff]  ;;  %v984_v18 = vld [vmem:[#allocation5 + $0x1100] sm:$0xff]  ;;  %v985_v19 = vld [vmem:[#allocation5 + $0x1108] sm:$0xff] }
  0x39   : > { %1389 = vmatpush.msra.mxu2 %v540_v55  ;;  %1409 = vmatpush.msra.mxu3 %v541_v56  ;;  %367 = vst.msk [vmem:[#allocation3 + $0x40] sm:$0xff] %vm357_vm0, %v7168_v24  ;;  %v986_v20 = vld [vmem:[#allocation5 + $0x1110] sm:$0xff]  ;;  %v935_v22 = vld [vmem:[#allocation5 + $0xf78] sm:$0xff]  ;;  %v936_v23 = vld [vmem:[#allocation5 + $0xf80] sm:$0xff] }
  0x3a   : > { %1350 = vmatpush.msra.mxu0 %v489_v57  ;;  %1370 = vmatpush.msra.mxu1 %v490_v58  ;;  %368 = vst.msk [vmem:[#allocation3 + $0x48] sm:$0x3] %vm359_vm1, %v7168_v24  ;;  %v934_v21 = vld [vmem:[#allocation5 + $0xf70] sm:$0xff]  ;;  %v937_v25 = vld [vmem:[#allocation5 + $0xf88] sm:$0xff]  ;;  %v887_v28 = vld [vmem:[#allocation5 + $0xdf8] sm:$0xff] }
  0x3b   : > { %1390 = vmatpush.msra.mxu2 %v491_v59  ;;  %1410 = vmatpush.msra.mxu3 %v492_v60  ;;  %369 = vst.msk [vmem:[#allocation3 + $0x50] sm:$0xff] %vm357_vm0, %v7168_v24  ;;  %v885_v26 = vld [vmem:[#allocation5 + $0xde8] sm:$0xff]  ;;  %v886_v27 = vld [vmem:[#allocation5 + $0xdf0] sm:$0xff]  ;;  %v888_v29 = vld [vmem:[#allocation5 + $0xe00] sm:$0xff] }
  0x3c   : > { %1351 = vmatpush.msra.mxu0 %v440_v61  ;;  %1371 = vmatpush.msra.mxu1 %v441_v62  ;;  %370 = vst.msk [vmem:[#allocation3 + $0x58] sm:$0x3] %vm359_vm1, %v7168_v24  ;;  %v836_v30 = vld [vmem:[#allocation5 + $0xc60] sm:$0xff]  ;;  %v837_v31 = vld [vmem:[#allocation5 + $0xc68] sm:$0xff]  ;;  %v838_v32 = vld [vmem:[#allocation5 + $0xc70] sm:$0xff] }
  0x3d   : > { %1391 = vmatpush.msra.mxu2 %v442_v63  ;;  %1411 = vmatpush.msra.mxu3 %v443_v0  ;;  %371 = vst.msk [vmem:[#allocation3 + $0x60] sm:$0xff] %vm357_vm0, %v7168_v24  ;;  %v839_v33 = vld [vmem:[#allocation5 + $0xc78] sm:$0xff]  ;;  %v788_v35 = vld [vmem:[#allocation5 + $0xae0] sm:$0xff]  ;;  %v789_v36 = vld [vmem:[#allocation5 + $0xae8] sm:$0xff] }
  0x3e   : > { %1416 = vmatpush.msrb.mxu0 %v1179_v1  ;;  %1436 = vmatpush.msrb.mxu1 %v1180_v2  ;;  %372 = vst.msk [vmem:[#allocation3 + $0x68] sm:$0x3] %vm359_vm1, %v7168_v24  ;;  %v787_v34 = vld [vmem:[#allocation5 + $0xad8] sm:$0xff]  ;;  %v790_v37 = vld [vmem:[#allocation5 + $0xaf0] sm:$0xff]  ;;  %v740_v40 = vld [vmem:[#allocation5 + $0x960] sm:$0xff] }
  0x3f   : > { %1456 = vmatpush.msrb.mxu2 %v1181_v3  ;;  %1476 = vmatpush.msrb.mxu3 %v1182_v4  ;;  %373 = vst.msk [vmem:[#allocation3 + $0x70] sm:$0xff] %vm357_vm0, %v7168_v24  ;;  %v738_v38 = vld [vmem:[#allocation5 + $0x950] sm:$0xff]  ;;  %v739_v39 = vld [vmem:[#allocation5 + $0x958] sm:$0xff]  ;;  %v741_v41 = vld [vmem:[#allocation5 + $0x968] sm:$0xff] }
  0x40   : > { %1417 = vmatpush.msrb.mxu0 %v1130_v5  ;;  %1437 = vmatpush.msrb.mxu1 %v1131_v6  ;;  %374 = vst.msk [vmem:[#allocation3 + $0x78] sm:$0x3] %vm359_vm1, %v7168_v24  ;;  %v689_v42 = vld [vmem:[#allocation5 + $0x7c8] sm:$0xff]  ;;  %v690_v43 = vld [vmem:[#allocation5 + $0x7d0] sm:$0xff]  ;;  %v691_v44 = vld [vmem:[#allocation5 + $0x7d8] sm:$0xff] }
  0x41   : > { %1457 = vmatpush.msrb.mxu2 %v1132_v7  ;;  %1477 = vmatpush.msrb.mxu3 %v1133_v8  ;;  %375 = vst.msk [vmem:[#allocation3 + $0x80] sm:$0xff] %vm357_vm0, %v7168_v24  ;;  %v692_v45 = vld [vmem:[#allocation5 + $0x7e0] sm:$0xff]  ;;  %v641_v47 = vld [vmem:[#allocation5 + $0x648] sm:$0xff]  ;;  %v642_v48 = vld [vmem:[#allocation5 + $0x650] sm:$0xff] }
  0x42   : > { %1418 = vmatpush.msrb.mxu0 %v1081_v9  ;;  %1438 = vmatpush.msrb.mxu1 %v1082_v10  ;;  %376 = vst.msk [vmem:[#allocation3 + $0x88] sm:$0x3] %vm359_vm1, %v7168_v24  ;;  %v640_v46 = vld [vmem:[#allocation5 + $0x640] sm:$0xff]  ;;  %v643_v49 = vld [vmem:[#allocation5 + $0x658] sm:$0xff]  ;;  %v593_v53 = vld [vmem:[#allocation5 + $0x4c8] sm:$0xff] }
  0x43   : > { %1458 = vmatpush.msrb.mxu2 %v1083_v11  ;;  %1478 = vmatpush.msrb.mxu3 %v1084_v12  ;;  %381 = vst.msk [vmem:[#allocation3 + $0xb0] sm:$0xff] %vm357_vm0, %v7168_v24  ;;  %v7353_v50 = vld [vmem:[%s7344_s10] sm:$0x1]  ;;  %v591_v51 = vld [vmem:[#allocation5 + $0x4b8] sm:$0xff]  ;;  %v594_v54 = vld [vmem:[#allocation5 + $0x4d0] sm:$0xff] }
  0x44   : > { %1419 = vmatpush.msrb.mxu0 %v1032_v13  ;;  %1439 = vmatpush.msrb.mxu1 %v1033_v14  ;;  %382 = vst.msk [vmem:[#allocation3 + $0xb8] sm:$0x3] %vm359_vm1, %v7168_v24  ;;  %v592_v52 = vld [vmem:[#allocation5 + $0x4c0] sm:$0xff]  ;;  %v542_v55 = vld [vmem:[#allocation5 + $0x330] sm:$0xff]  ;;  %v543_v56 = vld [vmem:[#allocation5 + $0x338] sm:$0xff] }
  0x45   : > { %1459 = vmatpush.msrb.mxu2 %v1034_v15  ;;  %1479 = vmatpush.msrb.mxu3 %v1035_v16  ;;  %383 = vst.msk [vmem:[#allocation3 + $0xc0] sm:$0xff] %vm357_vm0, %v7168_v24  ;;  %v544_v57 = vld [vmem:[#allocation5 + $0x340] sm:$0xff]  ;;  %v545_v58 = vld [vmem:[#allocation5 + $0x348] sm:$0xff]  ;;  %v494_v60 = vld [vmem:[#allocation5 + $0x1b0] sm:$0xff] }
  0x46   : > { %1420 = vmatpush.msrb.mxu0 %v983_v17  ;;  %1440 = vmatpush.msrb.mxu1 %v984_v18  ;;  %384 = vst.msk [vmem:[#allocation3 + $0xc8] sm:$0x3] %vm359_vm1, %v7168_v24  ;;  %v493_v59 = vld [vmem:[#allocation5 + $0x1a8] sm:$0xff]  ;;  %v495_v61 = vld [vmem:[#allocation5 + $0x1b8] sm:$0xff]  ;;  %v496_v62 = vld [vmem:[#allocation5 + $0x1c0] sm:$0xff] }
  0x47   : > { %1460 = vmatpush.msrb.mxu2 %v985_v19  ;;  %1480 = vmatpush.msrb.mxu3 %v986_v20  ;;  %385 = vst.msk [vmem:[#allocation3 + $0xd0] sm:$0xff] %vm357_vm0, %v7168_v24  ;;  %v444_v63 = vld [vmem:[#allocation5 + $0x20] sm:$0xff]  ;;  %v445_v0 = vld [vmem:[#allocation5 + $0x28] sm:$0xff]  ;;  %v446_v1 = vld [vmem:[#allocation5 + $0x30] sm:$0xff] }
  0x48   : > { %1421 = vmatpush.msrb.mxu0 %v934_v21  ;;  %1441 = vmatpush.msrb.mxu1 %v935_v22  ;;  %386 = vst.msk [vmem:[#allocation3 + $0xd8] sm:$0x3] %vm359_vm1, %v7168_v24  ;;  %v447_v2 = vld [vmem:[#allocation5 + $0x38] sm:$0xff]  ;;  %v1184_v4 = vld [vmem:[#allocation5 + $0x1740] sm:$0xff]  ;;  %v1185_v5 = vld [vmem:[#allocation5 + $0x1748] sm:$0xff] }
  0x49   : > { %1461 = vmatpush.msrb.mxu2 %v936_v23  ;;  %1481 = vmatpush.msrb.mxu3 %v937_v25  ;;  %387 = vst.msk [vmem:[#allocation3 + $0xe0] sm:$0xff] %vm357_vm0, %v7168_v24  ;;  %v1183_v3 = vld [vmem:[#allocation5 + $0x1738] sm:$0xff]  ;;  %v1186_v6 = vld [vmem:[#allocation5 + $0x1750] sm:$0xff]  ;;  %v1136_v9 = vld [vmem:[#allocation5 + $0x15c0] sm:$0xff] }
  0x4a   : > { %1422 = vmatpush.msrb.mxu0 %v885_v26  ;;  %1442 = vmatpush.msrb.mxu1 %v886_v27  ;;  %388 = vst.msk [vmem:[#allocation3 + $0xe8] sm:$0x3] %vm359_vm1, %v7168_v24  ;;  %v1134_v7 = vld [vmem:[#allocation5 + $0x15b0] sm:$0xff]  ;;  %v1135_v8 = vld [vmem:[#allocation5 + $0x15b8] sm:$0xff]  ;;  %v1137_v10 = vld [vmem:[#allocation5 + $0x15c8] sm:$0xff] }
  0x4b   : > { %1462 = vmatpush.msrb.mxu2 %v887_v28  ;;  %1482 = vmatpush.msrb.mxu3 %v888_v29  ;;  %389 = vst.msk [vmem:[#allocation3 + $0xf0] sm:$0xff] %vm357_vm0, %v7168_v24  ;;  %v1085_v11 = vld [vmem:[#allocation5 + $0x1428] sm:$0xff]  ;;  %v1086_v12 = vld [vmem:[#allocation5 + $0x1430] sm:$0xff]  ;;  %v1087_v13 = vld [vmem:[#allocation5 + $0x1438] sm:$0xff] }
  0x4c   : > { %1423 = vmatpush.msrb.mxu0 %v836_v30  ;;  %1443 = vmatpush.msrb.mxu1 %v837_v31  ;;  %390 = vst.msk [vmem:[#allocation3 + $0xf8] sm:$0x3] %vm359_vm1, %v7168_v24  ;;  %v1088_v14 = vld [vmem:[#allocation5 + $0x1440] sm:$0xff]  ;;  %v1037_v16 = vld [vmem:[#allocation5 + $0x12a8] sm:$0xff]  ;;  %v1038_v17 = vld [vmem:[#allocation5 + $0x12b0] sm:$0xff] }
  0x4d   : > { %1463 = vmatpush.msrb.mxu2 %v838_v32  ;;  %1483 = vmatpush.msrb.mxu3 %v839_v33  ;;  %391 = vst.msk [vmem:[#allocation3 + $0x100] sm:$0xff] %vm357_vm0, %v7168_v24  ;;  %v1036_v15 = vld [vmem:[#allocation5 + $0x12a0] sm:$0xff]  ;;  %v1039_v18 = vld [vmem:[#allocation5 + $0x12b8] sm:$0xff]  ;;  %v989_v21 = vld [vmem:[#allocation5 + $0x1128] sm:$0xff] }
  0x4e   : > { %1424 = vmatpush.msrb.mxu0 %v787_v34  ;;  %1444 = vmatpush.msrb.mxu1 %v788_v35  ;;  %392 = vst.msk [vmem:[#allocation3 + $0x108] sm:$0x3] %vm359_vm1, %v7168_v24  ;;  %v987_v19 = vld [vmem:[#allocation5 + $0x1118] sm:$0xff]  ;;  %v988_v20 = vld [vmem:[#allocation5 + $0x1120] sm:$0xff]  ;;  %v990_v22 = vld [vmem:[#allocation5 + $0x1130] sm:$0xff] }
  0x4f   : > { %1464 = vmatpush.msrb.mxu2 %v789_v36  ;;  %1484 = vmatpush.msrb.mxu3 %v790_v37  ;;  %393 = vst.msk [vmem:[#allocation3 + $0x110] sm:$0xff] %vm357_vm0, %v7168_v24  ;;  %v938_v23 = vld [vmem:[#allocation5 + $0xf90] sm:$0xff]  ;;  %v939_v25 = vld [vmem:[#allocation5 + $0xf98] sm:$0xff]  ;;  %v940_v26 = vld [vmem:[#allocation5 + $0xfa0] sm:$0xff] }
  0x50   : > { %1425 = vmatpush.msrb.mxu0 %v738_v38  ;;  %1445 = vmatpush.msrb.mxu1 %v739_v39  ;;  %394 = vst.msk [vmem:[#allocation3 + $0x118] sm:$0x3] %vm359_vm1, %v7168_v24  ;;  %v941_v27 = vld [vmem:[#allocation5 + $0xfa8] sm:$0xff]  ;;  %v890_v29 = vld [vmem:[#allocation5 + $0xe10] sm:$0xff]  ;;  %v891_v30 = vld [vmem:[#allocation5 + $0xe18] sm:$0xff] }
  0x51   : > { %1465 = vmatpush.msrb.mxu2 %v740_v40  ;;  %1485 = vmatpush.msrb.mxu3 %v741_v41  ;;  %395 = vst.msk [vmem:[#allocation3 + $0x120] sm:$0xff] %vm357_vm0, %v7168_v24  ;;  %v889_v28 = vld [vmem:[#allocation5 + $0xe08] sm:$0xff]  ;;  %v892_v31 = vld [vmem:[#allocation5 + $0xe20] sm:$0xff]  ;;  %v842_v34 = vld [vmem:[#allocation5 + $0xc90] sm:$0xff] }
  0x52   : > { %1426 = vmatpush.msrb.mxu0 %v689_v42  ;;  %1446 = vmatpush.msrb.mxu1 %v690_v43  ;;  %396 = vst.msk [vmem:[#allocation3 + $0x128] sm:$0x3] %vm359_vm1, %v7168_v24  ;;  %v840_v32 = vld [vmem:[#allocation5 + $0xc80] sm:$0xff]  ;;  %v841_v33 = vld [vmem:[#allocation5 + $0xc88] sm:$0xff]  ;;  %v843_v35 = vld [vmem:[#allocation5 + $0xc98] sm:$0xff] }
  0x53   : > { %1466 = vmatpush.msrb.mxu2 %v691_v44  ;;  %1486 = vmatpush.msrb.mxu3 %v692_v45  ;;  %399 = vst.msk [vmem:[#allocation3 + $0x140] sm:$0xff] %vm357_vm0, %v7168_v24  ;;  %v791_v36 = vld [vmem:[#allocation5 + $0xaf8] sm:$0xff]  ;;  %v792_v37 = vld [vmem:[#allocation5 + $0xb00] sm:$0xff]  ;;  %v793_v38 = vld [vmem:[#allocation5 + $0xb08] sm:$0xff] }
  0x54   : > { %1427 = vmatpush.msrb.mxu0 %v640_v46  ;;  %1447 = vmatpush.msrb.mxu1 %v641_v47  ;;  %400 = vst.msk [vmem:[#allocation3 + $0x148] sm:$0x3] %vm359_vm1, %v7168_v24  ;;  %v794_v39 = vld [vmem:[#allocation5 + $0xb10] sm:$0xff]  ;;  %v743_v41 = vld [vmem:[#allocation5 + $0x978] sm:$0xff]  ;;  %v744_v42 = vld [vmem:[#allocation5 + $0x980] sm:$0xff] }
  0x55   : > { %1467 = vmatpush.msrb.mxu2 %v642_v48  ;;  %1487 = vmatpush.msrb.mxu3 %v643_v49  ;;  %401 = vst.msk [vmem:[#allocation3 + $0x150] sm:$0xff] %vm357_vm0, %v7168_v24  ;;  %v742_v40 = vld [vmem:[#allocation5 + $0x970] sm:$0xff]  ;;  %v745_v43 = vld [vmem:[#allocation5 + $0x988] sm:$0xff]  ;;  %v695_v46 = vld [vmem:[#allocation5 + $0x7f8] sm:$0xff] }
  0x56   : > { %1392 = vmatmul.f32.vlgmr.msra.gmra.mxu2 %v7353_v50  ;;  %1428 = vmatpush.msrb.mxu0 %v591_v51  ;;  %402 = vst.msk [vmem:[#allocation3 + $0x158] sm:$0x3] %vm359_vm1, %v7168_v24  ;;  %v693_v44 = vld [vmem:[#allocation5 + $0x7e8] sm:$0xff]  ;;  %v694_v45 = vld [vmem:[#allocation5 + $0x7f0] sm:$0xff]  ;;  %v696_v47 = vld [vmem:[#allocation5 + $0x800] sm:$0xff] }
  0x57   : > { %1448 = vmatpush.msrb.mxu1 %v592_v52  ;;  %1468 = vmatpush.msrb.mxu2 %v593_v53  ;;  %403 = vst.msk [vmem:[#allocation3 + $0x160] sm:$0xff] %vm357_vm0, %v7168_v24  ;;  %v644_v48 = vld [vmem:[#allocation5 + $0x660] sm:$0xff]  ;;  %v645_v49 = vld [vmem:[#allocation5 + $0x668] sm:$0xff]  ;;  %v646_v51 = vld [vmem:[#allocation5 + $0x670] sm:$0xff] }
  0x58   : > { %1488 = vmatpush.msrb.mxu3 %v594_v54  ;;  %1429 = vmatpush.msrb.mxu0 %v542_v55  ;;  %404 = vst.msk [vmem:[#allocation3 + $0x168] sm:$0x3] %vm359_vm1, %v7168_v24  ;;  %v647_v52 = vld [vmem:[#allocation5 + $0x678] sm:$0xff]  ;;  %v596_v54 = vld [vmem:[#allocation5 + $0x4e0] sm:$0xff]  ;;  %v597_v55 = vld [vmem:[#allocation5 + $0x4e8] sm:$0xff] }
  0x59   : > { %1449 = vmatpush.msrb.mxu1 %v543_v56  ;;  %1469 = vmatpush.msrb.mxu2 %v544_v57  ;;  %405 = vst.msk [vmem:[#allocation3 + $0x170] sm:$0xff] %vm357_vm0, %v7168_v24  ;;  %v595_v53 = vld [vmem:[#allocation5 + $0x4d8] sm:$0xff]  ;;  %v598_v56 = vld [vmem:[#allocation5 + $0x4f0] sm:$0xff] }
  0x5a   : > { %1489 = vmatpush.msrb.mxu3 %v545_v58  ;;  %1430 = vmatpush.msrb.mxu0 %v493_v59  ;;  %406 = vst.msk [vmem:[#allocation3 + $0x178] sm:$0x3] %vm359_vm1, %v7168_v24  ;;  %v546_v57 = vld [vmem:[#allocation5 + $0x350] sm:$0xff]  ;;  %v547_v58 = vld [vmem:[#allocation5 + $0x358] sm:$0xff]  ;;  %v548_v59 = vld [vmem:[#allocation5 + $0x360] sm:$0xff] }
  0x5b   : > { %1450 = vmatpush.msrb.mxu1 %v494_v60  ;;  %1470 = vmatpush.msrb.mxu2 %v495_v61  ;;  %407 = vst.msk [vmem:[#allocation3 + $0x180] sm:$0xff] %vm357_vm0, %v7168_v24  ;;  %v549_v60 = vld [vmem:[#allocation5 + $0x368] sm:$0xff] }
  0x5c   : > { %1490 = vmatpush.msrb.mxu3 %v496_v62  ;;  %1352 = vmatmul.f32.vlgmr.msra.gmra.mxu0 %v7353_v50  ;;  %408 = vst.msk [vmem:[#allocation3 + $0x188] sm:$0x3] %vm359_vm1, %v7168_v24  ;;  %v497_v61 = vld [vmem:[#allocation5 + $0x1c8] sm:$0xff]  ;;  %v498_v62 = vld [vmem:[#allocation5 + $0x1d0] sm:$0xff] }
  0x5d   : > { %1372 = vmatmul.f32.vlgmr.msra.gmra.mxu1 %v7353_v50  ;;  %1431 = vmatpush.msrb.mxu0 %v444_v63  ;;  %409 = vst.msk [vmem:[#allocation3 + $0x190] sm:$0xff] %vm357_vm0, %v7168_v24  ;;  %v499_v63 = vld [vmem:[#allocation5 + $0x1d8] sm:$0xff] }
  0x5e   : > { %1451 = vmatpush.msrb.mxu1 %v445_v0  ;;  %1471 = vmatpush.msrb.mxu2 %v446_v1  ;;  %410 = vst.msk [vmem:[#allocation3 + $0x198] sm:$0x3] %vm359_vm1, %v7168_v24  ;;  %v500_v0 = vld [vmem:[#allocation5 + $0x1e0] sm:$0xff] }
  0x5f   : > { %1491 = vmatpush.msrb.mxu3 %v447_v2  ;;  %1472 = vmatmul.f32.vlgmr.msrb.gmra.mxu2 %v7353_v50  ;;  %411 = vst.msk [vmem:[#allocation3 + $0x1a0] sm:$0xff] %vm357_vm0, %v7168_v24  ;;  %v448_v1 = vld [vmem:[#allocation5 + $0x40] sm:$0xff]  ;;  %v449_v2 = vld [vmem:[#allocation5 + $0x48] sm:$0xff] }
  0x60   : > { %1412 = vmatmul.f32.vlgmr.msra.gmra.mxu3 %v7353_v50  ;;  %1496 = vmatpush.msra.mxu0 %v1183_v3  ;;  %412 = vst.msk [vmem:[#allocation3 + $0x1a8] sm:$0x3] %vm359_vm1, %v7168_v24  ;;  %v450_v3 = vld [vmem:[#allocation5 + $0x50] sm:$0xff] }
  0x61   : > { %1516 = vmatpush.msra.mxu1 %v1184_v4  ;;  %1536 = vmatpush.msra.mxu2 %v1185_v5  ;;  %413 = vst.msk [vmem:[#allocation3 + $0x1b0] sm:$0xff] %vm357_vm0, %v7168_v24  ;;  %v451_v4 = vld [vmem:[#allocation5 + $0x58] sm:$0xff]  ;;  %v1188_v5 = vld [vmem:[#allocation5 + $0x1760] sm:$0xff] }
  0x62   : > { %1556 = vmatpush.msra.mxu3 %v1186_v6  ;;  %1497 = vmatpush.msra.mxu0 %v1134_v7  ;;  %414 = vst.msk [vmem:[#allocation3 + $0x1b8] sm:$0x3] %vm359_vm1, %v7168_v24  ;;  %v1189_v6 = vld [vmem:[#allocation5 + $0x1768] sm:$0xff]  ;;  %v1190_v7 = vld [vmem:[#allocation5 + $0x1770] sm:$0xff] }
  0x63   : > { %1517 = vmatpush.msra.mxu1 %v1135_v8  ;;  %1537 = vmatpush.msra.mxu2 %v1136_v9  ;;  %419 = vst.msk [vmem:[#allocation3 + $0x1e0] sm:$0xff] %vm357_vm0, %v7168_v24  ;;  %v1138_v8 = vld [vmem:[#allocation5 + $0x15d0] sm:$0xff]  ;;  %v1139_v9 = vld [vmem:[#allocation5 + $0x15d8] sm:$0xff] }
  0x64   : > { %1557 = vmatpush.msra.mxu3 %v1137_v10  ;;  %1498 = vmatpush.msra.mxu0 %v1085_v11  ;;  %420 = vst.msk [vmem:[#allocation3 + $0x1e8] sm:$0x3] %vm359_vm1, %v7168_v24  ;;  %v1140_v10 = vld [vmem:[#allocation5 + $0x15e0] sm:$0xff]  ;;  %v1141_v11 = vld [vmem:[#allocation5 + $0x15e8] sm:$0xff] }
  0x65   : > { %1518 = vmatpush.msra.mxu1 %v1086_v12  ;;  %1538 = vmatpush.msra.mxu2 %v1087_v13  ;;  %421 = vst.msk [vmem:[#allocation3 + $0x1f0] sm:$0xff] %vm357_vm0, %v7168_v24  ;;  %v1089_v12 = vld [vmem:[#allocation5 + $0x1448] sm:$0xff]  ;;  %v1090_v13 = vld [vmem:[#allocation5 + $0x1450] sm:$0xff] }
  0x66   : > { %1558 = vmatpush.msra.mxu3 %v1088_v14  ;;  %1432 = vmatmul.f32.vlgmr.msrb.gmra.mxu0 %v7353_v50  ;;  %422 = vst.msk [vmem:[#allocation3 + $0x1f8] sm:$0x3] %vm359_vm1, %v7168_v24  ;;  %v1091_v14 = vld [vmem:[#allocation5 + $0x1458] sm:$0xff] }
  0x67   : > { %1452 = vmatmul.f32.vlgmr.msrb.gmra.mxu1 %v7353_v50  ;;  %1499 = vmatpush.msra.mxu0 %v1036_v15  ;;  %423 = vst.msk [vmem:[#allocation3 + $0x200] sm:$0xff] %vm357_vm0, %v7168_v24  ;;  %v1092_v15 = vld [vmem:[#allocation5 + $0x1460] sm:$0xff] }
  0x68   : > { %1519 = vmatpush.msra.mxu1 %v1037_v16  ;;  %1539 = vmatpush.msra.mxu2 %v1038_v17  ;;  %424 = vst.msk [vmem:[#allocation3 + $0x208] sm:$0x3] %vm359_vm1, %v7168_v24  ;;  %v1040_v16 = vld [vmem:[#allocation5 + $0x12c0] sm:$0xff]  ;;  %v1041_v17 = vld [vmem:[#allocation5 + $0x12c8] sm:$0xff] }
  0x69   : > { %1559 = vmatpush.msra.mxu3 %v1039_v18  ;;  %1500 = vmatpush.msra.mxu0 %v987_v19  ;;  %425 = vst.msk [vmem:[#allocation3 + $0x210] sm:$0xff] %vm357_vm0, %v7168_v24  ;;  %v1042_v18 = vld [vmem:[#allocation5 + $0x12d0] sm:$0xff]  ;;  %v1043_v19 = vld [vmem:[#allocation5 + $0x12d8] sm:$0xff] }
  0x6a   : > { %1520 = vmatpush.msra.mxu1 %v988_v20  ;;  %1540 = vmatpush.msra.mxu2 %v989_v21  ;;  %426 = vst.msk [vmem:[#allocation3 + $0x218] sm:$0x3] %vm359_vm1, %v7168_v24  ;;  %v991_v20 = vld [vmem:[#allocation5 + $0x1138] sm:$0xff]  ;;  %v992_v21 = vld [vmem:[#allocation5 + $0x1140] sm:$0xff] }
  0x6b   : > { %1560 = vmatpush.msra.mxu3 %v990_v22  ;;  %1501 = vmatpush.msra.mxu0 %v938_v23  ;;  %427 = vst.msk [vmem:[#allocation3 + $0x220] sm:$0xff] %vm357_vm0, %v7168_v24  ;;  %v993_v22 = vld [vmem:[#allocation5 + $0x1148] sm:$0xff]  ;;  %v994_v23 = vld [vmem:[#allocation5 + $0x1150] sm:$0xff] }
  0x6c   : > { %1521 = vmatpush.msra.mxu1 %v939_v25  ;;  %1541 = vmatpush.msra.mxu2 %v940_v26  ;;  %428 = vst.msk [vmem:[#allocation3 + $0x228] sm:$0x3] %vm359_vm1, %v7168_v24  ;;  %v942_v25 = vld [vmem:[#allocation5 + $0xfb0] sm:$0xff]  ;;  %v943_v26 = vld [vmem:[#allocation5 + $0xfb8] sm:$0xff] }
  0x6d   : > { %1561 = vmatpush.msra.mxu3 %v941_v27  ;;  %1502 = vmatpush.msra.mxu0 %v889_v28  ;;  %429 = vst.msk [vmem:[#allocation3 + $0x230] sm:$0xff] %vm357_vm0, %v7168_v24  ;;  %v944_v27 = vld [vmem:[#allocation5 + $0xfc0] sm:$0xff]  ;;  %v945_v28 = vld [vmem:[#allocation5 + $0xfc8] sm:$0xff] }
  0x6e   : > { %1522 = vmatpush.msra.mxu1 %v890_v29  ;;  %1542 = vmatpush.msra.mxu2 %v891_v30  ;;  %430 = vst.msk [vmem:[#allocation3 + $0x238] sm:$0x3] %vm359_vm1, %v7168_v24  ;;  %v893_v29 = vld [vmem:[#allocation5 + $0xe28] sm:$0xff]  ;;  %v894_v30 = vld [vmem:[#allocation5 + $0xe30] sm:$0xff] }
  0x6f   : > { %1562 = vmatpush.msra.mxu3 %v892_v31  ;;  %1503 = vmatpush.msra.mxu0 %v840_v32  ;;  %431 = vst.msk [vmem:[#allocation3 + $0x240] sm:$0xff] %vm357_vm0, %v7168_v24  ;;  %v895_v31 = vld [vmem:[#allocation5 + $0xe38] sm:$0xff]  ;;  %v896_v32 = vld [vmem:[#allocation5 + $0xe40] sm:$0xff] }
  0x70   : > { %1523 = vmatpush.msra.mxu1 %v841_v33  ;;  %1543 = vmatpush.msra.mxu2 %v842_v34  ;;  %432 = vst.msk [vmem:[#allocation3 + $0x248] sm:$0x3] %vm359_vm1, %v7168_v24  ;;  %v844_v33 = vld [vmem:[#allocation5 + $0xca0] sm:$0xff]  ;;  %v845_v34 = vld [vmem:[#allocation5 + $0xca8] sm:$0xff] }
  0x71   : > { %1563 = vmatpush.msra.mxu3 %v843_v35  ;;  %1504 = vmatpush.msra.mxu0 %v791_v36  ;;  %433 = vst.msk [vmem:[#allocation3 + $0x250] sm:$0xff] %vm357_vm0, %v7168_v24  ;;  %v846_v35 = vld [vmem:[#allocation5 + $0xcb0] sm:$0xff]  ;;  %v847_v36 = vld [vmem:[#allocation5 + $0xcb8] sm:$0xff] }
  0x72   : > { %1524 = vmatpush.msra.mxu1 %v792_v37  ;;  %1544 = vmatpush.msra.mxu2 %v793_v38  ;;  %434 = vst.msk [vmem:[#allocation3 + $0x258] sm:$0x3] %vm359_vm1, %v7168_v24  ;;  %v1187_v24 = vld [vmem:[#allocation5 + $0x1758] sm:$0xff]  ;;  %v796_v38 = vld [vmem:[#allocation5 + $0xb20] sm:$0xff] }
  0x73   : > { %1564 = vmatpush.msra.mxu3 %v794_v39  ;;  %1505 = vmatpush.msra.mxu0 %v742_v40  ;;  %v795_v37 = vld [vmem:[#allocation5 + $0xb18] sm:$0xff]  ;;  %v797_v39 = vld [vmem:[#allocation5 + $0xb28] sm:$0xff]  ;;  %v798_v40 = vld [vmem:[#allocation5 + $0xb30] sm:$0xff] }
  0x74   : > { %1525 = vmatpush.msra.mxu1 %v743_v41  ;;  %1545 = vmatpush.msra.mxu2 %v744_v42  ;;  %v746_v41 = vld [vmem:[#allocation5 + $0x990] sm:$0xff]  ;;  %v747_v42 = vld [vmem:[#allocation5 + $0x998] sm:$0xff] }
  0x75   : > { %1565 = vmatpush.msra.mxu3 %v745_v43  ;;  %1506 = vmatpush.msra.mxu0 %v693_v44  ;;  %v748_v43 = vld [vmem:[#allocation5 + $0x9a0] sm:$0xff]  ;;  %v749_v44 = vld [vmem:[#allocation5 + $0x9a8] sm:$0xff] }
  0x76   : > { %1526 = vmatpush.msra.mxu1 %v694_v45  ;;  %1546 = vmatpush.msra.mxu2 %v695_v46  ;;  %v697_v45 = vld [vmem:[#allocation5 + $0x808] sm:$0xff]  ;;  %v698_v46 = vld [vmem:[#allocation5 + $0x810] sm:$0xff] }
  0x77   : > { %1566 = vmatpush.msra.mxu3 %v696_v47  ;;  %1507 = vmatpush.msra.mxu0 %v644_v48  ;;  %v699_v47 = vld [vmem:[#allocation5 + $0x818] sm:$0xff]  ;;  %v700_v48 = vld [vmem:[#allocation5 + $0x820] sm:$0xff] }
  0x78   : > { %1527 = vmatpush.msra.mxu1 %v645_v49  ;;  %1547 = vmatpush.msra.mxu2 %v646_v51  ;;  %v648_v49 = vld [vmem:[#allocation5 + $0x680] sm:$0xff]  ;;  %v649_v51 = vld [vmem:[#allocation5 + $0x688] sm:$0xff] }
  0x79   : > { %1567 = vmatpush.msra.mxu3 %v647_v52  ;;  %1508 = vmatpush.msra.mxu0 %v595_v53  ;;  %v650_v52 = vld [vmem:[#allocation5 + $0x690] sm:$0xff]  ;;  %v651_v53 = vld [vmem:[#allocation5 + $0x698] sm:$0xff] }
  0x7a   : > { %1528 = vmatpush.msra.mxu1 %v596_v54  ;;  %1548 = vmatpush.msra.mxu2 %v597_v55  ;;  %v599_v54 = vld [vmem:[#allocation5 + $0x4f8] sm:$0xff]  ;;  %v600_v55 = vld [vmem:[#allocation5 + $0x500] sm:$0xff] }
  0x7b   : > { %1568 = vmatpush.msra.mxu3 %v598_v56  ;;  %1509 = vmatpush.msra.mxu0 %v546_v57  ;;  %v601_v56 = vld [vmem:[#allocation5 + $0x508] sm:$0xff]  ;;  %v602_v57 = vld [vmem:[#allocation5 + $0x510] sm:$0xff] }
  0x7c   : > { %1529 = vmatpush.msra.mxu1 %v547_v58  ;;  %1549 = vmatpush.msra.mxu2 %v548_v59  ;;  %v550_v58 = vld [vmem:[#allocation5 + $0x370] sm:$0xff]  ;;  %v551_v59 = vld [vmem:[#allocation5 + $0x378] sm:$0xff] }
  0x7d   : > { %1569 = vmatpush.msra.mxu3 %v549_v60  ;;  %1510 = vmatpush.msra.mxu0 %v497_v61  ;;  %v552_v60 = vld [vmem:[#allocation5 + $0x380] sm:$0xff]  ;;  %v553_v61 = vld [vmem:[#allocation5 + $0x388] sm:$0xff] }
  0x7e   : > { %1530 = vmatpush.msra.mxu1 %v498_v62  ;;  %1550 = vmatpush.msra.mxu2 %v499_v63  ;;  %v501_v62 = vld [vmem:[#allocation5 + $0x1e8] sm:$0xff]  ;;  %v502_v63 = vld [vmem:[#allocation5 + $0x1f0] sm:$0xff] }
  0x7f   : > { %1570 = vmatpush.msra.mxu3 %v500_v0  ;;  %1511 = vmatpush.msra.mxu0 %v448_v1  ;;  %v503_v0 = vld [vmem:[#allocation5 + $0x1f8] sm:$0xff]  ;;  %v504_v1 = vld [vmem:[#allocation5 + $0x200] sm:$0xff] }
  0x80   : > { %1531 = vmatpush.msra.mxu1 %v449_v2  ;;  %1551 = vmatpush.msra.mxu2 %v450_v3  ;;  %v452_v2 = vld [vmem:[#allocation5 + $0x60] sm:$0xff]  ;;  %v453_v3 = vld [vmem:[#allocation5 + $0x68] sm:$0xff] }
  0x81   : > { %1571 = vmatpush.msra.mxu3 %v451_v4  ;;  %1576 = vmatpush.msrb.mxu0 %v1187_v24  ;;  %v454_v4 = vld [vmem:[#allocation5 + $0x70] sm:$0xff]  ;;  %v455_v24 = vld [vmem:[#allocation5 + $0x78] sm:$0xff] }
  0x82   : > { %1492 = vmatmul.f32.vlgmr.msrb.gmra.mxu3 %v7353_v50  ;;  %1596 = vmatpush.msrb.mxu1 %v1188_v5  ;;  %v1191_v5 = vld [vmem:[#allocation5 + $0x1778] sm:$0xff] }
  0x83   : > { %1616 = vmatpush.msrb.mxu2 %v1189_v6  ;;  %1636 = vmatpush.msrb.mxu3 %v1190_v7  ;;  %v1192_v6 = vld [vmem:[#allocation5 + $0x1780] sm:$0xff]  ;;  %v1193_v7 = vld [vmem:[#allocation5 + $0x1788] sm:$0xff] }
  0x84   : > { %1577 = vmatpush.msrb.mxu0 %v1138_v8  ;;  %1597 = vmatpush.msrb.mxu1 %v1139_v9  ;;  %v1194_v8 = vld [vmem:[#allocation5 + $0x1790] sm:$0xff] }
  0x85   : > { %1617 = vmatpush.msrb.mxu2 %v1140_v10  ;;  %1637 = vmatpush.msrb.mxu3 %v1141_v11  ;;  %v1142_v9 = vld [vmem:[#allocation5 + $0x15f0] sm:$0xff]  ;;  %v1143_v10 = vld [vmem:[#allocation5 + $0x15f8] sm:$0xff]  ;;  %v1144_v11 = vld [vmem:[#allocation5 + $0x1600] sm:$0xff] }
  0x86   : > { %1578 = vmatpush.msrb.mxu0 %v1089_v12  ;;  %1598 = vmatpush.msrb.mxu1 %v1090_v13  ;;  %v1145_v12 = vld [vmem:[#allocation5 + $0x1608] sm:$0xff] }
  0x87   : > { %1618 = vmatpush.msrb.mxu2 %v1091_v14  ;;  %1638 = vmatpush.msrb.mxu3 %v1092_v15  ;;  %v1093_v13 = vld [vmem:[#allocation5 + $0x1468] sm:$0xff]  ;;  %v1094_v14 = vld [vmem:[#allocation5 + $0x1470] sm:$0xff]  ;;  %v1095_v15 = vld [vmem:[#allocation5 + $0x1478] sm:$0xff] }
  0x88   : > { %1579 = vmatpush.msrb.mxu0 %v1040_v16  ;;  %1599 = vmatpush.msrb.mxu1 %v1041_v17  ;;  %v1096_v16 = vld [vmem:[#allocation5 + $0x1480] sm:$0xff] }
  0x89   : > { %1619 = vmatpush.msrb.mxu2 %v1042_v18  ;;  %1639 = vmatpush.msrb.mxu3 %v1043_v19  ;;  %v1044_v17 = vld [vmem:[#allocation5 + $0x12e0] sm:$0xff]  ;;  %v1045_v18 = vld [vmem:[#allocation5 + $0x12e8] sm:$0xff]  ;;  %v1046_v19 = vld [vmem:[#allocation5 + $0x12f0] sm:$0xff] }
  0x8a   : > { %1580 = vmatpush.msrb.mxu0 %v991_v20  ;;  %1600 = vmatpush.msrb.mxu1 %v992_v21  ;;  %v1047_v20 = vld [vmem:[#allocation5 + $0x12f8] sm:$0xff] }
  0x8b   : > { %1620 = vmatpush.msrb.mxu2 %v993_v22  ;;  %1640 = vmatpush.msrb.mxu3 %v994_v23  ;;  %v995_v21 = vld [vmem:[#allocation5 + $0x1158] sm:$0xff]  ;;  %v996_v22 = vld [vmem:[#allocation5 + $0x1160] sm:$0xff]  ;;  %v997_v23 = vld [vmem:[#allocation5 + $0x1168] sm:$0xff] }
  0x8c   : > { %1581 = vmatpush.msrb.mxu0 %v942_v25  ;;  %1601 = vmatpush.msrb.mxu1 %v943_v26  ;;  %v998_v25 = vld [vmem:[#allocation5 + $0x1170] sm:$0xff] }
  0x8d   : > { %1621 = vmatpush.msrb.mxu2 %v944_v27  ;;  %1641 = vmatpush.msrb.mxu3 %v945_v28  ;;  %v946_v26 = vld [vmem:[#allocation5 + $0xfd0] sm:$0xff]  ;;  %v947_v27 = vld [vmem:[#allocation5 + $0xfd8] sm:$0xff]  ;;  %v948_v28 = vld [vmem:[#allocation5 + $0xfe0] sm:$0xff] }
  0x8e   : > { %1582 = vmatpush.msrb.mxu0 %v893_v29  ;;  %1602 = vmatpush.msrb.mxu1 %v894_v30  ;;  %v949_v29 = vld [vmem:[#allocation5 + $0xfe8] sm:$0xff] }
  0x8f   : > { %1622 = vmatpush.msrb.mxu2 %v895_v31  ;;  %1642 = vmatpush.msrb.mxu3 %v896_v32  ;;  %v897_v30 = vld [vmem:[#allocation5 + $0xe48] sm:$0xff]  ;;  %v898_v31 = vld [vmem:[#allocation5 + $0xe50] sm:$0xff]  ;;  %v899_v32 = vld [vmem:[#allocation5 + $0xe58] sm:$0xff] }
  0x90   : > { %1583 = vmatpush.msrb.mxu0 %v844_v33  ;;  %1603 = vmatpush.msrb.mxu1 %v845_v34  ;;  %v900_v33 = vld [vmem:[#allocation5 + $0xe60] sm:$0xff] }
  0x91   : > { %1623 = vmatpush.msrb.mxu2 %v846_v35  ;;  %1643 = vmatpush.msrb.mxu3 %v847_v36  ;;  %v848_v34 = vld [vmem:[#allocation5 + $0xcc0] sm:$0xff]  ;;  %v849_v35 = vld [vmem:[#allocation5 + $0xcc8] sm:$0xff]  ;;  %v850_v36 = vld [vmem:[#allocation5 + $0xcd0] sm:$0xff] }
  0x92   : > { %1584 = vmatpush.msrb.mxu0 %v795_v37  ;;  %1604 = vmatpush.msrb.mxu1 %v796_v38  ;;  %v851_v37 = vld [vmem:[#allocation5 + $0xcd8] sm:$0xff] }
  0x93   : > { %1624 = vmatpush.msrb.mxu2 %v797_v39  ;;  %1644 = vmatpush.msrb.mxu3 %v798_v40  ;;  %v799_v38 = vld [vmem:[#allocation5 + $0xb38] sm:$0xff]  ;;  %v800_v39 = vld [vmem:[#allocation5 + $0xb40] sm:$0xff]  ;;  %v801_v40 = vld [vmem:[#allocation5 + $0xb48] sm:$0xff] }
  0x94   : > { %1585 = vmatpush.msrb.mxu0 %v746_v41  ;;  %1605 = vmatpush.msrb.mxu1 %v747_v42  ;;  %v802_v41 = vld [vmem:[#allocation5 + $0xb50] sm:$0xff] }
  0x95   : > { %1625 = vmatpush.msrb.mxu2 %v748_v43  ;;  %1645 = vmatpush.msrb.mxu3 %v749_v44  ;;  %v750_v42 = vld [vmem:[#allocation5 + $0x9b0] sm:$0xff]  ;;  %v751_v43 = vld [vmem:[#allocation5 + $0x9b8] sm:$0xff]  ;;  %v752_v44 = vld [vmem:[#allocation5 + $0x9c0] sm:$0xff] }
  0x96   : > { %1586 = vmatpush.msrb.mxu0 %v697_v45  ;;  %1606 = vmatpush.msrb.mxu1 %v698_v46  ;;  %v753_v45 = vld [vmem:[#allocation5 + $0x9c8] sm:$0xff] }
  0x97   : > { %1626 = vmatpush.msrb.mxu2 %v699_v47  ;;  %1646 = vmatpush.msrb.mxu3 %v700_v48  ;;  %v701_v46 = vld [vmem:[#allocation5 + $0x828] sm:$0xff]  ;;  %v702_v47 = vld [vmem:[#allocation5 + $0x830] sm:$0xff]  ;;  %v703_v48 = vld [vmem:[#allocation5 + $0x838] sm:$0xff] }
  0x98   : > { %1587 = vmatpush.msrb.mxu0 %v648_v49  ;;  %1607 = vmatpush.msrb.mxu1 %v649_v51  ;;  %v704_v49 = vld [vmem:[#allocation5 + $0x840] sm:$0xff] }
  0x99   : > { %1627 = vmatpush.msrb.mxu2 %v650_v52  ;;  %1647 = vmatpush.msrb.mxu3 %v651_v53  ;;  %v652_v51 = vld [vmem:[#allocation5 + $0x6a0] sm:$0xff]  ;;  %v653_v52 = vld [vmem:[#allocation5 + $0x6a8] sm:$0xff]  ;;  %v654_v53 = vld [vmem:[#allocation5 + $0x6b0] sm:$0xff] }
  0x9a   : > { %1512 = vmatmul.f32.vlgmr.msra.gmra.mxu0 %v7353_v50  ;;  %1532 = vmatmul.f32.vlgmr.msra.gmra.mxu1 %v7353_v50 }
  0x9b   : > { %1588 = vmatpush.msrb.mxu0 %v599_v54  ;;  %1608 = vmatpush.msrb.mxu1 %v600_v55  ;;  %v655_v54 = vld [vmem:[#allocation5 + $0x6b8] sm:$0xff] }
  0x9c   : > { %1628 = vmatpush.msrb.mxu2 %v601_v56  ;;  %1648 = vmatpush.msrb.mxu3 %v602_v57  ;;  %v603_v55 = vld [vmem:[#allocation5 + $0x518] sm:$0xff]  ;;  %v604_v56 = vld [vmem:[#allocation5 + $0x520] sm:$0xff]  ;;  %v605_v57 = vld [vmem:[#allocation5 + $0x528] sm:$0xff] }
  0x9d   : > { %1552 = vmatmul.f32.vlgmr.msra.gmra.mxu2 %v7353_v50  ;;  %1572 = vmatmul.f32.vlgmr.msra.gmra.mxu3 %v7353_v50 }
  0x9e   : > { %1589 = vmatpush.msrb.mxu0 %v550_v58  ;;  %1609 = vmatpush.msrb.mxu1 %v551_v59  ;;  %v606_v58 = vld [vmem:[#allocation5 + $0x530] sm:$0xff] }
  0x9f   : > { %1629 = vmatpush.msrb.mxu2 %v552_v60  ;;  %1649 = vmatpush.msrb.mxu3 %v553_v61  ;;  %v554_v59 = vld [vmem:[#allocation5 + $0x390] sm:$0xff]  ;;  %v555_v60 = vld [vmem:[#allocation5 + $0x398] sm:$0xff]  ;;  %v556_v61 = vld [vmem:[#allocation5 + $0x3a0] sm:$0xff] }
  0xa0   : > { %1590 = vmatpush.msrb.mxu0 %v501_v62  ;;  %1610 = vmatpush.msrb.mxu1 %v502_v63  ;;  %v557_v62 = vld [vmem:[#allocation5 + $0x3a8] sm:$0xff] }
  0xa1   : > { %1630 = vmatpush.msrb.mxu2 %v503_v0  ;;  %1650 = vmatpush.msrb.mxu3 %v504_v1  ;;  %v505_v63 = vld [vmem:[#allocation5 + $0x208] sm:$0xff]  ;;  %v506_v0 = vld [vmem:[#allocation5 + $0x210] sm:$0xff]  ;;  %v507_v1 = vld [vmem:[#allocation5 + $0x218] sm:$0xff] }
  0xa2   : > { %1591 = vmatpush.msrb.mxu0 %v452_v2  ;;  %1611 = vmatpush.msrb.mxu1 %v453_v3  ;;  %v508_v2 = vld [vmem:[#allocation5 + $0x220] sm:$0xff] }
  0xa3   : > { %1631 = vmatpush.msrb.mxu2 %v454_v4  ;;  %1651 = vmatpush.msrb.mxu3 %v455_v24  ;;  %v456_v3 = vld [vmem:[#allocation5 + $0x80] sm:$0xff]  ;;  %v457_v4 = vld [vmem:[#allocation5 + $0x88] sm:$0xff]  ;;  %v458_v24 = vld [vmem:[#allocation5 + $0x90] sm:$0xff] }
  0xa4   : > { %1592 = vmatmul.f32.vlgmr.msrb.gmra.mxu0 %v7353_v50  ;;  %1612 = vmatmul.f32.vlgmr.msrb.gmra.mxu1 %v7353_v50 }
  0xa5   : > { %1656 = vmatpush.msra.mxu0 %v1191_v5  ;;  %1676 = vmatpush.msra.mxu1 %v1192_v6  ;;  %v459_v5 = vld [vmem:[#allocation5 + $0x98] sm:$0xff] }
  0xa6   : > { %1696 = vmatpush.msra.mxu2 %v1193_v7  ;;  %1716 = vmatpush.msra.mxu3 %v1194_v8  ;;  %v1195_v6 = vld [vmem:[#allocation5 + $0x1798] sm:$0xff]  ;;  %v1196_v7 = vld [vmem:[#allocation5 + $0x17a0] sm:$0xff]  ;;  %v1197_v8 = vld [vmem:[#allocation5 + $0x17a8] sm:$0xff] }
  0xa7   : > { %1657 = vmatpush.msra.mxu0 %v1142_v9  ;;  %1677 = vmatpush.msra.mxu1 %v1143_v10  ;;  %v1198_v9 = vld [vmem:[#allocation5 + $0x17b0] sm:$0xff] }
  0xa8   : > { %1697 = vmatpush.msra.mxu2 %v1144_v11  ;;  %1717 = vmatpush.msra.mxu3 %v1145_v12  ;;  %v1146_v10 = vld [vmem:[#allocation5 + $0x1610] sm:$0xff]  ;;  %v1147_v11 = vld [vmem:[#allocation5 + $0x1618] sm:$0xff]  ;;  %v1148_v12 = vld [vmem:[#allocation5 + $0x1620] sm:$0xff] }
  0xa9   : > { %1658 = vmatpush.msra.mxu0 %v1093_v13  ;;  %1678 = vmatpush.msra.mxu1 %v1094_v14  ;;  %v1149_v13 = vld [vmem:[#allocation5 + $0x1628] sm:$0xff] }
  0xaa   : > { %1698 = vmatpush.msra.mxu2 %v1095_v15  ;;  %1718 = vmatpush.msra.mxu3 %v1096_v16  ;;  %v1097_v14 = vld [vmem:[#allocation5 + $0x1488] sm:$0xff]  ;;  %v1098_v15 = vld [vmem:[#allocation5 + $0x1490] sm:$0xff]  ;;  %v1099_v16 = vld [vmem:[#allocation5 + $0x1498] sm:$0xff] }
  0xab   : > { %1659 = vmatpush.msra.mxu0 %v1044_v17  ;;  %1679 = vmatpush.msra.mxu1 %v1045_v18  ;;  %v1100_v17 = vld [vmem:[#allocation5 + $0x14a0] sm:$0xff] }
  0xac   : > { %1699 = vmatpush.msra.mxu2 %v1046_v19  ;;  %1719 = vmatpush.msra.mxu3 %v1047_v20  ;;  %v1048_v18 = vld [vmem:[#allocation5 + $0x1300] sm:$0xff]  ;;  %v1049_v19 = vld [vmem:[#allocation5 + $0x1308] sm:$0xff]  ;;  %v1051_v20 = vld [vmem:[#allocation5 + $0x1318] sm:$0xff] }
  0xad   : > { %1660 = vmatpush.msra.mxu0 %v995_v21  ;;  %1680 = vmatpush.msra.mxu1 %v996_v22  ;;  %v999_v21 = vld [vmem:[#allocation5 + $0x1178] sm:$0xff]  ;;  %v1000_v22 = vld [vmem:[#allocation5 + $0x1180] sm:$0xff] }
  0xae   : > { %1700 = vmatpush.msra.mxu2 %v997_v23  ;;  %1720 = vmatpush.msra.mxu3 %v998_v25  ;;  %v1001_v23 = vld [vmem:[#allocation5 + $0x1188] sm:$0xff]  ;;  %v1002_v25 = vld [vmem:[#allocation5 + $0x1190] sm:$0xff] }
  0xaf   : > { %1661 = vmatpush.msra.mxu0 %v946_v26  ;;  %1681 = vmatpush.msra.mxu1 %v947_v27  ;;  %v950_v26 = vld [vmem:[#allocation5 + $0xff0] sm:$0xff]  ;;  %v951_v27 = vld [vmem:[#allocation5 + $0xff8] sm:$0xff] }
  0xb0   : > { %1701 = vmatpush.msra.mxu2 %v948_v28  ;;  %1721 = vmatpush.msra.mxu3 %v949_v29  ;;  %v952_v28 = vld [vmem:[#allocation5 + $0x1000] sm:$0xff]  ;;  %v953_v29 = vld [vmem:[#allocation5 + $0x1008] sm:$0xff] }
  0xb1   : > { %1662 = vmatpush.msra.mxu0 %v897_v30  ;;  %1682 = vmatpush.msra.mxu1 %v898_v31  ;;  %v901_v30 = vld [vmem:[#allocation5 + $0xe68] sm:$0xff]  ;;  %v902_v31 = vld [vmem:[#allocation5 + $0xe70] sm:$0xff] }
  0xb2   : > { %1702 = vmatpush.msra.mxu2 %v899_v32  ;;  %1722 = vmatpush.msra.mxu3 %v900_v33  ;;  %v903_v32 = vld [vmem:[#allocation5 + $0xe78] sm:$0xff]  ;;  %v904_v33 = vld [vmem:[#allocation5 + $0xe80] sm:$0xff] }
  0xb3   : > { %1663 = vmatpush.msra.mxu0 %v848_v34  ;;  %1683 = vmatpush.msra.mxu1 %v849_v35  ;;  %v852_v34 = vld [vmem:[#allocation5 + $0xce0] sm:$0xff]  ;;  %v853_v35 = vld [vmem:[#allocation5 + $0xce8] sm:$0xff] }
  0xb4   : > { %1703 = vmatpush.msra.mxu2 %v850_v36  ;;  %1723 = vmatpush.msra.mxu3 %v851_v37  ;;  %v854_v36 = vld [vmem:[#allocation5 + $0xcf0] sm:$0xff]  ;;  %v855_v37 = vld [vmem:[#allocation5 + $0xcf8] sm:$0xff] }
  0xb5   : > { %1664 = vmatpush.msra.mxu0 %v799_v38  ;;  %1684 = vmatpush.msra.mxu1 %v800_v39  ;;  %v803_v38 = vld [vmem:[#allocation5 + $0xb58] sm:$0xff]  ;;  %v804_v39 = vld [vmem:[#allocation5 + $0xb60] sm:$0xff] }
  0xb6   : > { %1704 = vmatpush.msra.mxu2 %v801_v40  ;;  %1724 = vmatpush.msra.mxu3 %v802_v41  ;;  %v7449_v40 = vld [vmem:[#allocation7] sm:$0xff]  ;;  %v805_v41 = vld [vmem:[#allocation5 + $0xb68] sm:$0xff] }
  0xb7   : > { %1665 = vmatpush.msra.mxu0 %v750_v42  ;;  %1685 = vmatpush.msra.mxu1 %v751_v43  ;;  %v806_v42 = vld [vmem:[#allocation5 + $0xb70] sm:$0xff] }
  0xb8   : > { %1705 = vmatpush.msra.mxu2 %v752_v44  ;;  %1725 = vmatpush.msra.mxu3 %v753_v45  ;;  %v754_v43 = vld [vmem:[#allocation5 + $0x9d0] sm:$0xff]  ;;  %v755_v44 = vld [vmem:[#allocation5 + $0x9d8] sm:$0xff]  ;;  %v756_v45 = vld [vmem:[#allocation5 + $0x9e0] sm:$0xff] }
  0xb9   : > { %1666 = vmatpush.msra.mxu0 %v701_v46  ;;  %1686 = vmatpush.msra.mxu1 %v702_v47  ;;  %v757_v46 = vld [vmem:[#allocation5 + $0x9e8] sm:$0xff]  ;;  %v1238_v47 = vperm.slane %v7449_v40, 0 }
  0xba   : > { %1706 = vmatpush.msra.mxu2 %v703_v48  ;;  %1726 = vmatpush.msra.mxu3 %v704_v49  ;;  %v1240_v48 = vperm.slane %v7449_v40, 2  ;;  %v705_v49 = vld [vmem:[#allocation5 + $0x848] sm:$0xff] }
  0xbb   : > { %1667 = vmatpush.msra.mxu0 %v652_v51  ;;  %1687 = vmatpush.msra.mxu1 %v653_v52  ;;  %v706_v51 = vld [vmem:[#allocation5 + $0x850] sm:$0xff]  ;;  %v1239_v52 = vperm.slane %v7449_v40, 1 }
  0xbc   : > { %1707 = vmatpush.msra.mxu2 %v654_v53  ;;  %1727 = vmatpush.msra.mxu3 %v655_v54  ;;  %v707_v53 = vld [vmem:[#allocation5 + $0x858] sm:$0xff]  ;;  %v708_v54 = vld [vmem:[#allocation5 + $0x860] sm:$0xff] }
  0xbd   : > { %1668 = vmatpush.msra.mxu0 %v603_v55  ;;  %1688 = vmatpush.msra.mxu1 %v604_v56  ;;  %v656_v55 = vld [vmem:[#allocation5 + $0x6c0] sm:$0xff]  ;;  %v657_v56 = vld [vmem:[#allocation5 + $0x6c8] sm:$0xff] }
  0xbe   : > { %1708 = vmatpush.msra.mxu2 %v605_v57  ;;  %1728 = vmatpush.msra.mxu3 %v606_v58 }
  0xbf   : > { %1669 = vmatpush.msra.mxu0 %v554_v59  ;;  %1689 = vmatpush.msra.mxu1 %v555_v60  ;;  %v658_v59 = vld [vmem:[#allocation5 + $0x6d0] sm:$0xff]  ;;  %v659_v60 = vld [vmem:[#allocation5 + $0x6d8] sm:$0xff] }
  0xc0   : > { %1709 = vmatpush.msra.mxu2 %v556_v61  ;;  %1729 = vmatpush.msra.mxu3 %v557_v62 }
  0xc1   : > { %1670 = vmatpush.msra.mxu0 %v505_v63  ;;  %1690 = vmatpush.msra.mxu1 %v506_v0  ;;  %v608_v0 = vld [vmem:[#allocation5 + $0x540] sm:$0xff] }
  0xc2   : > { %1710 = vmatpush.msra.mxu2 %v507_v1  ;;  %1730 = vmatpush.msra.mxu3 %v508_v2  ;;  %v607_v2 = vld [vmem:[#allocation5 + $0x538] sm:$0xff] }
  0xc3   : > { %1671 = vmatpush.msra.mxu0 %v456_v3  ;;  %1691 = vmatpush.msra.mxu1 %v457_v4  ;;  %v609_v3 = vld [vmem:[#allocation5 + $0x548] sm:$0xff] }
  0xc4   : > { %1711 = vmatpush.msra.mxu2 %v458_v24  ;;  %1731 = vmatpush.msra.mxu3 %v459_v5  ;;  %v610_v5 = vld [vmem:[#allocation5 + $0x550] sm:$0xff] }
  0xc5   : > { %1632 = vmatmul.f32.vlgmr.msrb.gmra.mxu2 %v7353_v50  ;;  %1652 = vmatmul.f32.vlgmr.msrb.gmra.mxu3 %v7353_v50  ;;  %v1050_v50 = vld [vmem:[#allocation5 + $0x1310] sm:$0xff] }
  0xc6   : > { %1736 = vmatpush.msrb.mxu0 %v1195_v6  ;;  %1756 = vmatpush.msrb.mxu1 %v1196_v7  ;;  %v7455_v7 = vld [vmem:[%s7344_s10] sm:$0x1] }
  0xc7   : > { %1776 = vmatpush.msrb.mxu2 %v1197_v8  ;;  %1796 = vmatpush.msrb.mxu3 %v1198_v9  ;;  %v558_v8 = vld [vmem:[#allocation5 + $0x3b0] sm:$0xff]  ;;  %v559_v9 = vld [vmem:[#allocation5 + $0x3b8] sm:$0xff] }
  0xc8   : > { %1737 = vmatpush.msrb.mxu0 %v1146_v10  ;;  %1757 = vmatpush.msrb.mxu1 %v1147_v11  ;;  %v560_v10 = vld [vmem:[#allocation5 + $0x3c0] sm:$0xff]  ;;  %v1244_v11 = vperm.slane %v7449_v40, 6 }
  0xc9   : > { %1777 = vmatpush.msrb.mxu2 %v1148_v12  ;;  %1797 = vmatpush.msrb.mxu3 %v1149_v13  ;;  %v561_v12 = vld [vmem:[#allocation5 + $0x3c8] sm:$0xff] }
  0xca   : > { %1738 = vmatpush.msrb.mxu0 %v1097_v14  ;;  %1758 = vmatpush.msrb.mxu1 %v1098_v15  ;;  %v509_v13 = vld [vmem:[#allocation5 + $0x228] sm:$0xff]  ;;  %v1241_v14 = vperm.slane %v7449_v40, 3  ;;  %v1242_v15 = vperm.slane %v7449_v40, 4 }
  0xcb   : > { %1778 = vmatpush.msrb.mxu2 %v1099_v16  ;;  %1798 = vmatpush.msrb.mxu3 %v1100_v17  ;;  %v510_v16 = vld [vmem:[#allocation5 + $0x230] sm:$0xff]  ;;  %v511_v17 = vld [vmem:[#allocation5 + $0x238] sm:$0xff] }
  0xcc   : > { %1739 = vmatpush.msrb.mxu0 %v1048_v18  ;;  %1759 = vmatpush.msrb.mxu1 %v1049_v19  ;;  %v1243_v18 = vperm.slane %v7449_v40, 5  ;;  %v512_v19 = vld [vmem:[#allocation5 + $0x240] sm:$0xff] }
  0xcd   : > { %1779 = vmatpush.msrb.mxu2 %v1050_v50  ;;  %1799 = vmatpush.msrb.mxu3 %v1051_v20  ;;  %v460_v50 = vld [vmem:[#allocation5 + $0xa0] sm:$0xff] }
  0xce   : > { %1740 = vmatpush.msrb.mxu0 %v999_v21  ;;  %1760 = vmatpush.msrb.mxu1 %v1000_v22  ;;  %v461_v21 = vld [vmem:[#allocation5 + $0xa8] sm:$0xff]  ;;  %v462_v22 = vld [vmem:[#allocation5 + $0xb0] sm:$0xff] }
  0xcf   : > { %1780 = vmatpush.msrb.mxu2 %v1001_v23  ;;  %1800 = vmatpush.msrb.mxu3 %v1002_v25 }
  0xd0   : > { %1741 = vmatpush.msrb.mxu0 %v950_v26  ;;  %1761 = vmatpush.msrb.mxu1 %v951_v27  ;;  %v463_v27 = vld [vmem:[#allocation5 + $0xb8] sm:$0xff] }
  0xd1   : > { %1781 = vmatpush.msrb.mxu2 %v952_v28  ;;  %1801 = vmatpush.msrb.mxu3 %v953_v29 }
  0xd2   : > { %1742 = vmatpush.msrb.mxu0 %v901_v30  ;;  %1762 = vmatpush.msrb.mxu1 %v902_v31  ;;  %v1200_v31 = vld [vmem:[#allocation5 + $0x17c0] sm:$0xff] }
  0xd3   : > { %1782 = vmatpush.msrb.mxu2 %v903_v32  ;;  %1802 = vmatpush.msrb.mxu3 %v904_v33 }
  0xd4   : > { %1743 = vmatpush.msrb.mxu0 %v852_v34  ;;  %1763 = vmatpush.msrb.mxu1 %v853_v35  ;;  %v1199_v34 = vld [vmem:[#allocation5 + $0x17b8] sm:$0xff]  ;;  %v1201_v35 = vld [vmem:[#allocation5 + $0x17c8] sm:$0xff] }
  0xd5   : > { %1783 = vmatpush.msrb.mxu2 %v854_v36  ;;  %1803 = vmatpush.msrb.mxu3 %v855_v37 }
  0xd6   : > { %1744 = vmatpush.msrb.mxu0 %v803_v38  ;;  %1764 = vmatpush.msrb.mxu1 %v804_v39  ;;  %v1202_v38 = vld [vmem:[#allocation5 + $0x17d0] sm:$0xff]  ;;  %v1151_v39 = vld [vmem:[#allocation5 + $0x1638] sm:$0xff] }
  0xd7   : > { %1784 = vmatpush.msrb.mxu2 %v805_v41  ;;  %1804 = vmatpush.msrb.mxu3 %v806_v42  ;;  %v1150_v42 = vld [vmem:[#allocation5 + $0x1630] sm:$0xff] }
  0xd8   : > { %1745 = vmatpush.msrb.mxu0 %v754_v43  ;;  %1765 = vmatpush.msrb.mxu1 %v755_v44  ;;  %v1152_v43 = vld [vmem:[#allocation5 + $0x1640] sm:$0xff]  ;;  %v1153_v44 = vld [vmem:[#allocation5 + $0x1648] sm:$0xff] }
  0xd9   : > { %1785 = vmatpush.msrb.mxu2 %v756_v45  ;;  %1805 = vmatpush.msrb.mxu3 %v757_v46  ;;  %v1353_v57 = vpop.f32.mrf.mxu0  ;;  %v1393_v58 = vpop.f32.mrf.mxu2  ;;  %v1102_v45 = vld [vmem:[#allocation5 + $0x14b0] sm:$0xff]  ;;  %v1101_v46 = vld [vmem:[#allocation5 + $0x14a8] sm:$0xff] }
  0xda   : > { %1746 = vmatpush.msrb.mxu0 %v705_v49  ;;  %1766 = vmatpush.msrb.mxu1 %v706_v51  ;;  %v1354_v61 = vadd.f32 %v1353_v57, %v1238_v47  ;;  %v1373_v62 = vpop.f32.mrf.mxu1  ;;  %v1394_v63 = vadd.f32 %v1393_v58, %v1240_v48  ;;  %v1103_v47 = vld [vmem:[#allocation5 + $0x14b8] sm:$0xff]  ;;  %v1104_v48 = vld [vmem:[#allocation5 + $0x14c0] sm:$0xff]  ;;  %v1053_v49 = vld [vmem:[#allocation5 + $0x1328] sm:$0xff] }
  0xdb   : > { %1786 = vmatpush.msrb.mxu2 %v707_v53  ;;  %1806 = vmatpush.msrb.mxu3 %v708_v54  ;;  %v1374_v1 = vadd.f32 %v1373_v62, %v1239_v52  ;;  %v1052_v51 = vld [vmem:[#allocation5 + $0x1320] sm:$0xff]  ;;  %v1054_v52 = vld [vmem:[#allocation5 + $0x1330] sm:$0xff]  ;;  %v1055_v53 = vld [vmem:[#allocation5 + $0x1338] sm:$0xff] }
  0xdc   : > { %1747 = vmatpush.msrb.mxu0 %v656_v55  ;;  %1767 = vmatpush.msrb.mxu1 %v657_v56  ;;  %v2316_v4 = vmax.f32 %v1354_v61, 0.0  ;;  %v2318_v24 = vmax.f32 %v1394_v63, 0.0  ;;  %v1004_v54 = vld [vmem:[#allocation5 + $0x11a0] sm:$0xff]  ;;  %v1003_v55 = vld [vmem:[#allocation5 + $0x1198] sm:$0xff]  ;;  %v1005_v56 = vld [vmem:[#allocation5 + $0x11a8] sm:$0xff] }
  0xdd   : > { %1787 = vmatpush.msrb.mxu2 %v658_v59  ;;  %1807 = vmatpush.msrb.mxu3 %v659_v60  ;;  %v2317_v6 = vmax.f32 %v1374_v1, 0.0  ;;  %v1006_v57 = vld [vmem:[#allocation5 + $0x11b0] sm:$0xff]  ;;  %v955_v58 = vld [vmem:[#allocation5 + $0x1018] sm:$0xff]  ;;  %v956_v60 = vld [vmem:[#allocation5 + $0x1020] sm:$0xff] }
  0xde   : > { %1672 = vmatmul.f32.vlgmr.msra.gmra.mxu0 %v7455_v7  ;;  %1768 = vmatpush.msrb.mxu1 %v608_v0  ;;  %2366 = vst [vmem:[#allocation2 + $0x11] sm:$0x1] %v2316_v4  ;;  %v954_v59 = vld [vmem:[#allocation5 + $0x1010] sm:$0xff]  ;;  %v957_v61 = vld [vmem:[#allocation5 + $0x1028] sm:$0xff]  ;;  %v907_v0 = vld [vmem:[#allocation5 + $0xe98] sm:$0xff] }
  0xdf   : > { %1748 = vmatpush.msrb.mxu0 %v607_v2  ;;  %1788 = vmatpush.msrb.mxu2 %v609_v3  ;;  %2367 = vst [vmem:[#allocation2 + $0x12] sm:$0x1] %v2317_v6  ;;  %v906_v62 = vld [vmem:[#allocation5 + $0xe90] sm:$0xff]  ;;  %v905_v63 = vld [vmem:[#allocation5 + $0xe88] sm:$0xff]  ;;  %v908_v1 = vld [vmem:[#allocation5 + $0xea0] sm:$0xff] }
  0xe0   : > { %1808 = vmatpush.msrb.mxu3 %v610_v5  ;;  %1712 = vmatmul.f32.vlgmr.msra.gmra.mxu2 %v7455_v7  ;;  %2368 = vst [vmem:[#allocation2 + $0x13] sm:$0x1] %v2318_v24  ;;  %v857_v2 = vld [vmem:[#allocation5 + $0xd08] sm:$0xff]  ;;  %v856_v3 = vld [vmem:[#allocation5 + $0xd00] sm:$0xff]  ;;  %v858_v4 = vld [vmem:[#allocation5 + $0xd10] sm:$0xff] }
  0xe1   : > { %1732 = vmatmul.f32.vlgmr.msra.gmra.mxu3 %v7455_v7  ;;  %1749 = vmatpush.msrb.mxu0 %v558_v8  ;;  %v859_v24 = vld [vmem:[#allocation5 + $0xd18] sm:$0xff]  ;;  %v808_v5 = vld [vmem:[#allocation5 + $0xb80] sm:$0xff]  ;;  %v809_v8 = vld [vmem:[#allocation5 + $0xb88] sm:$0xff] }
  0xe2   : > { %1769 = vmatpush.msrb.mxu1 %v559_v9  ;;  %1789 = vmatpush.msrb.mxu2 %v560_v10  ;;  %v1473_v20 = vpop.f32.mrf.mxu2  ;;  %v807_v6 = vld [vmem:[#allocation5 + $0xb78] sm:$0xff]  ;;  %v810_v9 = vld [vmem:[#allocation5 + $0xb90] sm:$0xff] }
  0xe3   : > { %1809 = vmatpush.msrb.mxu3 %v561_v12  ;;  %1750 = vmatpush.msrb.mxu0 %v509_v13  ;;  %v1413_v23 = vpop.f32.mrf.mxu3  ;;  %v1433_v25 = vpop.f32.mrf.mxu0  ;;  %v1474_v26 = vadd.f32 %v1473_v20, %v1244_v11  ;;  %v759_v10 = vld [vmem:[#allocation5 + $0x9f8] sm:$0xff]  ;;  %v758_v11 = vld [vmem:[#allocation5 + $0x9f0] sm:$0xff]  ;;  %v760_v12 = vld [vmem:[#allocation5 + $0xa00] sm:$0xff] }
  0xe4   : > { %1770 = vmatpush.msrb.mxu1 %v510_v16  ;;  %1790 = vmatpush.msrb.mxu2 %v511_v17  ;;  %v1414_v28 = vadd.f32 %v1413_v23, %v1241_v14  ;;  %v1434_v29 = vadd.f32 %v1433_v25, %v1242_v15  ;;  %v1453_v30 = vpop.f32.mrf.mxu1  ;;  %v761_v13 = vld [vmem:[#allocation5 + $0xa08] sm:$0xff]  ;;  %v710_v14 = vld [vmem:[#allocation5 + $0x870] sm:$0xff]  ;;  %v711_v16 = vld [vmem:[#allocation5 + $0x878] sm:$0xff] }
  0xe5   : > { %1810 = vmatpush.msrb.mxu3 %v512_v19  ;;  %1751 = vmatpush.msrb.mxu0 %v460_v50  ;;  %v1454_v32 = vadd.f32 %v1453_v30, %v1243_v18  ;;  %v2322_v33 = vmax.f32 %v1474_v26, 0.0  ;;  %v709_v15 = vld [vmem:[#allocation5 + $0x868] sm:$0xff]  ;;  %v712_v17 = vld [vmem:[#allocation5 + $0x880] sm:$0xff]  ;;  %v662_v50 = vld [vmem:[#allocation5 + $0x6f0] sm:$0xff] }
  0xe6   : > { %1771 = vmatpush.msrb.mxu1 %v461_v21  ;;  %1791 = vmatpush.msrb.mxu2 %v462_v22  ;;  %v2319_v36 = vmax.f32 %v1414_v28, 0.0  ;;  %v2320_v37 = vmax.f32 %v1434_v29, 0.0  ;;  %v661_v18 = vld [vmem:[#allocation5 + $0x6e8] sm:$0xff]  ;;  %v660_v19 = vld [vmem:[#allocation5 + $0x6e0] sm:$0xff]  ;;  %v663_v20 = vld [vmem:[#allocation5 + $0x6f8] sm:$0xff] }
  0xe7   : > { %1811 = vmatpush.msrb.mxu3 %v463_v27  ;;  %1692 = vmatmul.f32.vlgmr.msra.gmra.mxu1 %v7455_v7  ;;  %v2321_v41 = vmax.f32 %v1454_v32, 0.0  ;;  %2372 = vst [vmem:[#allocation2 + $0x17] sm:$0x1] %v2322_v33  ;;  %v612_v21 = vld [vmem:[#allocation5 + $0x560] sm:$0xff]  ;;  %v611_v22 = vld [vmem:[#allocation5 + $0x558] sm:$0xff]  ;;  %v613_v23 = vld [vmem:[#allocation5 + $0x568] sm:$0xff] }
  0xe8   : > { %1752 = vmatmul.f32.vlgmr.msrb.gmra.mxu0 %v7455_v7  ;;  %1836 = vmatpush.msra.mxu1 %v1200_v31  ;;  %2369 = vst [vmem:[#allocation2 + $0x14] sm:$0x1] %v2319_v36  ;;  %v614_v25 = vld [vmem:[#allocation5 + $0x570] sm:$0xff]  ;;  %v563_v26 = vld [vmem:[#allocation5 + $0x3d8] sm:$0xff]  ;;  %v564_v28 = vld [vmem:[#allocation5 + $0x3e0] sm:$0xff]  ;;  %v1245_v33 = vperm.slane %v7449_v40, 7 }
  0xe9   : > { %1816 = vmatpush.msra.mxu0 %v1199_v34  ;;  %1856 = vmatpush.msra.mxu2 %v1201_v35  ;;  %2370 = vst [vmem:[#allocation2 + $0x15] sm:$0x1] %v2320_v37  ;;  %v562_v27 = vld [vmem:[#allocation5 + $0x3d0] sm:$0xff]  ;;  %v565_v29 = vld [vmem:[#allocation5 + $0x3e8] sm:$0xff]  ;;  %v515_v32 = vld [vmem:[#allocation5 + $0x258] sm:$0xff] }
  0xea   : > { %1876 = vmatpush.msra.mxu3 %v1202_v38  ;;  %1837 = vmatpush.msra.mxu1 %v1151_v39  ;;  %2371 = vst [vmem:[#allocation2 + $0x16] sm:$0x1] %v2321_v41  ;;  %v514_v30 = vld [vmem:[#allocation5 + $0x250] sm:$0xff]  ;;  %v513_v31 = vld [vmem:[#allocation5 + $0x248] sm:$0xff]  ;;  %v516_v34 = vld [vmem:[#allocation5 + $0x260] sm:$0xff] }
  0xeb   : > { %1817 = vmatpush.msra.mxu0 %v1150_v42  ;;  %1857 = vmatpush.msra.mxu2 %v1152_v43  ;;  %v465_v35 = vld [vmem:[#allocation5 + $0xc8] sm:$0xff]  ;;  %v464_v36 = vld [vmem:[#allocation5 + $0xc0] sm:$0xff]  ;;  %v466_v37 = vld [vmem:[#allocation5 + $0xd0] sm:$0xff] }
  0xec   : > { %1877 = vmatpush.msra.mxu3 %v1153_v44  ;;  %1838 = vmatpush.msra.mxu1 %v1102_v45  ;;  %v467_v38 = vld [vmem:[#allocation5 + $0xd8] sm:$0xff]  ;;  %v1204_v43 = vld [vmem:[#allocation5 + $0x17e0] sm:$0xff]  ;;  %v1205_v40 = vld [vmem:[#allocation5 + $0x17e8] sm:$0xff] }
  0xed   : > { %1818 = vmatpush.msra.mxu0 %v1101_v46  ;;  %1858 = vmatpush.msra.mxu2 %v1103_v47  ;;  %v1203_v42 = vld [vmem:[#allocation5 + $0x17d8] sm:$0xff]  ;;  %v1206_v44 = vld [vmem:[#allocation5 + $0x17f0] sm:$0xff] }
  0xee   : > { %1878 = vmatpush.msra.mxu3 %v1104_v48  ;;  %1839 = vmatpush.msra.mxu1 %v1053_v49  ;;  %v1154_v46 = vld [vmem:[#allocation5 + $0x1650] sm:$0xff]  ;;  %v1155_v47 = vld [vmem:[#allocation5 + $0x1658] sm:$0xff]  ;;  %v1156_v48 = vld [vmem:[#allocation5 + $0x1660] sm:$0xff] }
  0xef   : > { %1819 = vmatpush.msra.mxu0 %v1052_v51  ;;  %1859 = vmatpush.msra.mxu2 %v1054_v52  ;;  %v1157_v49 = vld [vmem:[#allocation5 + $0x1668] sm:$0xff]  ;;  %v1106_v52 = vld [vmem:[#allocation5 + $0x14d0] sm:$0xff] }
  0xf0   : > { %1879 = vmatpush.msra.mxu3 %v1055_v53  ;;  %1840 = vmatpush.msra.mxu1 %v1004_v54  ;;  %v1105_v51 = vld [vmem:[#allocation5 + $0x14c8] sm:$0xff]  ;;  %v1107_v53 = vld [vmem:[#allocation5 + $0x14d8] sm:$0xff]  ;;  %v1108_v54 = vld [vmem:[#allocation5 + $0x14e0] sm:$0xff] }
  0xf1   : > { %1820 = vmatpush.msra.mxu0 %v1003_v55  ;;  %1860 = vmatpush.msra.mxu2 %v1005_v56  ;;  %v1056_v55 = vld [vmem:[#allocation5 + $0x1340] sm:$0xff]  ;;  %v1057_v56 = vld [vmem:[#allocation5 + $0x1348] sm:$0xff] }
  0xf2   : > { %1880 = vmatpush.msra.mxu3 %v1006_v57  ;;  %1841 = vmatpush.msra.mxu1 %v955_v58  ;;  %v1058_v57 = vld [vmem:[#allocation5 + $0x1350] sm:$0xff]  ;;  %v1059_v58 = vld [vmem:[#allocation5 + $0x1358] sm:$0xff] }
  0xf3   : > { %1821 = vmatpush.msra.mxu0 %v954_v59  ;;  %1861 = vmatpush.msra.mxu2 %v956_v60  ;;  %v1007_v59 = vld [vmem:[#allocation5 + $0x11b8] sm:$0xff]  ;;  %v1008_v60 = vld [vmem:[#allocation5 + $0x11c0] sm:$0xff] }
  0xf4   : > { %1881 = vmatpush.msra.mxu3 %v957_v61  ;;  %1842 = vmatpush.msra.mxu1 %v906_v62  ;;  %v1009_v61 = vld [vmem:[#allocation5 + $0x11c8] sm:$0xff]  ;;  %v1010_v62 = vld [vmem:[#allocation5 + $0x11d0] sm:$0xff] }
  0xf5   : > { %1822 = vmatpush.msra.mxu0 %v905_v63  ;;  %1862 = vmatpush.msra.mxu2 %v907_v0  ;;  %v958_v63 = vld [vmem:[#allocation5 + $0x1030] sm:$0xff]  ;;  %v959_v0 = vld [vmem:[#allocation5 + $0x1038] sm:$0xff] }
  0xf6   : > { %1882 = vmatpush.msra.mxu3 %v908_v1  ;;  %1843 = vmatpush.msra.mxu1 %v857_v2  ;;  %v7470_v1 = vld [vmem:[#allocation7 + $0x8] sm:$0xff]  ;;  %v960_v2 = vld [vmem:[#allocation5 + $0x1040] sm:$0xff] }
  0xf7   : > { %1823 = vmatpush.msra.mxu0 %v856_v3  ;;  %1863 = vmatpush.msra.mxu2 %v858_v4  ;;  %v961_v3 = vld [vmem:[#allocation5 + $0x1048] sm:$0xff] }
  0xf8   : > { %1883 = vmatpush.msra.mxu3 %v859_v24  ;;  %1844 = vmatpush.msra.mxu1 %v808_v5  ;;  %v909_v4 = vld [vmem:[#allocation5 + $0xea8] sm:$0xff]  ;;  %v910_v24 = vld [vmem:[#allocation5 + $0xeb0] sm:$0xff]  ;;  %v911_v5 = vld [vmem:[#allocation5 + $0xeb8] sm:$0xff] }
  0xf9   : > { %1824 = vmatpush.msra.mxu0 %v807_v6  ;;  %1864 = vmatpush.msra.mxu2 %v809_v8  ;;  %v912_v6 = vld [vmem:[#allocation5 + $0xec0] sm:$0xff]  ;;  %v1246_v8 = vperm.slane %v7470_v1, 0 }
  0xfa   : > { %1884 = vmatpush.msra.mxu3 %v810_v9  ;;  %1845 = vmatpush.msra.mxu1 %v759_v10  ;;  %v1247_v9 = vperm.slane %v7470_v1, 1  ;;  %v860_v10 = vld [vmem:[#allocation5 + $0xd20] sm:$0xff] }
  0xfb   : > { %1825 = vmatpush.msra.mxu0 %v758_v11  ;;  %1865 = vmatpush.msra.mxu2 %v760_v12  ;;  %v861_v11 = vld [vmem:[#allocation5 + $0xd28] sm:$0xff]  ;;  %v862_v12 = vld [vmem:[#allocation5 + $0xd30] sm:$0xff] }
  0xfc   : > { %1885 = vmatpush.msra.mxu3 %v761_v13  ;;  %1846 = vmatpush.msra.mxu1 %v710_v14  ;;  %v863_v13 = vld [vmem:[#allocation5 + $0xd38] sm:$0xff] }
  0xfd   : > { %1826 = vmatpush.msra.mxu0 %v709_v15  ;;  %1866 = vmatpush.msra.mxu2 %v711_v16  ;;  %v811_v14 = vld [vmem:[#allocation5 + $0xb98] sm:$0xff]  ;;  %v812_v15 = vld [vmem:[#allocation5 + $0xba0] sm:$0xff] }
  0xfe   : > { %1886 = vmatpush.msra.mxu3 %v712_v17  ;;  %1847 = vmatpush.msra.mxu1 %v661_v18  ;;  %v813_v18 = vld [vmem:[#allocation5 + $0xba8] sm:$0xff] }
  0xff   : > { %1827 = vmatpush.msra.mxu0 %v660_v19  ;;  %1867 = vmatpush.msra.mxu2 %v662_v50  ;;  %v814_v19 = vld [vmem:[#allocation5 + $0xbb0] sm:$0xff] }
 0x100   : > { %1887 = vmatpush.msra.mxu3 %v663_v20  ;;  %1848 = vmatpush.msra.mxu1 %v612_v21  ;;  %v762_v21 = vld [vmem:[#allocation5 + $0xa10] sm:$0xff] }
 0x101   : > { %1828 = vmatpush.msra.mxu0 %v611_v22  ;;  %1868 = vmatpush.msra.mxu2 %v613_v23  ;;  %v763_v22 = vld [vmem:[#allocation5 + $0xa18] sm:$0xff]  ;;  %v764_v23 = vld [vmem:[#allocation5 + $0xa20] sm:$0xff] }
 0x102   : > { %1888 = vmatpush.msra.mxu3 %v614_v25  ;;  %1849 = vmatpush.msra.mxu1 %v563_v26  ;;  %v765_v25 = vld [vmem:[#allocation5 + $0xa28] sm:$0xff] }
 0x103   : > { %1829 = vmatpush.msra.mxu0 %v562_v27  ;;  %1869 = vmatpush.msra.mxu2 %v564_v28  ;;  %v713_v28 = vld [vmem:[#allocation5 + $0x888] sm:$0xff] }
 0x104   : > { %1889 = vmatpush.msra.mxu3 %v565_v29  ;;  %1850 = vmatpush.msra.mxu1 %v514_v30  ;;  %v714_v29 = vld [vmem:[#allocation5 + $0x890] sm:$0xff]  ;;  %v715_v30 = vld [vmem:[#allocation5 + $0x898] sm:$0xff] }
 0x105   : > { %1830 = vmatpush.msra.mxu0 %v513_v31  ;;  %1870 = vmatpush.msra.mxu2 %v515_v32  ;;  %v1493_v39 = vpop.f32.mrf.mxu3  ;;  %v716_v31 = vld [vmem:[#allocation5 + $0x8a0] sm:$0xff] }
 0x106   : > { %1890 = vmatpush.msra.mxu3 %v516_v34  ;;  %1851 = vmatpush.msra.mxu1 %v465_v35  ;;  %v1494_v41 = vadd.f32 %v1493_v39, %v1245_v33  ;;  %v664_v32 = vld [vmem:[#allocation5 + $0x700] sm:$0xff]  ;;  %v665_v33 = vld [vmem:[#allocation5 + $0x708] sm:$0xff]  ;;  %v1248_v34 = vperm.slane %v7470_v1, 2  ;;  %v1249_v35 = vperm.slane %v7470_v1, 3  ;;  %v1251_v39 = vperm.slane %v7470_v1, 5 }
 0x107   : > { %1831 = vmatpush.msra.mxu0 %v464_v36  ;;  %1871 = vmatpush.msra.mxu2 %v466_v37  ;;  %v666_v36 = vld [vmem:[#allocation5 + $0x710] sm:$0xff]  ;;  %v667_v37 = vld [vmem:[#allocation5 + $0x718] sm:$0xff] }
 0x108   : > { %1891 = vmatpush.msra.mxu3 %v467_v38  ;;  %1772 = vmatmul.f32.vlgmr.msrb.gmra.mxu1 %v7455_v7  ;;  %v2323_v45 = vmax.f32 %v1494_v41, 0.0  ;;  %v1250_v38 = vperm.slane %v7470_v1, 4  ;;  %v615_v41 = vld [vmem:[#allocation5 + $0x578] sm:$0xff] }
 0x109   : > { %1792 = vmatmul.f32.vlgmr.msrb.gmra.mxu2 %v7455_v7  ;;  %1812 = vmatmul.f32.vlgmr.msrb.gmra.mxu3 %v7455_v7 }
 0x10a   : > { %1896 = vmatpush.msrb.mxu0 %v1203_v42  ;;  %1916 = vmatpush.msrb.mxu1 %v1204_v43  ;;  %2374 = vst [vmem:[#allocation2 + $0x21] sm:$0x1] %v2323_v45  ;;  %v616_v42 = vld [vmem:[#allocation5 + $0x580] sm:$0xff]  ;;  %v617_v43 = vld [vmem:[#allocation5 + $0x588] sm:$0xff] }
 0x10b   : > { %1936 = vmatpush.msrb.mxu2 %v1205_v40  ;;  %1956 = vmatpush.msrb.mxu3 %v1206_v44  ;;  %v618_v40 = vld [vmem:[#allocation5 + $0x590] sm:$0xff] }
 0x10c   : > { %1897 = vmatpush.msrb.mxu0 %v1154_v46  ;;  %1917 = vmatpush.msrb.mxu1 %v1155_v47 }
 0x10d   : > { %1937 = vmatpush.msrb.mxu2 %v1156_v48  ;;  %1957 = vmatpush.msrb.mxu3 %v1157_v49 }
 0x10e   : > { %1898 = vmatpush.msrb.mxu0 %v1105_v51  ;;  %1918 = vmatpush.msrb.mxu1 %v1106_v52  ;;  %v566_v51 = vld [vmem:[#allocation5 + $0x3f0] sm:$0xff]  ;;  %v567_v52 = vld [vmem:[#allocation5 + $0x3f8] sm:$0xff] }
 0x10f   : > { %1938 = vmatpush.msrb.mxu2 %v1107_v53  ;;  %1958 = vmatpush.msrb.mxu3 %v1108_v54 }
 0x110   : > { %1899 = vmatpush.msrb.mxu0 %v1056_v55  ;;  %1919 = vmatpush.msrb.mxu1 %v1057_v56  ;;  %v568_v55 = vld [vmem:[#allocation5 + $0x400] sm:$0xff]  ;;  %v569_v56 = vld [vmem:[#allocation5 + $0x408] sm:$0xff] }
 0x111   : > { %1939 = vmatpush.msrb.mxu2 %v1058_v57  ;;  %1959 = vmatpush.msrb.mxu3 %v1059_v58 }
 0x112   : > { %1900 = vmatpush.msrb.mxu0 %v1007_v59  ;;  %1920 = vmatpush.msrb.mxu1 %v1008_v60  ;;  %v517_v59 = vld [vmem:[#allocation5 + $0x268] sm:$0xff]  ;;  %v518_v60 = vld [vmem:[#allocation5 + $0x270] sm:$0xff] }
 0x113   : > { %1940 = vmatpush.msrb.mxu2 %v1009_v61  ;;  %1960 = vmatpush.msrb.mxu3 %v1010_v62 }
 0x114   : > { %1901 = vmatpush.msrb.mxu0 %v958_v63  ;;  %1921 = vmatpush.msrb.mxu1 %v959_v0  ;;  %v519_v63 = vld [vmem:[#allocation5 + $0x278] sm:$0xff]  ;;  %v520_v0 = vld [vmem:[#allocation5 + $0x280] sm:$0xff] }
 0x115   : > { %1941 = vmatpush.msrb.mxu2 %v960_v2  ;;  %1961 = vmatpush.msrb.mxu3 %v961_v3  ;;  %v468_v2 = vld [vmem:[#allocation5 + $0xe0] sm:$0xff]  ;;  %v469_v3 = vld [vmem:[#allocation5 + $0xe8] sm:$0xff] }
 0x116   : > { %1902 = vmatpush.msrb.mxu0 %v909_v4  ;;  %1922 = vmatpush.msrb.mxu1 %v910_v24  ;;  %v470_v4 = vld [vmem:[#allocation5 + $0xf0] sm:$0xff]  ;;  %v471_v24 = vld [vmem:[#allocation5 + $0xf8] sm:$0xff] }
 0x117   : > { %1942 = vmatpush.msrb.mxu2 %v911_v5  ;;  %1962 = vmatpush.msrb.mxu3 %v912_v6  ;;  %v1513_v16 = vpop.f32.mrf.mxu0  ;;  %v1533_v17 = vpop.f32.mrf.mxu1  ;;  %v1207_v5 = vld [vmem:[#allocation5 + $0x17f8] sm:$0xff]  ;;  %v1208_v6 = vld [vmem:[#allocation5 + $0x1800] sm:$0xff] }
 0x118   : > { %1903 = vmatpush.msrb.mxu0 %v860_v10  ;;  %1923 = vmatpush.msrb.mxu1 %v861_v11  ;;  %v1514_v50 = vadd.f32 %v1513_v16, %v1246_v8  ;;  %v1534_v20 = vadd.f32 %v1533_v17, %v1247_v9  ;;  %v1209_v8 = vld [vmem:[#allocation5 + $0x1808] sm:$0xff]  ;;  %v1210_v9 = vld [vmem:[#allocation5 + $0x1810] sm:$0xff]  ;;  %v1159_v11 = vld [vmem:[#allocation5 + $0x1678] sm:$0xff] }
 0x119   : > { %1943 = vmatpush.msrb.mxu2 %v862_v12  ;;  %1963 = vmatpush.msrb.mxu3 %v863_v13  ;;  %v1158_v10 = vld [vmem:[#allocation5 + $0x1670] sm:$0xff]  ;;  %v1160_v12 = vld [vmem:[#allocation5 + $0x1680] sm:$0xff]  ;;  %v1161_v13 = vld [vmem:[#allocation5 + $0x1688] sm:$0xff] }
 0x11a   : > { %1904 = vmatpush.msrb.mxu0 %v811_v14  ;;  %1924 = vmatpush.msrb.mxu1 %v812_v15  ;;  %v2324_v26 = vmax.f32 %v1514_v50, 0.0  ;;  %v2325_v27 = vmax.f32 %v1534_v20, 0.0  ;;  %v1109_v14 = vld [vmem:[#allocation5 + $0x14e8] sm:$0xff]  ;;  %v1110_v15 = vld [vmem:[#allocation5 + $0x14f0] sm:$0xff]  ;;  %v1111_v16 = vld [vmem:[#allocation5 + $0x14f8] sm:$0xff] }
 0x11b   : > { %1944 = vmatpush.msrb.mxu2 %v813_v18  ;;  %1964 = vmatpush.msrb.mxu3 %v814_v19  ;;  %v1112_v17 = vld [vmem:[#allocation5 + $0x1500] sm:$0xff]  ;;  %v1061_v19 = vld [vmem:[#allocation5 + $0x1368] sm:$0xff]  ;;  %v1062_v50 = vld [vmem:[#allocation5 + $0x1370] sm:$0xff] }
 0x11c   : > { %1905 = vmatpush.msrb.mxu0 %v762_v21  ;;  %1925 = vmatpush.msrb.mxu1 %v763_v22  ;;  %2375 = vst [vmem:[#allocation2 + $0x22] sm:$0x1] %v2324_v26  ;;  %v1060_v18 = vld [vmem:[#allocation5 + $0x1360] sm:$0xff]  ;;  %v1063_v20 = vld [vmem:[#allocation5 + $0x1378] sm:$0xff]  ;;  %v962_v26 = vld [vmem:[#allocation5 + $0x1050] sm:$0xff] }
 0x11d   : > { %1945 = vmatpush.msrb.mxu2 %v764_v23  ;;  %1965 = vmatpush.msrb.mxu3 %v765_v25  ;;  %2376 = vst [vmem:[#allocation2 + $0x23] sm:$0x1] %v2325_v27  ;;  %v1011_v21 = vld [vmem:[#allocation5 + $0x11d8] sm:$0xff]  ;;  %v1012_v22 = vld [vmem:[#allocation5 + $0x11e0] sm:$0xff]  ;;  %v1013_v23 = vld [vmem:[#allocation5 + $0x11e8] sm:$0xff] }
 0x11e   : > { %1906 = vmatpush.msrb.mxu0 %v713_v28  ;;  %1926 = vmatpush.msrb.mxu1 %v714_v29  ;;  %v1014_v25 = vld [vmem:[#allocation5 + $0x11f0] sm:$0xff]  ;;  %v963_v27 = vld [vmem:[#allocation5 + $0x1058] sm:$0xff]  ;;  %v964_v28 = vld [vmem:[#allocation5 + $0x1060] sm:$0xff] }
 0x11f   : > { %1946 = vmatpush.msrb.mxu2 %v715_v30  ;;  %1966 = vmatpush.msrb.mxu3 %v716_v31  ;;  %v965_v29 = vld [vmem:[#allocation5 + $0x1068] sm:$0xff]  ;;  %v914_v31 = vld [vmem:[#allocation5 + $0xed0] sm:$0xff] }
 0x120   : > { %1907 = vmatpush.msrb.mxu0 %v664_v32  ;;  %1927 = vmatpush.msrb.mxu1 %v665_v33  ;;  %v1553_v44 = vpop.f32.mrf.mxu2  ;;  %v1573_v45 = vpop.f32.mrf.mxu3  ;;  %v913_v30 = vld [vmem:[#allocation5 + $0xec8] sm:$0xff]  ;;  %v915_v32 = vld [vmem:[#allocation5 + $0xed8] sm:$0xff]  ;;  %v916_v33 = vld [vmem:[#allocation5 + $0xee0] sm:$0xff] }
 0x121   : > { %1947 = vmatpush.msrb.mxu2 %v666_v36  ;;  %1967 = vmatpush.msrb.mxu3 %v667_v37  ;;  %v1554_v46 = vadd.f32 %v1553_v44, %v1248_v34  ;;  %v1574_v47 = vadd.f32 %v1573_v45, %v1249_v35  ;;  %v1593_v48 = vpop.f32.mrf.mxu0  ;;  %v1613_v49 = vpop.f32.mrf.mxu1  ;;  %v864_v34 = vld [vmem:[#allocation5 + $0xd40] sm:$0xff]  ;;  %v865_v35 = vld [vmem:[#allocation5 + $0xd48] sm:$0xff]  ;;  %v866_v36 = vld [vmem:[#allocation5 + $0xd50] sm:$0xff] }
 0x122   : > { %1908 = vmatpush.msrb.mxu0 %v615_v41  ;;  %1928 = vmatpush.msrb.mxu1 %v616_v42  ;;  %v1594_v53 = vadd.f32 %v1593_v48, %v1250_v38  ;;  %v1614_v54 = vadd.f32 %v1613_v49, %v1251_v39  ;;  %v867_v37 = vld [vmem:[#allocation5 + $0xd58] sm:$0xff]  ;;  %v816_v39 = vld [vmem:[#allocation5 + $0xbc0] sm:$0xff]  ;;  %v817_v41 = vld [vmem:[#allocation5 + $0xbc8] sm:$0xff] }
 0x123   : > { %1948 = vmatpush.msrb.mxu2 %v617_v43  ;;  %1968 = vmatpush.msrb.mxu3 %v618_v40  ;;  %v2326_v57 = vmax.f32 %v1554_v46, 0.0  ;;  %v2327_v58 = vmax.f32 %v1574_v47, 0.0  ;;  %v815_v38 = vld [vmem:[#allocation5 + $0xbb8] sm:$0xff]  ;;  %v818_v42 = vld [vmem:[#allocation5 + $0xbd0] sm:$0xff]  ;;  %v768_v44 = vld [vmem:[#allocation5 + $0xa40] sm:$0xff] }
 0x124   : > { %1872 = vmatmul.f32.vlgmr.msra.gmra.mxu2 %v7455_v7  ;;  %1892 = vmatmul.f32.vlgmr.msra.gmra.mxu3 %v7455_v7  ;;  %v2328_v61 = vmax.f32 %v1594_v53, 0.0  ;;  %v2329_v62 = vmax.f32 %v1614_v54, 0.0  ;;  %v766_v43 = vld [vmem:[#allocation5 + $0xa30] sm:$0xff]  ;;  %v767_v40 = vld [vmem:[#allocation5 + $0xa38] sm:$0xff]  ;;  %v769_v45 = vld [vmem:[#allocation5 + $0xa48] sm:$0xff] }
 0x125   : > { %1909 = vmatpush.msrb.mxu0 %v566_v51  ;;  %1929 = vmatpush.msrb.mxu1 %v567_v52  ;;  %2377 = vst [vmem:[#allocation2 + $0x24] sm:$0x1] %v2326_v57  ;;  %v717_v46 = vld [vmem:[#allocation5 + $0x8a8] sm:$0xff]  ;;  %v718_v47 = vld [vmem:[#allocation5 + $0x8b0] sm:$0xff]  ;;  %v719_v48 = vld [vmem:[#allocation5 + $0x8b8] sm:$0xff] }
 0x126   : > { %1949 = vmatpush.msrb.mxu2 %v568_v55  ;;  %1969 = vmatpush.msrb.mxu3 %v569_v56  ;;  %2378 = vst [vmem:[#allocation2 + $0x25] sm:$0x1] %v2327_v58  ;;  %v720_v49 = vld [vmem:[#allocation5 + $0x8c0] sm:$0xff]  ;;  %v669_v52 = vld [vmem:[#allocation5 + $0x728] sm:$0xff]  ;;  %v670_v53 = vld [vmem:[#allocation5 + $0x730] sm:$0xff] }
 0x127   : > { %1910 = vmatpush.msrb.mxu0 %v517_v59  ;;  %1930 = vmatpush.msrb.mxu1 %v518_v60  ;;  %2379 = vst [vmem:[#allocation2 + $0x26] sm:$0x1] %v2328_v61  ;;  %v668_v51 = vld [vmem:[#allocation5 + $0x720] sm:$0xff]  ;;  %v671_v54 = vld [vmem:[#allocation5 + $0x738] sm:$0xff]  ;;  %v621_v57 = vld [vmem:[#allocation5 + $0x5a8] sm:$0xff] }
 0x128   : > { %1950 = vmatpush.msrb.mxu2 %v519_v63  ;;  %1970 = vmatpush.msrb.mxu3 %v520_v0  ;;  %2380 = vst [vmem:[#allocation2 + $0x27] sm:$0x1] %v2329_v62  ;;  %v619_v55 = vld [vmem:[#allocation5 + $0x598] sm:$0xff]  ;;  %v620_v56 = vld [vmem:[#allocation5 + $0x5a0] sm:$0xff]  ;;  %v622_v58 = vld [vmem:[#allocation5 + $0x5b0] sm:$0xff] }
 0x129   : > { %1911 = vmatpush.msrb.mxu0 %v468_v2  ;;  %1931 = vmatpush.msrb.mxu1 %v469_v3  ;;  %v570_v59 = vld [vmem:[#allocation5 + $0x410] sm:$0xff]  ;;  %v571_v60 = vld [vmem:[#allocation5 + $0x418] sm:$0xff]  ;;  %v572_v61 = vld [vmem:[#allocation5 + $0x420] sm:$0xff] }
 0x12a   : > { %1951 = vmatpush.msrb.mxu2 %v470_v4  ;;  %1971 = vmatpush.msrb.mxu3 %v471_v24  ;;  %v573_v62 = vld [vmem:[#allocation5 + $0x428] sm:$0xff]  ;;  %v522_v0 = vld [vmem:[#allocation5 + $0x290] sm:$0xff]  ;;  %v523_v2 = vld [vmem:[#allocation5 + $0x298] sm:$0xff]  ;;  %v1252_v4 = vperm.slane %v7470_v1, 6  ;;  %v1253_v24 = vperm.slane %v7470_v1, 7 }
 0x12b   : > { %1832 = vmatmul.f32.vlgmr.msra.gmra.mxu0 %v7455_v7  ;;  %1852 = vmatmul.f32.vlgmr.msra.gmra.mxu1 %v7455_v7  ;;  %v521_v63 = vld [vmem:[#allocation5 + $0x288] sm:$0xff]  ;;  %v524_v3 = vld [vmem:[#allocation5 + $0x2a0] sm:$0xff] }
 0x12c   : > { %1976 = vmatpush.msra.mxu0 %v1207_v5  ;;  %1996 = vmatpush.msra.mxu1 %v1208_v6  ;;  %v472_v5 = vld [vmem:[#allocation5 + $0x100] sm:$0xff] }
 0x12d   : > { %2016 = vmatpush.msra.mxu2 %v1209_v8  ;;  %2036 = vmatpush.msra.mxu3 %v1210_v9  ;;  %v473_v9 = vld [vmem:[#allocation5 + $0x108] sm:$0xff] }
 0x12e   : > { %1977 = vmatpush.msra.mxu0 %v1158_v10  ;;  %1997 = vmatpush.msra.mxu1 %v1159_v11  ;;  %v474_v10 = vld [vmem:[#allocation5 + $0x110] sm:$0xff] }
 0x12f   : > { %2017 = vmatpush.msra.mxu2 %v1160_v12  ;;  %2037 = vmatpush.msra.mxu3 %v1161_v13  ;;  %v475_v13 = vld [vmem:[#allocation5 + $0x118] sm:$0xff] }
 0x130   : > { %1978 = vmatpush.msra.mxu0 %v1109_v14  ;;  %1998 = vmatpush.msra.mxu1 %v1110_v15  ;;  %v1211_v14 = vld [vmem:[#allocation5 + $0x1818] sm:$0xff] }
 0x131   : > { %2018 = vmatpush.msra.mxu2 %v1111_v16  ;;  %2038 = vmatpush.msra.mxu3 %v1112_v17  ;;  %v1212_v16 = vld [vmem:[#allocation5 + $0x1820] sm:$0xff]  ;;  %v1213_v17 = vld [vmem:[#allocation5 + $0x1828] sm:$0xff] }
 0x132   : > { %1979 = vmatpush.msra.mxu0 %v1060_v18  ;;  %1999 = vmatpush.msra.mxu1 %v1061_v19  ;;  %v1214_v18 = vld [vmem:[#allocation5 + $0x1830] sm:$0xff] }
 0x133   : > { %2019 = vmatpush.msra.mxu2 %v1062_v50  ;;  %2039 = vmatpush.msra.mxu3 %v1063_v20  ;;  %v1162_v19 = vld [vmem:[#allocation5 + $0x1690] sm:$0xff]  ;;  %v1163_v50 = vld [vmem:[#allocation5 + $0x1698] sm:$0xff]  ;;  %v1164_v20 = vld [vmem:[#allocation5 + $0x16a0] sm:$0xff] }
 0x134   : > { %1980 = vmatpush.msra.mxu0 %v1011_v21  ;;  %2000 = vmatpush.msra.mxu1 %v1012_v22  ;;  %v1165_v21 = vld [vmem:[#allocation5 + $0x16a8] sm:$0xff] }
 0x135   : > { %2020 = vmatpush.msra.mxu2 %v1013_v23  ;;  %2040 = vmatpush.msra.mxu3 %v1014_v25  ;;  %v1113_v22 = vld [vmem:[#allocation5 + $0x1508] sm:$0xff]  ;;  %v1114_v23 = vld [vmem:[#allocation5 + $0x1510] sm:$0xff]  ;;  %v1115_v25 = vld [vmem:[#allocation5 + $0x1518] sm:$0xff] }
 0x136   : > { %1981 = vmatpush.msra.mxu0 %v962_v26  ;;  %2001 = vmatpush.msra.mxu1 %v963_v27  ;;  %v1116_v26 = vld [vmem:[#allocation5 + $0x1520] sm:$0xff] }
 0x137   : > { %2021 = vmatpush.msra.mxu2 %v964_v28  ;;  %2041 = vmatpush.msra.mxu3 %v965_v29  ;;  %v1064_v27 = vld [vmem:[#allocation5 + $0x1380] sm:$0xff]  ;;  %v1066_v28 = vld [vmem:[#allocation5 + $0x1390] sm:$0xff] }
 0x138   : > { %1982 = vmatpush.msra.mxu0 %v913_v30  ;;  %2002 = vmatpush.msra.mxu1 %v914_v31  ;;  %v7490_v29 = vld [vmem:[%s7344_s10] sm:$0x1]  ;;  %v1067_v30 = vld [vmem:[#allocation5 + $0x1398] sm:$0xff] }
 0x139   : > { %2022 = vmatpush.msra.mxu2 %v915_v32  ;;  %2042 = vmatpush.msra.mxu3 %v916_v33  ;;  %v1015_v31 = vld [vmem:[#allocation5 + $0x11f8] sm:$0xff]  ;;  %v1016_v32 = vld [vmem:[#allocation5 + $0x1200] sm:$0xff]  ;;  %v1017_v33 = vld [vmem:[#allocation5 + $0x1208] sm:$0xff] }
 0x13a   : > { %1983 = vmatpush.msra.mxu0 %v864_v34  ;;  %2003 = vmatpush.msra.mxu1 %v865_v35  ;;  %v7494_v34 = vld [vmem:[#allocation7 + $0x10] sm:$0xff] }
 0x13b   : > { %2023 = vmatpush.msra.mxu2 %v866_v36  ;;  %2043 = vmatpush.msra.mxu3 %v867_v37  ;;  %v1018_v35 = vld [vmem:[#allocation5 + $0x1210] sm:$0xff]  ;;  %v967_v37 = vld [vmem:[#allocation5 + $0x1078] sm:$0xff] }
 0x13c   : > { %1984 = vmatpush.msra.mxu0 %v815_v38  ;;  %2004 = vmatpush.msra.mxu1 %v816_v39  ;;  %v966_v36 = vld [vmem:[#allocation5 + $0x1070] sm:$0xff]  ;;  %v968_v38 = vld [vmem:[#allocation5 + $0x1080] sm:$0xff]  ;;  %v969_v39 = vld [vmem:[#allocation5 + $0x1088] sm:$0xff] }
 0x13d   : > { %2024 = vmatpush.msra.mxu2 %v817_v41  ;;  %2044 = vmatpush.msra.mxu3 %v818_v42  ;;  %v917_v41 = vld [vmem:[#allocation5 + $0xee8] sm:$0xff]  ;;  %v1254_v42 = vperm.slane %v7494_v34, 0 }
 0x13e   : > { %1985 = vmatpush.msra.mxu0 %v766_v43  ;;  %2005 = vmatpush.msra.mxu1 %v767_v40  ;;  %v918_v43 = vld [vmem:[#allocation5 + $0xef0] sm:$0xff]  ;;  %v919_v40 = vld [vmem:[#allocation5 + $0xef8] sm:$0xff] }
 0x13f   : > { %2025 = vmatpush.msra.mxu2 %v768_v44  ;;  %2045 = vmatpush.msra.mxu3 %v769_v45  ;;  %v920_v44 = vld [vmem:[#allocation5 + $0xf00] sm:$0xff] }
 0x140   : > { %1986 = vmatpush.msra.mxu0 %v717_v46  ;;  %2006 = vmatpush.msra.mxu1 %v718_v47  ;;  %v868_v45 = vld [vmem:[#allocation5 + $0xd60] sm:$0xff]  ;;  %v869_v46 = vld [vmem:[#allocation5 + $0xd68] sm:$0xff]  ;;  %v870_v47 = vld [vmem:[#allocation5 + $0xd70] sm:$0xff] }
 0x141   : > { %2026 = vmatpush.msra.mxu2 %v719_v48  ;;  %2046 = vmatpush.msra.mxu3 %v720_v49  ;;  %v871_v49 = vld [vmem:[#allocation5 + $0xd78] sm:$0xff] }
 0x142   : > { %1987 = vmatpush.msra.mxu0 %v668_v51  ;;  %2007 = vmatpush.msra.mxu1 %v669_v52  ;;  %v819_v51 = vld [vmem:[#allocation5 + $0xbd8] sm:$0xff] }
 0x143   : > { %2027 = vmatpush.msra.mxu2 %v670_v53  ;;  %2047 = vmatpush.msra.mxu3 %v671_v54  ;;  %v820_v53 = vld [vmem:[#allocation5 + $0xbe0] sm:$0xff]  ;;  %v821_v54 = vld [vmem:[#allocation5 + $0xbe8] sm:$0xff] }
 0x144   : > { %1952 = vmatmul.f32.vlgmr.msrb.gmra.mxu2 %v7455_v7  ;;  %1988 = vmatpush.msra.mxu0 %v619_v55  ;;  %v822_v55 = vld [vmem:[#allocation5 + $0xbf0] sm:$0xff] }
 0x145   : > { %2008 = vmatpush.msra.mxu1 %v620_v56  ;;  %2028 = vmatpush.msra.mxu2 %v621_v57  ;;  %v770_v56 = vld [vmem:[#allocation5 + $0xa50] sm:$0xff] }
 0x146   : > { %2048 = vmatpush.msra.mxu3 %v622_v58  ;;  %1989 = vmatpush.msra.mxu0 %v570_v59  ;;  %v771_v58 = vld [vmem:[#allocation5 + $0xa58] sm:$0xff]  ;;  %v772_v59 = vld [vmem:[#allocation5 + $0xa60] sm:$0xff] }
 0x147   : > { %2009 = vmatpush.msra.mxu1 %v571_v60  ;;  %2029 = vmatpush.msra.mxu2 %v572_v61  ;;  %v773_v60 = vld [vmem:[#allocation5 + $0xa68] sm:$0xff] }
 0x148   : > { %2049 = vmatpush.msra.mxu3 %v573_v62  ;;  %1990 = vmatpush.msra.mxu0 %v521_v63  ;;  %v1633_v6 = vpop.f32.mrf.mxu2  ;;  %v1653_v8 = vpop.f32.mrf.mxu3  ;;  %v721_v61 = vld [vmem:[#allocation5 + $0x8c8] sm:$0xff]  ;;  %v1256_v62 = vperm.slane %v7494_v34, 2  ;;  %v722_v63 = vld [vmem:[#allocation5 + $0x8d0] sm:$0xff] }
 0x149   : > { %2010 = vmatpush.msra.mxu1 %v522_v0  ;;  %2030 = vmatpush.msra.mxu2 %v523_v2  ;;  %v1634_v11 = vadd.f32 %v1633_v6, %v1252_v4  ;;  %v1654_v12 = vadd.f32 %v1653_v8, %v1253_v24  ;;  %v723_v0 = vld [vmem:[#allocation5 + $0x8d8] sm:$0xff]  ;;  %v1255_v2 = vperm.slane %v7494_v34, 1  ;;  %v724_v4 = vld [vmem:[#allocation5 + $0x8e0] sm:$0xff]  ;;  %v673_v6 = vld [vmem:[#allocation5 + $0x748] sm:$0xff] }
 0x14a   : > { %2050 = vmatpush.msra.mxu3 %v524_v3  ;;  %1912 = vmatmul.f32.vlgmr.msrb.gmra.mxu0 %v7455_v7  ;;  %v1257_v3 = vperm.slane %v7494_v34, 3  ;;  %v672_v24 = vld [vmem:[#allocation5 + $0x740] sm:$0xff]  ;;  %v674_v8 = vld [vmem:[#allocation5 + $0x750] sm:$0xff] }
 0x14b   : > { %1932 = vmatmul.f32.vlgmr.msrb.gmra.mxu1 %v7455_v7  ;;  %1991 = vmatpush.msra.mxu0 %v472_v5  ;;  %v2330_v1 = vmax.f32 %v1634_v11, 0.0  ;;  %v2331_v15 = vmax.f32 %v1654_v12, 0.0  ;;  %v1258_v5 = vperm.slane %v7494_v34, 4  ;;  %v623_v11 = vld [vmem:[#allocation5 + $0x5b8] sm:$0xff] }
 0x14c   : > { %2011 = vmatpush.msra.mxu1 %v473_v9  ;;  %2031 = vmatpush.msra.mxu2 %v474_v10  ;;  %v675_v10 = vld [vmem:[#allocation5 + $0x758] sm:$0xff] }
 0x14d   : > { %2051 = vmatpush.msra.mxu3 %v475_v13  ;;  %2032 = vmatmul.f32.vlgmr.msra.gmra.mxu2 %v7455_v7  ;;  %2382 = vst [vmem:[#allocation2 + $0x31] sm:$0x1] %v2330_v1  ;;  %v624_v1 = vld [vmem:[#allocation5 + $0x5c0] sm:$0xff] }
 0x14e   : > { %1972 = vmatmul.f32.vlgmr.msrb.gmra.mxu3 %v7455_v7  ;;  %2056 = vmatpush.msrb.mxu0 %v1211_v14  ;;  %2383 = vst [vmem:[#allocation2 + $0x32] sm:$0x1] %v2331_v15  ;;  %v1065_v7 = vld [vmem:[#allocation5 + $0x1388] sm:$0xff] }
 0x14f   : > { %2076 = vmatpush.msrb.mxu1 %v1212_v16  ;;  %2096 = vmatpush.msrb.mxu2 %v1213_v17  ;;  %v625_v15 = vld [vmem:[#allocation5 + $0x5c8] sm:$0xff] }
 0x150   : > { %2116 = vmatpush.msrb.mxu3 %v1214_v18  ;;  %2057 = vmatpush.msrb.mxu0 %v1162_v19  ;;  %v626_v19 = vld [vmem:[#allocation5 + $0x5d0] sm:$0xff] }
 0x151   : > { %2077 = vmatpush.msrb.mxu1 %v1163_v50  ;;  %2097 = vmatpush.msrb.mxu2 %v1164_v20  ;;  %v574_v50 = vld [vmem:[#allocation5 + $0x430] sm:$0xff] }
 0x152   : > { %2117 = vmatpush.msrb.mxu3 %v1165_v21  ;;  %2058 = vmatpush.msrb.mxu0 %v1113_v22  ;;  %v575_v22 = vld [vmem:[#allocation5 + $0x438] sm:$0xff] }
 0x153   : > { %2078 = vmatpush.msrb.mxu1 %v1114_v23  ;;  %2098 = vmatpush.msrb.mxu2 %v1115_v25  ;;  %v576_v23 = vld [vmem:[#allocation5 + $0x440] sm:$0xff] }
 0x154   : > { %2118 = vmatpush.msrb.mxu3 %v1116_v26  ;;  %1992 = vmatmul.f32.vlgmr.msra.gmra.mxu0 %v7490_v29 }
 0x155   : > { %2012 = vmatmul.f32.vlgmr.msra.gmra.mxu1 %v7490_v29  ;;  %2059 = vmatpush.msrb.mxu0 %v1064_v27  ;;  %v577_v27 = vld [vmem:[#allocation5 + $0x448] sm:$0xff] }
 0x156   : > { %2079 = vmatpush.msrb.mxu1 %v1065_v7  ;;  %2099 = vmatpush.msrb.mxu2 %v1066_v28  ;;  %v525_v7 = vld [vmem:[#allocation5 + $0x2a8] sm:$0xff] }
 0x157   : > { %2119 = vmatpush.msrb.mxu3 %v1067_v30  ;;  %2060 = vmatpush.msrb.mxu0 %v1015_v31  ;;  %v526_v30 = vld [vmem:[#allocation5 + $0x2b0] sm:$0xff]  ;;  %v527_v31 = vld [vmem:[#allocation5 + $0x2b8] sm:$0xff] }
 0x158   : > { %2080 = vmatpush.msrb.mxu1 %v1016_v32  ;;  %2100 = vmatpush.msrb.mxu2 %v1017_v33  ;;  %v528_v32 = vld [vmem:[#allocation5 + $0x2c0] sm:$0xff] }
 0x159   : > { %2120 = vmatpush.msrb.mxu3 %v1018_v35  ;;  %2061 = vmatpush.msrb.mxu0 %v966_v36  ;;  %v476_v33 = vld [vmem:[#allocation5 + $0x120] sm:$0xff]  ;;  %v477_v35 = vld [vmem:[#allocation5 + $0x128] sm:$0xff]  ;;  %v478_v36 = vld [vmem:[#allocation5 + $0x130] sm:$0xff] }
 0x15a   : > { %2081 = vmatpush.msrb.mxu1 %v967_v37  ;;  %2101 = vmatpush.msrb.mxu2 %v968_v38  ;;  %v479_v37 = vld [vmem:[#allocation5 + $0x138] sm:$0xff] }
 0x15b   : > { %2121 = vmatpush.msrb.mxu3 %v969_v39  ;;  %2062 = vmatpush.msrb.mxu0 %v917_v41  ;;  %v1673_v48 = vpop.f32.mrf.mxu0  ;;  %v1215_v38 = vld [vmem:[#allocation5 + $0x1838] sm:$0xff]  ;;  %v1216_v39 = vld [vmem:[#allocation5 + $0x1840] sm:$0xff]  ;;  %v1217_v41 = vld [vmem:[#allocation5 + $0x1848] sm:$0xff] }
 0x15c   : > { %2082 = vmatpush.msrb.mxu1 %v918_v43  ;;  %2102 = vmatpush.msrb.mxu2 %v919_v40  ;;  %v1674_v52 = vadd.f32 %v1673_v48, %v1254_v42  ;;  %v1218_v42 = vld [vmem:[#allocation5 + $0x1850] sm:$0xff]  ;;  %v1167_v40 = vld [vmem:[#allocation5 + $0x16b8] sm:$0xff] }
 0x15d   : > { %2122 = vmatpush.msrb.mxu3 %v920_v44  ;;  %2063 = vmatpush.msrb.mxu0 %v868_v45  ;;  %v1166_v43 = vld [vmem:[#allocation5 + $0x16b0] sm:$0xff]  ;;  %v1168_v44 = vld [vmem:[#allocation5 + $0x16c0] sm:$0xff]  ;;  %v1169_v45 = vld [vmem:[#allocation5 + $0x16c8] sm:$0xff] }
 0x15e   : > { %2083 = vmatpush.msrb.mxu1 %v869_v46  ;;  %2103 = vmatpush.msrb.mxu2 %v870_v47  ;;  %v2332_v57 = vmax.f32 %v1674_v52, 0.0  ;;  %v1117_v46 = vld [vmem:[#allocation5 + $0x1528] sm:$0xff]  ;;  %v1118_v47 = vld [vmem:[#allocation5 + $0x1530] sm:$0xff]  ;;  %v1119_v48 = vld [vmem:[#allocation5 + $0x1538] sm:$0xff] }
 0x15f   : > { %2123 = vmatpush.msrb.mxu3 %v871_v49  ;;  %2064 = vmatpush.msrb.mxu0 %v819_v51  ;;  %v1120_v49 = vld [vmem:[#allocation5 + $0x1540] sm:$0xff]  ;;  %v1069_v52 = vld [vmem:[#allocation5 + $0x13a8] sm:$0xff] }
 0x160   : > { %2084 = vmatpush.msrb.mxu1 %v820_v53  ;;  %2104 = vmatpush.msrb.mxu2 %v821_v54  ;;  %2384 = vst [vmem:[#allocation2 + $0x33] sm:$0x1] %v2332_v57  ;;  %v1068_v51 = vld [vmem:[#allocation5 + $0x13a0] sm:$0xff]  ;;  %v1070_v53 = vld [vmem:[#allocation5 + $0x13b0] sm:$0xff]  ;;  %v1071_v54 = vld [vmem:[#allocation5 + $0x13b8] sm:$0xff] }
 0x161   : > { %2124 = vmatpush.msrb.mxu3 %v822_v55  ;;  %2065 = vmatpush.msrb.mxu0 %v770_v56  ;;  %v1019_v55 = vld [vmem:[#allocation5 + $0x1218] sm:$0xff]  ;;  %v1020_v56 = vld [vmem:[#allocation5 + $0x1220] sm:$0xff]  ;;  %v1021_v57 = vld [vmem:[#allocation5 + $0x1228] sm:$0xff] }
 0x162   : > { %2085 = vmatpush.msrb.mxu1 %v771_v58  ;;  %2105 = vmatpush.msrb.mxu2 %v772_v59  ;;  %v1022_v58 = vld [vmem:[#allocation5 + $0x1230] sm:$0xff] }
 0x163   : > { %2125 = vmatpush.msrb.mxu3 %v773_v60  ;;  %2066 = vmatpush.msrb.mxu0 %v721_v61  ;;  %v1713_v9 = vpop.f32.mrf.mxu2  ;;  %v970_v59 = vld [vmem:[#allocation5 + $0x1090] sm:$0xff]  ;;  %v971_v60 = vld [vmem:[#allocation5 + $0x1098] sm:$0xff]  ;;  %v972_v61 = vld [vmem:[#allocation5 + $0x10a0] sm:$0xff] }
 0x164   : > { %2086 = vmatpush.msrb.mxu1 %v722_v63  ;;  %2106 = vmatpush.msrb.mxu2 %v723_v0  ;;  %v1693_v12 = vpop.f32.mrf.mxu1  ;;  %v1714_v13 = vadd.f32 %v1713_v9, %v1256_v62  ;;  %v1733_v14 = vpop.f32.mrf.mxu3  ;;  %v973_v62 = vld [vmem:[#allocation5 + $0x10a8] sm:$0xff]  ;;  %v922_v0 = vld [vmem:[#allocation5 + $0xf10] sm:$0xff]  ;;  %v824_v9 = vld [vmem:[#allocation5 + $0xc00] sm:$0xff] }
 0x165   : > { %2126 = vmatpush.msrb.mxu3 %v724_v4  ;;  %2067 = vmatpush.msrb.mxu0 %v672_v24  ;;  %v1694_v16 = vadd.f32 %v1693_v12, %v1255_v2  ;;  %v1734_v17 = vadd.f32 %v1733_v14, %v1257_v3  ;;  %v1753_v18 = vpop.f32.mrf.mxu0  ;;  %v921_v63 = vld [vmem:[#allocation5 + $0xf08] sm:$0xff]  ;;  %v923_v2 = vld [vmem:[#allocation5 + $0xf18] sm:$0xff]  ;;  %v924_v3 = vld [vmem:[#allocation5 + $0xf20] sm:$0xff] }
 0x166   : > { %2087 = vmatpush.msrb.mxu1 %v673_v6  ;;  %2107 = vmatpush.msrb.mxu2 %v674_v8  ;;  %v2334_v20 = vmax.f32 %v1714_v13, 0.0  ;;  %v1754_v21 = vadd.f32 %v1753_v18, %v1258_v5  ;;  %v872_v4 = vld [vmem:[#allocation5 + $0xd80] sm:$0xff]  ;;  %v873_v24 = vld [vmem:[#allocation5 + $0xd88] sm:$0xff]  ;;  %v874_v5 = vld [vmem:[#allocation5 + $0xd90] sm:$0xff] }
 0x167   : > { %2127 = vmatpush.msrb.mxu3 %v675_v10  ;;  %2068 = vmatpush.msrb.mxu0 %v623_v11  ;;  %v2333_v25 = vmax.f32 %v1694_v16, 0.0  ;;  %v2335_v26 = vmax.f32 %v1734_v17, 0.0  ;;  %v875_v6 = vld [vmem:[#allocation5 + $0xd98] sm:$0xff]  ;;  %v825_v10 = vld [vmem:[#allocation5 + $0xc08] sm:$0xff]  ;;  %v826_v11 = vld [vmem:[#allocation5 + $0xc10] sm:$0xff] }
 0x168   : > { %2088 = vmatpush.msrb.mxu1 %v624_v1  ;;  %2108 = vmatpush.msrb.mxu2 %v625_v15  ;;  %2386 = vst [vmem:[#allocation2 + $0x35] sm:$0x1] %v2334_v20  ;;  %v2336_v28 = vmax.f32 %v1754_v21, 0.0  ;;  %v823_v8 = vld [vmem:[#allocation5 + $0xbf8] sm:$0xff]  ;;  %v774_v12 = vld [vmem:[#allocation5 + $0xa70] sm:$0xff]  ;;  %v776_v14 = vld [vmem:[#allocation5 + $0xa80] sm:$0xff] }
 0x169   : > { %2128 = vmatpush.msrb.mxu3 %v626_v19  ;;  %2069 = vmatpush.msrb.mxu0 %v574_v50  ;;  %2385 = vst [vmem:[#allocation2 + $0x34] sm:$0x1] %v2333_v25  ;;  %v775_v13 = vld [vmem:[#allocation5 + $0xa78] sm:$0xff]  ;;  %v777_v1 = vld [vmem:[#allocation5 + $0xa88] sm:$0xff]  ;;  %v726_v16 = vld [vmem:[#allocation5 + $0x8f0] sm:$0xff] }
 0x16a   : > { %2089 = vmatpush.msrb.mxu1 %v575_v22  ;;  %2109 = vmatpush.msrb.mxu2 %v576_v23  ;;  %2387 = vst [vmem:[#allocation2 + $0x36] sm:$0x1] %v2335_v26  ;;  %v725_v15 = vld [vmem:[#allocation5 + $0x8e8] sm:$0xff]  ;;  %v727_v17 = vld [vmem:[#allocation5 + $0x8f8] sm:$0xff]  ;;  %v728_v18 = vld [vmem:[#allocation5 + $0x900] sm:$0xff] }
 0x16b   : > { %2129 = vmatpush.msrb.mxu3 %v577_v27  ;;  %2070 = vmatpush.msrb.mxu0 %v525_v7  ;;  %2388 = vst [vmem:[#allocation2 + $0x37] sm:$0x1] %v2336_v28  ;;  %v676_v19 = vld [vmem:[#allocation5 + $0x760] sm:$0xff]  ;;  %v677_v50 = vld [vmem:[#allocation5 + $0x768] sm:$0xff]  ;;  %v678_v20 = vld [vmem:[#allocation5 + $0x770] sm:$0xff] }
 0x16c   : > { %2090 = vmatpush.msrb.mxu1 %v526_v30  ;;  %2110 = vmatpush.msrb.mxu2 %v527_v31  ;;  %v679_v21 = vld [vmem:[#allocation5 + $0x778] sm:$0xff]  ;;  %v628_v23 = vld [vmem:[#allocation5 + $0x5e0] sm:$0xff]  ;;  %v629_v25 = vld [vmem:[#allocation5 + $0x5e8] sm:$0xff]  ;;  %v1259_v31 = vperm.slane %v7494_v34, 5 }
 0x16d   : > { %2130 = vmatpush.msrb.mxu3 %v528_v32  ;;  %2071 = vmatpush.msrb.mxu0 %v476_v33  ;;  %v627_v22 = vld [vmem:[#allocation5 + $0x5d8] sm:$0xff]  ;;  %v630_v26 = vld [vmem:[#allocation5 + $0x5f0] sm:$0xff]  ;;  %v580_v28 = vld [vmem:[#allocation5 + $0x460] sm:$0xff]  ;;  %v1260_v32 = vperm.slane %v7494_v34, 6  ;;  %v1261_v33 = vperm.slane %v7494_v34, 7 }
 0x16e   : > { %2091 = vmatpush.msrb.mxu1 %v477_v35  ;;  %2111 = vmatpush.msrb.mxu2 %v478_v36  ;;  %v578_v27 = vld [vmem:[#allocation5 + $0x450] sm:$0xff]  ;;  %v579_v7 = vld [vmem:[#allocation5 + $0x458] sm:$0xff]  ;;  %v581_v30 = vld [vmem:[#allocation5 + $0x468] sm:$0xff] }
 0x16f   : > { %2131 = vmatpush.msrb.mxu3 %v479_v37  ;;  %2136 = vmatpush.msra.mxu0 %v1215_v38  ;;  %v529_v35 = vld [vmem:[#allocation5 + $0x2c8] sm:$0xff]  ;;  %v530_v36 = vld [vmem:[#allocation5 + $0x2d0] sm:$0xff]  ;;  %v531_v38 = vld [vmem:[#allocation5 + $0x2d8] sm:$0xff] }
 0x170   : > { %2052 = vmatmul.f32.vlgmr.msra.gmra.mxu3 %v7490_v29  ;;  %2156 = vmatpush.msra.mxu1 %v1216_v39  ;;  %v532_v39 = vld [vmem:[#allocation5 + $0x2e0] sm:$0xff] }
 0x171   : > { %2176 = vmatpush.msra.mxu2 %v1217_v41  ;;  %2196 = vmatpush.msra.mxu3 %v1218_v42 }
 0x172   : > { %2137 = vmatpush.msra.mxu0 %v1166_v43  ;;  %2157 = vmatpush.msra.mxu1 %v1167_v40  ;;  %v480_v40 = vld [vmem:[#allocation5 + $0x140] sm:$0xff] }
 0x173   : > { %2177 = vmatpush.msra.mxu2 %v1168_v44  ;;  %2197 = vmatpush.msra.mxu3 %v1169_v45  ;;  %v481_v44 = vld [vmem:[#allocation5 + $0x148] sm:$0xff] }
 0x174   : > { %2138 = vmatpush.msra.mxu0 %v1117_v46  ;;  %2158 = vmatpush.msra.mxu1 %v1118_v47  ;;  %v482_v46 = vld [vmem:[#allocation5 + $0x150] sm:$0xff]  ;;  %v483_v47 = vld [vmem:[#allocation5 + $0x158] sm:$0xff] }
 0x175   : > { %2178 = vmatpush.msra.mxu2 %v1119_v48  ;;  %2198 = vmatpush.msra.mxu3 %v1120_v49 }
 0x176   : > { %2139 = vmatpush.msra.mxu0 %v1068_v51  ;;  %2159 = vmatpush.msra.mxu1 %v1069_v52  ;;  %v1219_v52 = vld [vmem:[#allocation5 + $0x1858] sm:$0xff] }
 0x177   : > { %2179 = vmatpush.msra.mxu2 %v1070_v53  ;;  %2199 = vmatpush.msra.mxu3 %v1071_v54  ;;  %v1220_v53 = vld [vmem:[#allocation5 + $0x1860] sm:$0xff]  ;;  %v1221_v54 = vld [vmem:[#allocation5 + $0x1868] sm:$0xff] }
 0x178   : > { %2140 = vmatpush.msra.mxu0 %v1019_v55  ;;  %2160 = vmatpush.msra.mxu1 %v1020_v56  ;;  %v1222_v55 = vld [vmem:[#allocation5 + $0x1870] sm:$0xff] }
 0x179   : > { %2180 = vmatpush.msra.mxu2 %v1021_v57  ;;  %2200 = vmatpush.msra.mxu3 %v1022_v58  ;;  %v1170_v56 = vld [vmem:[#allocation5 + $0x16d0] sm:$0xff]  ;;  %v1171_v57 = vld [vmem:[#allocation5 + $0x16d8] sm:$0xff]  ;;  %v1172_v58 = vld [vmem:[#allocation5 + $0x16e0] sm:$0xff] }
 0x17a   : > { %2141 = vmatpush.msra.mxu0 %v970_v59  ;;  %2161 = vmatpush.msra.mxu1 %v971_v60  ;;  %v1173_v59 = vld [vmem:[#allocation5 + $0x16e8] sm:$0xff] }
 0x17b   : > { %2181 = vmatpush.msra.mxu2 %v972_v61  ;;  %2201 = vmatpush.msra.mxu3 %v973_v62  ;;  %v1121_v60 = vld [vmem:[#allocation5 + $0x1548] sm:$0xff]  ;;  %v1122_v61 = vld [vmem:[#allocation5 + $0x1550] sm:$0xff]  ;;  %v1123_v62 = vld [vmem:[#allocation5 + $0x1558] sm:$0xff] }
 0x17c   : > { %2142 = vmatpush.msra.mxu0 %v921_v63  ;;  %2162 = vmatpush.msra.mxu1 %v922_v0  ;;  %v1124_v63 = vld [vmem:[#allocation5 + $0x1560] sm:$0xff] }
 0x17d   : > { %2182 = vmatpush.msra.mxu2 %v923_v2  ;;  %2202 = vmatpush.msra.mxu3 %v924_v3  ;;  %v1072_v0 = vld [vmem:[#allocation5 + $0x13c0] sm:$0xff]  ;;  %v1073_v2 = vld [vmem:[#allocation5 + $0x13c8] sm:$0xff]  ;;  %v1074_v3 = vld [vmem:[#allocation5 + $0x13d0] sm:$0xff] }
 0x17e   : > { %2143 = vmatpush.msra.mxu0 %v872_v4  ;;  %2163 = vmatpush.msra.mxu1 %v873_v24  ;;  %v1075_v4 = vld [vmem:[#allocation5 + $0x13d8] sm:$0xff] }
 0x17f   : > { %2183 = vmatpush.msra.mxu2 %v874_v5  ;;  %2203 = vmatpush.msra.mxu3 %v875_v6  ;;  %v1023_v24 = vld [vmem:[#allocation5 + $0x1238] sm:$0xff]  ;;  %v1024_v5 = vld [vmem:[#allocation5 + $0x1240] sm:$0xff]  ;;  %v1025_v6 = vld [vmem:[#allocation5 + $0x1248] sm:$0xff] }
 0x180   : > { %2144 = vmatpush.msra.mxu0 %v823_v8  ;;  %2164 = vmatpush.msra.mxu1 %v824_v9  ;;  %v1026_v8 = vld [vmem:[#allocation5 + $0x1250] sm:$0xff] }
 0x181   : > { %2184 = vmatpush.msra.mxu2 %v825_v10  ;;  %2204 = vmatpush.msra.mxu3 %v826_v11  ;;  %v974_v9 = vld [vmem:[#allocation5 + $0x10b0] sm:$0xff]  ;;  %v975_v10 = vld [vmem:[#allocation5 + $0x10b8] sm:$0xff]  ;;  %v976_v11 = vld [vmem:[#allocation5 + $0x10c0] sm:$0xff] }
 0x182   : > { %2145 = vmatpush.msra.mxu0 %v774_v12  ;;  %2165 = vmatpush.msra.mxu1 %v775_v13  ;;  %v977_v12 = vld [vmem:[#allocation5 + $0x10c8] sm:$0xff] }
 0x183   : > { %2185 = vmatpush.msra.mxu2 %v776_v14  ;;  %2205 = vmatpush.msra.mxu3 %v777_v1  ;;  %v925_v13 = vld [vmem:[#allocation5 + $0xf28] sm:$0xff]  ;;  %v926_v14 = vld [vmem:[#allocation5 + $0xf30] sm:$0xff]  ;;  %v927_v1 = vld [vmem:[#allocation5 + $0xf38] sm:$0xff] }
 0x184   : > { %2146 = vmatpush.msra.mxu0 %v725_v15  ;;  %2166 = vmatpush.msra.mxu1 %v726_v16  ;;  %v928_v15 = vld [vmem:[#allocation5 + $0xf40] sm:$0xff] }
 0x185   : > { %2186 = vmatpush.msra.mxu2 %v727_v17  ;;  %2206 = vmatpush.msra.mxu3 %v728_v18  ;;  %v1773_v37 = vpop.f32.mrf.mxu1  ;;  %v876_v16 = vld [vmem:[#allocation5 + $0xda0] sm:$0xff]  ;;  %v877_v17 = vld [vmem:[#allocation5 + $0xda8] sm:$0xff]  ;;  %v878_v18 = vld [vmem:[#allocation5 + $0xdb0] sm:$0xff] }
 0x186   : > { %2147 = vmatpush.msra.mxu0 %v676_v19  ;;  %2167 = vmatpush.msra.mxu1 %v677_v50  ;;  %v1774_v41 = vadd.f32 %v1773_v37, %v1259_v31  ;;  %v879_v19 = vld [vmem:[#allocation5 + $0xdb8] sm:$0xff] }
 0x187   : > { %2187 = vmatpush.msra.mxu2 %v678_v20  ;;  %2207 = vmatpush.msra.mxu3 %v679_v21  ;;  %v827_v50 = vld [vmem:[#allocation5 + $0xc18] sm:$0xff]  ;;  %v828_v20 = vld [vmem:[#allocation5 + $0xc20] sm:$0xff]  ;;  %v829_v21 = vld [vmem:[#allocation5 + $0xc28] sm:$0xff] }
 0x188   : > { %2072 = vmatmul.f32.vlgmr.msrb.gmra.mxu0 %v7490_v29  ;;  %2092 = vmatmul.f32.vlgmr.msrb.gmra.mxu1 %v7490_v29  ;;  %v2337_v48 = vmax.f32 %v1774_v41, 0.0  ;;  %v682_v41 = vld [vmem:[#allocation5 + $0x790] sm:$0xff] }
 0x189   : > { %2148 = vmatpush.msra.mxu0 %v627_v22  ;;  %2168 = vmatpush.msra.mxu1 %v628_v23  ;;  %v830_v22 = vld [vmem:[#allocation5 + $0xc30] sm:$0xff]  ;;  %v7511_v23 = vld [vmem:[#allocation7 + $0x18] sm:$0xff] }
 0x18a   : > { %2188 = vmatpush.msra.mxu2 %v629_v25  ;;  %2208 = vmatpush.msra.mxu3 %v630_v26  ;;  %2390 = vst [vmem:[#allocation2 + $0x41] sm:$0x1] %v2337_v48  ;;  %v778_v25 = vld [vmem:[#allocation5 + $0xa90] sm:$0xff]  ;;  %v779_v26 = vld [vmem:[#allocation5 + $0xa98] sm:$0xff]  ;;  %v1264_v31 = vperm.slane %v7511_v23, 2  ;;  %v1263_v37 = vperm.slane %v7511_v23, 1 }
 0x18b   : > { %2112 = vmatmul.f32.vlgmr.msrb.gmra.mxu2 %v7490_v29  ;;  %2132 = vmatmul.f32.vlgmr.msrb.gmra.mxu3 %v7490_v29 }
 0x18c   : > { %2149 = vmatpush.msra.mxu0 %v578_v27  ;;  %2169 = vmatpush.msra.mxu1 %v579_v7  ;;  %v1793_v42 = vpop.f32.mrf.mxu2  ;;  %v1813_v43 = vpop.f32.mrf.mxu3  ;;  %v780_v27 = vld [vmem:[#allocation5 + $0xaa0] sm:$0xff]  ;;  %v781_v7 = vld [vmem:[#allocation5 + $0xaa8] sm:$0xff] }
 0x18d   : > { %2189 = vmatpush.msra.mxu2 %v580_v28  ;;  %2209 = vmatpush.msra.mxu3 %v581_v30  ;;  %v1794_v45 = vadd.f32 %v1793_v42, %v1260_v32  ;;  %v1814_v34 = vadd.f32 %v1813_v43, %v1261_v33  ;;  %v729_v28 = vld [vmem:[#allocation5 + $0x908] sm:$0xff]  ;;  %v730_v30 = vld [vmem:[#allocation5 + $0x910] sm:$0xff]  ;;  %v1265_v32 = vperm.slane %v7511_v23, 3  ;;  %v731_v33 = vld [vmem:[#allocation5 + $0x918] sm:$0xff] }
 0x18e   : > { %2150 = vmatpush.msra.mxu0 %v529_v35  ;;  %2170 = vmatpush.msra.mxu1 %v530_v36  ;;  %v732_v35 = vld [vmem:[#allocation5 + $0x920] sm:$0xff]  ;;  %v1262_v36 = vperm.slane %v7511_v23, 0  ;;  %v683_v42 = vld [vmem:[#allocation5 + $0x798] sm:$0xff] }
 0x18f   : > { %2190 = vmatpush.msra.mxu2 %v531_v38  ;;  %2210 = vmatpush.msra.mxu3 %v532_v39  ;;  %v2338_v49 = vmax.f32 %v1794_v45, 0.0  ;;  %v2339_v51 = vmax.f32 %v1814_v34, 0.0  ;;  %v680_v38 = vld [vmem:[#allocation5 + $0x780] sm:$0xff]  ;;  %v681_v39 = vld [vmem:[#allocation5 + $0x788] sm:$0xff] }
 0x190   : > { %2151 = vmatpush.msra.mxu0 %v480_v40  ;;  %2171 = vmatpush.msra.mxu1 %v481_v44  ;;  %v631_v44 = vld [vmem:[#allocation5 + $0x5f8] sm:$0xff]  ;;  %v632_v45 = vld [vmem:[#allocation5 + $0x600] sm:$0xff] }
 0x191   : > { %2191 = vmatpush.msra.mxu2 %v482_v46  ;;  %2211 = vmatpush.msra.mxu3 %v483_v47  ;;  %2391 = vst [vmem:[#allocation2 + $0x42] sm:$0x1] %v2338_v49  ;;  %v633_v49 = vld [vmem:[#allocation5 + $0x608] sm:$0xff] }
 0x192   : > { %2152 = vmatmul.f32.vlgmr.msra.gmra.mxu0 %v7490_v29  ;;  %2172 = vmatmul.f32.vlgmr.msra.gmra.mxu1 %v7490_v29  ;;  %2392 = vst [vmem:[#allocation2 + $0x43] sm:$0x1] %v2339_v51  ;;  %v634_v51 = vld [vmem:[#allocation5 + $0x610] sm:$0xff] }
 0x193   : > { %2216 = vmatpush.msrb.mxu0 %v1219_v52  ;;  %2236 = vmatpush.msrb.mxu1 %v1220_v53 }
 0x194   : > { %2256 = vmatpush.msrb.mxu2 %v1221_v54  ;;  %2276 = vmatpush.msrb.mxu3 %v1222_v55  ;;  %v582_v54 = vld [vmem:[#allocation5 + $0x470] sm:$0xff]  ;;  %v583_v55 = vld [vmem:[#allocation5 + $0x478] sm:$0xff] }
 0x195   : > { %2217 = vmatpush.msrb.mxu0 %v1170_v56  ;;  %2237 = vmatpush.msrb.mxu1 %v1171_v57  ;;  %v584_v57 = vld [vmem:[#allocation5 + $0x480] sm:$0xff] }
 0x196   : > { %2257 = vmatpush.msrb.mxu2 %v1172_v58  ;;  %2277 = vmatpush.msrb.mxu3 %v1173_v59  ;;  %v585_v58 = vld [vmem:[#allocation5 + $0x488] sm:$0xff] }
 0x197   : > { %2218 = vmatpush.msrb.mxu0 %v1121_v60  ;;  %2238 = vmatpush.msrb.mxu1 %v1122_v61 }
 0x198   : > { %2258 = vmatpush.msrb.mxu2 %v1123_v62  ;;  %2278 = vmatpush.msrb.mxu3 %v1124_v63  ;;  %v533_v62 = vld [vmem:[#allocation5 + $0x2e8] sm:$0xff]  ;;  %v534_v63 = vld [vmem:[#allocation5 + $0x2f0] sm:$0xff] }
 0x199   : > { %2219 = vmatpush.msrb.mxu0 %v1072_v0  ;;  %2239 = vmatpush.msrb.mxu1 %v1073_v2  ;;  %v535_v0 = vld [vmem:[#allocation5 + $0x2f8] sm:$0xff]  ;;  %v536_v2 = vld [vmem:[#allocation5 + $0x300] sm:$0xff] }
 0x19a   : > { %2259 = vmatpush.msrb.mxu2 %v1074_v3  ;;  %2279 = vmatpush.msrb.mxu3 %v1075_v4  ;;  %v484_v3 = vld [vmem:[#allocation5 + $0x160] sm:$0xff]  ;;  %v485_v4 = vld [vmem:[#allocation5 + $0x168] sm:$0xff] }
 0x19b   : > { %2220 = vmatpush.msrb.mxu0 %v1023_v24  ;;  %2240 = vmatpush.msrb.mxu1 %v1024_v5  ;;  %v486_v24 = vld [vmem:[#allocation5 + $0x170] sm:$0xff]  ;;  %v487_v5 = vld [vmem:[#allocation5 + $0x178] sm:$0xff] }
 0x19c   : > { %2260 = vmatpush.msrb.mxu2 %v1025_v6  ;;  %2280 = vmatpush.msrb.mxu3 %v1026_v8  ;;  %v1223_v6 = vld [vmem:[#allocation5 + $0x1878] sm:$0xff] }
 0x19d   : > { %2221 = vmatpush.msrb.mxu0 %v974_v9  ;;  %2241 = vmatpush.msrb.mxu1 %v975_v10  ;;  %v2469_v8 = vld [vmem:[%s10570_s3 + $0x78] sm:$0xff] }
 0x19e   : > { %2261 = vmatpush.msrb.mxu2 %v976_v11  ;;  %2281 = vmatpush.msrb.mxu3 %v977_v12  ;;  %v2485_v9 = vld [vmem:[%s10570_s3 + $0xf8] sm:$0xff]  ;;  %v1174_v11 = vld [vmem:[#allocation5 + $0x16f0] sm:$0xff] }
 0x19f   : > { %2222 = vmatpush.msrb.mxu0 %v925_v13  ;;  %2242 = vmatpush.msrb.mxu1 %v926_v14  ;;  %v2501_v10 = vld [vmem:[%s10570_s3 + $0x178] sm:$0xff]  ;;  %v2468_v12 = vld [vmem:[%s10570_s3 + $0x70] sm:$0xff] }
 0x1a0   : > { %2262 = vmatpush.msrb.mxu2 %v927_v1  ;;  %2282 = vmatpush.msrb.mxu3 %v928_v15  ;;  %v2484_v13 = vld [vmem:[%s10570_s3 + $0xf0] sm:$0xff]  ;;  %v1125_v1 = vld [vmem:[#allocation5 + $0x1568] sm:$0xff] }
 0x1a1   : > { %2223 = vmatpush.msrb.mxu0 %v876_v16  ;;  %2243 = vmatpush.msrb.mxu1 %v877_v17  ;;  %v2500_v14 = vld [vmem:[%s10570_s3 + $0x170] sm:$0xff]  ;;  %v2483_v15 = vld [vmem:[%s10570_s3 + $0xe8] sm:$0xff]  ;;  %v1076_v17 = vld [vmem:[#allocation5 + $0x13e0] sm:$0xff] }
 0x1a2   : > { %2263 = vmatpush.msrb.mxu2 %v878_v18  ;;  %2283 = vmatpush.msrb.mxu3 %v879_v19  ;;  %v2499_v16 = vld [vmem:[%s10570_s3 + $0x168] sm:$0xff]  ;;  %v2466_v18 = vld [vmem:[%s10570_s3 + $0x60] sm:$0xff] }
 0x1a3   : > { %2224 = vmatpush.msrb.mxu0 %v827_v50  ;;  %2244 = vmatpush.msrb.mxu1 %v828_v20  ;;  %v2482_v19 = vld [vmem:[%s10570_s3 + $0xe0] sm:$0xff]  ;;  %v1027_v20 = vld [vmem:[#allocation5 + $0x1258] sm:$0xff] }
 0x1a4   : > { %2264 = vmatpush.msrb.mxu2 %v829_v21  ;;  %2284 = vmatpush.msrb.mxu3 %v830_v22  ;;  %v2498_v50 = vld [vmem:[%s10570_s3 + $0x160] sm:$0xff]  ;;  %v2465_v21 = vld [vmem:[%s10570_s3 + $0x58] sm:$0xff] }
 0x1a5   : > { %2225 = vmatpush.msrb.mxu0 %v778_v25  ;;  %2245 = vmatpush.msrb.mxu1 %v779_v26  ;;  %v2481_v22 = vld [vmem:[%s10570_s3 + $0xd8] sm:$0xff]  ;;  %v978_v26 = vld [vmem:[#allocation5 + $0x10d0] sm:$0xff] }
 0x1a6   : > { %2265 = vmatpush.msrb.mxu2 %v780_v27  ;;  %2285 = vmatpush.msrb.mxu3 %v781_v7  ;;  %v2497_v25 = vld [vmem:[%s10570_s3 + $0x158] sm:$0xff]  ;;  %v2464_v27 = vld [vmem:[%s10570_s3 + $0x50] sm:$0xff] }
 0x1a7   : > { %2226 = vmatpush.msrb.mxu0 %v729_v28  ;;  %2246 = vmatpush.msrb.mxu1 %v730_v30  ;;  %v1873_v43 = vpop.f32.mrf.mxu2  ;;  %v1893_v40 = vpop.f32.mrf.mxu3  ;;  %v2480_v7 = vld [vmem:[%s10570_s3 + $0xd0] sm:$0xff]  ;;  %v929_v30 = vld [vmem:[#allocation5 + $0xf48] sm:$0xff] }
 0x1a8   : > { %2266 = vmatpush.msrb.mxu2 %v731_v33  ;;  %2286 = vmatpush.msrb.mxu3 %v732_v35  ;;  %v1833_v34 = vpop.f32.mrf.mxu0  ;;  %v1853_v46 = vpop.f32.mrf.mxu1  ;;  %v1874_v47 = vadd.f32 %v1873_v43, %v1264_v31  ;;  %v1894_v48 = vadd.f32 %v1893_v40, %v1265_v32  ;;  %v2496_v28 = vld [vmem:[%s10570_s3 + $0x150] sm:$0xff]  ;;  %v2463_v31 = vld [vmem:[%s10570_s3 + $0x48] sm:$0xff]  ;;  %v880_v35 = vld [vmem:[#allocation5 + $0xdc0] sm:$0xff] }
 0x1a9   : > { %2227 = vmatpush.msrb.mxu0 %v680_v38  ;;  %2247 = vmatpush.msrb.mxu1 %v681_v39  ;;  %v1834_v52 = vadd.f32 %v1833_v34, %v1262_v36  ;;  %v1854_v53 = vadd.f32 %v1853_v46, %v1263_v37  ;;  %v2479_v32 = vld [vmem:[%s10570_s3 + $0xc8] sm:$0xff]  ;;  %v2462_v36 = vld [vmem:[%s10570_s3 + $0x40] sm:$0xff]  ;;  %v831_v39 = vld [vmem:[#allocation5 + $0xc38] sm:$0xff]  ;;  %v1266_v46 = vperm.slane %v7511_v23, 4 }
 0x1aa   : > { %2267 = vmatpush.msrb.mxu2 %v682_v41  ;;  %2287 = vmatpush.msrb.mxu3 %v683_v42  ;;  %v2342_v56 = vmax.f32 %v1874_v47, 0.0  ;;  %v2343_v61 = vmax.f32 %v1894_v48, 0.0  ;;  %v2495_v33 = vld [vmem:[%s10570_s3 + $0x148] sm:$0xff]  ;;  %v2478_v37 = vld [vmem:[%s10570_s3 + $0xc0] sm:$0xff]  ;;  %v2461_v41 = vld [vmem:[%s10570_s3 + $0x38] sm:$0xff]  ;;  %v1268_v47 = vperm.slane %v7511_v23, 6 }
 0x1ab   : > { %2228 = vmatpush.msrb.mxu0 %v631_v44  ;;  %2248 = vmatpush.msrb.mxu1 %v632_v45  ;;  %v2340_v59 = vmax.f32 %v1834_v52, 0.0  ;;  %v2341_v60 = vmax.f32 %v1854_v53, 0.0  ;;  %v2494_v38 = vld [vmem:[%s10570_s3 + $0x140] sm:$0xff]  ;;  %v2477_v42 = vld [vmem:[%s10570_s3 + $0xb8] sm:$0xff]  ;;  %v782_v40 = vld [vmem:[#allocation5 + $0xab0] sm:$0xff] }
 0x1ac   : > { %2268 = vmatpush.msrb.mxu2 %v633_v49  ;;  %2288 = vmatpush.msrb.mxu3 %v634_v51  ;;  %2395 = vst [vmem:[#allocation2 + $0x46] sm:$0x1] %v2342_v56  ;;  %v2493_v43 = vld [vmem:[%s10570_s3 + $0x138] sm:$0xff]  ;;  %v2460_v44 = vld [vmem:[%s10570_s3 + $0x30] sm:$0xff]  ;;  %v733_v48 = vld [vmem:[#allocation5 + $0x928] sm:$0xff]  ;;  %v1267_v51 = vperm.slane %v7511_v23, 5 }
 0x1ad   : > { %2229 = vmatpush.msrb.mxu0 %v582_v54  ;;  %2249 = vmatpush.msrb.mxu1 %v583_v55  ;;  %2393 = vst [vmem:[#allocation2 + $0x44] sm:$0x1] %v2340_v59  ;;  %v2476_v45 = vld [vmem:[%s10570_s3 + $0xb0] sm:$0xff]  ;;  %v2459_v49 = vld [vmem:[%s10570_s3 + $0x28] sm:$0xff]  ;;  %v684_v54 = vld [vmem:[#allocation5 + $0x7a0] sm:$0xff] }
 0x1ae   : > { %2269 = vmatpush.msrb.mxu2 %v584_v57  ;;  %2289 = vmatpush.msrb.mxu3 %v585_v58  ;;  %2394 = vst [vmem:[#allocation2 + $0x45] sm:$0x1] %v2341_v60  ;;  %v2492_v34 = vld [vmem:[%s10570_s3 + $0x130] sm:$0xff]  ;;  %v2475_v52 = vld [vmem:[%s10570_s3 + $0xa8] sm:$0xff]  ;;  %v2458_v55 = vld [vmem:[%s10570_s3 + $0x20] sm:$0xff] }
 0x1af   : > { %2230 = vmatpush.msrb.mxu0 %v533_v62  ;;  %2250 = vmatpush.msrb.mxu1 %v534_v63  ;;  %2396 = vst [vmem:[#allocation2 + $0x47] sm:$0x1] %v2343_v61  ;;  %v2491_v53 = vld [vmem:[%s10570_s3 + $0x128] sm:$0xff]  ;;  %v2474_v58 = vld [vmem:[%s10570_s3 + $0xa0] sm:$0xff] }
 0x1b0   : > { %2270 = vmatpush.msrb.mxu2 %v535_v0  ;;  %2290 = vmatpush.msrb.mxu3 %v536_v2  ;;  %v2490_v59 = vld [vmem:[%s10570_s3 + $0x120] sm:$0xff] }
 0x1b1   : > { %2231 = vmatpush.msrb.mxu0 %v484_v3  ;;  %2251 = vmatpush.msrb.mxu1 %v485_v4  ;;  %v7630_v3 = vld [vmem:[#allocation7 + $0x20] sm:$0xff]  ;;  %v635_v4 = vld [vmem:[#allocation5 + $0x618] sm:$0xff] }
 0x1b2   : > { %2271 = vmatpush.msrb.mxu2 %v486_v24  ;;  %2291 = vmatpush.msrb.mxu3 %v487_v5  ;;  %v2457_v24 = vld [vmem:[%s10570_s3 + $0x18] sm:$0xff] }
 0x1b3   : > { %2192 = vmatmul.f32.vlgmr.msra.gmra.mxu2 %v7490_v29  ;;  %2212 = vmatmul.f32.vlgmr.msra.gmra.mxu3 %v7490_v29  ;;  %v2467_v29 = vld [vmem:[%s10570_s3 + $0x68] sm:$0xff] }
 0x1b4   : > { %2296 = vmatpush.msra.mxu0 %v1223_v6  ;;  %2521 = vmatpush.msra.mxu1 %v2469_v8  ;;  %v6996_v6 = vld [vmem:[%s7344_s10] sm:$0x1]  ;;  %v2473_v8 = vld [vmem:[%s10570_s3 + $0x98] sm:$0xff]  ;;  %s7169_s10 = smov 64  }
 0x1b5   : > { %2561 = vmatpush.msra.mxu2 %v2485_v9  ;;  %2601 = vmatpush.msra.mxu3 %v2501_v10  ;;  %v2489_v9 = vld [vmem:[%s10570_s3 + $0x118] sm:$0xff]  ;;  %v586_v10 = vld [vmem:[#allocation5 + $0x490] sm:$0xff] }
 0x1b6   : > { %2297 = vmatpush.msra.mxu0 %v1174_v11  ;;  %2522 = vmatpush.msra.mxu1 %v2468_v12  ;;  %v2456_v11 = vld [vmem:[%s10570_s3 + $0x10] sm:$0xff]  ;;  %v1272_v12 = vperm.slane %v7630_v3, 2 }
 0x1b7   : > { %2562 = vmatpush.msra.mxu2 %v2484_v13  ;;  %2602 = vmatpush.msra.mxu3 %v2500_v14  ;;  %v2472_v13 = vld [vmem:[%s10570_s3 + $0x90] sm:$0xff] }
 0x1b8   : > { %2298 = vmatpush.msra.mxu0 %v1125_v1  ;;  %2523 = vmatpush.msra.mxu1 %v2467_v29  ;;  %v2488_v14 = vld [vmem:[%s10570_s3 + $0x110] sm:$0xff]  ;;  %v1269_v1 = vperm.slane %v7511_v23, 7  ;;  %v1270_v29 = vperm.slane %v7630_v3, 0  ;;  %v2487_v23 = vld [vmem:[%s10570_s3 + $0x108] sm:$0xff] }
 0x1b9   : > { %2563 = vmatpush.msra.mxu2 %v2483_v15  ;;  %2603 = vmatpush.msra.mxu3 %v2499_v16  ;;  %v537_v15 = vld [vmem:[#allocation5 + $0x308] sm:$0xff] }
 0x1ba   : > { %2299 = vmatpush.msra.mxu0 %v1076_v17  ;;  %2524 = vmatpush.msra.mxu1 %v2466_v18  ;;  %v2455_v16 = vld [vmem:[%s10570_s3 + $0x8] sm:$0xff]  ;;  %v1271_v17 = vperm.slane %v7630_v3, 1 }
 0x1bb   : > { %2564 = vmatpush.msra.mxu2 %v2482_v19  ;;  %2604 = vmatpush.msra.mxu3 %v2498_v50  ;;  %v2471_v18 = vld [vmem:[%s10570_s3 + $0x88] sm:$0xff]  ;;  %v488_v50 = vld [vmem:[#allocation5 + $0x180] sm:$0xff] }
 0x1bc   : > { %2300 = vmatpush.msra.mxu0 %v1027_v20  ;;  %2525 = vmatpush.msra.mxu1 %v2465_v21  ;;  %v2454_v20 = vld [vmem:[%s10570_s3] sm:$0xff] }
 0x1bd   : > { %2565 = vmatpush.msra.mxu2 %v2481_v22  ;;  %2605 = vmatpush.msra.mxu3 %v2497_v25 }
 0x1be   : > { %2301 = vmatpush.msra.mxu0 %v978_v26  ;;  %2526 = vmatpush.msra.mxu1 %v2464_v27  ;;  %v2470_v26 = vld [vmem:[%s10570_s3 + $0x80] sm:$0xff] }
 0x1bf   : > { %2566 = vmatpush.msra.mxu2 %v2480_v7  ;;  %2606 = vmatpush.msra.mxu3 %v2496_v28  ;;  %v2486_v27 = vld [vmem:[%s10570_s3 + $0x100] sm:$0xff] }
 0x1c0   : > { %2302 = vmatpush.msra.mxu0 %v929_v30  ;;  %2527 = vmatpush.msra.mxu1 %v2463_v31 }
 0x1c1   : > { %2567 = vmatpush.msra.mxu2 %v2479_v32  ;;  %2607 = vmatpush.msra.mxu3 %v2495_v33  ;;  %v7673_v33 = vld [vmem:[#allocation2 + $0x1] sm:$0xff] }
 0x1c2   : > { %2303 = vmatpush.msra.mxu0 %v880_v35  ;;  %2528 = vmatpush.msra.mxu1 %v2462_v36 }
 0x1c3   : > { %2568 = vmatpush.msra.mxu2 %v2478_v37  ;;  %2608 = vmatpush.msra.mxu3 %v2494_v38  ;;  %v2517_v37 = vld [vmem:[%s10570_s3 + $0x1f8] sm:$0xff] }
 0x1c4   : > { %2304 = vmatpush.msra.mxu0 %v831_v39  ;;  %2529 = vmatpush.msra.mxu1 %v2461_v41  ;;  %v7678_v39 = vld [vmem:[#allocation2] sm:$0xff]  ;;  %v2438_v41 = vld [vmem:[#allocation2 + $0x10] sm:$0xff] }
 0x1c5   : > { %2569 = vmatpush.msra.mxu2 %v2477_v42  ;;  %2609 = vmatpush.msra.mxu3 %v2493_v43  ;;  %v2516_v42 = vld [vmem:[%s10570_s3 + $0x1f0] sm:$0xff]  ;;  %v2515_v43 = vld [vmem:[%s10570_s3 + $0x1e8] sm:$0xff] }
 0x1c6   : > { %2305 = vmatpush.msra.mxu0 %v782_v40  ;;  %2530 = vmatpush.msra.mxu1 %v2460_v44  ;;  %v2514_v40 = vld [vmem:[%s10570_s3 + $0x1e0] sm:$0xff]  ;;  %v2513_v44 = vld [vmem:[%s10570_s3 + $0x1d8] sm:$0xff] }
 0x1c7   : > { %2570 = vmatpush.msra.mxu2 %v2476_v45  ;;  %2610 = vmatpush.msra.mxu3 %v2492_v34  ;;  %v1913_v56 = vpop.f32.mrf.mxu0  ;;  %v1953_v57 = vpop.f32.mrf.mxu2  ;;  %v7694_v45 = vld [vmem:[#allocation2 + $0x11] sm:$0xff]  ;;  %v2439_v34 = vld [vmem:[#allocation2 + $0x20] sm:$0xff] }
 0x1c8   : > { %2306 = vmatpush.msra.mxu0 %v733_v48  ;;  %2531 = vmatpush.msra.mxu1 %v2459_v49  ;;  %v1914_v60 = vadd.f32 %v1913_v56, %v1266_v46  ;;  %v1933_v61 = vpop.f32.mrf.mxu1  ;;  %v1954_v62 = vadd.f32 %v1953_v57, %v1268_v47  ;;  %v2512_v46 = vld [vmem:[%s10570_s3 + $0x1d0] sm:$0xff]  ;;  %v2511_v47 = vld [vmem:[%s10570_s3 + $0x1c8] sm:$0xff]  ;;  %v2510_v48 = vld [vmem:[%s10570_s3 + $0x1c0] sm:$0xff] }
 0x1c9   : > { %2571 = vmatpush.msra.mxu2 %v2475_v52  ;;  %2611 = vmatpush.msra.mxu3 %v2491_v53  ;;  %v1934_v63 = vadd.f32 %v1933_v61, %v1267_v51  ;;  %v2509_v49 = vld [vmem:[%s10570_s3 + $0x1b8] sm:$0xff]  ;;  %v7709_v51 = vld [vmem:[#allocation2 + $0x21] sm:$0xff]  ;;  %v2440_v52 = vld [vmem:[#allocation2 + $0x30] sm:$0xff] }
 0x1ca   : > { %2307 = vmatpush.msra.mxu0 %v684_v54  ;;  %2532 = vmatpush.msra.mxu1 %v2458_v55  ;;  %v2344_v0 = vmax.f32 %v1914_v60, 0.0  ;;  %v2346_v2 = vmax.f32 %v1954_v62, 0.0  ;;  %v2508_v53 = vld [vmem:[%s10570_s3 + $0x1b0] sm:$0xff]  ;;  %v2507_v54 = vld [vmem:[%s10570_s3 + $0x1a8] sm:$0xff]  ;;  %v2506_v55 = vld [vmem:[%s10570_s3 + $0x1a0] sm:$0xff]  ;;  %v1273_v60 = vperm.slane %v7630_v3, 3 }
 0x1cb   : > { %2572 = vmatpush.msra.mxu2 %v2474_v58  ;;  %2612 = vmatpush.msra.mxu3 %v2490_v59  ;;  %v2345_v5 = vmax.f32 %v1934_v63, 0.0  ;;  %v2505_v56 = vld [vmem:[%s10570_s3 + $0x198] sm:$0xff]  ;;  %v2441_v58 = vld [vmem:[#allocation2 + $0x40] sm:$0xff]  ;;  %v2504_v59 = vld [vmem:[%s10570_s3 + $0x190] sm:$0xff] }
 0x1cc   : > { %2232 = vmatmul.f32.vlgmr.msrb.gmra.mxu0 %v6996_v6  ;;  %2252 = vmatmul.f32.vlgmr.msrb.gmra.mxu1 %v6996_v6  ;;  %2398 = vst [vmem:[#allocation2 + $0x51] sm:$0x1] %v2344_v0  ;;  %v7724_v57 = vld [vmem:[#allocation2 + $0x31] sm:$0xff]  ;;  %v2503_v61 = vld [vmem:[%s10570_s3 + $0x188] sm:$0xff]  ;;  %v2502_v62 = vld [vmem:[%s10570_s3 + $0x180] sm:$0xff] }
 0x1cd   : > { %2272 = vmatmul.f32.vlgmr.msrb.gmra.mxu2 %v6996_v6  ;;  %2292 = vmatmul.f32.vlgmr.msrb.gmra.mxu3 %v6996_v6  ;;  %2399 = vst [vmem:[#allocation2 + $0x52] sm:$0x1] %v2345_v5 }
 0x1ce   : > { %2308 = vmatpush.msra.mxu0 %v635_v4  ;;  %2533 = vmatpush.msra.mxu1 %v2457_v24  ;;  %2400 = vst [vmem:[#allocation2 + $0x53] sm:$0x1] %v2346_v2  ;;  %v7737_v2 = vld [vmem:[#allocation2 + $0x41] sm:$0xff] }
 0x1cf   : > { %2573 = vmatpush.msra.mxu2 %v2473_v8  ;;  %2613 = vmatpush.msra.mxu3 %v2489_v9  ;;  %v6502_v8 = vld [vmem:[%s10570_s3 + $0x378] sm:$0xff] }
 0x1d0   : > { %2309 = vmatpush.msra.mxu0 %v586_v10  ;;  %2534 = vmatpush.msra.mxu1 %v2456_v11  ;;  %v2033_v19 = vpop.f32.mrf.mxu2  ;;  %v6470_v9 = vld [vmem:[%s10570_s3 + $0x278] sm:$0xff]  ;;  %v6485_v10 = vld [vmem:[%s10570_s3 + $0x2f0] sm:$0xff] }
 0x1d1   : > { %2574 = vmatpush.msra.mxu2 %v2472_v13  ;;  %2614 = vmatpush.msra.mxu3 %v2488_v14  ;;  %v1973_v21 = vpop.f32.mrf.mxu3  ;;  %v1993_v22 = vpop.f32.mrf.mxu0  ;;  %v2034_v25 = vadd.f32 %v2033_v19, %v1272_v12  ;;  %v6501_v11 = vld [vmem:[%s10570_s3 + $0x370] sm:$0xff]  ;;  %v6484_v13 = vld [vmem:[%s10570_s3 + $0x2e8] sm:$0xff]  ;;  %v6467_v19 = vld [vmem:[%s10570_s3 + $0x260] sm:$0xff] }
 0x1d2   : > { %2310 = vmatpush.msra.mxu0 %v537_v15  ;;  %2535 = vmatpush.msra.mxu1 %v2455_v16  ;;  %v1974_v7 = vadd.f32 %v1973_v21, %v1269_v1  ;;  %v1994_v28 = vadd.f32 %v1993_v22, %v1270_v29  ;;  %v2013_v30 = vpop.f32.mrf.mxu1  ;;  %v6469_v12 = vld [vmem:[%s10570_s3 + $0x270] sm:$0xff]  ;;  %v6500_v14 = vld [vmem:[%s10570_s3 + $0x368] sm:$0xff]  ;;  %v6518_v1 = vld [vmem:[%s10570_s3 + $0x3f8] sm:$0xff]  ;;  %v1274_v29 = vperm.slane %v7630_v3, 4  ;;  %v1275_v15 = vperm.slane %v7630_v3, 5 }
 0x1d3   : > { %2575 = vmatpush.msra.mxu2 %v2471_v18  ;;  %2615 = vmatpush.msra.mxu3 %v2487_v23  ;;  %v2014_v31 = vadd.f32 %v2013_v30, %v1271_v17  ;;  %v2350_v32 = vmax.f32 %v2034_v25, 0.0  ;;  %v6468_v16 = vld [vmem:[%s10570_s3 + $0x268] sm:$0xff]  ;;  %v6483_v17 = vld [vmem:[%s10570_s3 + $0x2e0] sm:$0xff]  ;;  %v6517_v23 = vld [vmem:[%s10570_s3 + $0x3f0] sm:$0xff] }
 0x1d4   : > { %2311 = vmatpush.msra.mxu0 %v488_v50  ;;  %2536 = vmatpush.msra.mxu1 %v2454_v20  ;;  %v2347_v35 = vmax.f32 %v1974_v7, 0.0  ;;  %v2348_v36 = vmax.f32 %v1994_v28, 0.0  ;;  %v6499_v18 = vld [vmem:[%s10570_s3 + $0x360] sm:$0xff]  ;;  %v6482_v21 = vld [vmem:[%s10570_s3 + $0x2d8] sm:$0xff]  ;;  %v7799_v30 = vld [vmem:[#allocation7 + $0x28] sm:$0xff] }
 0x1d5   : > { %2576 = vmatpush.msra.mxu2 %v2470_v26  ;;  %2616 = vmatpush.msra.mxu3 %v2486_v27  ;;  %v2349_v38 = vmax.f32 %v2014_v31, 0.0  ;;  %2404 = vst [vmem:[#allocation2 + $0x57] sm:$0x1] %v2350_v32  ;;  %v6498_v22 = vld [vmem:[%s10570_s3 + $0x358] sm:$0xff]  ;;  %v6516_v27 = vld [vmem:[%s10570_s3 + $0x3e8] sm:$0xff]  ;;  %v1276_v31 = vperm.slane %v7630_v3, 6 }
 0x1d6   : > { %2312 = vmatmul.f32.vlgmr.msra.gmra.mxu0 %v6996_v6  ;;  %2537 = vmatmul.f32.vlgmr.msra.gmra.mxu1 %v7678_v39  ;;  %2401 = vst [vmem:[#allocation2 + $0x54] sm:$0x1] %v2347_v35  ;;  %v6486_v6 = vld [vmem:[%s10570_s3 + $0x2f8] sm:$0xff]  ;;  %v1277_v32 = vperm.slane %v7630_v3, 7  ;;  %v1278_v35 = vperm.slane %v7799_v30, 0 }
 0x1d7   : > { %2577 = vmatmul.f32.vlgmr.msra.gmra.mxu2 %v7673_v33  ;;  %2617 = vmatmul.f32.vlgmr.msra.gmra.mxu3 %v2438_v41  ;;  %2402 = vst [vmem:[#allocation2 + $0x55] sm:$0x1] %v2348_v36  ;;  %v1279_v36 = vperm.slane %v7799_v30, 1  ;;  %v6466_v3 = vld [vmem:[%s10570_s3 + $0x258] sm:$0xff] }
 0x1d8   : > { %2641 = vmatpush.msrb.mxu0 %v2517_v37  ;;  %2403 = vst [vmem:[#allocation2 + $0x56] sm:$0x1] %v2349_v38  ;;  %2834 = vmatpush.msrb.mxu2 %v6486_v6  ;;  %v6479_v6 = vld [vmem:[%s10570_s3 + $0x2c0] sm:$0xff] }
 0x1d9   : > { %2874 = vmatpush.msrb.mxu3 %v6502_v8  ;;  %2794 = vmatpush.msrb.mxu1 %v6470_v9 }
 0x1da   : > { %2642 = vmatpush.msrb.mxu0 %v2516_v42  ;;  %2835 = vmatpush.msrb.mxu2 %v6485_v10  ;;  %v6495_v10 = vld [vmem:[%s10570_s3 + $0x340] sm:$0xff] }
 0x1db   : > { %2875 = vmatpush.msrb.mxu3 %v6501_v11  ;;  %2795 = vmatpush.msrb.mxu1 %v6469_v12  ;;  %v6513_v11 = vld [vmem:[%s10570_s3 + $0x3d0] sm:$0xff] }
 0x1dc   : > { %2643 = vmatpush.msrb.mxu0 %v2515_v43  ;;  %2836 = vmatpush.msrb.mxu2 %v6484_v13 }
 0x1dd   : > { %2876 = vmatpush.msrb.mxu3 %v6500_v14  ;;  %2796 = vmatpush.msrb.mxu1 %v6468_v16  ;;  %v6463_v14 = vld [vmem:[%s10570_s3 + $0x240] sm:$0xff]  ;;  %v6462_v16 = vld [vmem:[%s10570_s3 + $0x238] sm:$0xff] }
 0x1de   : > { %2644 = vmatpush.msrb.mxu0 %v2514_v40  ;;  %2540 = vmatmul.f32.gmra.mxu1 %v2438_v41 }
 0x1df   : > { %2580 = vmatmul.f32.gmra.mxu2 %v7694_v45  ;;  %2620 = vmatmul.f32.gmra.mxu3 %v2439_v34  ;;  %v2442_v24 = vld [vmem:[#allocation2 + $0x50] sm:$0xff] }
 0x1e0   : > { %2645 = vmatpush.msrb.mxu0 %v2513_v44  ;;  %v7741_v5 = vld [vmem:[#allocation2 + $0x51] sm:$0xff]  ;;  %2837 = vmatpush.msrb.mxu2 %v6483_v17 }
 0x1e1   : > { %2877 = vmatpush.msrb.mxu3 %v6499_v18  ;;  %2797 = vmatpush.msrb.mxu1 %v6467_v19  ;;  %v6477_v17 = vld [vmem:[%s10570_s3 + $0x2b0] sm:$0xff]  ;;  %v6511_v19 = vld [vmem:[%s10570_s3 + $0x3c0] sm:$0xff] }
 0x1e2   : > { %2646 = vmatpush.msrb.mxu0 %v2512_v46  ;;  %2838 = vmatpush.msrb.mxu2 %v6482_v21  ;;  %v6461_v18 = vld [vmem:[%s10570_s3 + $0x230] sm:$0xff]  ;;  %v6475_v21 = vld [vmem:[%s10570_s3 + $0x2a0] sm:$0xff] }
 0x1e3   : > { %2878 = vmatpush.msrb.mxu3 %v6498_v22  ;;  %2798 = vmatpush.msrb.mxu1 %v6466_v3  ;;  %v6459_v22 = vld [vmem:[%s10570_s3 + $0x220] sm:$0xff]  ;;  %v6506_v3 = vld [vmem:[%s10570_s3 + $0x398] sm:$0xff] }
 0x1e4   : > { %2647 = vmatpush.msrb.mxu0 %v2511_v47 }
 0x1e6   : > { %2648 = vmatpush.msrb.mxu0 %v2510_v48  ;;  %2543 = vmatmul.f32.gmra.mxu1 %v2439_v34 }
 0x1e7   : > { %2583 = vmatmul.f32.gmra.mxu2 %v7709_v51  ;;  %2623 = vmatmul.f32.gmra.mxu3 %v2440_v52 }
 0x1e8   : > { %2649 = vmatpush.msrb.mxu0 %v2509_v49 }
 0x1ea   : > { %2650 = vmatpush.msrb.mxu0 %v2508_v53 }
 0x1ec   : > { %2651 = vmatpush.msrb.mxu0 %v2507_v54 }
 0x1ee   : > { %2652 = vmatpush.msrb.mxu0 %v2506_v55  ;;  %2546 = vmatmul.f32.gmra.mxu1 %v2440_v52  ;;  %v6481_v52 = vld [vmem:[%s10570_s3 + $0x2d0] sm:$0xff] }
 0x1ef   : > { %2586 = vmatmul.f32.gmra.mxu2 %v7724_v57  ;;  %2626 = vmatmul.f32.gmra.mxu3 %v2441_v58  ;;  %v6497_v55 = vld [vmem:[%s10570_s3 + $0x350] sm:$0xff] }
 0x1f0   : > { %2653 = vmatpush.msrb.mxu0 %v2505_v56  ;;  %2839 = vmatpush.msrb.mxu2 %v6481_v52  ;;  %v6515_v56 = vld [vmem:[%s10570_s3 + $0x3e0] sm:$0xff] }
 0x1f1   : > { %2879 = vmatpush.msrb.mxu3 %v6497_v55  ;;  %v6489_v55 = vld [vmem:[%s10570_s3 + $0x310] sm:$0xff] }
 0x1f2   : > { %2654 = vmatpush.msrb.mxu0 %v2504_v59  ;;  %v6480_v59 = vld [vmem:[%s10570_s3 + $0x2c8] sm:$0xff] }
 0x1f3   : > { %v2053_v63 = vpop.f32.mrf.mxu3  ;;  %2840 = vmatpush.msrb.mxu2 %v6480_v59  ;;  %v1285_v59 = vperm.slane %v7799_v30, 7 }
 0x1f4   : > { %2655 = vmatpush.msrb.mxu0 %v2503_v61  ;;  %v2054_v0 = vadd.f32 %v2053_v63, %v1273_v60  ;;  %v6496_v60 = vld [vmem:[%s10570_s3 + $0x348] sm:$0xff]  ;;  %v6514_v61 = vld [vmem:[%s10570_s3 + $0x3d8] sm:$0xff]  ;;  %v1281_v63 = vperm.slane %v7799_v30, 3 }
 0x1f5   : > { %2880 = vmatpush.msrb.mxu3 %v6496_v60  ;;  %2841 = vmatpush.msrb.mxu2 %v6479_v6  ;;  %v6488_v60 = vld [vmem:[%s10570_s3 + $0x308] sm:$0xff] }
 0x1f6   : > { %2656 = vmatpush.msrb.mxu0 %v2502_v62  ;;  %2549 = vmatmul.f32.gmra.mxu1 %v2441_v58  ;;  %v2351_v4 = vmax.f32 %v2054_v0, 0.0  ;;  %v6465_v58 = vld [vmem:[%s10570_s3 + $0x250] sm:$0xff]  ;;  %v1280_v62 = vperm.slane %v7799_v30, 2 }
 0x1f7   : > { %2657 = vmatmul.f32.vlgmr.msrb.gmra.mxu0 %v7694_v45  ;;  %2589 = vmatmul.f32.gmra.mxu2 %v7737_v2 }
 0x1f8   : > { %2629 = vmatmul.f32.gmra.mxu3 %v2442_v24  ;;  %2406 = vst [vmem:[#allocation2 + $0x61] sm:$0x1] %v2351_v4  ;;  %2914 = vmatpush.msra.mxu0 %v6518_v1  ;;  %v6478_v1 = vld [vmem:[%s10570_s3 + $0x2b8] sm:$0xff] }
 0x1f9   : > { %2799 = vmatpush.msrb.mxu1 %v6465_v58  ;;  %2881 = vmatpush.msrb.mxu3 %v6495_v10  ;;  %v1284_v58 = vperm.slane %v7799_v30, 6 }
 0x1fa   : > { %2915 = vmatpush.msra.mxu0 %v6517_v23  ;;  %2842 = vmatpush.msrb.mxu2 %v6478_v1  ;;  %v6493_v23 = vld [vmem:[%s10570_s3 + $0x330] sm:$0xff]  ;;  %v3885_v1 = vld [vmem:[#allocation3 + $0x1e1] sm:$0xff] }
 0x1fb   : > { %3736 = vrot.lane.b32.xlu2 %v3885_v1, %s7169_s10 }
 0x1fc   : > { %2916 = vmatpush.msra.mxu0 %v6516_v27  ;;  %2843 = vmatpush.msrb.mxu2 %v6477_v17  ;;  %v6458_v27 = vld [vmem:[%s10570_s3 + $0x218] sm:$0xff] }
 0x1fe   : > { %2552 = vmatmul.f32.gmra.mxu1 %v2442_v24  ;;  %2917 = vmatpush.msra.mxu0 %v6515_v56  ;;  %v6464_v24 = vld [vmem:[%s10570_s3 + $0x248] sm:$0xff]  ;;  %v6505_v56 = vld [vmem:[%s10570_s3 + $0x390] sm:$0xff] }
 0x1ff   : > { %2660 = vmatmul.f32.gmra.mxu0 %v7709_v51  ;;  %2592 = vmatmul.f32.gmra.mxu2 %v7741_v5 }
 0x200   : > { %2918 = vmatpush.msra.mxu0 %v6514_v61  ;;  %2800 = vmatpush.msrb.mxu1 %v6464_v24  ;;  %v6504_v61 = vld [vmem:[%s10570_s3 + $0x388] sm:$0xff]  ;;  %v6768_v24 = vld [vmem:[#allocation7 + $0x30] ss:$0 sm:$0xff] }
 0x202   : > { %2919 = vmatpush.msra.mxu0 %v6513_v11  ;;  %2801 = vmatpush.msrb.mxu1 %v6463_v14  ;;  %v4061_v14 = vld [vmem:[#allocation3 + $0x142] sm:$0xff] }
 0x203   : > { %4089 = vrot.lane.b32.xlu1 %v4061_v14, %s7169_s10 }
 0x204   : > { %2802 = vmatpush.msrb.mxu1 %v6462_v16  ;;  %v6550_v16 = vld [vmem:[%s10570_s3 + $0x4f8] sm:$0xff] }
 0x205   : > { %v2073_v50 = vpop.f32.mrf.mxu0  ;;  %v2093_v20 = vpop.f32.mrf.mxu1 }
 0x206   : > { %v2074_v25 = vadd.f32 %v2073_v50, %v1274_v29  ;;  %v2094_v26 = vadd.f32 %v2093_v20, %v1275_v15  ;;  %v6494_v29 = vld [vmem:[%s10570_s3 + $0x338] sm:$0xff]  ;;  %v6512_v15 = vld [vmem:[%s10570_s3 + $0x3c8] sm:$0xff]  ;;  %2803 = vmatpush.msrb.mxu1 %v6461_v18 }
 0x207   : > { %2663 = vmatmul.f32.gmra.mxu0 %v7724_v57  ;;  %2882 = vmatpush.msrb.mxu3 %v6494_v29  ;;  %v6460_v50 = vld [vmem:[%s10570_s3 + $0x228] sm:$0xff]  ;;  %v6566_v18 = vld [vmem:[%s10570_s3 + $0x578] sm:$0xff] }
 0x208   : > { %v2352_v7 = vmax.f32 %v2074_v25, 0.0  ;;  %v2353_v28 = vmax.f32 %v2094_v26, 0.0  ;;  %2920 = vmatpush.msra.mxu0 %v6512_v15  ;;  %v6476_v20 = vld [vmem:[%s10570_s3 + $0x2a8] sm:$0xff]  ;;  %2804 = vmatpush.msrb.mxu1 %v6460_v50  ;;  %v6510_v26 = vld [vmem:[%s10570_s3 + $0x3b8] sm:$0xff] }
 0x209   : > { %2883 = vmatpush.msrb.mxu3 %v6493_v23  ;;  %2844 = vmatpush.msrb.mxu2 %v6476_v20  ;;  %v6492_v25 = vld [vmem:[%s10570_s3 + $0x328] sm:$0xff]  ;;  %v7978_v20 = vld [vmem:[#allocation9] ss:$0 sm:$0xff] }
 0x20a   : > { %2407 = vst [vmem:[#allocation2 + $0x62] sm:$0x1] %v2352_v7  ;;  %2921 = vmatpush.msra.mxu0 %v6511_v19  ;;  %2805 = vmatpush.msrb.mxu1 %v6459_v22  ;;  %v6474_v7 = vld [vmem:[%s10570_s3 + $0x298] sm:$0xff]  ;;  %v2705_v19 = vld [vmem:[#allocation2 + $0x2] sm:$0xff]  ;;  %v6549_v22 = vld [vmem:[%s10570_s3 + $0x4f0] sm:$0xff] }
 0x20b   : > { %2408 = vst [vmem:[#allocation2 + $0x63] sm:$0x1] %v2353_v28  ;;  %2845 = vmatpush.msrb.mxu2 %v6475_v21  ;;  %2884 = vmatpush.msrb.mxu3 %v6492_v25  ;;  %v6457_v28 = vld [vmem:[%s10570_s3 + $0x210] sm:$0xff]  ;;  %v7976_v50 = vld [vmem:[#allocation2 + $0x81] sm:$0xff]  ;;  %v6534_v21 = vld [vmem:[%s10570_s3 + $0x478] sm:$0xff] }
 0x20c   : > { %2922 = vmatpush.msra.mxu0 %v6510_v26  ;;  %2806 = vmatpush.msrb.mxu1 %v6458_v27  ;;  %v6565_v25 = vld [vmem:[%s10570_s3 + $0x570] sm:$0xff] }
 0x20d   : > { %2846 = vmatpush.msrb.mxu2 %v6474_v7  ;;  %v6564_v7 = vld [vmem:[%s10570_s3 + $0x568] sm:$0xff] }
 0x20e   : > { %v2113_v37 = vpop.f32.mrf.mxu2  ;;  %v2133_v38 = vpop.f32.mrf.mxu3  ;;  %2807 = vmatpush.msrb.mxu1 %v6457_v28  ;;  %v6582_v28 = vld [vmem:[%s10570_s3 + $0x5f8] sm:$0xff] }
 0x20f   : > { %2666 = vmatmul.f32.gmra.mxu0 %v7737_v2  ;;  %v2114_v41 = vadd.f32 %v2113_v37, %v1276_v31  ;;  %v2134_v42 = vadd.f32 %v2133_v38, %v1277_v32  ;;  %v2153_v43 = vpop.f32.mrf.mxu0  ;;  %v2173_v40 = vpop.f32.mrf.mxu1  ;;  %v6473_v31 = vld [vmem:[%s10570_s3 + $0x290] sm:$0xff]  ;;  %v6472_v37 = vld [vmem:[%s10570_s3 + $0x288] sm:$0xff]  ;;  %v1282_v38 = vperm.slane %v7799_v30, 4 }
 0x210   : > { %v2154_v44 = vadd.f32 %v2153_v43, %v1278_v35  ;;  %v2174_v34 = vadd.f32 %v2173_v40, %v1279_v36  ;;  %v6509_v32 = vld [vmem:[%s10570_s3 + $0x3b0] sm:$0xff]  ;;  %2847 = vmatpush.msrb.mxu2 %v6473_v31  ;;  %v6491_v35 = vld [vmem:[%s10570_s3 + $0x320] sm:$0xff]  ;;  %v6456_v36 = vld [vmem:[%s10570_s3 + $0x208] sm:$0xff] }
 0x211   : > { %v2354_v46 = vmax.f32 %v2114_v41, 0.0  ;;  %v2355_v47 = vmax.f32 %v2134_v42, 0.0  ;;  %2923 = vmatpush.msra.mxu0 %v6509_v32  ;;  %v1283_v41 = vperm.slane %v7799_v30, 5  ;;  %2885 = vmatpush.msrb.mxu3 %v6491_v35  ;;  %v6508_v42 = vld [vmem:[%s10570_s3 + $0x3a8] sm:$0xff]  ;;  %v6471_v43 = vld [vmem:[%s10570_s3 + $0x280] sm:$0xff] }
 0x212   : > { %v2356_v48 = vmax.f32 %v2154_v44, 0.0  ;;  %v2357_v49 = vmax.f32 %v2174_v34, 0.0  ;;  %2848 = vmatpush.msrb.mxu2 %v6472_v37  ;;  %v6455_v40 = vld [vmem:[%s10570_s3 + $0x200] sm:$0xff]  ;;  %2808 = vmatpush.msrb.mxu1 %v6456_v36  ;;  %v8005_v36 = vld [vmem:[#allocation2 + $0x12] sm:$0xff]  ;;  %v6532_v37 = vld [vmem:[%s10570_s3 + $0x468] sm:$0xff] }
 0x213   : > { %2409 = vst [vmem:[#allocation2 + $0x64] sm:$0x1] %v2354_v46  ;;  %2924 = vmatpush.msra.mxu0 %v6508_v42  ;;  %v6507_v44 = vld [vmem:[%s10570_s3 + $0x3a0] sm:$0xff]  ;;  %v6581_v42 = vld [vmem:[%s10570_s3 + $0x5f0] sm:$0xff] }
 0x214   : > { %2410 = vst [vmem:[#allocation2 + $0x65] sm:$0x1] %v2355_v47  ;;  %2849 = vmatpush.msrb.mxu2 %v6471_v43  ;;  %v6490_v47 = vld [vmem:[%s10570_s3 + $0x318] sm:$0xff]  ;;  %2809 = vmatpush.msrb.mxu1 %v6455_v40  ;;  %v3523_v30 = vld [vmem:[#allocation3 + $0x141] sm:$0xff] }
 0x215   : > { %2411 = vst [vmem:[#allocation2 + $0x66] sm:$0x1] %v2356_v48  ;;  %2925 = vmatpush.msra.mxu0 %v6507_v44  ;;  %2886 = vmatpush.msrb.mxu3 %v6490_v47  ;;  %v6546_v43 = vld [vmem:[%s10570_s3 + $0x4d8] sm:$0xff] }
 0x216   : > { %2412 = vst [vmem:[#allocation2 + $0x67] sm:$0x1] %v2357_v49  ;;  %3551 = vrot.lane.b32.xlu0 %v3523_v30, %s7169_s10  ;;  %3106 = vmatpush.msra.mxu2 %v6550_v16  ;;  %v6562_v44 = vld [vmem:[%s10570_s3 + $0x558] sm:$0xff]  ;;  %v6528_v30 = vld [vmem:[%s10570_s3 + $0x448] sm:$0xff] }
 0x217   : > { %2669 = vmatmul.f32.gmra.mxu0 %v7741_v5  ;;  %2887 = vmatpush.msrb.mxu3 %v6489_v55 }
 0x218   : > { %2926 = vmatpush.msra.mxu0 %v6506_v3  ;;  %3066 = vmatpush.msra.mxu1 %v6534_v21 }
 0x219   : > { %2888 = vmatpush.msrb.mxu3 %v6488_v60  ;;  %3107 = vmatpush.msra.mxu2 %v6549_v22  ;;  %v6541_v22 = vld [vmem:[%s10570_s3 + $0x4b0] sm:$0xff] }
 0x21a   : > { %2927 = vmatpush.msra.mxu0 %v6505_v56 }
 0x21c   : > { %2928 = vmatpush.msra.mxu0 %v6504_v61  ;;  %v6544_v61 = vld [vmem:[%s10570_s3 + $0x4c8] sm:$0xff] }
 0x21d   : > { %v2428_v53 = vld [vmem:[#allocation2 + $0x60] sm:$0xff] }
 0x21e   : > { %v7813_v54 = vld [vmem:[#allocation2 + $0x61] sm:$0xff]  ;;  %2555 = vmatmul.f32.gmra.mxu1 %v2428_v53  ;;  %2632 = vmatmul.f32.gmra.mxu3 %v2428_v53 }
 0x21f   : > { %2595 = vmatmul.f32.gmra.mxu2 %v7813_v54  ;;  %2672 = vmatmul.f32.gmra.mxu0 %v7813_v54 }
 0x220   : > { %3913 = vrot.lane.b32.xlu0 %v3885_v1, %s7169_s10 }
 0x236   : > { %v2193_v0 = vpop.f32.mrf.mxu2  ;;  %v2213_v4 = vpop.f32.mrf.mxu3 }
 0x237   : > { %v2194_v8 = vadd.f32 %v2193_v0, %v1280_v62  ;;  %v2214_v9 = vadd.f32 %v2213_v4, %v1281_v63  ;;  %v6487_v62 = vld [vmem:[%s10570_s3 + $0x300] sm:$0xff] }
 0x238   : > { %v6503_v63 = vld [vmem:[%s10570_s3 + $0x380] sm:$0xff]  ;;  %2889 = vmatpush.msrb.mxu3 %v6487_v62  ;;  %v6561_v62 = vld [vmem:[%s10570_s3 + $0x550] sm:$0xff] }
 0x239   : > { %v2358_v12 = vmax.f32 %v2194_v8, 0.0  ;;  %v2359_v13 = vmax.f32 %v2214_v9, 0.0  ;;  %2929 = vmatpush.msra.mxu0 %v6503_v63  ;;  %v6579_v63 = vld [vmem:[%s10570_s3 + $0x5e0] sm:$0xff] }
 0x23a   : > { %3146 = vmatpush.msra.mxu3 %v6566_v18  ;;  %v6526_v18 = vld [vmem:[%s10570_s3 + $0x438] sm:$0xff] }
 0x23b   : > { %2414 = vst [vmem:[#allocation2 + $0x71] sm:$0x1] %v2358_v12  ;;  %3186 = vmatpush.msrb.mxu0 %v6582_v28 }
 0x23c   : > { %2415 = vst [vmem:[#allocation2 + $0x72] sm:$0x1] %v2359_v13  ;;  %3147 = vmatpush.msra.mxu3 %v6565_v25  ;;  %v6576_v25 = vld [vmem:[%s10570_s3 + $0x5c8] sm:$0xff] }
 0x23d   : > { %3187 = vmatpush.msrb.mxu0 %v6581_v42 }
 0x23e   : > { %3148 = vmatpush.msra.mxu3 %v6564_v7  ;;  %v6575_v7 = vld [vmem:[%s10570_s3 + $0x5c0] sm:$0xff] }
 0x249   : > { %v2233_v34 = vpop.f32.mrf.mxu0  ;;  %v2253_v46 = vpop.f32.mrf.mxu1 }
 0x24a   : > { %v2234_v48 = vadd.f32 %v2233_v34, %v1282_v38  ;;  %v2254_v49 = vadd.f32 %v2253_v46, %v1283_v41  ;;  %v6547_v38 = vld [vmem:[%s10570_s3 + $0x4e0] sm:$0xff]  ;;  %v6580_v34 = vld [vmem:[%s10570_s3 + $0x5e8] sm:$0xff]  ;;  %v6530_v46 = vld [vmem:[%s10570_s3 + $0x458] sm:$0xff] }
 0x24b   : > { %v6563_v41 = vld [vmem:[%s10570_s3 + $0x560] sm:$0xff]  ;;  %3188 = vmatpush.msrb.mxu0 %v6580_v34  ;;  %v6538_v34 = vld [vmem:[%s10570_s3 + $0x498] sm:$0xff] }
 0x24c   : > { %v2360_v52 = vmax.f32 %v2234_v48, 0.0  ;;  %v2361_v53 = vmax.f32 %v2254_v49, 0.0  ;;  %3149 = vmatpush.msra.mxu3 %v6563_v41 }
 0x24d   : > { %3189 = vmatpush.msrb.mxu0 %v6579_v63 }
 0x24e   : > { %2416 = vst [vmem:[#allocation2 + $0x73] sm:$0x1] %v2360_v52  ;;  %3150 = vmatpush.msra.mxu3 %v6562_v44  ;;  %v6545_v52 = vld [vmem:[%s10570_s3 + $0x4d0] sm:$0xff]  ;;  %v6523_v44 = vld [vmem:[%s10570_s3 + $0x420] sm:$0xff] }
 0x24f   : > { %2417 = vst [vmem:[#allocation2 + $0x74] sm:$0x1] %v2361_v53 }
 0x250   : > { %v2273_v0 = vpop.f32.mrf.mxu2  ;;  %v2293_v4 = vpop.f32.mrf.mxu3  ;;  %3151 = vmatpush.msra.mxu3 %v6561_v62 }
 0x251   : > { %v2274_v6 = vadd.f32 %v2273_v0, %v1284_v58  ;;  %v2294_v8 = vadd.f32 %v2293_v4, %v1285_v59  ;;  %v8042_v58 = vld [vmem:[#allocation2 + $0x22] sm:$0xff]  ;;  %v6529_v59 = vld [vmem:[%s10570_s3 + $0x450] sm:$0xff] }
 0x252   : > { %v6527_v4 = vld [vmem:[%s10570_s3 + $0x440] sm:$0xff] }
 0x253   : > { %v2362_v9 = vmax.f32 %v2274_v6, 0.0  ;;  %v2363_v10 = vmax.f32 %v2294_v8, 0.0  ;;  %v2313_v11 = vpop.f32.mrf.mxu0  ;;  %v2538_v17 = vpop.f32.mrf.mxu1  ;;  %v6578_v6 = vld [vmem:[%s10570_s3 + $0x5d8] sm:$0xff] }
 0x254   : > { %v2314_v12 = vadd.f32 %v6768_v24, %v2313_v11  ;;  %v2539_v27 = vadd.f32 %v7978_v20, %v2538_v17  ;;  %v6560_v24 = vld [vmem:[%s10570_s3 + $0x548] sm:$0xff]  ;;  %3190 = vmatpush.msrb.mxu0 %v6578_v6  ;;  %v8086_v17 = vld [vmem:[#allocation2 + $0x32] sm:$0xff] }
 0x255   : > { %2418 = vst [vmem:[#allocation2 + $0x75] sm:$0x1] %v2362_v9  ;;  %3152 = vmatpush.msra.mxu3 %v6560_v24  ;;  %v6542_v9 = vld [vmem:[%s10570_s3 + $0x4b8] sm:$0xff]  ;;  %v6572_v24 = vld [vmem:[%s10570_s3 + $0x5a8] sm:$0xff] }
 0x256   : > { %2419 = vst [vmem:[#allocation2 + $0x76] sm:$0x1] %v2363_v10  ;;  %v2364_v13 = vmax.f32 %v2314_v12, 0.0  ;;  %v6577_v12 = vld [vmem:[%s10570_s3 + $0x5d0] sm:$0xff] }
 0x257   : > { %3191 = vmatpush.msrb.mxu0 %v6577_v12 }
 0x258   : > { %2420 = vst [vmem:[#allocation2 + $0x77] sm:$0x1] %v2364_v13  ;;  %v6559_v13 = vld [vmem:[%s10570_s3 + $0x540] sm:$0xff] }
 0x259   : > { %3153 = vmatpush.msra.mxu3 %v6559_v13  ;;  %3192 = vmatpush.msrb.mxu0 %v6576_v25  ;;  %v6553_v13 = vld [vmem:[%s10570_s3 + $0x510] sm:$0xff] }
 0x25a   : > { %v2578_v23 = vpop.f32.mrf.mxu2  ;;  %v2618_v26 = vpop.f32.mrf.mxu3  ;;  %v6569_v25 = vld [vmem:[%s10570_s3 + $0x590] sm:$0xff] }
 0x25b   : > { %v2541_v31 = vpop.f32.mrf.mxu1  ;;  %v2579_v35 = vadd.f32 %v2578_v23, %v2539_v27  ;;  %3193 = vmatpush.msrb.mxu0 %v6575_v7 }
 0x25c   : > { %v2542_v49 = vadd.f32 %v7978_v20, %v2541_v31  ;;  %v6524_v31 = vld [vmem:[%s10570_s3 + $0x428] sm:$0xff] }
 0x25d   : > { %v2619_v40 = vadd.f32 %v2618_v26, %v2579_v35 }
 0x25f   : > { %v7962_v29 = vld [vmem:[#allocation2 + $0x70] sm:$0xff] }
 0x260   : > { %v7964_v15 = vld [vmem:[#allocation2 + $0x71] sm:$0xff]  ;;  %2558 = vmatmul.f32.gmra.mxu1 %v7962_v29  ;;  %2635 = vmatmul.f32.gmra.mxu3 %v7962_v29 }
 0x261   : > { %2598 = vmatmul.f32.gmra.mxu2 %v7964_v15  ;;  %2675 = vmatmul.f32.gmra.mxu0 %v7964_v15 }
 0x262   : > { %v2581_v32 = vpop.f32.mrf.mxu2  ;;  %v2621_v47 = vpop.f32.mrf.mxu3 }
 0x263   : > { %v2544_v53 = vpop.f32.mrf.mxu1  ;;  %v2582_v55 = vadd.f32 %v2581_v32, %v2542_v49  ;;  %v6539_v32 = vld [vmem:[%s10570_s3 + $0x4a0] sm:$0xff]  ;;  %v6556_v49 = vld [vmem:[%s10570_s3 + $0x528] sm:$0xff] }
 0x264   : > { %v2545_v10 = vadd.f32 %v7978_v20, %v2544_v53 }
 0x265   : > { %v2622_v0 = vadd.f32 %v2621_v47, %v2582_v55 }
 0x268   : > { %2810 = vmatmul.f32.vlgmr.msrb.gmra.mxu1 %v7673_v33  ;;  %2638 = vmatmul.f32.gmra.mxu3 %v7678_v39  ;;  %v6533_v33 = vld [vmem:[%s10570_s3 + $0x470] sm:$0xff]  ;;  %v6548_v39 = vld [vmem:[%s10570_s3 + $0x4e8] sm:$0xff] }
 0x269   : > { %2850 = vmatmul.f32.vlgmr.msrb.gmra.mxu2 %v2705_v19  ;;  %2678 = vmatmul.f32.gmra.mxu0 %v7976_v50 }
 0x26a   : > { %3067 = vmatpush.msra.mxu1 %v6533_v33  ;;  %3108 = vmatpush.msra.mxu2 %v6548_v39  ;;  %v2584_v60 = vpop.f32.mrf.mxu2  ;;  %v2624_v14 = vpop.f32.mrf.mxu3  ;;  %v6525_v33 = vld [vmem:[%s10570_s3 + $0x430] sm:$0xff]  ;;  %v6540_v39 = vld [vmem:[%s10570_s3 + $0x4a8] sm:$0xff] }
 0x26b   : > { %v2585_v1 = vadd.f32 %v2584_v60, %v2545_v10  ;;  %v2547_v23 = vpop.f32.mrf.mxu1 }
 0x26c   : > { %3068 = vmatpush.msra.mxu1 %v6532_v37  ;;  %3109 = vmatpush.msra.mxu2 %v6547_v38  ;;  %v2548_v35 = vadd.f32 %v7978_v20, %v2547_v23  ;;  %v6557_v38 = vld [vmem:[%s10570_s3 + $0x530] sm:$0xff]  ;;  %v6552_v23 = vld [vmem:[%s10570_s3 + $0x508] sm:$0xff] }
 0x26d   : > { %v2625_v27 = vadd.f32 %v2624_v14, %v2585_v1 }
 0x26e   : > { %3110 = vmatpush.msra.mxu2 %v6546_v43 }
 0x270   : > { %2813 = vmatmul.f32.gmra.mxu1 %v7694_v45  ;;  %2890 = vmatmul.f32.vlgmr.msrb.gmra.mxu3 %v7694_v45  ;;  %v6531_v45 = vld [vmem:[%s10570_s3 + $0x460] sm:$0xff] }
 0x271   : > { %2853 = vmatmul.f32.gmra.mxu2 %v8005_v36  ;;  %2930 = vmatmul.f32.vlgmr.msra.gmra.mxu0 %v8005_v36 }
 0x272   : > { %3069 = vmatpush.msra.mxu1 %v6531_v45  ;;  %3111 = vmatpush.msra.mxu2 %v6545_v52  ;;  %v2587_v26 = vpop.f32.mrf.mxu2  ;;  %v8129_v45 = vld [vmem:[#allocation2 + $0x42] sm:$0xff]  ;;  %v2627_v43 = vpop.f32.mrf.mxu3  ;;  %v6537_v52 = vld [vmem:[%s10570_s3 + $0x490] sm:$0xff] }
 0x273   : > { %v2588_v41 = vadd.f32 %v2587_v26, %v2548_v35  ;;  %v2550_v47 = vpop.f32.mrf.mxu1  ;;  %v6567_v35 = vld [vmem:[%s10570_s3 + $0x580] sm:$0xff] }
 0x274   : > { %v2658_v48 = vpop.f32.mrf.mxu0  ;;  %3070 = vmatpush.msra.mxu1 %v6530_v46  ;;  %3112 = vmatpush.msra.mxu2 %v6544_v61  ;;  %v6574_v46 = vld [vmem:[%s10570_s3 + $0x5b8] sm:$0xff]  ;;  %v2551_v60 = vadd.f32 %v7978_v20, %v2550_v47  ;;  %v6597_v47 = vld [vmem:[%s10570_s3 + $0x670] sm:$0xff] }
 0x275   : > { %v2659_v3 = vadd.f32 %v2658_v48, %v2619_v40  ;;  %v6522_v48 = vld [vmem:[%s10570_s3 + $0x418] sm:$0xff]  ;;  %3194 = vmatpush.msrb.mxu0 %v6574_v46 }
 0x276   : > { %3071 = vmatpush.msra.mxu1 %v6529_v59  ;;  %v6555_v59 = vld [vmem:[%s10570_s3 + $0x520] sm:$0xff]  ;;  %v6614_v46 = vld [vmem:[%s10570_s3 + $0x6f8] sm:$0xff] }
 0x277   : > { %v2681_v56 = vmax.f32 %v2659_v3, 0.0  ;;  %v2628_v3 = vadd.f32 %v2627_v43, %v2588_v41  ;;  %v8240_v43 = vld [vmem:[#allocation2 + $0x11] sm:$0xff] }
 0x278   : > { %2816 = vmatmul.f32.gmra.mxu1 %v7709_v51  ;;  %2893 = vmatmul.f32.gmra.mxu3 %v7709_v51  ;;  %v6543_v51 = vld [vmem:[%s10570_s3 + $0x4c0] sm:$0xff] }
 0x279   : > { %2856 = vmatmul.f32.gmra.mxu2 %v8042_v58  ;;  %2690 = vst.msk [vmem:[#allocation3 + $0x11] sm:$0x7f] %vm2689_vm2, %v2681_v56  ;;  %2933 = vmatmul.f32.gmra.mxu0 %v8042_v58  ;;  %v6521_v56 = vld [vmem:[%s10570_s3 + $0x410] sm:$0xff] }
 0x27a   : > { %3072 = vmatpush.msra.mxu1 %v6528_v30  ;;  %3113 = vmatpush.msra.mxu2 %v6543_v51  ;;  %v2590_v53 = vpop.f32.mrf.mxu2  ;;  %v8167_v30 = vld [vmem:[#allocation2 + $0x52] sm:$0xff] }
 0x27b   : > { %v2591_v62 = vadd.f32 %v2590_v53, %v2551_v60  ;;  %v2630_v6 = vpop.f32.mrf.mxu3  ;;  %v2553_v26 = vpop.f32.mrf.mxu1  ;;  %v6612_v53 = vld [vmem:[%s10570_s3 + $0x6e8] sm:$0xff]  ;;  %v6594_v60 = vld [vmem:[%s10570_s3 + $0x658] sm:$0xff] }
 0x27c   : > { %v2661_v8 = vpop.f32.mrf.mxu0  ;;  %3073 = vmatpush.msra.mxu1 %v6527_v4  ;;  %3114 = vmatpush.msra.mxu2 %v6542_v9  ;;  %v6536_v4 = vld [vmem:[%s10570_s3 + $0x488] sm:$0xff]  ;;  %v6554_v9 = vld [vmem:[%s10570_s3 + $0x518] sm:$0xff] }
 0x27d   : > { %v2662_v11 = vadd.f32 %v2661_v8, %v2622_v0  ;;  %v6520_v0 = vld [vmem:[%s10570_s3 + $0x408] sm:$0xff]  ;;  %v6519_v8 = vld [vmem:[%s10570_s3 + $0x400] sm:$0xff]  ;;  %v2631_v10 = vadd.f32 %v2630_v6, %v2591_v62  ;;  %v6629_v62 = vld [vmem:[%s10570_s3 + $0x770] sm:$0xff] }
 0x27e   : > { %3074 = vmatpush.msra.mxu1 %v6526_v18  ;;  %3115 = vmatpush.msra.mxu2 %v6541_v22  ;;  %v6551_v22 = vld [vmem:[%s10570_s3 + $0x500] sm:$0xff] }
 0x27f   : > { %v2682_v16 = vmax.f32 %v2662_v11, 0.0  ;;  %v6535_v11 = vld [vmem:[%s10570_s3 + $0x480] sm:$0xff] }
 0x280   : > { %v8091_v19 = vld [vmem:[#allocation3 + $0x12] sm:$0xff]  ;;  %2819 = vmatmul.f32.gmra.mxu1 %v7724_v57  ;;  %2896 = vmatmul.f32.gmra.mxu3 %v7724_v57 }
 0x281   : > { %v3537_v21 = vld [vmem:[#allocation3 + $0x11] sm:$0xff]  ;;  %2859 = vmatmul.f32.gmra.mxu2 %v8086_v17  ;;  %2691 = vst.msk [vmem:[#allocation3 + $0x21] sm:$0x7f] %vm2689_vm2, %v2682_v16  ;;  %4117 = vrot.lane.b32.xlu0 %v8091_v19, %s7169_s10  ;;  %v8202_v16 = vld [vmem:[#allocation2 + $0x62] sm:$0xff] }
 0x282   : > { %3579 = vrot.lane.b32.xlu1 %v3537_v21, %s7169_s10  ;;  %2936 = vmatmul.f32.gmra.mxu0 %v8086_v17  ;;  %v6558_v57 = vld [vmem:[%s10570_s3 + $0x538] sm:$0xff] }
 0x283   : > { %3154 = vmatpush.msra.mxu3 %v6558_v57  ;;  %3075 = vmatpush.msra.mxu1 %v6525_v33  ;;  %v2593_v33 = vpop.f32.mrf.mxu2 }
 0x284   : > { %v2664_v28 = vpop.f32.mrf.mxu0  ;;  %3116 = vmatpush.msra.mxu2 %v6540_v39  ;;  %v2554_v39 = vadd.f32 %v7978_v20, %v2553_v26  ;;  %v8365_v26 = vld [vmem:[%s10570_s3 + $0x7d8] sm:$0xff] }
 0x285   : > { %v2665_v37 = vadd.f32 %v2664_v28, %v2625_v27  ;;  %3155 = vmatpush.msra.mxu3 %v6557_v38  ;;  %3076 = vmatpush.msra.mxu1 %v6524_v31  ;;  %v8225_v27 = vld [vmem:[#allocation2 + $0x72] sm:$0xff]  ;;  %v6568_v28 = vld [vmem:[%s10570_s3 + $0x588] sm:$0xff] }
 0x286   : > { %3117 = vmatpush.msra.mxu2 %v6539_v32  ;;  %v2594_v7 = vadd.f32 %v2593_v33, %v2554_v39  ;;  %v6589_v33 = vld [vmem:[%s10570_s3 + $0x630] sm:$0xff] }
 0x287   : > { %v2683_v42 = vmax.f32 %v2665_v37, 0.0  ;;  %3077 = vmatpush.msra.mxu1 %v6523_v44  ;;  %3156 = vmatpush.msra.mxu3 %v6556_v49  ;;  %v8242_v44 = vld [vmem:[#allocation2 + $0x82] sm:$0xff]  ;;  %v6605_v39 = vld [vmem:[%s10570_s3 + $0x6b0] sm:$0xff] }
 0x288   : > { %v3538_v40 = vld [vmem:[#allocation3 + $0x21] sm:$0xff]  ;;  %2822 = vmatmul.f32.gmra.mxu1 %v7737_v2  ;;  %2899 = vmatmul.f32.gmra.mxu3 %v7737_v2  ;;  %v6573_v2 = vld [vmem:[%s10570_s3 + $0x5b0] sm:$0xff] }
 0x289   : > { %2862 = vmatmul.f32.gmra.mxu2 %v8129_v45  ;;  %2692 = vst.msk [vmem:[#allocation3 + $0x31] sm:$0x7f] %vm2689_vm2, %v2683_v42  ;;  %3581 = vrot.lane.b32.xlu2 %v3538_v40, %s7169_s10  ;;  %v4076_v51 = vld [vmem:[#allocation3 + $0x22] sm:$0xff]  ;;  %v2969_v42 = vld [vmem:[#allocation2 + $0x10] sm:$0xff] }
 0x28a   : > { %4267 = vrot.lane.b32.xlu0 %v3538_v40, %s7169_s10  ;;  %4265 = vrot.lane.b32.xlu1 %v3537_v21, %s7169_s10  ;;  %v6570_v21 = vld [vmem:[%s10570_s3 + $0x598] sm:$0xff]  ;;  %v2970_v49 = vld [vmem:[#allocation2 + $0x20] sm:$0xff] }
 0x28b   : > { %2939 = vmatmul.f32.gmra.mxu0 %v8129_v45  ;;  %3118 = vmatpush.msra.mxu2 %v6538_v34  ;;  %v6598_v34 = vld [vmem:[%s10570_s3 + $0x678] sm:$0xff] }
 0x28c   : > { %v2667_v55 = vpop.f32.mrf.mxu0  ;;  %3078 = vmatpush.msra.mxu1 %v6522_v48  ;;  %3195 = vmatpush.msrb.mxu0 %v6573_v2  ;;  %v6613_v48 = vld [vmem:[%s10570_s3 + $0x6f0] sm:$0xff]  ;;  %v6596_v2 = vld [vmem:[%s10570_s3 + $0x668] sm:$0xff] }
 0x28d   : > { %v2668_v61 = vadd.f32 %v2667_v55, %v2628_v3  ;;  %3119 = vmatpush.msra.mxu2 %v6537_v52  ;;  %3157 = vmatpush.msra.mxu3 %v6555_v59  ;;  %v8263_v3 = vld [vmem:[#allocation2 + $0x21] sm:$0xff]  ;;  %v6630_v59 = vld [vmem:[%s10570_s3 + $0x778] sm:$0xff] }
 0x28e   : > { %3079 = vmatpush.msra.mxu1 %v6521_v56  ;;  %3196 = vmatpush.msrb.mxu0 %v6572_v24  ;;  %v6595_v55 = vld [vmem:[%s10570_s3 + $0x660] sm:$0xff]  ;;  %v6610_v24 = vld [vmem:[%s10570_s3 + $0x6d8] sm:$0xff] }
 0x28f   : > { %v2684_v63 = vmax.f32 %v2668_v61, 0.0  ;;  %3120 = vmatpush.msra.mxu2 %v6536_v4  ;;  %3158 = vmatpush.msra.mxu3 %v6554_v9  ;;  %v6611_v56 = vld [vmem:[%s10570_s3 + $0x6e0] sm:$0xff]  ;;  %v8291_v61 = vld [vmem:[%s10570_s3 + $0x7f8] sm:$0xff]  ;;  %v6628_v9 = vld [vmem:[%s10570_s3 + $0x768] sm:$0xff] }
 0x290   : > { %2825 = vmatmul.f32.gmra.mxu1 %v7741_v5  ;;  %2902 = vmatmul.f32.gmra.mxu3 %v7741_v5  ;;  %v6571_v5 = vld [vmem:[%s10570_s3 + $0x5a0] sm:$0xff]  ;;  %v4239_v18 = vld [vmem:[#allocation3 + $0x31] sm:$0xff] }
 0x291   : > { %2865 = vmatmul.f32.gmra.mxu2 %v8167_v30  ;;  %2693 = vst.msk [vmem:[#allocation3 + $0x41] sm:$0x7f] %vm2689_vm2, %v2684_v63  ;;  %4119 = vrot.lane.b32.xlu2 %v4076_v51, %s7169_s10  ;;  %v8300_v63 = vld [vmem:[%s10570_s3 + $0x7f0] sm:$0xff] }
 0x292   : > { %4797 = vrot.lane.b32.xlu0 %v4076_v51, %s7169_s10  ;;  %4795 = vrot.lane.b32.xlu1 %v8091_v19, %s7169_s10  ;;  %v4077_v19 = vld [vmem:[#allocation3 + $0x32] sm:$0xff] }
 0x293   : > { %2942 = vmatmul.f32.gmra.mxu0 %v8167_v30  ;;  %3080 = vmatpush.msra.mxu1 %v6520_v0  ;;  %v2971_v51 = vld [vmem:[#allocation2 + $0x30] sm:$0xff] }
 0x294   : > { %v2670_v12 = vpop.f32.mrf.mxu0  ;;  %3121 = vmatpush.msra.mxu2 %v6535_v11  ;;  %3197 = vmatpush.msrb.mxu0 %v6571_v5  ;;  %v8302_v0 = vld [vmem:[#allocation2 + $0x31] sm:$0xff]  ;;  %v8324_v11 = vld [vmem:[%s10570_s3 + $0x7e8] sm:$0xff] }
 0x295   : > { %v2671_v14 = vadd.f32 %v2670_v12, %v2631_v10  ;;  %3081 = vmatpush.msra.mxu1 %v6519_v8  ;;  %3159 = vmatpush.msra.mxu3 %v6553_v13  ;;  %v6593_v8 = vld [vmem:[%s10570_s3 + $0x650] sm:$0xff]  ;;  %v6592_v5 = vld [vmem:[%s10570_s3 + $0x648] sm:$0xff]  ;;  %v6627_v12 = vld [vmem:[%s10570_s3 + $0x760] sm:$0xff] }
 0x296   : > { %3198 = vmatpush.msrb.mxu0 %v6570_v21  ;;  %3378 = vmatpush.msrb.mxu2 %v6614_v46  ;;  %v6609_v10 = vld [vmem:[%s10570_s3 + $0x6d0] sm:$0xff]  ;;  %v6608_v13 = vld [vmem:[%s10570_s3 + $0x6c8] sm:$0xff]  ;;  %v6590_v21 = vld [vmem:[%s10570_s3 + $0x638] sm:$0xff] }
 0x297   : > { %v2685_v1 = vmax.f32 %v2671_v14, 0.0  ;;  %3160 = vmatpush.msra.mxu3 %v6552_v23  ;;  %3338 = vmatpush.msrb.mxu1 %v6598_v34  ;;  %v8339_v14 = vld [vmem:[%s10570_s3 + $0x7e0] sm:$0xff]  ;;  %v6586_v34 = vld [vmem:[%s10570_s3 + $0x618] sm:$0xff] }
 0x298   : > { %2828 = vmatmul.f32.gmra.mxu1 %v7813_v54  ;;  %2905 = vmatmul.f32.gmra.mxu3 %v7813_v54  ;;  %v4078_v54 = vld [vmem:[#allocation3 + $0x42] sm:$0xff]  ;;  %v6602_v46 = vld [vmem:[%s10570_s3 + $0x698] sm:$0xff] }
 0x299   : > { %2868 = vmatmul.f32.gmra.mxu2 %v8202_v16  ;;  %2694 = vst.msk [vmem:[#allocation3 + $0x51] sm:$0x7f] %vm2689_vm2, %v2685_v1  ;;  %4269 = vrot.lane.b32.xlu2 %v4239_v18, %s7169_s10  ;;  %v3540_v57 = vld [vmem:[#allocation3 + $0x41] sm:$0xff] }
 0x29a   : > { %3583 = vrot.lane.b32.xlu0 %v4239_v18, %s7169_s10  ;;  %4121 = vrot.lane.b32.xlu1 %v4077_v19, %s7169_s10  ;;  %v6591_v1 = vld [vmem:[%s10570_s3 + $0x640] sm:$0xff] }
 0x29b   : > { %2945 = vmatmul.f32.gmra.mxu0 %v8202_v16  ;;  %3161 = vmatpush.msra.mxu3 %v6551_v22  ;;  %v2972_v18 = vld [vmem:[#allocation2 + $0x40] sm:$0xff]  ;;  %v6606_v22 = vld [vmem:[%s10570_s3 + $0x6b8] sm:$0xff] }
 0x29c   : > { %3199 = vmatpush.msrb.mxu0 %v6569_v25  ;;  %v2673_v37 = vpop.f32.mrf.mxu0  ;;  %3339 = vmatpush.msrb.mxu1 %v6597_v47  ;;  %v8345_v23 = vld [vmem:[#allocation2 + $0x41] sm:$0xff]  ;;  %v6626_v25 = vld [vmem:[%s10570_s3 + $0x758] sm:$0xff] }
 0x29d   : > { %3379 = vmatpush.msrb.mxu2 %v6613_v48  ;;  %3418 = vmatpush.msrb.mxu3 %v6630_v59  ;;  %v6622_v47 = vld [vmem:[%s10570_s3 + $0x738] sm:$0xff]  ;;  %v6584_v59 = vld [vmem:[%s10570_s3 + $0x608] sm:$0xff] }
 0x29e   : > { %3200 = vmatpush.msrb.mxu0 %v6568_v28  ;;  %3340 = vmatpush.msrb.mxu1 %v6596_v2  ;;  %v6604_v28 = vld [vmem:[%s10570_s3 + $0x6a8] sm:$0xff]  ;;  %v8429_v48 = vld [vmem:[%s10570_s3 + $0x7b8] sm:$0xff]  ;;  %v6621_v2 = vld [vmem:[%s10570_s3 + $0x730] sm:$0xff] }
 0x29f   : > { %3380 = vmatpush.msrb.mxu2 %v6612_v53  ;;  %3419 = vmatpush.msrb.mxu3 %v6629_v62  ;;  %v2974_v53 = vld [vmem:[#allocation2 + $0x60] sm:$0xff]  ;;  %v6620_v62 = vld [vmem:[%s10570_s3 + $0x728] sm:$0xff] }
 0x2a0   : > { %2831 = vmatmul.f32.gmra.mxu1 %v7964_v15  ;;  %2908 = vmatmul.f32.gmra.mxu3 %v7964_v15  ;;  %v3541_v40 = vld [vmem:[#allocation3 + $0x51] sm:$0xff] }
 0x2a1   : > { %2871 = vmatmul.f32.gmra.mxu2 %v8225_v27  ;;  %4799 = vrot.lane.b32.xlu2 %v4077_v19, %s7169_s10  ;;  %v2633_v31 = vpop.f32.mrf.mxu3  ;;  %v4079_v52 = vld [vmem:[#allocation3 + $0x52] sm:$0xff]  ;;  %v6607_v19 = vld [vmem:[%s10570_s3 + $0x6c0] sm:$0xff] }
 0x2a2   : > { %4123 = vrot.lane.b32.xlu0 %v4078_v54, %s7169_s10  ;;  %3585 = vrot.lane.b32.xlu1 %v3540_v57, %s7169_s10  ;;  %v2634_v32 = vadd.f32 %v2633_v31, %v2594_v7  ;;  %v8380_v7 = vld [vmem:[%s10570_s3 + $0x7d0] sm:$0xff]  ;;  %v6624_v31 = vld [vmem:[%s10570_s3 + $0x748] sm:$0xff] }
 0x2a3   : > { %2948 = vmatmul.f32.gmra.mxu0 %v8225_v27  ;;  %3341 = vmatpush.msrb.mxu1 %v6595_v55  ;;  %v8441_v55 = vld [vmem:[#allocation2 + $0x61] sm:$0xff] }
 0x2a4   : > { %v2674_v38 = vadd.f32 %v2673_v37, %v2634_v32  ;;  %3201 = vmatpush.msrb.mxu0 %v6567_v35  ;;  %3381 = vmatpush.msrb.mxu2 %v6611_v56  ;;  %v2973_v32 = vld [vmem:[#allocation2 + $0x50] sm:$0xff]  ;;  %v8398_v37 = vld [vmem:[%s10570_s3 + $0x7c8] sm:$0xff] }
 0x2a5   : > { %3342 = vmatpush.msrb.mxu1 %v6594_v60  ;;  %3420 = vmatpush.msrb.mxu3 %v6628_v9  ;;  %v8392_v35 = vld [vmem:[#allocation2 + $0x51] sm:$0xff]  ;;  %v6600_v60 = vld [vmem:[%s10570_s3 + $0x688] sm:$0xff]  ;;  %v2556_v9 = vpop.f32.mrf.mxu1 }
 0x2a6   : > { %v2686_v41 = vmax.f32 %v2674_v38, 0.0  ;;  %3458 = vmatpush.msra.mxu0 %v8291_v61  ;;  %3382 = vmatpush.msrb.mxu2 %v6610_v24  ;;  %v6587_v38 = vld [vmem:[%s10570_s3 + $0x620] sm:$0xff]  ;;  %v8447_v56 = vld [vmem:[%s10570_s3 + $0x7b0] sm:$0xff] }
 0x2a7   : > { %3343 = vmatpush.msrb.mxu1 %v6593_v8  ;;  %3421 = vmatpush.msrb.mxu3 %v6627_v12  ;;  %v6599_v24 = vld [vmem:[%s10570_s3 + $0x680] sm:$0xff]  ;;  %v6617_v12 = vld [vmem:[%s10570_s3 + $0x710] sm:$0xff] }
 0x2a8   : > { %3082 = vmatmul.f32.vlgmr.msra.gmra.mxu1 %v2969_v42  ;;  %2695 = vst.msk [vmem:[#allocation3 + $0x61] sm:$0x7f] %vm2689_vm2, %v2686_v41  ;;  %2911 = vmatmul.f32.gmra.mxu3 %v7976_v50  ;;  %v6603_v41 = vld [vmem:[%s10570_s3 + $0x6a0] sm:$0xff] }
 0x2a9   : > { %3122 = vmatmul.f32.vlgmr.msra.gmra.mxu2 %v8240_v43  ;;  %3587 = vrot.lane.b32.xlu2 %v3541_v40, %s7169_s10  ;;  %v6623_v42 = vld [vmem:[%s10570_s3 + $0x740] sm:$0xff] }
 0x2aa   : > { %4271 = vrot.lane.b32.xlu0 %v3540_v57, %s7169_s10  ;;  %4273 = vrot.lane.b32.xlu1 %v3541_v40, %s7169_s10  ;;  %v6588_v57 = vld [vmem:[%s10570_s3 + $0x628] sm:$0xff]  ;;  %v8414_v40 = vld [vmem:[%s10570_s3 + $0x7c0] sm:$0xff] }
 0x2ab   : > { %2951 = vmatmul.f32.gmra.mxu0 %v8242_v44  ;;  %3383 = vmatpush.msrb.mxu2 %v6609_v10  ;;  %v8478_v8 = vld [vmem:[%s10570_s3 + $0x7a0] sm:$0xff]  ;;  %v6618_v10 = vld [vmem:[%s10570_s3 + $0x718] sm:$0xff] }
 0x2ac   : > { %3459 = vmatpush.msra.mxu0 %v8300_v63  ;;  %3344 = vmatpush.msrb.mxu1 %v6592_v5  ;;  %v8487_v5 = vld [vmem:[%s10570_s3 + $0x798] sm:$0xff] }
 0x2ad   : > { %3384 = vmatpush.msrb.mxu2 %v6608_v13  ;;  %3422 = vmatpush.msrb.mxu3 %v6626_v25  ;;  %v8500_v13 = vld [vmem:[%s10570_s3 + $0x790] sm:$0xff]  ;;  %v6998_v25 = vld [vmem:[#allocation2] sm:$0xff] }
 0x2ae   : > { %3460 = vmatpush.msra.mxu0 %v8324_v11  ;;  %3345 = vmatpush.msrb.mxu1 %v6591_v1  ;;  %v6616_v1 = vld [vmem:[%s10570_s3 + $0x708] sm:$0xff] }
 0x2af   : > { %v4242_v4 = vld [vmem:[#allocation3 + $0x61] sm:$0xff]  ;;  %3385 = vmatpush.msrb.mxu2 %v6607_v19 }
 0x2b0   : > { %3085 = vmatmul.f32.gmra.mxu1 %v2970_v49  ;;  %3162 = vmatmul.f32.vlgmr.msra.gmra.mxu3 %v2970_v49  ;;  %v4080_v6 = vld [vmem:[#allocation3 + $0x62] sm:$0xff]  ;;  %v6585_v49 = vld [vmem:[%s10570_s3 + $0x610] sm:$0xff] }
 0x2b1   : > { %3125 = vmatmul.f32.gmra.mxu2 %v8263_v3  ;;  %4125 = vrot.lane.b32.xlu2 %v4079_v52, %s7169_s10  ;;  %v8511_v19 = vld [vmem:[%s10570_s3 + $0x788] sm:$0xff] }
 0x2b2   : > { %4801 = vrot.lane.b32.xlu0 %v4078_v54, %s7169_s10  ;;  %4803 = vrot.lane.b32.xlu1 %v4079_v52, %s7169_s10  ;;  %v6625_v54 = vld [vmem:[%s10570_s3 + $0x750] sm:$0xff] }
 0x2b3   : > { %3202 = vmatmul.f32.vlgmr.msrb.gmra.mxu0 %v8263_v3  ;;  %3346 = vmatpush.msrb.mxu1 %v6590_v21  ;;  %v6601_v52 = vld [vmem:[%s10570_s3 + $0x690] sm:$0xff] }
 0x2b4   : > { %3461 = vmatpush.msra.mxu0 %v8339_v14  ;;  %3386 = vmatpush.msrb.mxu2 %v6606_v22 }
 0x2b5   : > { %3347 = vmatpush.msrb.mxu1 %v6589_v33  ;;  %3423 = vmatpush.msrb.mxu3 %v6625_v54  ;;  %v2557_v33 = vadd.f32 %v7978_v20, %v2556_v9 }
 0x2b6   : > { %3462 = vmatpush.msra.mxu0 %v8365_v26  ;;  %3387 = vmatpush.msrb.mxu2 %v6605_v39 }
 0x2b7   : > { %3348 = vmatpush.msrb.mxu1 %v6588_v57  ;;  %3424 = vmatpush.msrb.mxu3 %v6624_v31 }
 0x2b8   : > { %3088 = vmatmul.f32.gmra.mxu1 %v2971_v51  ;;  %3165 = vmatmul.f32.gmra.mxu3 %v2971_v51  ;;  %v8463_v51 = vld [vmem:[%s10570_s3 + $0x7a8] sm:$0xff] }
 0x2b9   : > { %3128 = vmatmul.f32.gmra.mxu2 %v8302_v0  ;;  %4275 = vrot.lane.b32.xlu2 %v4242_v4, %s7169_s10 }
 0x2ba   : > { %3589 = vrot.lane.b32.xlu0 %v4242_v4, %s7169_s10  ;;  %4127 = vrot.lane.b32.xlu1 %v4080_v6, %s7169_s10  ;;  %v6583_v4 = vld [vmem:[%s10570_s3 + $0x600] sm:$0xff] }
 0x2bb   : > { %3205 = vmatmul.f32.gmra.mxu0 %v8302_v0  ;;  %3388 = vmatpush.msrb.mxu2 %v6604_v28 }
 0x2bc   : > { %3463 = vmatpush.msra.mxu0 %v8380_v7  ;;  %3349 = vmatpush.msrb.mxu1 %v6587_v38 }
 0x2bd   : > { %3389 = vmatpush.msrb.mxu2 %v6603_v41  ;;  %3425 = vmatpush.msrb.mxu3 %v6623_v42 }
 0x2be   : > { %3464 = vmatpush.msra.mxu0 %v8398_v37  ;;  %3350 = vmatpush.msrb.mxu1 %v6586_v34 }
 0x2bf   : > { %3390 = vmatpush.msrb.mxu2 %v6602_v46  ;;  %3426 = vmatpush.msrb.mxu3 %v6622_v47 }
 0x2c0   : > { %3091 = vmatmul.f32.gmra.mxu1 %v2972_v18  ;;  %3168 = vmatmul.f32.gmra.mxu3 %v2972_v18  ;;  %v2596_v18 = vpop.f32.mrf.mxu2 }
 0x2c1   : > { %3131 = vmatmul.f32.gmra.mxu2 %v8345_v23  ;;  %4805 = vrot.lane.b32.xlu2 %v4080_v6, %s7169_s10  ;;  %v6619_v6 = vld [vmem:[%s10570_s3 + $0x720] sm:$0xff]  ;;  %v2597_v39 = vadd.f32 %v2596_v18, %v2557_v33 }
 0x2c2   : > { %3465 = vmatpush.msra.mxu0 %v8414_v40  ;;  %3351 = vmatpush.msrb.mxu1 %v6585_v49 }
 0x2c3   : > { %3208 = vmatmul.f32.gmra.mxu0 %v8345_v23  ;;  %3391 = vmatpush.msrb.mxu2 %v6601_v52 }
 0x2c4   : > { %3466 = vmatpush.msra.mxu0 %v8429_v48  ;;  %3427 = vmatpush.msrb.mxu3 %v6621_v2 }
 0x2c5   : > { %3352 = vmatpush.msrb.mxu1 %v6584_v59  ;;  %3392 = vmatpush.msrb.mxu2 %v6600_v60 }
 0x2c6   : > { %3467 = vmatpush.msra.mxu0 %v8447_v56  ;;  %3428 = vmatpush.msrb.mxu3 %v6620_v62  ;;  %v8585_v62 = vpop.permute.xlu0 %3551 }
 0x2c7   : > { %3353 = vmatpush.msrb.mxu1 %v6583_v4  ;;  %3393 = vmatpush.msrb.mxu2 %v6599_v24  ;;  %v8587_v4 = vld [vmem:[#allocation9] ss:$0 sm:$0xff] }
 0x2c8   : > { %3094 = vmatmul.f32.gmra.mxu1 %v2973_v32  ;;  %3171 = vmatmul.f32.gmra.mxu3 %v2973_v32 }
 0x2c9   : > { %3134 = vmatmul.f32.gmra.mxu2 %v8392_v35  ;;  %3468 = vmatpush.msra.mxu0 %v8463_v51 }
 0x2ca   : > { %3429 = vmatpush.msrb.mxu3 %v6619_v6  ;;  %6665 = vmatpush.msra.mxu1 %v8291_v61 }
 0x2cb   : > { %3211 = vmatmul.f32.gmra.mxu0 %v8392_v35  ;;  %6666 = vmatpush.msra.mxu2 %v8291_v61 }
 0x2cc   : > { %3469 = vmatpush.msra.mxu0 %v8478_v8  ;;  %3430 = vmatpush.msrb.mxu3 %v6618_v10 }
 0x2cd   : > { %6668 = vmatpush.msra.mxu1 %v8300_v63  ;;  %6669 = vmatpush.msra.mxu2 %v8300_v63 }
 0x2ce   : > { %3470 = vmatpush.msra.mxu0 %v8487_v5  ;;  %3431 = vmatpush.msrb.mxu3 %v6617_v12 }
 0x2cf   : > { %6671 = vmatpush.msra.mxu1 %v8324_v11  ;;  %6672 = vmatpush.msra.mxu2 %v8324_v11 }
 0x2d0   : > { %3097 = vmatmul.f32.gmra.mxu1 %v2974_v53  ;;  %3174 = vmatmul.f32.gmra.mxu3 %v2974_v53 }
 0x2d1   : > { %3137 = vmatmul.f32.gmra.mxu2 %v8441_v55  ;;  %3471 = vmatpush.msra.mxu0 %v8500_v13 }
 0x2d2   : > { %3432 = vmatpush.msrb.mxu3 %v6616_v1  ;;  %6674 = vmatpush.msra.mxu1 %v8339_v14 }
 0x2d3   : > { %3214 = vmatmul.f32.gmra.mxu0 %v8441_v55  ;;  %6675 = vmatpush.msra.mxu2 %v8339_v14 }
 0x2d4   : > { %3472 = vmatpush.msra.mxu0 %v8511_v19  ;;  %6677 = vmatpush.msra.mxu1 %v8365_v26 }
 0x2d5   : > { %6678 = vmatpush.msra.mxu2 %v8365_v26 }
 0x2d6   : > { %6680 = vmatpush.msra.mxu1 %v8380_v7 }
 0x2d7   : > { %6681 = vmatpush.msra.mxu2 %v8380_v7 }
 0x2d8   : > { %3100 = vmatmul.f32.gmra.mxu1 %v7962_v29  ;;  %3177 = vmatmul.f32.gmra.mxu3 %v7962_v29  ;;  %v6615_v29 = vld [vmem:[%s10570_s3 + $0x700] sm:$0xff] }
 0x2d9   : > { %3140 = vmatmul.f32.gmra.mxu2 %v7964_v15  ;;  %3433 = vmatpush.msrb.mxu3 %v6615_v29 }
 0x2da   : > { %6683 = vmatpush.msra.mxu1 %v8398_v37  ;;  %6684 = vmatpush.msra.mxu2 %v8398_v37 }
 0x2db   : > { %3217 = vmatmul.f32.gmra.mxu0 %v7964_v15  ;;  %v8523_v15 = vld [vmem:[%s10570_s3 + $0x780] sm:$0xff]  ;;  %6667 = vmatpush.msra.mxu3 %v8291_v61 }
 0x2dc   : > { %3473 = vmatpush.msra.mxu0 %v8523_v15  ;;  %6686 = vmatpush.msra.mxu1 %v8414_v40 }
 0x2dd   : > { %v2559_v21 = vpop.f32.mrf.mxu1  ;;  %6670 = vmatpush.msra.mxu3 %v8300_v63  ;;  %6687 = vmatpush.msra.mxu2 %v8414_v40 }
 0x2de   : > { %v2676_v22 = vpop.f32.mrf.mxu0  ;;  %6689 = vmatpush.msra.mxu1 %v8429_v48 }
 0x2df   : > { %6673 = vmatpush.msra.mxu3 %v8324_v11  ;;  %6690 = vmatpush.msra.mxu2 %v8429_v48 }
 0x2e0   : > { %3103 = vmatmul.f32.gmra.mxu1 %v6998_v25  ;;  %3180 = vmatmul.f32.gmra.mxu3 %v6998_v25 }
 0x2e1   : > { %3143 = vmatmul.f32.gmra.mxu2 %v7976_v50  ;;  %6692 = vmatpush.msra.mxu1 %v8447_v56 }
 0x2e2   : > { %6676 = vmatpush.msra.mxu3 %v8339_v14  ;;  %6693 = vmatpush.msra.mxu2 %v8447_v56 }
 0x2e3   : > { %3220 = vmatmul.f32.gmra.mxu0 %v7976_v50  ;;  %v2636_v57 = vpop.f32.mrf.mxu3  ;;  %v3000_v50 = vld [vmem:[#allocation2 + $0x91] sm:$0xff]  ;;  %6695 = vmatpush.msra.mxu1 %v8463_v51 }
 0x2e4   : > { %v2599_v54 = vpop.f32.mrf.mxu2  ;;  %v2637_v28 = vadd.f32 %v2636_v57, %v2597_v39  ;;  %6696 = vmatpush.msra.mxu2 %v8463_v51  ;;  %6679 = vmatpush.msra.mxu3 %v8365_v26 }
 0x2e5   : > { %v2811_v31 = vpop.f32.mrf.mxu1  ;;  %6698 = vmatpush.msra.mxu1 %v8478_v8 }
 0x2e6   : > { %v2679_v32 = vpop.f32.mrf.mxu0  ;;  %v2677_v38 = vadd.f32 %v2676_v22, %v2637_v28  ;;  %6699 = vmatpush.msra.mxu2 %v8478_v8  ;;  %6682 = vmatpush.msra.mxu3 %v8380_v7 }
 0x2e7   : > { %6701 = vmatpush.msra.mxu1 %v8487_v5 }
 0x2e8   : > { %3354 = vmatmul.f32.vlgmr.msrb.gmra.mxu1 %v8240_v43  ;;  %v2687_v41 = vmax.f32 %v2677_v38, 0.0  ;;  %3183 = vmatmul.f32.gmra.mxu3 %v6998_v25 }
 0x2e9   : > { %3394 = vmatmul.f32.vlgmr.msrb.gmra.mxu2 %v8005_v36  ;;  %v2812_v36 = vadd.f32 %v7978_v20, %v2811_v31  ;;  %6704 = vmatpush.msra.mxu1 %v8500_v13 }
 0x2ea   : > { %2696 = vst.msk [vmem:[#allocation3 + $0x71] sm:$0x7f] %vm2689_vm2, %v2687_v41  ;;  %6702 = vmatpush.msra.mxu2 %v8487_v5  ;;  %6685 = vmatpush.msra.mxu3 %v8398_v37 }
 0x2eb   : > { %3223 = vmatmul.f32.gmra.mxu0 %v3000_v50  ;;  %v2639_v63 = vpop.f32.mrf.mxu3  ;;  %6707 = vmatpush.msra.mxu1 %v8511_v19 }
 0x2ec   : > { %v2851_v61 = vpop.f32.mrf.mxu2  ;;  %6705 = vmatpush.msra.mxu2 %v8500_v13  ;;  %6688 = vmatpush.msra.mxu3 %v8414_v40 }
 0x2ed   : > { %v2814_v43 = vpop.f32.mrf.mxu1  ;;  %v2852_v11 = vadd.f32 %v2851_v61, %v2812_v36  ;;  %6710 = vmatpush.msra.mxu1 %v8523_v15  ;;  %v3248_v36 = vld [vmem:[#allocation2 + $0x81] sm:$0xff] }
 0x2ee   : > { %v2931_v42 = vpop.f32.mrf.mxu0  ;;  %6708 = vmatpush.msra.mxu2 %v8511_v19  ;;  %6691 = vmatpush.msra.mxu3 %v8429_v48 }
 0x2f0   : > { %3357 = vmatmul.f32.gmra.mxu1 %v8263_v3  ;;  %3434 = vmatmul.f32.vlgmr.msrb.gmra.mxu3 %v8263_v3  ;;  %v2815_v3 = vadd.f32 %v7978_v20, %v2814_v43 }
 0x2f1   : > { %3397 = vmatmul.f32.gmra.mxu2 %v8042_v58  ;;  %v4081_v34 = vld [vmem:[#allocation3 + $0x72] sm:$0xff]  ;;  %6694 = vmatpush.msra.mxu3 %v8447_v56  ;;  %v8612_v56 = vpop.permute.xlu0 %3913 }
 0x2f2   : > { %v3543_v46 = vld [vmem:[#allocation3 + $0x71] sm:$0xff]  ;;  %4129 = vrot.lane.b32.xlu0 %v4081_v34, %s7169_s10  ;;  %6711 = vmatpush.msra.mxu2 %v8523_v15 }
 0x2f3   : > { %3474 = vmatmul.f32.vlgmr.msra.gmra.mxu0 %v8042_v58  ;;  %3591 = vrot.lane.b32.xlu1 %v3543_v46, %s7169_s10  ;;  %v2891_v47 = vpop.f32.mrf.mxu3 }
 0x2f4   : > { %v2854_v14 = vpop.f32.mrf.mxu2  ;;  %v2892_v52 = vadd.f32 %v2891_v47, %v2852_v11  ;;  %6697 = vmatpush.msra.mxu3 %v8463_v51 }
 0x2f5   : > { %v2817_v49 = vpop.f32.mrf.mxu1  ;;  %v2855_v53 = vadd.f32 %v2854_v14, %v2815_v3 }
 0x2f6   : > { %v2934_v2 = vpop.f32.mrf.mxu0  ;;  %v2932_v58 = vadd.f32 %v2931_v42, %v2892_v52  ;;  %v2818_v37 = vadd.f32 %v8587_v4, %v2817_v49  ;;  %6700 = vmatpush.msra.mxu3 %v8478_v8 }
 0x2f8   : > { %3360 = vmatmul.f32.gmra.mxu1 %v8302_v0  ;;  %v2954_v26 = vmax.f32 %v2932_v58, 0.0  ;;  %3437 = vmatmul.f32.gmra.mxu3 %v8302_v0 }
 0x2f9   : > { %3400 = vmatmul.f32.gmra.mxu2 %v8086_v17  ;;  %6703 = vmatpush.msra.mxu3 %v8487_v5  ;;  %v8631_v5 = vpop.permute.xlu1 %4089  ;;  %v8637_v28 = vpop.permute.xlu0 %4117 }
 0x2fa   : > { %4277 = vrot.lane.b32.xlu0 %v3543_v46, %s7169_s10  ;;  %2962 = vst.msk [vmem:[#allocation3 + $0xb1] sm:$0x7f] %vm2689_vm2, %v2954_v26  ;;  %v3271_v26 = vld [vmem:[#allocation2 + $0x82] sm:$0xff] }
 0x2fb   : > { %3477 = vmatmul.f32.gmra.mxu0 %v8086_v17  ;;  %v2894_v59 = vpop.f32.mrf.mxu3  ;;  %6706 = vmatpush.msra.mxu3 %v8500_v13 }
 0x2fc   : > { %v2857_v7 = vpop.f32.mrf.mxu2  ;;  %v2895_v20 = vadd.f32 %v2894_v59, %v2855_v53  ;;  %v3270_v53 = vld [vmem:[#allocation2 + $0x72] sm:$0xff] }
 0x2fd   : > { %v2820_v60 = vpop.f32.mrf.mxu1  ;;  %v2858_v40 = vadd.f32 %v2857_v7, %v2818_v37  ;;  %6709 = vmatpush.msra.mxu3 %v8511_v19  ;;  %v3614_v7 = vld [vmem:[#allocation10] ss:$2 sm:$0x3] }
 0x2fe   : > { %v2935_v0 = vadd.f32 %v2934_v2, %v2895_v20  ;;  %v2821_v1 = vadd.f32 %v8587_v4, %v2820_v60 }
 0x2ff   : > { %v2937_v17 = vpop.f32.mrf.mxu0  ;;  %6712 = vmatpush.msra.mxu3 %v8523_v15 }
 0x300   : > { %3363 = vmatmul.f32.gmra.mxu1 %v8345_v23  ;;  %v2955_v24 = vmax.f32 %v2935_v0, 0.0  ;;  %3440 = vmatmul.f32.gmra.mxu3 %v8345_v23 }
 0x301   : > { %3403 = vmatmul.f32.gmra.mxu2 %v8129_v45  ;;  %v8592_v6 = vld [vmem:[#allocation3 + $0xb1] sm:$0xff]  ;;  %v3580_v42 = vpop.permute.xlu1 %3579 }
 0x302   : > { %4807 = vrot.lane.b32.xlu0 %v4081_v34, %s7169_s10  ;;  %2963 = vst.msk [vmem:[#allocation3 + $0xc1] sm:$0x7f] %vm2689_vm2, %v2955_v24  ;;  %3764 = vrot.lane.b32.xlu2 %v8592_v6, %s7169_s10  ;;  %v8659_v0 = vld [vmem:[#allocation3 + $0xb0] sm:$0xff] }
 0x303   : > { %3480 = vmatmul.f32.gmra.mxu0 %v8129_v45  ;;  %4619 = vrot.lane.b32.xlu1 %v8592_v6, %s7169_s10  ;;  %v2897_v9 = vpop.f32.mrf.mxu3 }
 0x304   : > { %v2860_v48 = vpop.f32.mrf.mxu2  ;;  %v2898_v23 = vadd.f32 %v2897_v9, %v2858_v40  ;;  %v8663_v40 = vperm.slane %v3614_v7, 0 }
 0x305   : > { %v2823_v10 = vpop.f32.mrf.mxu1  ;;  %v2861_v51 = vadd.f32 %v2860_v48, %v2821_v1  ;;  %v8665_v48 = vperm.slane %v3614_v7, 1 }
 0x306   : > { %v2938_v45 = vadd.f32 %v2937_v17, %v2898_v23  ;;  %v2824_v33 = vadd.f32 %v8587_v4, %v2823_v10  ;;  %v3515_v17 = vld [vmem:[#allocation3 + $0x1e0] sm:$0xff] }
 0x307   : > { %v3600_v10 = vsel %vm357_vm0, %v3515_v17, %v8585_v62 }
 0x308   : > { %v2940_v12 = vpop.f32.mrf.mxu0  ;;  %3366 = vmatmul.f32.gmra.mxu1 %v8392_v35  ;;  %v2956_v18 = vmax.f32 %v2938_v45, 0.0  ;;  %3443 = vmatmul.f32.gmra.mxu3 %v8392_v35  ;;  %v3607_v45 = vsel %vm357_vm0, %v8659_v0, %v3580_v42 }
 0x309   : > { %3406 = vmatmul.f32.gmra.mxu2 %v8167_v30  ;;  %v8607_v29 = vld [vmem:[#allocation3 + $0xc1] sm:$0xff]  ;;  %v8657_v59 = vpop.permute.xlu1 %4265 }
 0x30a   : > { %4442 = vrot.lane.b32.xlu0 %v8592_v6, %s7169_s10  ;;  %2964 = vst.msk [vmem:[#allocation3 + $0xd1] sm:$0x7f] %vm2689_vm2, %v2956_v18  ;;  %3941 = vrot.lane.b32.xlu2 %v8592_v6, %s7169_s10  ;;  %v3620_v18 = vmul.f32 %v8663_v40, %v3600_v10 }
 0x30b   : > { %3483 = vmatmul.f32.gmra.mxu0 %v8167_v30  ;;  %3766 = vrot.lane.b32.xlu1 %v8607_v29, %s7169_s10  ;;  %v2900_v35 = vpop.f32.mrf.mxu3 }
 0x30c   : > { %v2863_v8 = vpop.f32.mrf.mxu2  ;;  %v2901_v30 = vadd.f32 %v2900_v35, %v2861_v51  ;;  %v3621_v51 = vmul.f32 %v8665_v48, %v3607_v45 }
 0x30d   : > { %v2826_v21 = vpop.f32.mrf.mxu1  ;;  %v2864_v13 = vadd.f32 %v2863_v8, %v2824_v33  ;;  %v4152_v8 = vld [vmem:[#allocation10 + $0x1] ss:$2 sm:$0x3] }
 0x30e   : > { %v2941_v22 = vadd.f32 %v2940_v12, %v2901_v30  ;;  %v2827_v50 = vadd.f32 %v8587_v4, %v2826_v21  ;;  %v8683_v30 = vperm.slane %v4152_v8, 0  ;;  %v3634_v33 = vadd.f32 %v3621_v51, %v3620_v18 }
 0x310   : > { %v2943_v25 = vpop.f32.mrf.mxu0  ;;  %3369 = vmatmul.f32.gmra.mxu1 %v8441_v55  ;;  %v2957_v39 = vmax.f32 %v2941_v22, 0.0  ;;  %3446 = vmatmul.f32.gmra.mxu3 %v8441_v55  ;;  %v8685_v22 = vperm.slane %v4152_v8, 1 }
 0x311   : > { %3409 = vmatmul.f32.gmra.mxu2 %v8202_v16  ;;  %v8626_v54 = vld [vmem:[#allocation3 + $0xd1] sm:$0xff]  ;;  %v8680_v21 = vpop.permute.xlu1 %4795 }
 0x312   : > { %3943 = vrot.lane.b32.xlu0 %v8607_v29, %s7169_s10  ;;  %2965 = vst.msk [vmem:[#allocation3 + $0xe1] sm:$0x7f] %vm2689_vm2, %v2957_v39  ;;  %v7000_v39 = vld [vmem:[#allocation3 + $0x1e1] sm:$0xff] }
 0x313   : > { %3486 = vmatmul.f32.gmra.mxu0 %v8202_v16  ;;  %3945 = vrot.lane.b32.xlu1 %v8626_v54, %s7169_s10  ;;  %v2903_v57 = vpop.f32.mrf.mxu3  ;;  %v3247_v16 = vld [vmem:[#allocation2 + $0x71] sm:$0xff] }
 0x314   : > { %v2866_v19 = vpop.f32.mrf.mxu2  ;;  %v2904_v31 = vadd.f32 %v2903_v57, %v2864_v13  ;;  %v4138_v13 = vsel %vm357_vm0, %v7000_v39, %v8631_v5 }
 0x315   : > { %v2829_v55 = vpop.f32.mrf.mxu1  ;;  %v2867_v61 = vadd.f32 %v2866_v19, %v2827_v50  ;;  %v4158_v50 = vmul.f32 %v8683_v30, %v4138_v13 }
 0x316   : > { %v2944_v32 = vadd.f32 %v2943_v25, %v2904_v31  ;;  %v2830_v14 = vadd.f32 %v8587_v4, %v2829_v55  ;;  %v4145_v31 = vsel %vm357_vm0, %v8592_v6, %v8637_v28 }
 0x318   : > { %v2946_v38 = vpop.f32.mrf.mxu0  ;;  %3372 = vmatmul.f32.gmra.mxu1 %v3247_v16  ;;  %v2958_v41 = vmax.f32 %v2944_v32, 0.0  ;;  %3449 = vmatmul.f32.gmra.mxu3 %v3247_v16 }
 0x319   : > { %3412 = vmatmul.f32.gmra.mxu2 %v8225_v27  ;;  %v8646_v27 = vpop.permute.xlu0 %4267  ;;  %v8650_v49 = vld [vmem:[#allocation3 + $0xe1] sm:$0xff]  ;;  %v8709_v42 = vpop.permute.xlu1 %4121 }
 0x31a   : > { %3768 = vrot.lane.b32.xlu0 %v8626_v54, %s7169_s10  ;;  %2966 = vst.msk [vmem:[#allocation3 + $0xf1] sm:$0x7f] %vm2689_vm2, %v2958_v41  ;;  %v4159_v41 = vmul.f32 %v8685_v22, %v4145_v31 }
 0x31b   : > { %4446 = vrot.lane.b32.xlu1 %v8626_v54, %s7169_s10  ;;  %v2906_v63 = vpop.f32.mrf.mxu3 }
 0x31c   : > { %v2869_v15 = vpop.f32.mrf.mxu2  ;;  %v2907_v11 = vadd.f32 %v2906_v63, %v2867_v61  ;;  %v4172_v28 = vadd.f32 %v4159_v41, %v4158_v50 }
 0x31d   : > { %v2832_v43 = vpop.f32.mrf.mxu1  ;;  %v2870_v52 = vadd.f32 %v2869_v15, %v2830_v14 }
 0x31e   : > { %v2947_v34 = vadd.f32 %v2946_v38, %v2907_v11  ;;  %v8703_v43 = vpop.permute.xlu2 %3736 }
 0x320   : > { %v2949_v46 = vpop.f32.mrf.mxu0  ;;  %3375 = vmatmul.f32.gmra.mxu1 %v3248_v36  ;;  %v2959_v47 = vmax.f32 %v2947_v34, 0.0  ;;  %3452 = vmatmul.f32.gmra.mxu3 %v3248_v36 }
 0x321   : > { %3415 = vmatmul.f32.gmra.mxu2 %v8242_v44  ;;  %v8661_v37 = vpop.permute.xlu0 %4797  ;;  %v8667_v9 = vld [vmem:[#allocation3 + $0xf1] sm:$0xff] }
 0x322   : > { %4623 = vrot.lane.b32.xlu0 %v8626_v54, %s7169_s10  ;;  %2967 = vst.msk [vmem:[#allocation3 + $0x101] sm:$0x7f] %vm2689_vm2, %v2959_v47 }
 0x323   : > { %4625 = vrot.lane.b32.xlu1 %v8650_v49, %s7169_s10  ;;  %v2909_v58 = vpop.f32.mrf.mxu3 }
 0x324   : > { %v2872_v2 = vpop.f32.mrf.mxu2  ;;  %v2910_v44 = vadd.f32 %v2909_v58, %v2870_v52 }
 0x325   : > { %v3083_v3 = vpop.f32.mrf.mxu1 }
 0x326   : > { %v2950_v60 = vadd.f32 %v2949_v46, %v2910_v44  ;;  %v3084_v62 = vadd.f32 %v8587_v4, %v3083_v3  ;;  %v8722_v17 = vpop.permute.xlu2 %3581 }
 0x328   : > { %v2952_v20 = vpop.f32.mrf.mxu0  ;;  %3489 = vmatmul.f32.vlgmr.msra.gmra.mxu1 %v3270_v53  ;;  %v2960_v24 = vmax.f32 %v2950_v60, 0.0 }
 0x329   : > { %3492 = vmatmul.f32.vlgmr.msra.gmra.mxu2 %v3271_v26  ;;  %v8687_v25 = vld [vmem:[#allocation3 + $0x101] sm:$0xff]  ;;  %v8693_v19 = vpop.permute.xlu0 %3583 }
 0x32a   : > { %4448 = vrot.lane.b32.xlu0 %v8650_v49, %s7169_s10  ;;  %2968 = vst.msk [vmem:[#allocation3 + $0x111] sm:$0x7f] %vm2689_vm2, %v2960_v24  ;;  %v8724_v24 = vpop.permute.xlu1 %3585 }
 0x32b   : > { %3772 = vrot.lane.b32.xlu1 %v8667_v9, %s7169_s10  ;;  %v2912_v12 = vpop.f32.mrf.mxu3 }
 0x32c   : > { %v3123_v23 = vpop.f32.mrf.mxu2 }
 0x32d   : > { %v3086_v1 = vpop.f32.mrf.mxu1  ;;  %v3124_v57 = vadd.f32 %v3123_v23, %v3084_v62 }
 0x32e   : > { %v3087_v15 = vadd.f32 %v8587_v4, %v3086_v1 }
 0x330   : > { %v3203_v35 = vpop.f32.mrf.mxu0 }
 0x331   : > { %v8707_v36 = vld [vmem:[#allocation3 + $0x111] sm:$0xff]  ;;  %v8714_v47 = vpop.permute.xlu0 %4123 }
 0x332   : > { %3949 = vrot.lane.b32.xlu0 %v8667_v9, %s7169_s10  ;;  %10599 = vst [vmem:[#allocation15_spill] sm:$0xff] %v8707_v36 }
 0x333   : > { %3951 = vrot.lane.b32.xlu1 %v8687_v25, %s7169_s10  ;;  %v3163_v16 = vpop.f32.mrf.mxu3  ;;  %3635 = vadd.xlane.f32.xlu2 %v3634_v33 }
 0x334   : > { %v3126_v55 = vpop.f32.mrf.mxu2  ;;  %v3164_v38 = vadd.f32 %v3163_v16, %v3124_v57  ;;  %v8736_v57 = vpop.permute.xlu2 %4119 }
 0x335   : > { %v3089_v32 = vpop.f32.mrf.mxu1  ;;  %v3127_v11 = vadd.f32 %v3126_v55, %v3087_v15  ;;  %v8738_v55 = vpop.permute.xlu1 %4273 }
 0x336   : > { %v3204_v5 = vadd.f32 %v3203_v35, %v3164_v38  ;;  %v3090_v3 = vadd.f32 %v8587_v4, %v3089_v32  ;;  %10601 = vst [vmem:[#allocation17_spill] sm:$0xff] %v8738_v55  ;;  %v3531_v55 = vld [vmem:[#allocation3 + $0xc0] sm:$0xff] }
 0x338   : > { %v3206_v61 = vpop.f32.mrf.mxu0  ;;  %v3226_v63 = vmax.f32 %v3204_v5, 0.0 }
 0x339   : > { %v8726_v10 = vpop.permute.xlu0 %4271 }
 0x33a   : > { %4627 = vrot.lane.b32.xlu0 %v8667_v9, %s7169_s10  ;;  %3234 = vst.msk [vmem:[#allocation3 + $0x151] sm:$0x7f] %vm2689_vm2, %v3226_v63 }
 0x33b   : > { %4454 = vrot.lane.b32.xlu1 %v8707_v36, %s7169_s10  ;;  %v3166_v46 = vpop.f32.mrf.mxu3  ;;  %4173 = vadd.xlane.f32.xlu2 %v4172_v28 }
 0x33c   : > { %v3129_v34 = vpop.f32.mrf.mxu2  ;;  %v3167_v52 = vadd.f32 %v3166_v46, %v3127_v11 }
 0x33d   : > { %v3092_v14 = vpop.f32.mrf.mxu1  ;;  %v3130_v44 = vadd.f32 %v3129_v34, %v3090_v3 }
 0x33e   : > { %v3207_v2 = vadd.f32 %v3206_v61, %v3167_v52  ;;  %v3093_v12 = vadd.f32 %v8587_v4, %v3092_v14  ;;  %v8755_v14 = vpop.permute.xlu2 %4269  ;;  %v8757_v52 = vpop.permute.xlu1 %4803 }
 0x33f   : > { %10603 = vst [vmem:[#allocation19_spill] sm:$0xff] %v8757_v52 }
 0x340   : > { %v3209_v58 = vpop.f32.mrf.mxu0  ;;  %v3227_v26 = vmax.f32 %v3207_v2, 0.0 }
 0x341   : > { %v8731_v18 = vld [vmem:[#allocation3 + $0x151] sm:$0xff]  ;;  %v8740_v31 = vpop.permute.xlu0 %4801 }
 0x342   : > { %3774 = vrot.lane.b32.xlu0 %v8687_v25, %s7169_s10  ;;  %3235 = vst.msk [vmem:[#allocation3 + $0x161] sm:$0x7f] %vm2689_vm2, %v3227_v26  ;;  %v8745_v38 = vld [vmem:[#allocation3 + $0x152] sm:$0xff] }
 0x343   : > { %4631 = vrot.lane.b32.xlu1 %v8707_v36, %s7169_s10  ;;  %v3169_v7 = vpop.f32.mrf.mxu3  ;;  %10600 = vst [vmem:[#allocation16_spill] sm:$0xff] %v8731_v18 }
 0x344   : > { %v3132_v53 = vpop.f32.mrf.mxu2  ;;  %v3170_v20 = vadd.f32 %v3169_v7, %v3130_v44  ;;  %10602 = vst [vmem:[#allocation18_spill] sm:$0xff] %v8740_v31 }
 0x345   : > { %v3095_v60 = vpop.f32.mrf.mxu1  ;;  %v3133_v51 = vadd.f32 %v3132_v53, %v3093_v12 }
 0x346   : > { %v3210_v23 = vadd.f32 %v3209_v58, %v3170_v20  ;;  %v3096_v16 = vadd.f32 %v8587_v4, %v3095_v60 }
 0x348   : > { %v3212_v45 = vpop.f32.mrf.mxu0  ;;  %v3228_v1 = vmax.f32 %v3210_v23, 0.0 }
 0x349   : > { %v8753_v46 = vld [vmem:[#allocation3 + $0x162] sm:$0xff]  ;;  %v8763_v58 = vpop.permute.xlu0 %3589 }
 0x34a   : > { %4452 = vrot.lane.b32.xlu0 %v8687_v25, %s7169_s10  ;;  %3236 = vst.msk [vmem:[#allocation3 + $0x171] sm:$0x7f] %vm2689_vm2, %v3228_v1  ;;  %v8761_v2 = vld [vmem:[#allocation3 + $0x161] sm:$0xff] }
 0x34b   : > { %4293 = vrot.lane.b32.xlu1 %v8731_v18, %s7169_s10  ;;  %v3172_v35 = vpop.f32.mrf.mxu3  ;;  %10604 = vst [vmem:[#allocation20_spill] sm:$0xff] %v8761_v2 }
 0x34c   : > { %v3135_v8 = vpop.f32.mrf.mxu2  ;;  %v3173_v33 = vadd.f32 %v3172_v35, %v3133_v51  ;;  %v8778_v35 = vpop.permute.xlu2 %4799 }
 0x34d   : > { %v3098_v62 = vpop.f32.mrf.mxu1  ;;  %v3136_v50 = vadd.f32 %v3135_v8, %v3096_v16 }
 0x34e   : > { %v3213_v39 = vadd.f32 %v3212_v45, %v3173_v33  ;;  %v3099_v11 = vadd.f32 %v8587_v4, %v3098_v62  ;;  %v8780_v62 = vpop.permute.xlu1 %4127 }
 0x350   : > { %v3215_v13 = vpop.f32.mrf.mxu0  ;;  %v3229_v32 = vmax.f32 %v3213_v39, 0.0 }
 0x351   : > { %v4253_v12 = vld [vmem:[#allocation3 + $0x171] sm:$0xff] }
 0x352   : > { %3553 = vrot.lane.b32.xlu0 %v8731_v18, %s7169_s10  ;;  %3237 = vst.msk [vmem:[#allocation3 + $0x181] sm:$0x7f] %vm2689_vm2, %v3229_v32 }
 0x353   : > { %4823 = vrot.lane.b32.xlu1 %v8745_v38, %s7169_s10  ;;  %v3175_v5 = vpop.f32.mrf.mxu3  ;;  %4444 = vrot.lane.b32.xlu2 %v8607_v29, %s7169_s10 }
 0x354   : > { %v3138_v41 = vpop.f32.mrf.mxu2  ;;  %v3176_v15 = vadd.f32 %v3175_v5, %v3136_v50  ;;  %v4783_v50 = vld [vmem:[#allocation3 + $0x172] sm:$0xff] }
 0x355   : > { %v3101_v61 = vpop.f32.mrf.mxu1  ;;  %v3139_v3 = vadd.f32 %v3138_v41, %v3099_v11 }
 0x356   : > { %v3216_v63 = vadd.f32 %v3215_v13, %v3176_v15  ;;  %v3102_v23 = vadd.f32 %v8587_v4, %v3101_v61 }
 0x358   : > { %v3218_v28 = vpop.f32.mrf.mxu0  ;;  %v3230_v34 = vmax.f32 %v3216_v63, 0.0 }
 0x35a   : > { %4093 = vrot.lane.b32.xlu0 %v8753_v46, %s7169_s10  ;;  %3238 = vst.msk [vmem:[#allocation3 + $0x191] sm:$0x7f] %vm2689_vm2, %v3230_v34 }
 0x35b   : > { %3555 = vrot.lane.b32.xlu1 %v8761_v2, %s7169_s10  ;;  %v3178_v44 = vpop.f32.mrf.mxu3  ;;  %4621 = vrot.lane.b32.xlu2 %v8607_v29, %s7169_s10 }
 0x35c   : > { %v3141_v26 = vpop.f32.mrf.mxu2  ;;  %v3179_v7 = vadd.f32 %v3178_v44, %v3139_v3  ;;  %v4065_v3 = vld [vmem:[#allocation3 + $0x182] sm:$0xff] }
 0x35d   : > { %v3104_v53 = vpop.f32.mrf.mxu1  ;;  %v3142_v1 = vadd.f32 %v3141_v26, %v3102_v23  ;;  %v8795_v26 = vld [vmem:[#allocation3 + $0x181] sm:$0xff] }
 0x35e   : > { %v3219_v60 = vadd.f32 %v3218_v28, %v3179_v7  ;;  %v8791_v28 = vpop.permute.xlu2 %3587  ;;  %10607 = vst [vmem:[#allocation23_spill] sm:$0xff] %v8795_v26 }
 0x360   : > { %v3221_v20 = vpop.f32.mrf.mxu0  ;;  %v3231_v45 = vmax.f32 %v3219_v60, 0.0 }
 0x362   : > { %4297 = vrot.lane.b32.xlu0 %v4253_v12, %s7169_s10  ;;  %3239 = vst.msk [vmem:[#allocation3 + $0x1a1] sm:$0x7f] %vm2689_vm2, %v3231_v45 }
 0x363   : > { %3557 = vrot.lane.b32.xlu1 %v4253_v12, %s7169_s10  ;;  %v3181_v8 = vpop.f32.mrf.mxu3  ;;  %3770 = vrot.lane.b32.xlu2 %v8650_v49, %s7169_s10 }
 0x364   : > { %v3144_v51 = vpop.f32.mrf.mxu2  ;;  %v8776_v29 = vpop.permute.xlu0 %4129  ;;  %v3182_v33 = vadd.f32 %v3181_v8, %v3142_v1 }
 0x365   : > { %10605 = vst [vmem:[#allocation21_spill] sm:$0xff] %v8776_v29  ;;  %v3355_v39 = vpop.f32.mrf.mxu1  ;;  %v8789_v15 = vpop.permute.xlu1 %3591 }
 0x366   : > { %v3222_v13 = vadd.f32 %v3221_v20, %v3182_v33  ;;  %v3356_v34 = vadd.f32 %v8587_v4, %v3355_v39  ;;  %v8805_v51 = vpop.permute.xlu2 %4125 }
 0x368   : > { %v3224_v16 = vpop.f32.mrf.mxu0  ;;  %v3232_v32 = vmax.f32 %v3222_v13, 0.0 }
 0x369   : > { %v3529_v39 = vld [vmem:[#allocation3 + $0x1a1] sm:$0xff] }
 0x36a   : > { %4827 = vrot.lane.b32.xlu0 %v4783_v50, %s7169_s10  ;;  %3240 = vst.msk [vmem:[#allocation3 + $0x1b1] sm:$0x7f] %vm2689_vm2, %v3232_v32 }
 0x36b   : > { %4095 = vrot.lane.b32.xlu1 %v4783_v50, %s7169_s10  ;;  %v3184_v5 = vpop.f32.mrf.mxu3  ;;  %3947 = vrot.lane.b32.xlu2 %v8650_v49, %s7169_s10 }
 0x36c   : > { %v3395_v41 = vpop.f32.mrf.mxu2  ;;  %v8787_v61 = vpop.permute.xlu0 %4277 }
 0x36d   : > { %10606 = vst [vmem:[#allocation22_spill] sm:$0xff] %v8787_v61  ;;  %v3358_v63 = vpop.f32.mrf.mxu1  ;;  %v3396_v44 = vadd.f32 %v3395_v41, %v3356_v34 }
 0x36e   : > { %v3359_v8 = vadd.f32 %v8587_v4, %v3358_v63 }
 0x370   : > { %v3475_v11 = vpop.f32.mrf.mxu0 }
 0x372   : > { %4097 = vrot.lane.b32.xlu0 %v4065_v3, %s7169_s10 }
 0x373   : > { %4299 = vrot.lane.b32.xlu1 %v8795_v26, %s7169_s10  ;;  %v3435_v7 = vpop.f32.mrf.mxu3  ;;  %4450 = vrot.lane.b32.xlu2 %v8667_v9, %s7169_s10 }
 0x374   : > { %v3398_v53 = vpop.f32.mrf.mxu2  ;;  %v8801_v60 = vpop.permute.xlu0 %4807  ;;  %v3436_v20 = vadd.f32 %v3435_v7, %v3396_v44 }
 0x375   : > { %v8803_v23 = vpop.permute.xlu1 %4619  ;;  %v3361_v45 = vpop.f32.mrf.mxu1  ;;  %v3399_v13 = vadd.f32 %v3398_v53, %v3359_v8  ;;  %v4067_v53 = vld [vmem:[#allocation3 + $0x1a2] sm:$0xff] }
 0x376   : > { %10608 = vst [vmem:[#allocation24_spill] sm:$0xff] %v8803_v23  ;;  %v3476_v12 = vadd.f32 %v3475_v11, %v3436_v20  ;;  %v3362_v11 = vadd.f32 %v8587_v4, %v3361_v45 }
 0x378   : > { %v3478_v1 = vpop.f32.mrf.mxu0  ;;  %v3498_v33 = vmax.f32 %v3476_v12, 0.0 }
 0x37a   : > { %3563 = vrot.lane.b32.xlu0 %v3529_v39, %s7169_s10  ;;  %3506 = vst.msk [vmem:[#allocation3 + $0x1f1] sm:$0x7f] %vm2689_vm2, %v3498_v33 }
 0x37b   : > { %4829 = vrot.lane.b32.xlu1 %v4065_v3, %s7169_s10  ;;  %v3438_v16 = vpop.f32.mrf.mxu3  ;;  %4629 = vrot.lane.b32.xlu2 %v8687_v25, %s7169_s10  ;;  %v8819_v3 = vpop.permute.xlu2 %4275 }
 0x37c   : > { %v3401_v9 = vpop.f32.mrf.mxu2  ;;  %v8813_v32 = vpop.permute.xlu0 %4442  ;;  %v3439_v50 = vadd.f32 %v3438_v16, %v3399_v13 }
 0x37d   : > { %10609 = vst [vmem:[#allocation25_spill] sm:$0xff] %v8813_v32  ;;  %v8815_v41 = vpop.permute.xlu1 %3766  ;;  %v3364_v5 = vpop.f32.mrf.mxu1  ;;  %v3402_v7 = vadd.f32 %v3401_v9, %v3362_v11  ;;  %v8831_v9 = vld [vmem:[#allocation3 + $0x1b1] sm:$0xff] }
 0x37e   : > { %10610 = vst [vmem:[#allocation26_spill] sm:$0xff] %v8815_v41  ;;  %v3479_v63 = vadd.f32 %v3478_v1, %v3439_v50  ;;  %v3365_v13 = vadd.f32 %v8587_v4, %v3364_v5  ;;  %v3976_v41 = vld [vmem:[#allocation10] ss:$2 sm:$0x3] }
 0x37f   : > { %10613 = vst [vmem:[#allocation29_spill] sm:$0xff] %v8831_v9 }
 0x380   : > { %v3499_v34 = vmax.f32 %v3479_v63, 0.0  ;;  %v3481_v44 = vpop.f32.mrf.mxu0 }
 0x382   : > { %4303 = vrot.lane.b32.xlu0 %v3529_v39, %s7169_s10  ;;  %3507 = vst.msk [vmem:[#allocation3 + $0x201] sm:$0x7f] %vm2689_vm2, %v3499_v34 }
 0x383   : > { %4101 = vrot.lane.b32.xlu1 %v4067_v53, %s7169_s10  ;;  %v3441_v12 = vpop.f32.mrf.mxu3  ;;  %3776 = vrot.lane.b32.xlu2 %v8707_v36, %s7169_s10  ;;  %v8840_v5 = vpop.permute.xlu2 %4805 }
 0x384   : > { %v3404_v20 = vpop.f32.mrf.mxu2  ;;  %v8825_v1 = vpop.permute.xlu0 %3943  ;;  %v3442_v45 = vadd.f32 %v3441_v12, %v3402_v7  ;;  %10615 = vst [vmem:[#allocation31_spill] sm:$0xff] %v8840_v5 }
 0x385   : > { %10611 = vst [vmem:[#allocation27_spill] sm:$0xff] %v8825_v1  ;;  %v8827_v8 = vpop.permute.xlu1 %3945  ;;  %v3367_v33 = vpop.f32.mrf.mxu1  ;;  %v3405_v50 = vadd.f32 %v3404_v20, %v3365_v13  ;;  %v4787_v13 = vld [vmem:[#allocation3 + $0x1b2] sm:$0xff] }
 0x386   : > { %10612 = vst [vmem:[#allocation28_spill] sm:$0xff] %v8827_v8  ;;  %v3482_v39 = vadd.f32 %v3481_v44, %v3442_v45  ;;  %v3368_v45 = vadd.f32 %v8587_v4, %v3367_v33 }
 0x388   : > { %v3500_v16 = vmax.f32 %v3482_v39, 0.0  ;;  %v3484_v63 = vpop.f32.mrf.mxu0 }
 0x38a   : > { %4833 = vrot.lane.b32.xlu0 %v4067_v53, %s7169_s10  ;;  %3508 = vst.msk [vmem:[#allocation3 + $0x211] sm:$0x7f] %vm2689_vm2, %v3500_v16 }
 0x38b   : > { %4305 = vrot.lane.b32.xlu1 %v8831_v9, %s7169_s10  ;;  %v3444_v34 = vpop.f32.mrf.mxu3  ;;  %3953 = vrot.lane.b32.xlu2 %v8707_v36, %s7169_s10 }
 0x38c   : > { %v3407_v11 = vpop.f32.mrf.mxu2  ;;  %v8838_v44 = vpop.permute.xlu0 %3768  ;;  %v3445_v7 = vadd.f32 %v3444_v34, %v3405_v50 }
 0x38d   : > { %10614 = vst [vmem:[#allocation30_spill] sm:$0xff] %v8838_v44  ;;  %v8842_v53 = vpop.permute.xlu1 %4446  ;;  %v3370_v12 = vpop.f32.mrf.mxu1  ;;  %v3408_v16 = vadd.f32 %v3407_v11, %v3368_v45 }
 0x38e   : > { %10616 = vst [vmem:[#allocation32_spill] sm:$0xff] %v8842_v53  ;;  %v3485_v20 = vadd.f32 %v3484_v63, %v3445_v7  ;;  %v3765_v50 = vpop.permute.xlu2 %3764 }
 0x390   : > { %v3501_v39 = vmax.f32 %v3485_v20, 0.0  ;;  %v3487_v63 = vpop.f32.mrf.mxu0 }
 0x392   : > { %3509 = vst.msk [vmem:[#allocation3 + $0x221] sm:$0x7f] %vm2689_vm2, %v3501_v39 }
 0x393   : > { %4835 = vrot.lane.b32.xlu1 %v4787_v13, %s7169_s10  ;;  %v3447_v23 = vpop.f32.mrf.mxu3  ;;  %4091 = vrot.lane.b32.xlu2 %v8745_v38, %s7169_s10 }
 0x394   : > { %v3410_v8 = vpop.f32.mrf.mxu2  ;;  %v8849_v44 = vpop.permute.xlu0 %4623  ;;  %v3448_v34 = vadd.f32 %v3447_v23, %v3408_v16  ;;  %v3371_v23 = vadd.f32 %v8587_v4, %v3370_v12 }
 0x395   : > { %10617 = vst [vmem:[#allocation33_spill] sm:$0xff] %v8849_v44  ;;  %v8851_v53 = vpop.permute.xlu1 %4625  ;;  %v3373_v33 = vpop.f32.mrf.mxu1 }
 0x396   : > { %10618 = vst [vmem:[#allocation34_spill] sm:$0xff] %v8851_v53  ;;  %v3488_v7 = vadd.f32 %v3487_v63, %v3448_v34  ;;  %v3942_v44 = vpop.permute.xlu2 %3941  ;;  %v3411_v16 = vadd.f32 %v3410_v8, %v3371_v23  ;;  %v8870_v8 = vld [vmem:[#allocation3 + $0x11] sm:$0xff] }
 0x397   : > { %10624 = vst [vmem:[#allocation40_spill] sm:$0xff] %v8870_v8 }
 0x398   : > { %v3502_v20 = vmax.f32 %v3488_v7, 0.0 }
 0x39a   : > { %3510 = vst.msk [vmem:[#allocation3 + $0x231] sm:$0x7f] %vm2689_vm2, %v3502_v20  ;;  %v3374_v20 = vadd.f32 %v8587_v4, %v3373_v33  ;;  %v8877_v4 = vperm.slane %v3976_v41, 0 }
 0x39b   : > { %4295 = vrot.lane.b32.xlu2 %v8761_v2, %s7169_s10  ;;  %v3450_v39 = vpop.f32.mrf.mxu3 }
 0x39c   : > { %v3413_v11 = vpop.f32.mrf.mxu2  ;;  %v8856_v45 = vpop.permute.xlu0 %4448  ;;  %v3451_v63 = vadd.f32 %v3450_v39, %v3411_v16  ;;  %v3969_v39 = vsel %vm357_vm0, %v8870_v8, %v3942_v44  ;;  %10626 = vst [vmem:[#allocation42_spill] sm:$0xff] %v8877_v4 }
 0x39d   : > { %10619 = vst [vmem:[#allocation35_spill] sm:$0xff] %v8856_v45  ;;  %v8858_v38 = vpop.permute.xlu1 %3772  ;;  %v3376_v13 = vpop.f32.mrf.mxu1 }
 0x39e   : > { %10620 = vst [vmem:[#allocation36_spill] sm:$0xff] %v8858_v38  ;;  %v3414_v13 = vadd.f32 %v3413_v11, %v3374_v20  ;;  %v3800_v20 = vld [vmem:[#allocation10 + $0x1] ss:$2 sm:$0x3] }
 0x3a1   : > { %v9026_v1 = vld [vmem:[#allocation3 + $0x231] sm:$0xff] }
 0x3a3   : > { %4825 = vrot.lane.b32.xlu2 %v8753_v46, %s7169_s10  ;;  %v3453_v2 = vpop.f32.mrf.mxu3 }
 0x3a4   : > { %v3416_v53 = vpop.f32.mrf.mxu2  ;;  %v8863_v34 = vpop.permute.xlu0 %3949  ;;  %v3454_v46 = vadd.f32 %v3453_v2, %v3414_v13 }
 0x3a5   : > { %10621 = vst [vmem:[#allocation37_spill] sm:$0xff] %v8863_v34  ;;  %v8865_v7 = vpop.permute.xlu1 %3951  ;;  %v3490_v45 = vpop.f32.mrf.mxu1  ;;  %v8872_v53 = vperm.slane %v3976_v41, 1 }
 0x3a6   : > { %10622 = vst [vmem:[#allocation38_spill] sm:$0xff] %v8865_v7  ;;  %v3491_v32 = vadd.f32 %v3490_v45, %v3451_v63  ;;  %v8868_v38 = vpop.xlane.xlu2 %3635 }
 0x3a7   : > { %10623 = vst [vmem:[#allocation39_spill] sm:$0xff] %v8868_v38  ;;  %v3983_v2 = vmul.f32 %v8872_v53, %v3969_v39 }
 0x3a8   : > { %v3503_v12 = vmax.f32 %v3491_v32, 0.0  ;;  %10625 = vst [vmem:[#allocation41_spill] sm:$0xff] %v8872_v53  ;;  %v7001_v32 = vld [vmem:[#allocation3 + $0x141] sm:$0xff] }
 0x3a9   : > { %v3962_v45 = vsel %vm357_vm0, %v7001_v32, %v8612_v56  ;;  %v3792_v56 = vsel %vm357_vm0, %v8870_v8, %v3765_v50  ;;  %v4066_v50 = vld [vmem:[#allocation3 + $0x192] sm:$0xff] }
 0x3aa   : > { %3511 = vst.msk [vmem:[#allocation3 + $0x241] sm:$0x7f] %vm2689_vm2, %v3503_v12  ;;  %v3982_v41 = vmul.f32 %v8877_v4, %v3962_v45  ;;  %v8892_v12 = vperm.slane %v3800_v20, 1  ;;  %v3785_v45 = vsel %vm357_vm0, %v7001_v32, %v8703_v43  ;;  %v4844_v32 = vsel %vm357_vm0, %v8592_v6, %v8680_v21 }
 0x3ab   : > { %3559 = vrot.lane.b32.xlu2 %v8795_v26, %s7169_s10  ;;  %v4147_v21 = vsel %vm357_vm0, %v8626_v54, %v8709_v42  ;;  %v8998_v26 = vld [vmem:[#allocation3 + $0x221] sm:$0xff] }
 0x3ac   : > { %v3493_v23 = vpop.f32.mrf.mxu2  ;;  %v8881_v11 = vpop.permute.xlu0 %4627  ;;  %v3996_v13 = vadd.f32 %v3983_v2, %v3982_v41  ;;  %10630 = vst [vmem:[#allocation46_spill] sm:$0xff] %v8892_v12  ;;  %v3807_v2 = vmul.f32 %v8892_v12, %v3792_v56 }
 0x3ad   : > { %v3494_v33 = vadd.f32 %v3493_v23, %v3454_v46  ;;  %10627 = vst [vmem:[#allocation43_spill] sm:$0xff] %v8881_v11  ;;  %v8885_v16 = vpop.permute.xlu1 %4454  ;;  %v8894_v46 = vld [vmem:[#allocation3 + $0x191] sm:$0xff]  ;;  %v8902_v23 = vperm.slane %v3800_v20, 0  ;;  %v4163_v11 = vmul.f32 %v8685_v22, %v4147_v21 }
 0x3ae   : > { %10628 = vst [vmem:[#allocation44_spill] sm:$0xff] %v8885_v16  ;;  %v8888_v63 = vpop.xlane.xlu2 %4173  ;;  %v8980_v21 = vld [vmem:[#allocation3 + $0x211] sm:$0xff] }
 0x3af   : > { %v3504_v44 = vmax.f32 %v3494_v33, 0.0  ;;  %10629 = vst [vmem:[#allocation45_spill] sm:$0xff] %v8888_v63  ;;  %v3806_v41 = vmul.f32 %v8902_v23, %v3785_v45  ;;  %v8930_v45 = vld [vmem:[#allocation3 + $0x1f1] sm:$0xff] }
 0x3b0   : > { %10631 = vst [vmem:[#allocation47_spill] sm:$0xff] %v8894_v46 }
 0x3b1   : > { %3512 = vst.msk [vmem:[#allocation3 + $0x251] sm:$0x7f] %vm2689_vm2, %v3504_v44  ;;  %v3820_v63 = vadd.f32 %v3807_v2, %v3806_v41 }
 0x3b2   : > { %10633 = vst [vmem:[#allocation49_spill] sm:$0xff] %v8902_v23  ;;  %v9018_v23 = vld [vmem:[#allocation3 + $0x240] sm:$0xff] }
 0x3b3   : > { %3561 = vrot.lane.b32.xlu2 %v8894_v46, %s7169_s10 }
 0x3b4   : > { %v8900_v39 = vpop.permute.xlu0 %3774  ;;  %3997 = vadd.xlane.f32.xlu0 %v3996_v13 }
 0x3b5   : > { %10632 = vst [vmem:[#allocation48_spill] sm:$0xff] %v8900_v39  ;;  %v8904_v33 = vpop.permute.xlu1 %4631  ;;  %v8946_v39 = vld [vmem:[#allocation3 + $0x201] sm:$0xff] }
 0x3b6   : > { %10634 = vst [vmem:[#allocation50_spill] sm:$0xff] %v8904_v33  ;;  %v8909_v44 = vpop.permute.xlu2 %4444  ;;  %v4858_v33 = vld [vmem:[#allocation10 + $0x5] ss:$2 sm:$0x3] }
 0x3b7   : > { %10635 = vst [vmem:[#allocation51_spill] sm:$0xff] %v8909_v44  ;;  %v8919_v7 = vperm.slane %v4858_v33, 0  ;;  %v8921_v43 = vperm.slane %v4858_v33, 1 }
 0x3b9   : > { %v4864_v41 = vmul.f32 %v8919_v7, %v4844_v32 }
 0x3bb   : > { %4099 = vrot.lane.b32.xlu2 %v4066_v50, %s7169_s10 }
 0x3bc   : > { %v8913_v38 = vpop.permute.xlu0 %4452 }
 0x3bd   : > { %10636 = vst [vmem:[#allocation52_spill] sm:$0xff] %v8913_v38  ;;  %3821 = vadd.xlane.f32.xlu1 %v3820_v63  ;;  %v8915_v20 = vpop.permute.xlu1 %4293 }
 0x3be   : > { %v8917_v13 = vpop.permute.xlu2 %4621 }
 0x3bf   : > { %10637 = vst [vmem:[#allocation53_spill] sm:$0xff] %v8917_v13  ;;  %v4329_v13 = vld [vmem:[#allocation10 + $0x4] ss:$2 sm:$0x3] }
 0x3c0   : > { %v9014_v44 = vperm.slane %v4329_v13, 0  ;;  %v9016_v12 = vperm.slane %v4329_v13, 1 }
 0x3c3   : > { %4301 = vrot.lane.b32.xlu2 %v8894_v46, %s7169_s10 }
 0x3c4   : > { %v8928_v56 = vpop.permute.xlu0 %3553 }
 0x3c5   : > { %v4824_v63 = vpop.permute.xlu1 %4823 }
 0x3c6   : > { %v4851_v2 = vsel %vm357_vm0, %v8930_v45, %v4824_v63  ;;  %v8936_v38 = vpop.permute.xlu2 %3770 }
 0x3c7   : > { %v4865_v33 = vmul.f32 %v8921_v43, %v4851_v2  ;;  %10638 = vst [vmem:[#allocation54_spill] sm:$0xff] %v8936_v38 }
 0x3c8   : > { %3738 = vrot.lane.b32.xlu0 %v8930_v45, %s7169_s10 }
 0x3c9   : > { %v8940_v6 = vadd.f32 %v4865_v33, %v4864_v41 }
 0x3cb   : > { %4831 = vrot.lane.b32.xlu2 %v4066_v50, %s7169_s10 }
 0x3cc   : > { %v4094_v63 = vpop.permute.xlu0 %4093 }
 0x3cd   : > { %v4140_v32 = vsel %vm357_vm0, %v8946_v39, %v4094_v63  ;;  %v8950_v2 = vpop.permute.xlu1 %3555 }
 0x3ce   : > { %v4162_v46 = vmul.f32 %v8683_v30, %v4140_v32  ;;  %v8954_v41 = vpop.permute.xlu2 %3947 }
 0x3cf   : > { %10639 = vst [vmem:[#allocation55_spill] sm:$0xff] %v8954_v41 }
 0x3d0   : > { %4647 = vrot.lane.b32.xlu0 %v8930_v45, %s7169_s10  ;;  %v8958_v54 = vadd.f32 %v4163_v11, %v4162_v46 }
 0x3d3   : > { %3915 = vrot.lane.b32.xlu2 %v8930_v45, %s7169_s10 }
 0x3d4   : > { %v8962_v42 = vpop.permute.xlu0 %4297 }
 0x3d5   : > { %v8964_v50 = vpop.permute.xlu1 %3557 }
 0x3d6   : > { %3740 = vrot.lane.b32.xlu1 %v8946_v39, %s7169_s10  ;;  %v8968_v33 = vpop.permute.xlu2 %4450 }
 0x3d7   : > { %10640 = vst [vmem:[#allocation56_spill] sm:$0xff] %v8968_v33 }
 0x3d8   : > { %4472 = vrot.lane.b32.xlu0 %v8946_v39, %s7169_s10 }
 0x3db   : > { %4470 = vrot.lane.b32.xlu2 %v8930_v45, %s7169_s10 }
 0x3dc   : > { %v8974_v11 = vpop.permute.xlu0 %4827 }
 0x3dd   : > { %v8976_v46 = vpop.permute.xlu1 %4095 }
 0x3de   : > { %3917 = vrot.lane.b32.xlu1 %v8946_v39, %s7169_s10  ;;  %v8982_v63 = vpop.permute.xlu2 %4629 }
 0x3df   : > { %10641 = vst [vmem:[#allocation57_spill] sm:$0xff] %v8982_v63 }
 0x3e0   : > { %3742 = vrot.lane.b32.xlu0 %v8980_v21, %s7169_s10 }
 0x3e3   : > { %4649 = vrot.lane.b32.xlu2 %v8946_v39, %s7169_s10 }
 0x3e4   : > { %v8988_v32 = vpop.permute.xlu0 %4097 }
 0x3e5   : > { %v8990_v33 = vpop.permute.xlu1 %4299 }
 0x3e6   : > { %4474 = vrot.lane.b32.xlu1 %v8980_v21, %s7169_s10  ;;  %v8994_v34 = vpop.permute.xlu2 %3776 }
 0x3e7   : > { %10642 = vst [vmem:[#allocation58_spill] sm:$0xff] %v8994_v34  ;;  %v4235_v34 = vld [vmem:[#allocation3 + $0x100] sm:$0xff] }
 0x3e8   : > { %3919 = vrot.lane.b32.xlu0 %v8980_v21, %s7169_s10  ;;  %v4319_v8 = vsel %vm357_vm0, %v4235_v34, %v8819_v3 }
 0x3e9   : > { %v4345_v3 = vmul.f32 %v9014_v44, %v4319_v8  ;;  %v4780_v8 = vld [vmem:[#allocation3 + $0x251] sm:$0xff] }
 0x3eb   : > { %3744 = vrot.lane.b32.xlu2 %v8998_v26, %s7169_s10 }
 0x3ec   : > { %v9002_v63 = vpop.permute.xlu0 %3563 }
 0x3ed   : > { %v9004_v38 = vpop.permute.xlu1 %4829 }
 0x3ee   : > { %4651 = vrot.lane.b32.xlu1 %v8980_v21, %s7169_s10  ;;  %v9008_v41 = vpop.permute.xlu2 %3953 }
 0x3ef   : > { %10643 = vst [vmem:[#allocation59_spill] sm:$0xff] %v9008_v41 }
 0x3f0   : > { %4653 = vrot.lane.b32.xlu0 %v8998_v26, %s7169_s10 }
 0x3f3   : > { %3921 = vrot.lane.b32.xlu2 %v8998_v26, %s7169_s10 }
 0x3f4   : > { %v4304_v53 = vpop.permute.xlu0 %4303 }
 0x3f5   : > { %v4326_v41 = vsel %vm357_vm0, %v9018_v23, %v4304_v53  ;;  %v9024_v4 = vpop.permute.xlu1 %4101  ;;  %v9038_v53 = vld [vmem:[#allocation3 + $0x241] sm:$0xff] }
 0x3f6   : > { %10644 = vst [vmem:[#allocation60_spill] sm:$0xff] %v9024_v4  ;;  %v4346_v9 = vmul.f32 %v9016_v12, %v4326_v41  ;;  %3746 = vrot.lane.b32.xlu1 %v9026_v1, %s7169_s10  ;;  %v4092_v34 = vpop.permute.xlu2 %4091 }
 0x3f7   : > { %10646 = vst [vmem:[#allocation62_spill] sm:$0xff] %v9038_v53 }
 0x3f8   : > { %3923 = vrot.lane.b32.xlu0 %v9026_v1, %s7169_s10  ;;  %v9034_v13 = vadd.f32 %v4346_v9, %v4345_v3  ;;  %v4850_v9 = vsel %vm357_vm0, %v8707_v36, %v8801_v60  ;;  %v4244_v36 = vld [vmem:[#allocation3 + $0x1f0] sm:$0xff] }
 0x3f9   : > { %v4876_v16 = vmul.f32 %v8919_v7, %v4850_v9 }
 0x3fa   : > { %10645 = vst [vmem:[#allocation61_spill] sm:$0xff] %v9034_v13 }
 0x3fb   : > { %4476 = vrot.lane.b32.xlu2 %v8998_v26, %s7169_s10 }
 0x3fd   : > { %v9040_v18 = vpop.permute.xlu1 %4305 }
 0x3fe   : > { %10647 = vst [vmem:[#allocation63_spill] sm:$0xff] %v9040_v18  ;;  %3925 = vrot.lane.b32.xlu1 %v9038_v53, %s7169_s10  ;;  %v9044_v41 = vpop.permute.xlu2 %4295 }
 0x400   : > { %4478 = vrot.lane.b32.xlu0 %v9026_v1, %s7169_s10 }
 0x403   : > { %4655 = vrot.lane.b32.xlu2 %v9026_v1, %s7169_s10 }
 0x405   : > { %v4836_v3 = vpop.permute.xlu1 %4835 }
 0x406   : > { %v4857_v13 = vsel %vm357_vm0, %v4780_v8, %v4836_v3  ;;  %4480 = vrot.lane.b32.xlu1 %v9038_v53, %s7169_s10  ;;  %v9058_v61 = vpop.permute.xlu2 %4825 }
 0x407   : > { %v4877_v52 = vmul.f32 %v8921_v43, %v4857_v13 }
 0x408   : > { %3748 = vrot.lane.b32.xlu0 %v9038_v53, %s7169_s10 }
 0x409   : > { %v9062_v60 = vadd.f32 %v4877_v52, %v4876_v16  ;;  %v4321_v52 = vsel %vm357_vm0, %v4244_v36, %v8915_v20  ;;  %v4314_v16 = vsel %vm357_vm0, %v8659_v0, %v8657_v59  ;;  %v3608_v0 = vsel %vm357_vm0, %v3531_v55, %v8722_v17 }
 0x40a   : > { %v4336_v29 = vmul.f32 %v9016_v12, %v4321_v52  ;;  %v4335_v5 = vmul.f32 %v9014_v44, %v4314_v16  ;;  %v3623_v31 = vmul.f32 %v8665_v48, %v3608_v0 }
 0x40b   : > { %10648 = vst [vmem:[#allocation64_spill] sm:$0xff] %v9062_v60  ;;  %4482 = vrot.lane.b32.xlu2 %v4780_v8, %s7169_s10  ;;  %v4069_v60 = vld [vmem:[#allocation3 + $0xc1] sm:$0xff] }
 0x40c   : > { %v4146_v20 = vsel %vm357_vm0, %v4069_v60, %v8736_v57  ;;  %v4349_v59 = vadd.f32 %v4336_v29, %v4335_v5  ;;  %v4246_v60 = vld [vmem:[#allocation3 + $0x210] sm:$0xff] }
 0x40e   : > { %4657 = vrot.lane.b32.xlu1 %v9038_v53, %s7169_s10  ;;  %v9067_v3 = vpop.permute.xlu2 %3559 }
 0x410   : > { %4659 = vrot.lane.b32.xlu0 %v4780_v8, %s7169_s10  ;;  %v4139_v8 = vsel %vm357_vm0, %v8930_v45, %v4092_v34  ;;  %v4161_v45 = vmul.f32 %v8685_v22, %v4146_v20  ;;  %v3532_v34 = vld [vmem:[#allocation3 + $0xd0] sm:$0xff]  ;;  %v4323_v20 = vsel %vm357_vm0, %v4246_v60, %v8962_v42 }
 0x411   : > { %v4160_v53 = vmul.f32 %v8683_v30, %v4139_v8  ;;  %v3609_v17 = vsel %vm357_vm0, %v3532_v34, %v8693_v19  ;;  %v4232_v8 = vld [vmem:[#allocation3 + $0xd0] sm:$0xff]  ;;  %v4315_v34 = vsel %vm357_vm0, %v3531_v55, %v8646_v27  ;;  %v4853_v27 = vsel %vm357_vm0, %v8980_v21, %v8974_v11 }
 0x413   : > { %v4175_v16 = vadd.f32 %v4161_v45, %v4160_v53  ;;  %v3625_v53 = vmul.f32 %v8665_v48, %v3609_v17 }
 0x416   : > { %v9070_v18 = vpop.permute.xlu2 %3561 }
 0x41e   : > { %v9072_v9 = vpop.permute.xlu2 %4099 }
 0x426   : > { %v9074_v13 = vpop.permute.xlu2 %4301 }
 0x427   : > { %10649 = vst [vmem:[#allocation65_spill] sm:$0xff] %v9074_v13  ;;  %v3601_v13 = vsel %vm357_vm0, %v4244_v36, %v8928_v56  ;;  %v9104_v56 = vld [vmem:[#allocation3 + $0xe0] sm:$0xff] }
 0x428   : > { %v3622_v52 = vmul.f32 %v8663_v40, %v3601_v13  ;;  %v9106_v13 = vpop.permute.xlu0 %4833 }
 0x42a   : > { %v3637_v29 = vadd.f32 %v3623_v31, %v3622_v52  ;;  %v3610_v31 = vsel %vm357_vm0, %v9104_v56, %v8724_v24  ;;  %v4340_v24 = vmul.f32 %v9016_v12, %v4323_v20 }
 0x42b   : > { %v3627_v52 = vmul.f32 %v8665_v48, %v3610_v31 }
 0x42e   : > { %v9084_v4 = vpop.permute.xlu2 %4831 }
 0x42f   : > { %10650 = vst [vmem:[#allocation66_spill] sm:$0xff] %v9084_v4  ;;  %v3517_v4 = vld [vmem:[#allocation3 + $0x200] sm:$0xff] }
 0x430   : > { %v3602_v36 = vsel %vm357_vm0, %v3517_v4, %v8950_v2  ;;  %v3603_v2 = vsel %vm357_vm0, %v4246_v60, %v8964_v50  ;;  %v4322_v50 = vsel %vm357_vm0, %v3517_v4, %v9044_v41  ;;  %v9127_v45 = vpop.xlane.xlu0 %3997  ;;  %v4337_v41 = vmul.f32 %v9014_v44, %v4315_v34 }
 0x431   : > { %v3624_v5 = vmul.f32 %v8663_v40, %v3602_v36  ;;  %v4338_v36 = vmul.f32 %v9016_v12, %v4322_v50  ;;  %v4869_v60 = vmul.f32 %v8921_v43, %v4853_v27 }
 0x433   : > { %v3640_v19 = vadd.f32 %v3625_v53, %v3624_v5  ;;  %v4352_v17 = vadd.f32 %v4338_v36, %v4337_v41  ;;  %v7002_v53 = vld [vmem:[#allocation3 + $0xc1] sm:$0xff] }
 0x434   : > { %4350 = vadd.xlane.f32.xlu2 %v4349_v59  ;;  %v3626_v59 = vmul.f32 %v8663_v40, %v3603_v2  ;;  %v4845_v11 = vsel %vm357_vm0, %v7002_v53, %v8661_v37  ;;  %v4072_v37 = vld [vmem:[#allocation3 + $0xf1] sm:$0xff] }
 0x436   : > { %v9099_v57 = vpop.permute.xlu2 %3915  ;;  %v3643_v42 = vadd.f32 %v3627_v52, %v3626_v59  ;;  %v4142_v52 = vsel %vm357_vm0, %v8998_v26, %v8988_v32 }
 0x437   : > { %v4166_v36 = vmul.f32 %v8683_v30, %v4142_v52  ;;  %v10654_v52 = vld [vmem:[#allocation31_spill] sm:$0xff] }
 0x438   : > { %4176 = vadd.xlane.f32.xlu1 %v4175_v16  ;;  %v4141_v16 = vsel %vm357_vm0, %v8980_v21, %v8976_v46  ;;  %v4247_v21 = vld [vmem:[#allocation3 + $0x220] sm:$0xff] }
 0x439   : > { %v4164_v55 = vmul.f32 %v8683_v30, %v4141_v16 }
 0x43a   : > { %3638 = vadd.xlane.f32.xlu0 %v3637_v29  ;;  %v4762_v29 = vld [vmem:[#allocation3 + $0xd1] sm:$0xff]  ;;  %v9155_v2 = vpop.permute.xlu0 %3738 }
 0x43c   : > { %4879 = vadd.xlane.f32.xlu2 %v8940_v6  ;;  %v4316_v6 = vsel %vm357_vm0, %v4232_v8, %v8755_v14  ;;  %v4148_v14 = vsel %vm357_vm0, %v8650_v49, %v8714_v47  ;;  %v4852_v49 = vsel %vm357_vm0, %v8946_v39, %v9058_v61  ;;  %v4846_v47 = vsel %vm357_vm0, %v4762_v29, %v8778_v35 }
 0x43d   : > { %v4339_v4 = vmul.f32 %v9014_v44, %v4316_v6  ;;  %v4165_v5 = vmul.f32 %v8685_v22, %v4148_v14  ;;  %v4867_v8 = vmul.f32 %v8921_v43, %v4852_v49  ;;  %v3604_v61 = vsel %vm357_vm0, %v4247_v21, %v9067_v3  ;;  %v3520_v3 = vld [vmem:[#allocation3 + $0x230] sm:$0xff] }
 0x43e   : > { %v9118_v0 = vpop.permute.xlu2 %4470  ;;  %v4868_v39 = vmul.f32 %v8919_v7, %v4846_v47  ;;  %v4866_v35 = vmul.f32 %v8919_v7, %v4845_v11  ;;  %v3628_v50 = vmul.f32 %v8663_v40, %v3604_v61  ;;  %v3605_v34 = vsel %vm357_vm0, %v3520_v3, %v9070_v18  ;;  %v9182_v18 = vpop.xlane.xlu1 %3821 }
 0x43f   : > { %v4181_v31 = vadd.f32 %v4165_v5, %v4164_v55  ;;  %v4324_v14 = vsel %vm357_vm0, %v4247_v21, %v8990_v33  ;;  %v3606_v33 = vsel %vm357_vm0, %v9018_v23, %v9002_v63  ;;  %v3536_v5 = vld [vmem:[#allocation3 + $0x110] sm:$0xff]  ;;  %v4150_v23 = vsel %vm357_vm0, %v8687_v25, %v8780_v62  ;;  %v4765_v25 = vld [vmem:[#allocation3 + $0x101] sm:$0xff] }
 0x440   : > { %3641 = vadd.xlane.f32.xlu1 %v3640_v19  ;;  %v3534_v19 = vld [vmem:[#allocation3 + $0xf0] sm:$0xff]  ;;  %v4884_v20 = vadd.f32 %v4869_v60, %v4868_v39  ;;  %v4342_v55 = vmul.f32 %v9016_v12, %v4324_v14  ;;  %v3613_v60 = vsel %vm357_vm0, %v3536_v5, %v8789_v15  ;;  %v4854_v11 = vsel %vm357_vm0, %v8998_v26, %v9004_v38  ;;  %v10658_v14 = vld [vmem:[#allocation15_spill] sm:$0xff] }
 0x441   : > { %v3611_v59 = vsel %vm357_vm0, %v3534_v19, %v8791_v28  ;;  %v4149_v28 = vsel %vm357_vm0, %v4072_v37, %v8805_v51  ;;  %v4317_v51 = vsel %vm357_vm0, %v9104_v56, %v8726_v10  ;;  %v4143_v10 = vsel %vm357_vm0, %v9026_v1, %v9072_v9  ;;  %v7003_v9 = vld [vmem:[#allocation3 + $0xe1] sm:$0xff]  ;;  %v4234_v39 = vld [vmem:[#allocation3 + $0xf0] sm:$0xff] }
 0x442   : > { %4179 = vadd.xlane.f32.xlu0 %v8958_v54  ;;  %v4355_v54 = vadd.f32 %v4340_v24, %v4339_v4  ;;  %v3535_v24 = vld [vmem:[#allocation3 + $0x100] sm:$0xff]  ;;  %v3629_v16 = vmul.f32 %v8665_v48, %v3611_v59  ;;  %v4167_v41 = vmul.f32 %v8685_v22, %v4149_v28  ;;  %v9184_v29 = vpop.permute.xlu0 %4647  ;;  %v4341_v47 = vmul.f32 %v9014_v44, %v4317_v51  ;;  %v10653_v59 = vld [vmem:[#allocation65_spill] sm:$0xff] }
 0x443   : > { %v3612_v32 = vsel %vm357_vm0, %v3535_v24, %v8763_v58  ;;  %v3632_v56 = vmul.f32 %v8663_v40, %v3606_v33  ;;  %v3633_v53 = vmul.f32 %v8665_v48, %v3613_v60  ;;  %v4168_v15 = vmul.f32 %v8683_v30, %v4143_v10  ;;  %v10660_v10 = vld [vmem:[#allocation22_spill] sm:$0xff] }
 0x444   : > { %3644 = vadd.xlane.f32.xlu2 %v3643_v42  ;;  %v4881_v42 = vadd.f32 %v4867_v8, %v4866_v35  ;;  %v3646_v4 = vadd.f32 %v3629_v16, %v3628_v50  ;;  %v3631_v27 = vmul.f32 %v8665_v48, %v3612_v32  ;;  %v4184_v58 = vadd.f32 %v4167_v41, %v4166_v36  ;;  %v10652_v48 = vld [vmem:[#allocation62_spill] sm:$0xff]  ;;  %v10656_v16 = vld [vmem:[#allocation60_spill] sm:$0xff] }
 0x445   : > { %v4358_v63 = vadd.f32 %v4342_v55, %v4341_v47  ;;  %v4169_v19 = vmul.f32 %v8685_v22, %v4150_v23  ;;  %v3652_v8 = vadd.f32 %v3633_v53, %v3632_v56  ;;  %v4871_v62 = vmul.f32 %v8921_v43, %v4854_v11  ;;  %v4250_v41 = vld [vmem:[#allocation3 + $0x250] sm:$0xff] }
 0x446   : > { %v9144_v46 = vpop.permute.xlu2 %4649  ;;  %v4856_v61 = vsel %vm357_vm0, %v10652_v48, %v9106_v13  ;;  %v4325_v37 = vsel %vm357_vm0, %v3520_v3, %v10653_v59  ;;  %v4849_v50 = vsel %vm357_vm0, %v4765_v25, %v10654_v52  ;;  %v4144_v28 = vsel %vm357_vm0, %v10652_v48, %v10656_v16  ;;  %v10661_v23 = vld [vmem:[#allocation66_spill] sm:$0xff]  ;;  %v10664_v48 = vld [vmem:[#allocation16_spill] sm:$0xff]  ;;  %v10666_v59 = vld [vmem:[#allocation27_spill] sm:$0xff] }
 0x447   : > { %v4187_v35 = vadd.f32 %v4169_v19, %v4168_v15  ;;  %v4875_v24 = vmul.f32 %v8921_v43, %v4856_v61  ;;  %v4344_v36 = vmul.f32 %v9016_v12, %v4325_v37  ;;  %v4874_v32 = vmul.f32 %v8919_v7, %v4849_v50  ;;  %v7004_v11 = vld [vmem:[#allocation3 + $0xf1] sm:$0xff]  ;;  %v10662_v15 = vld [vmem:[#allocation19_spill] sm:$0xff] }
 0x448   : > { %4356 = vadd.xlane.f32.xlu1 %v4355_v54  ;;  %v3630_v54 = vmul.f32 %v8663_v40, %v3605_v34  ;;  %v9211_v21 = vpop.permute.xlu1 %3740  ;;  %v4320_v56 = vsel %vm357_vm0, %v3536_v5, %v10660_v10  ;;  %v9261_v5 = vld [vmem:[#allocation3 + $0x71] sm:$0xff]  ;;  %v3963_v61 = vsel %vm357_vm0, %v10664_v48, %v9099_v57  ;;  %v3786_v50 = vsel %vm357_vm0, %v10664_v48, %v9155_v2 }
 0x449   : > { %v4893_v51 = vadd.f32 %v4875_v24, %v4874_v32  ;;  %v10669_v32 = vld [vmem:[#allocation41_spill] sm:$0xff]  ;;  %v10672_v2 = vld [vmem:[#allocation46_spill] sm:$0xff] }
 0x44a   : > { %4353 = vadd.xlane.f32.xlu0 %v4352_v17  ;;  %v3649_v49 = vadd.f32 %v3631_v27, %v3630_v54  ;;  %v9220_v26 = vpop.permute.xlu0 %4472  ;;  %v4170_v27 = vmul.f32 %v8683_v30, %v4144_v28 }
 0x44c   : > { %4182 = vadd.xlane.f32.xlu2 %v4181_v31  ;;  %v10651_v31 = vld [vmem:[#allocation18_spill] sm:$0xff] }
 0x44d   : > { %v4847_v40 = vsel %vm357_vm0, %v7003_v9, %v10651_v31  ;;  %v4848_v9 = vsel %vm357_vm0, %v7004_v11, %v10662_v15  ;;  %v10675_v11 = vld [vmem:[#allocation40_spill] sm:$0xff] }
 0x44e   : > { %v9168_v6 = vpop.permute.xlu2 %3744 }
 0x450   : > { %4885 = vadd.xlane.f32.xlu1 %v4884_v20  ;;  %v4870_v20 = vmul.f32 %v8919_v7, %v4847_v40  ;;  %v9244_v33 = vpop.permute.xlu1 %3917  ;;  %v4347_v40 = vmul.f32 %v9014_v44, %v4320_v56 }
 0x452   : > { %4882 = vadd.xlane.f32.xlu0 %v4881_v42  ;;  %v10655_v42 = vld [vmem:[#allocation17_spill] sm:$0xff]  ;;  %v4887_v34 = vadd.f32 %v4871_v62, %v4870_v20  ;;  %v9254_v53 = vpop.permute.xlu0 %3742 }
 0x453   : > { %v4318_v13 = vsel %vm357_vm0, %v4234_v39, %v10655_v42  ;;  %v10667_v42 = vld [vmem:[#allocation42_spill] sm:$0xff] }
 0x454   : > { %3647 = vadd.xlane.f32.xlu2 %v3646_v4  ;;  %v4343_v3 = vmul.f32 %v9014_v44, %v4318_v13  ;;  %v10657_v4 = vld [vmem:[#allocation21_spill] sm:$0xff]  ;;  %v3984_v13 = vmul.f32 %v10667_v42, %v3963_v61 }
 0x455   : > { %v4151_v54 = vsel %vm357_vm0, %v10658_v14, %v10657_v4  ;;  %v10670_v4 = vld [vmem:[#allocation49_spill] sm:$0xff] }
 0x456   : > { %v9194_v17 = vpop.permute.xlu2 %3921  ;;  %v4361_v47 = vadd.f32 %v4344_v36, %v4343_v3  ;;  %v4171_v60 = vmul.f32 %v8685_v22, %v4151_v54  ;;  %v4506_v22 = vld [vmem:[#allocation10 + $0x5] ss:$2 sm:$0x3]  ;;  %v3808_v14 = vmul.f32 %v10670_v4, %v3786_v50  ;;  %v10671_v54 = vld [vmem:[#allocation61_spill] sm:$0xff]  ;;  %v9337_v50 = vld [vmem:[#allocation3 + $0x41] sm:$0xff] }
 0x457   : > { %v9267_v62 = vperm.slane %v4506_v22, 0  ;;  %v9272_v44 = vperm.slane %v4506_v22, 1 }
 0x458   : > { %4185 = vadd.xlane.f32.xlu1 %v4184_v58  ;;  %v10659_v58 = vld [vmem:[#allocation63_spill] sm:$0xff]  ;;  %v4190_v31 = vadd.f32 %v4171_v60, %v4170_v27  ;;  %v9282_v24 = vpop.permute.xlu1 %4474 }
 0x459   : > { %v4327_v55 = vsel %vm357_vm0, %v4250_v41, %v10659_v58  ;;  %v10673_v60 = vld [vmem:[#allocation51_spill] sm:$0xff] }
 0x45a   : > { %3650 = vadd.xlane.f32.xlu0 %v3649_v49  ;;  %v4348_v30 = vmul.f32 %v9016_v12, %v4327_v55  ;;  %v3920_v28 = vpop.permute.xlu0 %3919  ;;  %v9299_v55 = vld [vmem:[#allocation3 + $0x151] sm:$0xff] }
 0x45b   : > { %v4498_v56 = vsel %vm357_vm0, %v9299_v55, %v9118_v0  ;;  %v4675_v22 = vsel %vm357_vm0, %v9299_v55, %v9184_v29  ;;  %v9330_v29 = vld [vmem:[#allocation3 + $0x171] sm:$0xff] }
 0x45c   : > { %4359 = vadd.xlane.f32.xlu2 %v4358_v63  ;;  %v4855_v63 = vsel %vm357_vm0, %v9026_v1, %v10661_v23  ;;  %v4872_v1 = vmul.f32 %v8919_v7, %v4848_v9  ;;  %v4367_v25 = vadd.f32 %v4348_v30, %v4347_v40  ;;  %v4682_v23 = vld [vmem:[#allocation10 + $0x4] ss:$2 sm:$0x3]  ;;  %v10674_v30 = vld [vmem:[#allocation25_spill] sm:$0xff]  ;;  %v4513_v40 = vmul.f32 %v9272_v44, %v4498_v56 }
 0x45d   : > { %v4873_v19 = vmul.f32 %v8921_v43, %v4855_v63  ;;  %v3716_v43 = vld [vmem:[#allocation3 + $0x21] sm:$0xff]  ;;  %v4491_v15 = vsel %vm357_vm0, %v10675_v11, %v10674_v30  ;;  %v9317_v0 = vperm.slane %v4682_v23, 0 }
 0x45e   : > { %v9222_v38 = vpop.permute.xlu2 %4476  ;;  %v3970_v37 = vsel %vm357_vm0, %v3716_v43, %v10666_v59  ;;  %v4492_v10 = vsel %vm357_vm0, %v3716_v43, %v10673_v60  ;;  %v10679_v59 = vld [vmem:[#allocation53_spill] sm:$0xff]  ;;  %v3788_v60 = vsel %vm357_vm0, %v9330_v29, %v9254_v53 }
 0x45f   : > { %v4890_v7 = vadd.f32 %v4873_v19, %v4872_v1  ;;  %v3985_v3 = vmul.f32 %v10669_v32, %v3970_v37  ;;  %v10676_v1 = vld [vmem:[#allocation64_spill] sm:$0xff]  ;;  %v4669_v37 = vsel %vm357_vm0, %v3716_v43, %v10679_v59  ;;  %v10686_v59 = vld [vmem:[#allocation37_spill] sm:$0xff] }
 0x460   : > { %3653 = vadd.xlane.f32.xlu1 %v3652_v8  ;;  %v10663_v8 = vld [vmem:[#allocation44_spill] sm:$0xff]  ;;  %v4652_v9 = vpop.permute.xlu1 %4651 }
 0x461   : > { %v4497_v12 = vsel %vm357_vm0, %v9261_v5, %v10663_v8  ;;  %v3999_v27 = vadd.f32 %v3985_v3, %v3984_v13  ;;  %v10677_v8 = vld [vmem:[#allocation24_spill] sm:$0xff]  ;;  %v10680_v13 = vld [vmem:[#allocation55_spill] sm:$0xff]  ;;  %v4677_v30 = vsel %vm357_vm0, %v9330_v29, %v4652_v9 }
 0x462   : > { %4188 = vadd.xlane.f32.xlu0 %v4187_v35  ;;  %v10665_v35 = vld [vmem:[#allocation29_spill] sm:$0xff]  ;;  %v4524_v52 = vmul.f32 %v9267_v62, %v4497_v12  ;;  %v9319_v19 = vpop.permute.xlu0 %4653  ;;  %v4668_v12 = vsel %vm357_vm0, %v10675_v11, %v10677_v8  ;;  %v3812_v11 = vmul.f32 %v10670_v4, %v3788_v60  ;;  %v10684_v8 = vld [vmem:[#allocation28_spill] sm:$0xff] }
 0x464   : > { %4888 = vadd.xlane.f32.xlu2 %v4887_v34  ;;  %v10668_v34 = vld [vmem:[#allocation26_spill] sm:$0xff] }
 0x465   : > { %v3793_v16 = vsel %vm357_vm0, %v3716_v43, %v10668_v34 }
 0x466   : > { %v9246_v49 = vpop.permute.xlu2 %4655  ;;  %v3809_v41 = vmul.f32 %v10672_v2, %v3793_v16  ;;  %v4690_v16 = vmul.f32 %v9317_v0, %v4669_v37 }
 0x468   : > { %4894 = vadd.xlane.f32.xlu1 %v4893_v51  ;;  %v9294_v51 = vld [vmem:[#allocation3 + $0x161] sm:$0xff] }
 0x469   : > { %v4499_v58 = vsel %vm357_vm0, %v9294_v51, %v9220_v26  ;;  %v9310_v26 = vperm.slane %v4682_v23, 1  ;;  %v10682_v23 = vld [vmem:[#allocation54_spill] sm:$0xff] }
 0x46a   : > { %4362 = vadd.xlane.f32.xlu0 %v4361_v47  ;;  %v3823_v47 = vadd.f32 %v3809_v41, %v3808_v14  ;;  %v4515_v63 = vmul.f32 %v9272_v44, %v4499_v58  ;;  %v3894_v14 = vld [vmem:[#allocation3 + $0x31] sm:$0xff] }
 0x46b   : > { %v4689_v61 = vmul.f32 %v9310_v26, %v4675_v22  ;;  %v3964_v22 = vsel %vm357_vm0, %v9294_v51, %v9244_v33 }
 0x46c   : > { %4191 = vadd.xlane.f32.xlu2 %v4190_v31  ;;  %v4514_v31 = vmul.f32 %v9267_v62, %v4492_v10  ;;  %v9357_v10 = vpop.permute.xlu0 %3923 }
 0x46e   : > { %v4483_v39 = vpop.permute.xlu2 %4482  ;;  %v4529_v48 = vadd.f32 %v4515_v63, %v4514_v31  ;;  %v3795_v63 = vsel %vm357_vm0, %v9337_v50, %v10682_v23  ;;  %v10690_v23 = vld [vmem:[#allocation56_spill] sm:$0xff] }
 0x46f   : > { %v4504_v20 = vsel %vm357_vm0, %v10665_v35, %v4483_v39  ;;  %v10678_v39 = vld [vmem:[#allocation20_spill] sm:$0xff] }
 0x470   : > { %4368 = vadd.xlane.f32.xlu1 %v4367_v25  ;;  %v4525_v57 = vmul.f32 %v9272_v44, %v4504_v20  ;;  %v4512_v25 = vmul.f32 %v9267_v62, %v4491_v15  ;;  %v4676_v35 = vsel %vm357_vm0, %v10678_v39, %v9144_v46  ;;  %v3972_v46 = vsel %vm357_vm0, %v9337_v50, %v10680_v13  ;;  %v10683_v15 = vld [vmem:[#allocation33_spill] sm:$0xff] }
 0x471   : > { %v3787_v3 = vsel %vm357_vm0, %v10678_v39, %v9211_v21  ;;  %v4670_v31 = vsel %vm357_vm0, %v3894_v14, %v10683_v15  ;;  %v10691_v15 = vld [vmem:[#allocation35_spill] sm:$0xff] }
 0x472   : > { %4891 = vadd.xlane.f32.xlu0 %v4890_v7  ;;  %v9288_v36 = vadd.f32 %v4525_v57, %v4524_v52  ;;  %v4526_v20 = vadd.f32 %v4513_v40, %v4512_v25  ;;  %v4688_v7 = vmul.f32 %v9317_v0, %v4668_v12  ;;  %v3965_v52 = vsel %vm357_vm0, %v9330_v29, %v3920_v28  ;;  %v9348_v28 = vpop.permute.xlu1 %3746 }
 0x473   : > { %v4691_v57 = vmul.f32 %v9310_v26, %v4676_v35  ;;  %v3988_v43 = vmul.f32 %v10667_v42, %v3965_v52  ;;  %v3813_v40 = vmul.f32 %v10672_v2, %v3795_v63  ;;  %v3971_v12 = vsel %vm357_vm0, %v3894_v14, %v10684_v8 }
 0x474   : > { %4365 = vadd.xlane.f32.xlu2 %v10671_v54  ;;  %v4702_v34 = vadd.f32 %v4689_v61, %v4688_v7  ;;  %v10681_v54 = vld [vmem:[#allocation30_spill] sm:$0xff]  ;;  %v4692_v9 = vmul.f32 %v9317_v0, %v4670_v31  ;;  %v10685_v61 = vld [vmem:[#allocation23_spill] sm:$0xff]  ;;  %v3987_v7 = vmul.f32 %v10669_v32, %v3971_v12  ;;  %v4494_v31 = vsel %vm357_vm0, %v9337_v50, %v10691_v15 }
 0x475   : > { %v3794_v41 = vsel %vm357_vm0, %v3894_v14, %v10681_v54  ;;  %v4705_v58 = vadd.f32 %v4691_v57, %v4690_v16  ;;  %v3829_v25 = vadd.f32 %v3813_v40, %v3812_v11  ;;  %v3966_v39 = vsel %vm357_vm0, %v10685_v61, %v9194_v17  ;;  %v4479_v57 = vpop.permute.xlu0 %4478  ;;  %v10688_v54 = vld [vmem:[#allocation32_spill] sm:$0xff]  ;;  %v10692_v12 = vld [vmem:[#allocation34_spill] sm:$0xff] }
 0x476   : > { %v3811_v56 = vmul.f32 %v10672_v2, %v3794_v41  ;;  %v3789_v52 = vsel %vm357_vm0, %v10685_v61, %v9168_v6  ;;  %v3990_v13 = vmul.f32 %v10667_v42, %v3966_v39  ;;  %v4493_v6 = vsel %vm357_vm0, %v3894_v14, %v10688_v54 }
 0x478   : > { %4000 = vadd.xlane.f32.xlu1 %v3999_v27  ;;  %v3989_v27 = vmul.f32 %v10669_v32, %v3972_v46  ;;  %v10687_v46 = vld [vmem:[#allocation36_spill] sm:$0xff] }
 0x47a   : > { %3824 = vadd.xlane.f32.xlu0 %v3823_v47  ;;  %v3810_v47 = vmul.f32 %v10670_v4, %v3787_v3  ;;  %v4005_v21 = vadd.f32 %v3989_v27, %v3988_v43  ;;  %v9380_v35 = vpop.permute.xlu1 %3925  ;;  %v3814_v3 = vmul.f32 %v10670_v4, %v3789_v52  ;;  %v4500_v43 = vsel %vm357_vm0, %v9330_v29, %v9282_v24  ;;  %v7005_v24 = vld [vmem:[#allocation3 + $0x181] sm:$0xff] }
 0x47c   : > { %4897 = vadd.xlane.f32.xlu2 %v10676_v1  ;;  %v3826_v53 = vadd.f32 %v3811_v56, %v3810_v47  ;;  %v4693_v1 = vmul.f32 %v9310_v26, %v4677_v30  ;;  %v10689_v47 = vld [vmem:[#allocation47_spill] sm:$0xff]  ;;  %v4516_v56 = vmul.f32 %v9267_v62, %v4493_v6  ;;  %v4501_v30 = vsel %vm357_vm0, %v7005_v24, %v9222_v38  ;;  %v10695_v6 = vld [vmem:[#allocation58_spill] sm:$0xff] }
 0x47d   : > { %v4502_v60 = vsel %vm357_vm0, %v10689_v47, %v4479_v57  ;;  %v3749_v40 = vpop.permute.xlu0 %3748  ;;  %v4519_v8 = vmul.f32 %v9272_v44, %v4501_v30  ;;  %v4679_v39 = vsel %vm357_vm0, %v10689_v47, %v9246_v49  ;;  %v9436_v49 = vld [vmem:[#allocation3 + $0x61] sm:$0xff] }
 0x47e   : > { %v4708_v33 = vadd.f32 %v4693_v1, %v4692_v9  ;;  %v4521_v11 = vmul.f32 %v9272_v44, %v4502_v60  ;;  %v4671_v9 = vsel %vm357_vm0, %v9337_v50, %v10692_v12 }
 0x480   : > { %4530 = vadd.xlane.f32.xlu1 %v4529_v48  ;;  %v3986_v48 = vmul.f32 %v10667_v42, %v3964_v22 }
 0x482   : > { %4527 = vadd.xlane.f32.xlu0 %v4526_v20  ;;  %v3719_v20 = vld [vmem:[#allocation3 + $0x51] sm:$0xff]  ;;  %v4481_v14 = vpop.permute.xlu1 %4480 }
 0x483   : > { %v3973_v37 = vsel %vm357_vm0, %v3719_v20, %v10686_v59  ;;  %v3796_v17 = vsel %vm357_vm0, %v3719_v20, %v10687_v46  ;;  %v4495_v63 = vsel %vm357_vm0, %v3719_v20, %v10690_v23  ;;  %v10693_v59 = vld [vmem:[#allocation43_spill] sm:$0xff] }
 0x484   : > { %4703 = vadd.xlane.f32.xlu2 %v4702_v34  ;;  %v4002_v34 = vadd.f32 %v3987_v7, %v3986_v48  ;;  %v3991_v16 = vmul.f32 %v10669_v32, %v3973_v37  ;;  %v3815_v41 = vmul.f32 %v10672_v2, %v3796_v17  ;;  %v4520_v1 = vmul.f32 %v9267_v62, %v4495_v63  ;;  %v10694_v17 = vld [vmem:[#allocation48_spill] sm:$0xff]  ;;  %v10696_v63 = vld [vmem:[#allocation38_spill] sm:$0xff] }
 0x485   : > { %v4694_v7 = vmul.f32 %v9317_v0, %v4671_v9  ;;  %v4697_v37 = vmul.f32 %v9310_v26, %v4679_v39  ;;  %v4660_v46 = vpop.permute.xlu0 %4659  ;;  %v3974_v24 = vsel %vm357_vm0, %v9436_v49, %v10696_v63  ;;  %v10698_v39 = vld [vmem:[#allocation50_spill] sm:$0xff] }
 0x486   : > { %v4008_v27 = vadd.f32 %v3991_v16, %v3990_v13  ;;  %v4538_v48 = vadd.f32 %v4521_v11, %v4520_v1  ;;  %v3790_v13 = vsel %vm357_vm0, %v10689_v47, %v9348_v28 }
 0x488   : > { %4706 = vadd.xlane.f32.xlu1 %v4705_v58  ;;  %v4517_v58 = vmul.f32 %v9272_v44, %v4500_v43 }
 0x48a   : > { %4006 = vadd.xlane.f32.xlu0 %v4005_v21  ;;  %v3832_v21 = vadd.f32 %v3815_v41, %v3814_v3  ;;  %v4532_v22 = vadd.f32 %v4517_v58, %v4516_v56  ;;  %v9430_v50 = vpop.permute.xlu1 %4657  ;;  %v3816_v3 = vmul.f32 %v10670_v4, %v3790_v13  ;;  %v3798_v41 = vsel %vm357_vm0, %v9261_v5, %v10695_v6 }
 0x48b   : > { %v3967_v56 = vsel %vm357_vm0, %v10689_v47, %v9357_v10  ;;  %v4943_v47 = vld [vmem:[#allocation3 + $0x11] sm:$0xff] }
 0x48c   : > { %3827 = vadd.xlane.f32.xlu2 %v3826_v53  ;;  %v9411_v53 = vld [vmem:[#allocation3 + $0x181] sm:$0xff]  ;;  %v3992_v11 = vmul.f32 %v10667_v42, %v3967_v56  ;;  %v10700_v56 = vld [vmem:[#allocation45_spill] sm:$0xff] }
 0x48d   : > { %v4678_v38 = vsel %vm357_vm0, %v9411_v53, %v9319_v19  ;;  %v4672_v19 = vsel %vm357_vm0, %v3719_v20, %v10693_v59  ;;  %v3797_v20 = vsel %vm357_vm0, %v9436_v49, %v10694_v17  ;;  %v9494_v17 = vld [vmem:[#allocation3 + $0x21] sm:$0xff] }
 0x48e   : > { %v4695_v61 = vmul.f32 %v9310_v26, %v4678_v38  ;;  %v4696_v57 = vmul.f32 %v9317_v0, %v4672_v19  ;;  %v3817_v28 = vmul.f32 %v10672_v2, %v3797_v20 }
 0x490   : > { %3830 = vadd.xlane.f32.xlu1 %v3829_v25  ;;  %v4518_v25 = vmul.f32 %v9267_v62, %v4494_v31  ;;  %v4711_v52 = vadd.f32 %v4695_v61, %v4694_v7  ;;  %v4714_v16 = vadd.f32 %v4697_v37, %v4696_v57  ;;  %v3835_v60 = vadd.f32 %v3817_v28, %v3816_v3  ;;  %v10699_v57 = vld [vmem:[#allocation39_spill] sm:$0xff] }
 0x491   : > { %v9488_v37 = vstv %s3513_s11 }
 0x492   : > { %4709 = vadd.xlane.f32.xlu0 %v4708_v33  ;;  %v4535_v33 = vadd.f32 %v4519_v8, %v4518_v25  ;;  %v3656_v13 = vadd.f32 %v9488_v37, %v10699_v57 }
 0x494   : > { %4003 = vadd.xlane.f32.xlu2 %v4002_v34  ;;  %v9441_v34 = vld [vmem:[#allocation3 + $0x1a1] sm:$0xff]  ;;  %6770 = vtanh.f32 %v3656_v13 }
 0x495   : > { %v3791_v43 = vsel %vm357_vm0, %v9441_v34, %v3749_v40  ;;  %v4503_v40 = vsel %vm357_vm0, %v9441_v34, %v4481_v14 }
 0x496   : > { %v4523_v8 = vmul.f32 %v9272_v44, %v4503_v40  ;;  %v3968_v40 = vsel %vm357_vm0, %v9441_v34, %v9380_v35 }
 0x498   : > { %4009 = vadd.xlane.f32.xlu1 %v4008_v27  ;;  %v3818_v27 = vmul.f32 %v10670_v4, %v3791_v43  ;;  %v3993_v4 = vmul.f32 %v10669_v32, %v3974_v24 }
 0x49a   : > { %3833 = vadd.xlane.f32.xlu0 %v3832_v21  ;;  %v3819_v21 = vmul.f32 %v10672_v2, %v3798_v41  ;;  %v4011_v2 = vadd.f32 %v3993_v4, %v3992_v11  ;;  %v3677_v41 = vlaneseq  ;;  %v6771_v63 = vpop.eup %6770  ;;  %v10701_v11 = vld [vmem:[#allocation59_spill] sm:$0xff] }
 0x49b   : > { %v3975_v4 = vsel %vm357_vm0, %v9261_v5, %v10701_v11  ;;  %v10702_v11 = vld [vmem:[#allocation57_spill] sm:$0xff] }
 0x49c   : > { %4533 = vadd.xlane.f32.xlu2 %v4532_v22  ;;  %v3838_v30 = vadd.f32 %v3819_v21, %v3818_v27  ;;  %v10697_v22 = vld [vmem:[#allocation52_spill] sm:$0xff]  ;;  %v9508_v24 = vand.u32 127, %v3677_v41 }
 0x49d   : > { %v4496_v1 = vsel %vm357_vm0, %v9436_v49, %v10697_v22  ;;  %v4948_v21 = vld [vmem:[#allocation3 + $0x61] sm:$0xff] }
 0x49e   : > { %v4522_v12 = vmul.f32 %v9267_v62, %v4496_v1 }
 0x4a0   : > { %4539 = vadd.xlane.f32.xlu1 %v4538_v48  ;;  %v4541_v25 = vadd.f32 %v4523_v8, %v4522_v12  ;;  %v7006_v48 = vld [vmem:[#allocation3 + $0x1b1] sm:$0xff]  ;;  %v3679_v12 = vperm.slane %v6771_v63, %v9508_v24 }
 0x4a1   : > { %v4681_v14 = vsel %vm357_vm0, %v7006_v48, %v4660_v46 }
 0x4a2   : > { %4536 = vadd.xlane.f32.xlu0 %v4535_v33  ;;  %v4674_v33 = vsel %vm357_vm0, %v9261_v5, %v10698_v39  ;;  %v4701_v7 = vmul.f32 %v9310_v26, %v4681_v14  ;;  %v3994_v14 = vmul.f32 %v10667_v42, %v3968_v40 }
 0x4a3   : > { %v4700_v59 = vmul.f32 %v9317_v0, %v4674_v33 }
 0x4a4   : > { %4712 = vadd.xlane.f32.xlu2 %v4711_v52 }
 0x4a5   : > { %v4720_v19 = vadd.f32 %v4701_v7, %v4700_v59 }
 0x4a7   : > { %v9446_v54 = vpop.xlane.xlu2 %4350 }
 0x4a8   : > { %4715 = vadd.xlane.f32.xlu1 %v4714_v16  ;;  %v4370_v7 = vadd.f32 %v9446_v54, %v9488_v37 }
 0x4ab   : > { %v9453_v58 = vpop.xlane.xlu1 %4176 }
 0x4ac   : > { %3836 = vadd.xlane.f32.xlu2 %v3835_v60  ;;  %v4194_v1 = vadd.f32 %v9453_v58, %v9488_v37 }
 0x4ad   : > { %v3639_v23 = vpop.xlane.xlu0 %3638 }
 0x4ae   : > { %v3657_v20 = vadd.f32 %v9488_v37, %v3639_v23  ;;  %v4193_v23 = vadd.f32 %v10700_v56, %v9488_v37 }
 0x4af   : > { %v9463_v15 = vpop.xlane.xlu2 %4879 }
 0x4b0   : > { %3839 = vadd.xlane.f32.xlu1 %v3838_v30  ;;  %6772 = vtanh.f32 %v3657_v20  ;;  %v4899_v54 = vadd.f32 %v9463_v15, %v9488_v37 }
 0x4b3   : > { %v3642_v31 = vpop.xlane.xlu1 %3641 }
 0x4b4   : > { %4012 = vadd.xlane.f32.xlu2 %v4011_v2  ;;  %v3658_v16 = vadd.f32 %v9488_v37, %v3642_v31 }
 0x4b5   : > { %v9468_v10 = vpop.xlane.xlu0 %4179 }
 0x4b6   : > { %4971 = vrot.lane.b32.xlu0 %v4943_v47, %s7169_s10  ;;  %6774 = vtanh.f32 %v3658_v16  ;;  %v6773_v30 = vpop.eup %6772  ;;  %v4195_v39 = vadd.f32 %v9468_v10, %v9488_v37  ;;  %v9548_v16 = vld [vmem:[#allocation3 + $0x31] sm:$0xff] }
 0x4b7   : > { %v3645_v38 = vpop.xlane.xlu2 %3644  ;;  %v3680_v5 = vperm.slane %v6773_v30, %v9508_v24 }
 0x4b8   : > { %v3659_v3 = vadd.f32 %v9488_v37, %v3645_v38 }
 0x4b9   : > { %v3687_v10 = vsel %vm3686_vm3, %v3680_v5, %v3679_v12  ;;  %v9591_v12 = vld [vmem:[#allocation3 + $0x71] sm:$0xff] }
 0x4ba   : > { %6776 = vtanh.f32 %v3659_v3 }
 0x4bb   : > { %v9476_v9 = vpop.xlane.xlu1 %4356 }
 0x4bc   : > { %4542 = vadd.xlane.f32.xlu2 %v4541_v25  ;;  %v6775_v2 = vpop.eup %6774  ;;  %v3995_v25 = vmul.f32 %v10669_v32, %v3975_v4  ;;  %v4673_v4 = vsel %vm357_vm0, %v9436_v49, %v10702_v11 }
 0x4bd   : > { %v9479_v61 = vpop.xlane.xlu0 %4353  ;;  %v3681_v35 = vperm.slane %v6775_v2, %v9508_v24 }
 0x4be   : > { %v4371_v3 = vadd.f32 %v9479_v61, %v9488_v37  ;;  %v4014_v41 = vadd.f32 %v3995_v25, %v3994_v14 }
 0x4bf   : > { %v4183_v44 = vpop.xlane.xlu2 %4182  ;;  %v3689_v13 = vsel %vm3688_vm4, %v3681_v35, %v3687_v10 }
 0x4c0   : > { %v6777_v22 = vpop.eup %6776  ;;  %v4196_v33 = vadd.f32 %v4183_v44, %v9488_v37 }
 0x4c1   : > { %v3682_v58 = vperm.slane %v6777_v22, %v9508_v24 }
 0x4c3   : > { %v9486_v62 = vpop.xlane.xlu1 %4885  ;;  %v3691_v20 = vsel %vm3690_vm5, %v3682_v58, %v3689_v13 }
 0x4c4   : > { %4721 = vadd.xlane.f32.xlu2 %v4720_v19  ;;  %v4901_v49 = vadd.f32 %v9486_v62, %v9488_v37 }
 0x4c5   : > { %v9490_v52 = vpop.xlane.xlu0 %4882 }
 0x4c7   : > { %v3648_v46 = vpop.xlane.xlu2 %3647 }
 0x4c8   : > { %v3660_v28 = vadd.f32 %v9488_v37, %v3648_v46 }
 0x4c9   : > { %4973 = vrot.lane.b32.xlu1 %v9494_v17, %s7169_s10 }
 0x4ca   : > { %6778 = vtanh.f32 %v3660_v28 }
 0x4cb   : > { %v4186_v43 = vpop.xlane.xlu1 %4185 }
 0x4cc   : > { %v4197_v59 = vadd.f32 %v4186_v43, %v9488_v37 }
 0x4cd   : > { %v3651_v6 = vpop.xlane.xlu0 %3650 }
 0x4ce   : > { %v3661_v27 = vadd.f32 %v9488_v37, %v3651_v6  ;;  %v4372_v6 = vadd.f32 %v9476_v9, %v9488_v37  ;;  %v9572_v9 = vld [vmem:[#allocation3 + $0x191] sm:$0xff] }
 0x4cf   : > { %v9503_v60 = vpop.xlane.xlu2 %4359 }
 0x4d0   : > { %6780 = vtanh.f32 %v3661_v27  ;;  %v6779_v38 = vpop.eup %6778 }
 0x4d1   : > { %4981 = vrot.lane.b32.xlu1 %v4948_v21, %s7169_s10  ;;  %6782 = vtanh.f32 %v4193_v23  ;;  %v3683_v42 = vperm.slane %v6779_v38, %v9508_v24  ;;  %v4680_v21 = vsel %vm357_vm0, %v9441_v34, %v9430_v50  ;;  %v4900_v23 = vadd.f32 %v9490_v52, %v9488_v37 }
 0x4d2   : > { %v4373_v50 = vadd.f32 %v9503_v60, %v9488_v37  ;;  %v4699_v2 = vmul.f32 %v9310_v26, %v4680_v21 }
 0x4d3   : > { %v3654_v31 = vpop.xlane.xlu1 %3653  ;;  %v3693_v43 = vsel %vm3692_vm6, %v3683_v42, %v3691_v20 }
 0x4d4   : > { %v3662_v47 = vadd.f32 %v9488_v37, %v3654_v31 }
 0x4d5   : > { %v4189_v8 = vpop.xlane.xlu0 %4188 }
 0x4d6   : > { %6784 = vtanh.f32 %v3662_v47  ;;  %v6781_v48 = vpop.eup %6780  ;;  %v4198_v44 = vadd.f32 %v4189_v8, %v9488_v37  ;;  %v4698_v8 = vmul.f32 %v9317_v0, %v4673_v4 }
 0x4d7   : > { %v9528_v32 = vpop.xlane.xlu2 %4888  ;;  %6786 = vtanh.f32 %v4194_v1  ;;  %v3684_v19 = vperm.slane %v6781_v48, %v9508_v24  ;;  %v9540_v57 = vpop.eup %6782 }
 0x4d8   : > { %6788 = vtanh.f32 %v4195_v39  ;;  %v4902_v26 = vadd.f32 %v9528_v32, %v9488_v37  ;;  %v4214_v5 = vperm.slane %v9540_v57, %v9508_v24  ;;  %v4717_v58 = vadd.f32 %v4699_v2, %v4698_v8 }
 0x4d9   : > { %5001 = vrot.lane.b32.xlu1 %v9294_v51, %s7169_s10  ;;  %6790 = vtanh.f32 %v4196_v33  ;;  %v3695_v61 = vsel %vm3694_vm7, %v3684_v19, %v3693_v43 }
 0x4da   : > { %6792 = vtanh.f32 %v4197_v59 }
 0x4db   : > { %v9545_v46 = vpop.xlane.xlu1 %4894  ;;  %6794 = vtanh.f32 %v4198_v44 }
 0x4dc   : > { %v6785_v51 = vpop.eup %6784  ;;  %4975 = vrot.lane.b32.xlu2 %v9548_v16, %s7169_s10  ;;  %6796 = vtanh.f32 %v4370_v7 }
 0x4dd   : > { %v3685_v15 = vperm.slane %v6785_v51, %v9508_v24  ;;  %v4363_v28 = vpop.xlane.xlu0 %4362  ;;  %v6787_v27 = vpop.eup %6786  ;;  %6798 = vtanh.f32 %v4899_v54 }
 0x4de   : > { %v6789_v30 = vpop.eup %6788  ;;  %6800 = vtanh.f32 %v4371_v3  ;;  %v4374_v40 = vadd.f32 %v4363_v28, %v9488_v37  ;;  %v4215_v22 = vperm.slane %v6787_v27, %v9508_v24 }
 0x4df   : > { %v3697_v56 = vsel %vm3696_vm8, %v3685_v15, %v3695_v61  ;;  %v4192_v63 = vpop.xlane.xlu2 %4191  ;;  %v6791_v52 = vpop.eup %6790  ;;  %6802 = vtanh.f32 %v4372_v6  ;;  %v4216_v38 = vperm.slane %v6789_v30, %v9508_v24  ;;  %v4904_v61 = vadd.f32 %v9545_v46, %v9488_v37 }
 0x4e0   : > { %3700 = vst.msk [vmem:[%s9556_s14] sm:$0x7f] %vm3699_vm9, %v3697_v56  ;;  %4015 = vadd.xlane.f32.xlu0 %v4014_v41  ;;  %v4199_v31 = vadd.f32 %v4192_v63, %v9488_v37  ;;  %v6793_v47 = vpop.eup %6792  ;;  %v4217_v48 = vperm.slane %v6791_v52, %v9508_v24  ;;  %v4221_v32 = vsel %vm3686_vm3, %v4215_v22, %v4214_v5 }
 0x4e1   : > { %5007 = vrot.lane.b32.xlu1 %v9572_v9, %s7169_s10  ;;  %v6795_v60 = vpop.eup %6794  ;;  %v4218_v35 = vperm.slane %v6793_v47, %v9508_v24  ;;  %v4222_v59 = vsel %vm3688_vm4, %v4216_v38, %v4221_v32 }
 0x4e2   : > { %6804 = vtanh.f32 %v4199_v31  ;;  %v6797_v25 = vpop.eup %6796  ;;  %v4219_v7 = vperm.slane %v6795_v60, %v9508_v24  ;;  %v4223_v44 = vsel %vm3690_vm5, %v4217_v48, %v4222_v59 }
 0x4e3   : > { %v4369_v1 = vpop.xlane.xlu1 %4368  ;;  %6806 = vtanh.f32 %v4900_v23  ;;  %v6799_v14 = vpop.eup %6798  ;;  %v4224_v51 = vsel %vm3692_vm6, %v4218_v35, %v4223_v44  ;;  %v4391_v6 = vperm.slane %v6797_v25, %v9508_v24 }
 0x4e4   : > { %6808 = vtanh.f32 %v4373_v50  ;;  %v4376_v62 = vadd.f32 %v4369_v1, %v9488_v37  ;;  %4983 = vrot.lane.b32.xlu2 %v9591_v12, %s7169_s10  ;;  %v6801_v33 = vpop.eup %6800  ;;  %v4225_v43 = vsel %vm3694_vm7, %v4219_v7, %v4224_v51  ;;  %v4920_v50 = vperm.slane %v6799_v14, %v9508_v24 }
 0x4e5   : > { %v4892_v0 = vpop.xlane.xlu0 %4891  ;;  %6810 = vtanh.f32 %v4374_v40  ;;  %v6803_v42 = vpop.eup %6802  ;;  %v4392_v13 = vperm.slane %v6801_v33, %v9508_v24 }
 0x4e6   : > { %v4903_v39 = vadd.f32 %v4892_v0, %v9488_v37  ;;  %6812 = vtanh.f32 %v4901_v49  ;;  %v4393_v11 = vperm.slane %v6803_v42, %v9508_v24 }
 0x4e7   : > { %6814 = vtanh.f32 %v4902_v26  ;;  %v4366_v10 = vpop.xlane.xlu2 %4365  ;;  %v4398_v56 = vsel %vm3686_vm3, %v4392_v13, %v4391_v6  ;;  %v9668_v13 = vld [vmem:[#allocation3 + $0x51] sm:$0xff] }
 0x4e8   : > { %4718 = vadd.xlane.f32.xlu0 %v4717_v58  ;;  %v6805_v19 = vpop.eup %6804  ;;  %6816 = vtanh.f32 %v4376_v62  ;;  %v4375_v57 = vadd.f32 %v4366_v10, %v9488_v37  ;;  %v4399_v52 = vsel %vm3688_vm4, %v4393_v11, %v4398_v56  ;;  %v9693_v11 = vld [vmem:[#allocation3 + $0x1b1] sm:$0xff] }
 0x4e9   : > { %v6807_v54 = vpop.eup %6806  ;;  %v4220_v20 = vperm.slane %v6805_v19, %v9508_v24  ;;  %6818 = vtanh.f32 %v4903_v39  ;;  %v9660_v19 = vld [vmem:[#allocation3 + $0x41] sm:$0xff] }
 0x4ea   : > { %v6809_v3 = vpop.eup %6808  ;;  %6820 = vtanh.f32 %v4375_v57  ;;  %v4921_v23 = vperm.slane %v6807_v54, %v9508_v24 }
 0x4eb   : > { %v9610_v15 = vpop.xlane.xlu1 %4000  ;;  %v6811_v28 = vpop.eup %6810  ;;  %v4226_v41 = vsel %vm3696_vm8, %v4220_v20, %v4225_v43  ;;  %v4394_v63 = vperm.slane %v6809_v3, %v9508_v24  ;;  %6822 = vtanh.f32 %v4904_v61  ;;  %v3841_v43 = vadd.f32 %v9182_v18, %v9488_v37 }
 0x4ec   : > { %v6813_v27 = vpop.eup %6812  ;;  %6649 = vst.msk [vmem:[%s9556_s14 + $0x18] sm:$0x7f] %vm3699_vm9, %v4226_v41  ;;  %5003 = vrot.lane.b32.xlu2 %v9330_v29, %s7169_s10  ;;  %v4395_v46 = vperm.slane %v6811_v28, %v9508_v24  ;;  %v4927_v47 = vsel %vm3686_vm3, %v4921_v23, %v4920_v50 }
 0x4ed   : > { %v6815_v21 = vpop.eup %6814  ;;  %v3825_v2 = vpop.xlane.xlu0 %3824  ;;  %v4400_v22 = vsel %vm3690_vm5, %v4394_v63, %v4399_v52  ;;  %v4922_v38 = vperm.slane %v6813_v27, %v9508_v24 }
 0x4ee   : > { %v6817_v30 = vpop.eup %6816  ;;  %v4923_v1 = vperm.slane %v6815_v21, %v9508_v24  ;;  %v4401_v60 = vsel %vm3692_vm6, %v4395_v46, %v4400_v22  ;;  %v3842_v6 = vadd.f32 %v3825_v2, %v9488_v37 }
 0x4ef   : > { %v6819_v4 = vpop.eup %6818  ;;  %v4898_v31 = vpop.xlane.xlu2 %4897  ;;  %v4397_v8 = vperm.slane %v6817_v30, %v9508_v24  ;;  %v4928_v62 = vsel %vm3688_vm4, %v4922_v38, %v4927_v47 }
 0x4f0   : > { %4545 = vadd.xlane.f32.xlu0 %v9288_v36  ;;  %v6821_v29 = vpop.eup %6820  ;;  %v4905_v40 = vadd.f32 %v4898_v31, %v9488_v37  ;;  %v4924_v26 = vperm.slane %v6819_v4, %v9508_v24  ;;  %v4929_v0 = vsel %vm3690_vm5, %v4923_v1, %v4928_v62 }
 0x4f1   : > { %v4396_v49 = vperm.slane %v6821_v29, %v9508_v24  ;;  %v6823_v48 = vpop.eup %6822 }
 0x4f2   : > { %6824 = vtanh.f32 %v4905_v40  ;;  %v4930_v14 = vsel %vm3692_vm6, %v4924_v26, %v4929_v0  ;;  %v4925_v58 = vperm.slane %v6823_v48, %v9508_v24 }
 0x4f3   : > { %v9635_v36 = vpop.xlane.xlu1 %4530  ;;  %v4402_v25 = vsel %vm3694_vm7, %v4396_v49, %v4401_v60  ;;  %6826 = vtanh.f32 %v3841_v43 }
 0x4f4   : > { %v4403_v5 = vsel %vm3696_vm8, %v4397_v8, %v4402_v25  ;;  %5009 = vrot.lane.b32.xlu2 %v9441_v34, %s7169_s10  ;;  %v4931_v32 = vsel %vm3694_vm7, %v4925_v58, %v4930_v14  ;;  %6828 = vtanh.f32 %v3842_v6  ;;  %v4937_v6 = vld [vmem:[#allocation3 + $0xc0] sm:$0xff] }
 0x4f5   : > { %6650 = vst.msk [vmem:[%s9556_s14 + $0x20] sm:$0x7f] %vm3699_vm9, %v4403_v5  ;;  %v9653_v7 = vpop.xlane.xlu0 %4527 }
 0x4f7   : > { %v9648_v35 = vpop.xlane.xlu2 %4703 }
 0x4f8   : > { %v6825_v39 = vpop.eup %6824 }
 0x4f9   : > { %v4926_v33 = vperm.slane %v6825_v39, %v9508_v24  ;;  %v6827_v23 = vpop.eup %6826 }
 0x4fa   : > { %v6829_v63 = vpop.eup %6828  ;;  %v3862_v52 = vperm.slane %v6827_v23, %v9508_v24 }
 0x4fb   : > { %v9655_v34 = vpop.xlane.xlu1 %4706  ;;  %v4932_v42 = vsel %vm3696_vm8, %v4926_v33, %v4931_v32  ;;  %v3863_v31 = vperm.slane %v6829_v63, %v9508_v24  ;;  %v4017_v32 = vadd.f32 %v9127_v45, %v9488_v37 }
 0x4fc   : > { %6653 = vst.msk [vmem:[%s9556_s14 + $0x38] sm:$0x7f] %vm3699_vm9, %v4932_v42  ;;  %v4018_v42 = vadd.f32 %v9610_v15, %v9488_v37  ;;  %v4951_v15 = vld [vmem:[#allocation3 + $0x200] sm:$0xff] }
 0x4fd   : > { %v9664_v44 = vpop.xlane.xlu0 %4006  ;;  %v3869_v49 = vsel %vm3686_vm3, %v3863_v31, %v3862_v52  ;;  %v4952_v52 = vld [vmem:[#allocation3 + $0x210] sm:$0xff] }
 0x4ff   : > { %v3828_v59 = vpop.xlane.xlu2 %3827 }
 0x500   : > { %v3843_v41 = vadd.f32 %v3828_v59, %v9488_v37 }
 0x502   : > { %6830 = vtanh.f32 %v3843_v41 }
 0x503   : > { %v3831_v10 = vpop.xlane.xlu1 %3830 }
 0x504   : > { %4977 = vrot.lane.b32.xlu0 %v9660_v19, %s7169_s10  ;;  %v3844_v27 = vadd.f32 %v3831_v10, %v9488_v37  ;;  %v5034_v10 = vld [vmem:[#allocation10] ss:$2 sm:$0x3] }
 0x505   : > { %v9672_v51 = vpop.xlane.xlu0 %4709  ;;  %v9733_v45 = vperm.slane %v5034_v10, 0 }
 0x506   : > { %6832 = vtanh.f32 %v3844_v27  ;;  %v4020_v27 = vadd.f32 %v9664_v44, %v9488_v37  ;;  %v4548_v44 = vadd.f32 %v9635_v36, %v9488_v37 }
 0x507   : > { %v4004_v57 = vpop.xlane.xlu2 %4003 }
 0x508   : > { %v6831_v46 = vpop.eup %6830  ;;  %v4019_v59 = vadd.f32 %v4004_v57, %v9488_v37 }
 0x509   : > { %v3864_v29 = vperm.slane %v6831_v46, %v9508_v24 }
 0x50b   : > { %v9666_v54 = vpop.xlane.xlu1 %4009  ;;  %v3870_v60 = vsel %vm3688_vm4, %v3864_v29, %v3869_v49 }
 0x50c   : > { %4979 = vrot.lane.b32.xlu0 %v9668_v13, %s7169_s10 }
 0x50d   : > { %v3834_v61 = vpop.xlane.xlu0 %3833 }
 0x50e   : > { %v3845_v56 = vadd.f32 %v3834_v61, %v9488_v37  ;;  %v9728_v61 = vperm.slane %v5034_v10, 1 }
 0x50f   : > { %v9674_v20 = vpop.xlane.xlu2 %4533 }
 0x510   : > { %6834 = vtanh.f32 %v3845_v56 }
 0x513   : > { %v9676_v3 = vpop.xlane.xlu1 %4539 }
 0x514   : > { %4999 = vrot.lane.b32.xlu0 %v9299_v55, %s7169_s10 }
 0x515   : > { %v9717_v58 = vpop.xlane.xlu0 %4536 }
 0x517   : > { %v9682_v28 = vpop.xlane.xlu2 %4712 }
 0x51b   : > { %v9687_v21 = vpop.xlane.xlu1 %4715 }
 0x51c   : > { %5005 = vrot.lane.b32.xlu0 %v9411_v53, %s7169_s10  ;;  %v6833_v53 = vpop.eup %6832 }
 0x51d   : > { %v6835_v50 = vpop.eup %6834  ;;  %v3865_v2 = vperm.slane %v6833_v53, %v9508_v24  ;;  %v7007_v53 = vld [vmem:[#allocation3 + $0xd0] sm:$0xff] }
 0x51e   : > { %v3866_v22 = vperm.slane %v6835_v50, %v9508_v24 }
 0x51f   : > { %v3837_v18 = vpop.xlane.xlu2 %3836  ;;  %v3871_v38 = vsel %vm3690_vm5, %v3865_v2, %v3870_v60 }
 0x520   : > { %v3846_v55 = vadd.f32 %v3837_v18, %v9488_v37  ;;  %v3872_v26 = vsel %vm3692_vm6, %v3866_v22, %v3871_v38  ;;  %v4021_v18 = vadd.f32 %v9666_v54, %v9488_v37  ;;  %v4723_v54 = vadd.f32 %v9648_v35, %v9488_v37 }
 0x521   : > { %v4725_v35 = vadd.f32 %v9672_v51, %v9488_v37  ;;  %v4547_v51 = vadd.f32 %v9653_v7, %v9488_v37 }
 0x522   : > { %6836 = vtanh.f32 %v3846_v55 }
 0x523   : > { %v3840_v30 = vpop.xlane.xlu1 %3839 }
 0x524   : > { %v3847_v4 = vadd.f32 %v3840_v30, %v9488_v37  ;;  %5011 = vrot.lane.b32.xlu0 %v9693_v11, %s7169_s10 }
 0x526   : > { %6838 = vtanh.f32 %v3847_v4 }
 0x527   : > { %v4013_v40 = vpop.xlane.xlu2 %4012  ;;  %6840 = vtanh.f32 %v4017_v32  ;;  %v4549_v32 = vadd.f32 %v9674_v20, %v9488_v37 }
 0x528   : > { %v6837_v47 = vpop.eup %6836  ;;  %6842 = vtanh.f32 %v4018_v42  ;;  %v9735_v56 = vpop.permute.xlu0 %4971  ;;  %v4022_v23 = vadd.f32 %v4013_v40, %v9488_v37  ;;  %v4724_v40 = vadd.f32 %v9655_v34, %v9488_v37  ;;  %v4726_v34 = vadd.f32 %v9682_v28, %v9488_v37 }
 0x529   : > { %v3867_v1 = vperm.slane %v6837_v47, %v9508_v24  ;;  %6844 = vtanh.f32 %v4019_v59 }
 0x52a   : > { %6846 = vtanh.f32 %v4020_v27 }
 0x52b   : > { %v3873_v5 = vsel %vm3694_vm7, %v3867_v1, %v3872_v26  ;;  %6848 = vtanh.f32 %v4021_v18 }
 0x52c   : > { %v6839_v8 = vpop.eup %6838  ;;  %6850 = vtanh.f32 %v4022_v23 }
 0x52d   : > { %v3868_v25 = vperm.slane %v6839_v8, %v9508_v24  ;;  %v6841_v46 = vpop.eup %6840  ;;  %6852 = vtanh.f32 %v4548_v44 }
 0x52e   : > { %v6843_v4 = vpop.eup %6842  ;;  %v4038_v1 = vperm.slane %v6841_v46, %v9508_v24  ;;  %6854 = vtanh.f32 %v4723_v54 }
 0x52f   : > { %v3874_v48 = vsel %vm3696_vm8, %v3868_v25, %v3873_v5  ;;  %v9713_v62 = vpop.xlane.xlu2 %4542  ;;  %v6845_v29 = vpop.eup %6844  ;;  %v4039_v36 = vperm.slane %v6843_v4, %v9508_v24  ;;  %6856 = vtanh.f32 %v4724_v40  ;;  %v4727_v5 = vadd.f32 %v9687_v21, %v9488_v37 }
 0x530   : > { %6647 = vst.msk [vmem:[%s9556_s14 + $0x8] sm:$0x7f] %vm3699_vm9, %v3874_v48  ;;  %v4040_v60 = vperm.slane %v6845_v29, %v9508_v24  ;;  %v6847_v25 = vpop.eup %6846  ;;  %v4550_v21 = vadd.f32 %v9717_v58, %v9488_v37 }
 0x531   : > { %v6849_v48 = vpop.eup %6848  ;;  %v4041_v42 = vperm.slane %v6847_v25, %v9508_v24 }
 0x532   : > { %v4042_v10 = vperm.slane %v6849_v48, %v9508_v24 }
 0x537   : > { %v9715_v0 = vpop.xlane.xlu2 %4721 }
 0x538   : > { %v4729_v7 = vadd.f32 %v9715_v0, %v9488_v37  ;;  %v4552_v0 = vadd.f32 %v9713_v62, %v9488_v37 }
 0x53b   : > { %v4974_v14 = vpop.permute.xlu1 %4973 }
 0x53c   : > { %v5021_v41 = vsel %vm357_vm0, %v4937_v6, %v4974_v14  ;;  %v4045_v14 = vsel %vm3686_vm3, %v4039_v36, %v4038_v1 }
 0x53d   : > { %v5042_v63 = vmul.f32 %v9733_v45, %v5021_v41  ;;  %v4046_v28 = vsel %vm3688_vm4, %v4040_v60, %v4045_v14 }
 0x53e   : > { %v4047_v41 = vsel %vm3690_vm5, %v4041_v42, %v4046_v28 }
 0x53f   : > { %v4976_v39 = vpop.permute.xlu2 %4975 }
 0x540   : > { %v5022_v50 = vsel %vm357_vm0, %v7007_v53, %v4976_v39  ;;  %v6851_v39 = vpop.eup %6850 }
 0x541   : > { %v5044_v22 = vmul.f32 %v9733_v45, %v5022_v50  ;;  %v6853_v59 = vpop.eup %6852  ;;  %v4043_v27 = vperm.slane %v6851_v39, %v9508_v24 }
 0x542   : > { %v6855_v6 = vpop.eup %6854 }
 0x543   : > { %v9719_v33 = vpop.permute.xlu1 %4981  ;;  %v6857_v20 = vpop.eup %6856  ;;  %v4744_v29 = vperm.slane %v6855_v6, %v9508_v24 }
 0x544   : > { %v4745_v44 = vperm.slane %v6857_v20, %v9508_v24 }
 0x546   : > { %v4751_v40 = vsel %vm3686_vm3, %v4745_v44, %v4744_v29  ;;  %v4954_v44 = vld [vmem:[#allocation3 + $0x230] sm:$0xff] }
 0x547   : > { %v9726_v43 = vpop.permute.xlu2 %4983 }
 0x54b   : > { %v5002_v57 = vpop.permute.xlu1 %5001 }
 0x54c   : > { %v5028_v55 = vsel %vm357_vm0, %v4951_v15, %v5002_v57 }
 0x54d   : > { %v5043_v30 = vmul.f32 %v9728_v61, %v5028_v55  ;;  %v4048_v55 = vsel %vm3692_vm6, %v4042_v10, %v4047_v41 }
 0x54e   : > { %v4049_v46 = vsel %vm3694_vm7, %v4043_v27, %v4048_v55 }
 0x54f   : > { %v5057_v31 = vadd.f32 %v5043_v30, %v5042_v63  ;;  %v5004_v2 = vpop.permute.xlu2 %5003  ;;  %v4551_v30 = vadd.f32 %v9676_v3, %v9488_v37 }
 0x550   : > { %v5029_v47 = vsel %vm357_vm0, %v4952_v52, %v5004_v2 }
 0x551   : > { %5058 = vadd.xlane.f32.xlu2 %v5057_v31  ;;  %v5045_v49 = vmul.f32 %v9728_v61, %v5029_v47 }
 0x553   : > { %v4016_v8 = vpop.xlane.xlu0 %4015  ;;  %v5060_v26 = vadd.f32 %v5045_v49, %v5044_v22 }
 0x554   : > { %v4023_v38 = vadd.f32 %v4016_v8, %v9488_v37 }
 0x555   : > { %5061 = vadd.xlane.f32.xlu0 %v5060_v26 }
 0x556   : > { %6858 = vtanh.f32 %v4023_v38 }
 0x557   : > { %6860 = vtanh.f32 %v4725_v35  ;;  %v4569_v35 = vperm.slane %v6853_v59, %v9508_v24 }
 0x558   : > { %6862 = vtanh.f32 %v4726_v34 }
 0x559   : > { %6864 = vtanh.f32 %v4727_v5 }
 0x55a   : > { %6866 = vtanh.f32 %v4547_v51 }
 0x55b   : > { %6868 = vtanh.f32 %v4549_v32  ;;  %v4719_v15 = vpop.xlane.xlu0 %4718 }
 0x55c   : > { %v6859_v57 = vpop.eup %6858  ;;  %6870 = vtanh.f32 %v4550_v21  ;;  %v4728_v58 = vadd.f32 %v4719_v15, %v9488_v37  ;;  %v4936_v15 = vld [vmem:[#allocation3 + $0xb0] sm:$0xff] }
 0x55d   : > { %v6861_v18 = vpop.eup %6860  ;;  %6872 = vtanh.f32 %v4729_v7  ;;  %v4044_v23 = vperm.slane %v6859_v57, %v9508_v24  ;;  %v5020_v57 = vsel %vm357_vm0, %v4936_v15, %v9735_v56 }
 0x55e   : > { %v6863_v63 = vpop.eup %6862  ;;  %6874 = vtanh.f32 %v4728_v58  ;;  %v4746_v31 = vperm.slane %v6861_v18, %v9508_v24  ;;  %v4950_v58 = vld [vmem:[#allocation3 + $0x1f0] sm:$0xff] }
 0x55f   : > { %v6865_v4 = vpop.eup %6864  ;;  %v4050_v53 = vsel %vm3696_vm8, %v4044_v23, %v4049_v46  ;;  %v4747_v54 = vperm.slane %v6863_v63, %v9508_v24  ;;  %6876 = vtanh.f32 %v4552_v0  ;;  %v5040_v0 = vmul.f32 %v9733_v45, %v5020_v57  ;;  %v5008_v63 = vpop.permute.xlu1 %5007  ;;  %v7008_v46 = vld [vmem:[#allocation3 + $0xf0] sm:$0xff] }
 0x560   : > { %v6867_v50 = vpop.eup %6866  ;;  %6648 = vst.msk [vmem:[%s9556_s14 + $0x10] sm:$0x7f] %vm3699_vm9, %v4050_v53  ;;  %6878 = vtanh.f32 %v4551_v30  ;;  %v4748_v52 = vperm.slane %v6865_v4, %v9508_v24  ;;  %v4752_v49 = vsel %vm3688_vm4, %v4746_v31, %v4751_v40  ;;  %v4939_v53 = vld [vmem:[#allocation3 + $0xe0] sm:$0xff] }
 0x561   : > { %v6869_v62 = vpop.eup %6868  ;;  %v4568_v22 = vperm.slane %v6867_v50, %v9508_v24  ;;  %v4753_v8 = vsel %vm3690_vm5, %v4747_v54, %v4752_v49  ;;  %v5031_v50 = vsel %vm357_vm0, %v4954_v44, %v5008_v63 }
 0x562   : > { %v6871_v3 = vpop.eup %6870  ;;  %v4570_v60 = vperm.slane %v6869_v62, %v9508_v24  ;;  %v4754_v26 = vsel %vm3692_vm6, %v4748_v52, %v4753_v8  ;;  %v4953_v62 = vld [vmem:[#allocation3 + $0x220] sm:$0xff]  ;;  %v5010_v52 = vpop.permute.xlu2 %5009 }
 0x563   : > { %v6873_v2 = vpop.eup %6872  ;;  %v4546_v47 = vpop.xlane.xlu0 %4545  ;;  %v4571_v38 = vperm.slane %v6871_v3, %v9508_v24  ;;  %v4575_v51 = vsel %vm3686_vm3, %v4569_v35, %v4568_v22  ;;  %v5049_v3 = vmul.f32 %v9728_v61, %v5031_v50  ;;  %v7009_v35 = vld [vmem:[#allocation3 + $0x100] sm:$0xff] }
 0x564   : > { %v6875_v36 = vpop.eup %6874  ;;  %v4553_v1 = vadd.f32 %v4546_v47, %v9488_v37  ;;  %v4750_v25 = vperm.slane %v6873_v2, %v9508_v24  ;;  %v4576_v28 = vsel %vm3688_vm4, %v4570_v60, %v4575_v51  ;;  %v4955_v47 = vld [vmem:[#allocation3 + $0x240] sm:$0xff]  ;;  %v5025_v60 = vsel %vm357_vm0, %v7009_v35, %v9719_v33  ;;  %v9842_v33 = vld [vmem:[#allocation3 + $0xb1] sm:$0xff] }
 0x565   : > { %v4749_v34 = vperm.slane %v6875_v36, %v9508_v24  ;;  %v6877_v5 = vpop.eup %6876  ;;  %v4577_v32 = vsel %vm3690_vm5, %v4571_v38, %v4576_v28  ;;  %v5032_v49 = vsel %vm357_vm0, %v4955_v47, %v5010_v52  ;;  %v4956_v38 = vld [vmem:[#allocation3 + $0x250] sm:$0xff]  ;;  %v9850_v28 = vld [vmem:[#allocation3 + $0xc1] sm:$0xff] }
 0x566   : > { %6880 = vtanh.f32 %v4553_v1  ;;  %v6879_v14 = vpop.eup %6878  ;;  %v4573_v42 = vperm.slane %v6877_v5, %v9508_v24  ;;  %v4942_v1 = vld [vmem:[#allocation3 + $0x110] sm:$0xff]  ;;  %v5050_v5 = vmul.f32 %v9733_v45, %v5025_v60 }
 0x567   : > { %v4755_v48 = vsel %vm3694_vm7, %v4749_v34, %v4754_v26  ;;  %v4572_v21 = vperm.slane %v6879_v14, %v9508_v24  ;;  %v5026_v8 = vsel %vm357_vm0, %v4942_v1, %v9726_v43  ;;  %v5051_v34 = vmul.f32 %v9728_v61, %v5032_v49  ;;  %v9846_v43 = vld [vmem:[#allocation3 + $0xd1] sm:$0xff] }
 0x568   : > { %v4756_v39 = vsel %vm3696_vm8, %v4750_v25, %v4755_v48  ;;  %v5052_v48 = vmul.f32 %v9733_v45, %v5026_v8 }
 0x569   : > { %6652 = vst.msk [vmem:[%s9556_s14 + $0x30] sm:$0x7f] %vm3699_vm9, %v4756_v39  ;;  %v4578_v10 = vsel %vm3692_vm6, %v4572_v21, %v4577_v32  ;;  %v5069_v39 = vadd.f32 %v5051_v34, %v5050_v5  ;;  %v7010_v32 = vld [vmem:[#allocation3 + $0x101] sm:$0xff]  ;;  %v9867_v21 = vld [vmem:[#allocation3 + $0x1f1] sm:$0xff] }
 0x56a   : > { %v4579_v6 = vsel %vm3694_vm7, %v4573_v42, %v4578_v10  ;;  %v9863_v42 = vld [vmem:[#allocation3 + $0x111] sm:$0xff] }
 0x56b   : > { %v9875_v10 = vld [vmem:[#allocation3 + $0x211] sm:$0xff] }
 0x56c   : > { %v6881_v59 = vpop.eup %6880 }
 0x56d   : > { %v4574_v7 = vperm.slane %v6881_v59, %v9508_v24  ;;  %v9871_v59 = vld [vmem:[#allocation3 + $0x201] sm:$0xff] }
 0x56f   : > { %v4580_v41 = vsel %vm3696_vm8, %v4574_v7, %v4579_v6  ;;  %v9879_v7 = vld [vmem:[#allocation3 + $0x221] sm:$0xff]  ;;  %v9883_v6 = vld [vmem:[#allocation3 + $0x231] sm:$0xff] }
 0x570   : > { %6651 = vst.msk [vmem:[%s9556_s14 + $0x28] sm:$0x7f] %vm3699_vm9, %v4580_v41  ;;  %v9887_v41 = vld [vmem:[#allocation3 + $0x241] sm:$0xff] }
 0x576   : > { %v4978_v27 = vpop.permute.xlu0 %4977 }
 0x577   : > { %v5023_v56 = vsel %vm357_vm0, %v4939_v53, %v4978_v27  ;;  %v9891_v27 = vld [vmem:[#allocation3 + $0x251] sm:$0xff] }
 0x578   : > { %v5046_v2 = vmul.f32 %v9733_v45, %v5023_v56 }
 0x57e   : > { %v4980_v20 = vpop.permute.xlu0 %4979 }
 0x57f   : > { %v5024_v4 = vsel %vm357_vm0, %v7008_v46, %v4980_v20 }
 0x580   : > { %v5048_v31 = vmul.f32 %v9733_v45, %v5024_v4  ;;  %v9858_v45 = vld [vmem:[#allocation3 + $0xf1] sm:$0xff] }
 0x582   : > { %v5066_v22 = vadd.f32 %v5049_v3, %v5048_v31 }
 0x586   : > { %v5000_v18 = vpop.permute.xlu0 %4999 }
 0x587   : > { %v5027_v55 = vsel %vm357_vm0, %v4950_v58, %v5000_v18 }
 0x588   : > { %v5041_v23 = vmul.f32 %v9728_v61, %v5027_v55 }
 0x58a   : > { %v5054_v30 = vadd.f32 %v5041_v23, %v5040_v0 }
 0x58c   : > { %5055 = vadd.xlane.f32.xlu1 %v5054_v30 }
 0x58e   : > { %v5006_v29 = vpop.permute.xlu0 %5005 }
 0x58f   : > { %v5030_v54 = vsel %vm357_vm0, %v4953_v62, %v5006_v29 }
 0x590   : > { %v5047_v40 = vmul.f32 %v9728_v61, %v5030_v54 }
 0x592   : > { %v5063_v36 = vadd.f32 %v5047_v40, %v5046_v2 }
 0x594   : > { %5064 = vadd.xlane.f32.xlu2 %v5063_v36  ;;  %5067 = vadd.xlane.f32.xlu1 %v5066_v22 }
 0x596   : > { %v5012_v26 = vpop.permute.xlu0 %5011 }
 0x597   : > { %v5033_v25 = vsel %vm357_vm0, %v4956_v38, %v5012_v26 }
 0x598   : > { %v5053_v14 = vmul.f32 %v9728_v61, %v5033_v25  ;;  %v9854_v61 = vld [vmem:[#allocation3 + $0xe1] sm:$0xff] }
 0x59a   : > { %v5072_v51 = vadd.f32 %v5053_v14, %v5052_v48  ;;  %v5210_v48 = vld [vmem:[#allocation10 + $0x1] ss:$2 sm:$0x3] }
 0x59c   : > { %5073 = vadd.xlane.f32.xlu0 %v5072_v51  ;;  %5070 = vadd.xlane.f32.xlu2 %v5069_v39  ;;  %v5212_v51 = vperm.slane %v5210_v48, 0  ;;  %v5213_v39 = vperm.slane %v5210_v48, 1  ;;  %v9948_v48 = vld [vmem:[#allocation3 + $0x1a1] sm:$0xff] }
 0x5ad   : > { %5147 = vrot.lane.b32.xlu1 %v9842_v33, %s7169_s10 }
 0x5b0   : > { %5151 = vrot.lane.b32.xlu0 %v9846_v43, %s7169_s10 }
 0x5b4   : > { %5149 = vrot.lane.b32.xlu2 %v9850_v28, %s7169_s10 }
 0x5b5   : > { %5153 = vrot.lane.b32.xlu1 %v9854_v61, %s7169_s10 }
 0x5b8   : > { %5155 = vrot.lane.b32.xlu0 %v9858_v45, %s7169_s10 }
 0x5bc   : > { %5157 = vrot.lane.b32.xlu2 %v7010_v32, %s7169_s10 }
 0x5bd   : > { %5159 = vrot.lane.b32.xlu1 %v9863_v42, %s7169_s10 }
 0x5c0   : > { %5175 = vrot.lane.b32.xlu0 %v9867_v21, %s7169_s10 }
 0x5c4   : > { %5177 = vrot.lane.b32.xlu2 %v9871_v59, %s7169_s10  ;;  %v5059_v20 = vpop.xlane.xlu2 %5058 }
 0x5c5   : > { %5179 = vrot.lane.b32.xlu1 %v9875_v10, %s7169_s10  ;;  %v5076_v58 = vadd.f32 %v5059_v20, %v9488_v37  ;;  %v9919_v20 = vld [vmem:[#allocation3 + $0x161] sm:$0xff] }
 0x5c8   : > { %5181 = vrot.lane.b32.xlu0 %v9879_v7, %s7169_s10  ;;  %v5062_v18 = vpop.xlane.xlu0 %5061 }
 0x5c9   : > { %v5077_v23 = vadd.f32 %v5062_v18, %v9488_v37 }
 0x5cc   : > { %5183 = vrot.lane.b32.xlu2 %v9883_v6, %s7169_s10 }
 0x5cd   : > { %5185 = vrot.lane.b32.xlu1 %v9887_v41, %s7169_s10 }
 0x5d0   : > { %5187 = vrot.lane.b32.xlu0 %v9891_v27, %s7169_s10 }
 0x5ff   : > { %v5056_v15 = vpop.xlane.xlu1 %5055 }
 0x600   : > { %v5075_v57 = vadd.f32 %v5056_v15, %v9488_v37 }
 0x602   : > { %6882 = vtanh.f32 %v5075_v57 }
 0x603   : > { %6884 = vtanh.f32 %v5076_v58 }
 0x607   : > { %v5065_v55 = vpop.xlane.xlu2 %5064  ;;  %v5068_v0 = vpop.xlane.xlu1 %5067 }
 0x608   : > { %v5078_v63 = vadd.f32 %v5065_v55, %v9488_v37  ;;  %v5079_v30 = vadd.f32 %v5068_v0, %v9488_v37  ;;  %v6883_v46 = vpop.eup %6882 }
 0x609   : > { %v6885_v4 = vpop.eup %6884  ;;  %v5096_v50 = vperm.slane %v6883_v46, %v9508_v24 }
 0x60a   : > { %6886 = vtanh.f32 %v5078_v63  ;;  %v5097_v54 = vperm.slane %v6885_v4, %v9508_v24  ;;  %v7011_v4 = vld [vmem:[#allocation3 + $0x11] sm:$0xff] }
 0x60b   : > { %6888 = vtanh.f32 %v5077_v23 }
 0x60c   : > { %6890 = vtanh.f32 %v5079_v30  ;;  %v5103_v52 = vsel %vm3686_vm3, %v5097_v54, %v5096_v50 }
 0x60f   : > { %v5074_v44 = vpop.xlane.xlu0 %5073  ;;  %v5071_v53 = vpop.xlane.xlu2 %5070 }
 0x610   : > { %v5081_v56 = vadd.f32 %v5074_v44, %v9488_v37  ;;  %v5080_v31 = vadd.f32 %v5071_v53, %v9488_v37  ;;  %v6887_v62 = vpop.eup %6886 }
 0x611   : > { %v6889_v29 = vpop.eup %6888  ;;  %v5099_v2 = vperm.slane %v6887_v62, %v9508_v24 }
 0x612   : > { %6892 = vtanh.f32 %v5081_v56  ;;  %v6891_v3 = vpop.eup %6890  ;;  %v5098_v40 = vperm.slane %v6889_v29, %v9508_v24  ;;  %v9928_v56 = vld [vmem:[#allocation3 + $0x151] sm:$0xff] }
 0x613   : > { %6894 = vtanh.f32 %v5080_v31  ;;  %v5100_v36 = vperm.slane %v6891_v3, %v9508_v24 }
 0x614   : > { %v5104_v47 = vsel %vm3688_vm4, %v5098_v40, %v5103_v52 }
 0x615   : > { %v5105_v1 = vsel %vm3690_vm5, %v5099_v2, %v5104_v47 }
 0x616   : > { %v5106_v34 = vsel %vm3692_vm6, %v5100_v36, %v5105_v1  ;;  %v9940_v1 = vld [vmem:[#allocation3 + $0x181] sm:$0xff] }
 0x617   : > { %v5150_v22 = vpop.permute.xlu2 %5149 }
 0x618   : > { %v6893_v49 = vpop.eup %6892  ;;  %v5197_v32 = vsel %vm357_vm0, %v9494_v17, %v5150_v22 }
 0x619   : > { %v6895_v35 = vpop.eup %6894  ;;  %v5102_v60 = vperm.slane %v6893_v49, %v9508_v24  ;;  %v5218_v18 = vmul.f32 %v5212_v51, %v5197_v32 }
 0x61a   : > { %v5101_v8 = vperm.slane %v6895_v35, %v9508_v24 }
 0x61c   : > { %v5107_v38 = vsel %vm3694_vm7, %v5101_v8, %v5106_v34 }
 0x61d   : > { %v5108_v26 = vsel %vm3696_vm8, %v5102_v60, %v5107_v38  ;;  %v9944_v38 = vld [vmem:[#allocation3 + $0x61] sm:$0xff] }
 0x61e   : > { %6654 = vst.msk [vmem:[%s9556_s14 + $0x40] sm:$0x7f] %vm3699_vm9, %v5108_v26 }
 0x61f   : > { %v5158_v25 = vpop.permute.xlu2 %5157  ;;  %v5148_v5 = vpop.permute.xlu1 %5147 }
 0x620   : > { %v5196_v44 = vsel %vm357_vm0, %v7011_v4, %v5148_v5  ;;  %v5201_v26 = vsel %vm357_vm0, %v9944_v38, %v5158_v25 }
 0x621   : > { %v5216_v54 = vmul.f32 %v5212_v51, %v5196_v44 }
 0x622   : > { %v5152_v14 = vpop.permute.xlu0 %5151 }
 0x623   : > { %v5198_v52 = vsel %vm357_vm0, %v9548_v16, %v5152_v14 }
 0x624   : > { %v5220_v36 = vmul.f32 %v5212_v51, %v5198_v52 }
 0x627   : > { %v5178_v15 = vpop.permute.xlu2 %5177  ;;  %v5154_v57 = vpop.permute.xlu1 %5153 }
 0x628   : > { %v5204_v58 = vsel %vm357_vm0, %v9919_v20, %v5178_v15  ;;  %v5199_v22 = vsel %vm357_vm0, %v9660_v19, %v5154_v57  ;;  %v5226_v15 = vmul.f32 %v5212_v51, %v5201_v26 }
 0x629   : > { %v5219_v55 = vmul.f32 %v5213_v39, %v5204_v58  ;;  %v5222_v8 = vmul.f32 %v5212_v51, %v5199_v22 }
 0x62a   : > { %v5156_v0 = vpop.permute.xlu0 %5155 }
 0x62b   : > { %v5233_v23 = vadd.f32 %v5219_v55, %v5218_v18  ;;  %v5200_v63 = vsel %vm357_vm0, %v9668_v13, %v5156_v0 }
 0x62c   : > { %v5224_v53 = vmul.f32 %v5212_v51, %v5200_v63 }
 0x62d   : > { %5234 = vadd.xlane.f32.xlu1 %v5233_v23 }
 0x62f   : > { %v5184_v30 = vpop.permute.xlu2 %5183  ;;  %v5160_v46 = vpop.permute.xlu1 %5159 }
 0x630   : > { %v5207_v17 = vsel %vm357_vm0, %v9572_v9, %v5184_v30  ;;  %v9934_v9 = vld [vmem:[#allocation3 + $0x171] sm:$0xff]  ;;  %v5202_v57 = vsel %vm357_vm0, %v9591_v12, %v5160_v46  ;;  %v9970_v12 = vld [vmem:[#allocation3 + $0x101] sm:$0xff] }
 0x631   : > { %v5225_v50 = vmul.f32 %v5213_v39, %v5207_v17  ;;  %v5228_v23 = vmul.f32 %v5212_v51, %v5202_v57 }
 0x632   : > { %v5176_v31 = vpop.permute.xlu0 %5175 }
 0x633   : > { %v5203_v62 = vsel %vm357_vm0, %v9928_v56, %v5176_v31  ;;  %v5242_v29 = vadd.f32 %v5225_v50, %v5224_v53 }
 0x634   : > { %v5217_v3 = vmul.f32 %v5213_v39, %v5203_v62 }
 0x635   : > { %5243 = vadd.xlane.f32.xlu1 %v5242_v29 }
 0x636   : > { %v5230_v2 = vadd.f32 %v5217_v3, %v5216_v54 }
 0x637   : > { %v5180_v40 = vpop.permute.xlu1 %5179 }
 0x638   : > { %v5205_v47 = vsel %vm357_vm0, %v9934_v9, %v5180_v40  ;;  %5231 = vadd.xlane.f32.xlu2 %v5230_v2 }
 0x639   : > { %v5221_v49 = vmul.f32 %v5213_v39, %v5205_v47 }
 0x63a   : > { %v5182_v35 = vpop.permute.xlu0 %5181 }
 0x63b   : > { %v5206_v60 = vsel %vm357_vm0, %v9940_v1, %v5182_v35  ;;  %v5236_v16 = vadd.f32 %v5221_v49, %v5220_v36 }
 0x63c   : > { %v5223_v34 = vmul.f32 %v5213_v39, %v5206_v60 }
 0x63d   : > { %5237 = vadd.xlane.f32.xlu0 %v5236_v16 }
 0x63e   : > { %v5239_v5 = vadd.f32 %v5223_v34, %v5222_v8 }
 0x63f   : > { %v5186_v14 = vpop.permute.xlu1 %5185 }
 0x640   : > { %v5208_v32 = vsel %vm357_vm0, %v9948_v48, %v5186_v14  ;;  %5240 = vadd.xlane.f32.xlu2 %v5239_v5 }
 0x641   : > { %v5227_v58 = vmul.f32 %v5213_v39, %v5208_v32 }
 0x642   : > { %v5188_v18 = vpop.permute.xlu0 %5187 }
 0x643   : > { %v5209_v55 = vsel %vm357_vm0, %v9693_v11, %v5188_v18  ;;  %v5245_v0 = vadd.f32 %v5227_v58, %v5226_v15 }
 0x644   : > { %v5229_v25 = vmul.f32 %v5213_v39, %v5209_v55 }
 0x645   : > { %5246 = vadd.xlane.f32.xlu0 %v5245_v0 }
 0x646   : > { %v5248_v63 = vadd.f32 %v5229_v25, %v5228_v23  ;;  %v5386_v25 = vld [vmem:[#allocation10] ss:$2 sm:$0x3] }
 0x648   : > { %5249 = vadd.xlane.f32.xlu2 %v5248_v63 }
 0x64e   : > { %5323 = vrot.lane.b32.xlu1 %v9842_v33, %s7169_s10 }
 0x656   : > { %5331 = vrot.lane.b32.xlu1 %v9858_v45, %s7169_s10 }
 0x659   : > { %5325 = vrot.lane.b32.xlu0 %v9850_v28, %s7169_s10 }
 0x65e   : > { %5351 = vrot.lane.b32.xlu1 %v9867_v21, %s7169_s10 }
 0x660   : > { %5327 = vrot.lane.b32.xlu2 %v9846_v43, %s7169_s10 }
 0x661   : > { %5329 = vrot.lane.b32.xlu0 %v9854_v61, %s7169_s10 }
 0x666   : > { %5357 = vrot.lane.b32.xlu1 %v9879_v7, %s7169_s10 }
 0x668   : > { %5333 = vrot.lane.b32.xlu2 %v9970_v12, %s7169_s10 }
 0x669   : > { %5335 = vrot.lane.b32.xlu0 %v9863_v42, %s7169_s10 }
 0x66e   : > { %5363 = vrot.lane.b32.xlu1 %v9891_v27, %s7169_s10 }
 0x670   : > { %5353 = vrot.lane.b32.xlu2 %v9871_v59, %s7169_s10 }
 0x671   : > { %5355 = vrot.lane.b32.xlu0 %v9875_v10, %s7169_s10 }
 0x678   : > { %5359 = vrot.lane.b32.xlu2 %v9883_v6, %s7169_s10 }
 0x679   : > { %5361 = vrot.lane.b32.xlu0 %v9887_v41, %s7169_s10 }
 0x6a0   : > { %v5235_v51 = vpop.xlane.xlu1 %5234 }
 0x6a1   : > { %v5252_v17 = vadd.f32 %v5235_v51, %v9488_v37 }
 0x6a8   : > { %v5244_v44 = vpop.xlane.xlu1 %5243 }
 0x6a9   : > { %v5255_v31 = vadd.f32 %v5244_v44, %v9488_v37  ;;  %v10009_v44 = vld [vmem:[#allocation3 + $0x21] sm:$0xff] }
 0x6ab   : > { %v5232_v39 = vpop.xlane.xlu2 %5231 }
 0x6ac   : > { %v5251_v30 = vadd.f32 %v5232_v39, %v9488_v37  ;;  %v5288_v39 = vld [vmem:[#allocation3 + $0x11] sm:$0xff] }
 0x6ae   : > { %6896 = vtanh.f32 %v5251_v30  ;;  %v5388_v30 = vperm.slane %v5386_v25, 0 }
 0x6b0   : > { %v5238_v46 = vpop.xlane.xlu0 %5237 }
 0x6b1   : > { %v5253_v4 = vadd.f32 %v5238_v46, %v9488_v37  ;;  %v5389_v46 = vperm.slane %v5386_v25, 1 }
 0x6b3   : > { %v5241_v53 = vpop.xlane.xlu2 %5240  ;;  %6898 = vtanh.f32 %v5253_v4 }
 0x6b4   : > { %v5254_v50 = vadd.f32 %v5241_v53, %v9488_v37  ;;  %6900 = vtanh.f32 %v5252_v17  ;;  %v6897_v29 = vpop.eup %6896 }
 0x6b5   : > { %v5272_v47 = vperm.slane %v6897_v29, %v9508_v24 }
 0x6b6   : > { %6902 = vtanh.f32 %v5254_v50 }
 0x6b7   : > { %6904 = vtanh.f32 %v5255_v31 }
 0x6b8   : > { %v5247_v62 = vpop.xlane.xlu0 %5246 }
 0x6b9   : > { %v5256_v54 = vadd.f32 %v5247_v62, %v9488_v37  ;;  %v6899_v3 = vpop.eup %6898 }
 0x6ba   : > { %v6901_v52 = vpop.eup %6900  ;;  %v5274_v22 = vperm.slane %v6899_v3, %v9508_v24 }
 0x6bb   : > { %6906 = vtanh.f32 %v5256_v54  ;;  %v5250_v2 = vpop.xlane.xlu2 %5249  ;;  %v5273_v49 = vperm.slane %v6901_v52, %v9508_v24 }
 0x6bc   : > { %v6903_v40 = vpop.eup %6902  ;;  %v5257_v36 = vadd.f32 %v5250_v2, %v9488_v37 }
 0x6bd   : > { %v5275_v35 = vperm.slane %v6903_v40, %v9508_v24  ;;  %v6905_v60 = vpop.eup %6904  ;;  %v5279_v16 = vsel %vm3686_vm3, %v5273_v49, %v5272_v47 }
 0x6be   : > { %6908 = vtanh.f32 %v5257_v36  ;;  %v5280_v26 = vsel %vm3688_vm4, %v5274_v22, %v5279_v16  ;;  %v5276_v32 = vperm.slane %v6905_v60, %v9508_v24 }
 0x6bf   : > { %v5281_v5 = vsel %vm3690_vm5, %v5275_v35, %v5280_v26  ;;  %v7013_v26 = vld [vmem:[#allocation3 + $0x191] sm:$0xff] }
 0x6c0   : > { %v5324_v8 = vpop.permute.xlu1 %5323  ;;  %v5282_v58 = vsel %vm3692_vm6, %v5276_v32, %v5281_v5 }
 0x6c1   : > { %v6907_v34 = vpop.eup %6906  ;;  %v5372_v17 = vsel %vm357_vm0, %v5288_v39, %v5324_v8 }
 0x6c2   : > { %v5277_v14 = vperm.slane %v6907_v34, %v9508_v24  ;;  %v5392_v50 = vmul.f32 %v5388_v30, %v5372_v17 }
 0x6c3   : > { %v5328_v15 = vpop.permute.xlu2 %5327 }
 0x6c4   : > { %v6909_v57 = vpop.eup %6908  ;;  %v5283_v55 = vsel %vm3694_vm7, %v5277_v14, %v5282_v58 }
 0x6c5   : > { %v5278_v18 = vperm.slane %v6909_v57, %v9508_v24 }
 0x6c7   : > { %v5284_v0 = vsel %vm3696_vm8, %v5278_v18, %v5283_v55 }
 0x6c8   : > { %6655 = vst.msk [vmem:[%s9556_s14 + $0x48] sm:$0x7f] %vm3699_vm9, %v5284_v0  ;;  %v5332_v23 = vpop.permute.xlu1 %5331 }
 0x6c9   : > { %v5376_v35 = vsel %vm357_vm0, %v9668_v13, %v5332_v23  ;;  %v7015_v13 = vld [vmem:[#allocation3 + $0x31] sm:$0xff] }
 0x6ca   : > { %v5400_v32 = vmul.f32 %v5388_v30, %v5376_v35  ;;  %v5374_v23 = vsel %vm357_vm0, %v7015_v13, %v5328_v15  ;;  %v10072_v35 = vld [vmem:[#allocation3 + $0x152] sm:$0xff] }
 0x6cb   : > { %v5334_v63 = vpop.permute.xlu2 %5333  ;;  %v5326_v51 = vpop.permute.xlu0 %5325 }
 0x6cc   : > { %v5373_v31 = vsel %vm357_vm0, %v10009_v44, %v5326_v51 }
 0x6cd   : > { %v5394_v2 = vmul.f32 %v5388_v30, %v5373_v31 }
 0x6d0   : > { %v5352_v4 = vpop.permute.xlu1 %5351 }
 0x6d1   : > { %v5379_v53 = vsel %vm357_vm0, %v9928_v56, %v5352_v4 }
 0x6d2   : > { %v5393_v62 = vmul.f32 %v5389_v46, %v5379_v53  ;;  %v5396_v53 = vmul.f32 %v5388_v30, %v5374_v23 }
 0x6d3   : > { %v5354_v29 = vpop.permute.xlu2 %5353  ;;  %v5330_v54 = vpop.permute.xlu0 %5329 }
 0x6d4   : > { %v5380_v3 = vsel %vm357_vm0, %v9919_v20, %v5354_v29  ;;  %v5406_v52 = vadd.f32 %v5393_v62, %v5392_v50  ;;  %v5375_v47 = vsel %vm357_vm0, %v9660_v19, %v5330_v54  ;;  %v7014_v19 = vld [vmem:[#allocation3 + $0x71] sm:$0xff]  ;;  %v5377_v62 = vsel %vm357_vm0, %v9944_v38, %v5334_v63  ;;  %v10043_v38 = vld [vmem:[#allocation3 + $0x62] sm:$0xff] }
 0x6d5   : > { %v5395_v40 = vmul.f32 %v5389_v46, %v5380_v3  ;;  %v5398_v60 = vmul.f32 %v5388_v30, %v5375_v47  ;;  %v5402_v15 = vmul.f32 %v5388_v30, %v5377_v62  ;;  %v10047_v63 = vld [vmem:[#allocation3 + $0x72] sm:$0xff] }
 0x6d6   : > { %5407 = vadd.xlane.f32.xlu2 %v5406_v52  ;;  %v5471_v52 = vld [vmem:[#allocation3 + $0x12] sm:$0xff] }
 0x6d7   : > { %v5409_v36 = vadd.f32 %v5395_v40, %v5394_v2  ;;  %v10035_v2 = vld [vmem:[#allocation3 + $0x42] sm:$0xff]  ;;  %v10039_v40 = vld [vmem:[#allocation3 + $0x32] sm:$0xff] }
 0x6d8   : > { %v5358_v22 = vpop.permute.xlu1 %5357  ;;  %v10059_v47 = vld [vmem:[#allocation3 + $0x172] sm:$0xff] }
 0x6d9   : > { %v5382_v49 = vsel %vm357_vm0, %v9940_v1, %v5358_v22  ;;  %5410 = vadd.xlane.f32.xlu0 %v5409_v36  ;;  %v10063_v36 = vld [vmem:[#allocation3 + $0x52] sm:$0xff] }
 0x6da   : > { %v5399_v16 = vmul.f32 %v5389_v46, %v5382_v49  ;;  %v10067_v22 = vld [vmem:[#allocation3 + $0x192] sm:$0xff]  ;;  %v5490_v49 = vld [vmem:[#allocation3 + $0x1a2] sm:$0xff] }
 0x6db   : > { %v5360_v8 = vpop.permute.xlu2 %5359  ;;  %v5336_v34 = vpop.permute.xlu0 %5335 }
 0x6dc   : > { %v5383_v5 = vsel %vm357_vm0, %v7013_v26, %v5360_v8  ;;  %v5415_v14 = vadd.f32 %v5399_v16, %v5398_v60  ;;  %v5378_v58 = vsel %vm357_vm0, %v7014_v19, %v5336_v34  ;;  %v10076_v60 = vld [vmem:[#allocation3 + $0x182] sm:$0xff]  ;;  %v10080_v16 = vld [vmem:[#allocation3 + $0x1b2] sm:$0xff] }
 0x6dd   : > { %v5401_v57 = vmul.f32 %v5389_v46, %v5383_v5  ;;  %v5404_v25 = vmul.f32 %v5388_v30, %v5378_v58  ;;  %v10051_v30 = vld [vmem:[#allocation3 + $0x22] sm:$0xff] }
 0x6de   : > { %5416 = vadd.xlane.f32.xlu2 %v5415_v14 }
 0x6df   : > { %v5418_v18 = vadd.f32 %v5401_v57, %v5400_v32 }
 0x6e0   : > { %v5364_v55 = vpop.permute.xlu1 %5363 }
 0x6e1   : > { %v5385_v0 = vsel %vm357_vm0, %v9693_v11, %v5364_v55  ;;  %5419 = vadd.xlane.f32.xlu0 %v5418_v18 }
 0x6e2   : > { %v5405_v51 = vmul.f32 %v5389_v46, %v5385_v0 }
 0x6e3   : > { %v5356_v39 = vpop.permute.xlu0 %5355 }
 0x6e4   : > { %v5381_v17 = vsel %vm357_vm0, %v9934_v9, %v5356_v39  ;;  %v5424_v4 = vadd.f32 %v5405_v51, %v5404_v25 }
 0x6e5   : > { %v5397_v50 = vmul.f32 %v5389_v46, %v5381_v17 }
 0x6e6   : > { %5425 = vadd.xlane.f32.xlu2 %v5424_v4 }
 0x6e7   : > { %v5412_v31 = vadd.f32 %v5397_v50, %v5396_v53 }
 0x6e9   : > { %5413 = vadd.xlane.f32.xlu1 %v5412_v31 }
 0x6eb   : > { %v5362_v11 = vpop.permute.xlu0 %5361 }
 0x6ec   : > { %v5384_v29 = vsel %vm357_vm0, %v9948_v48, %v5362_v11 }
 0x6ed   : > { %v5403_v54 = vmul.f32 %v5389_v46, %v5384_v29  ;;  %v10055_v46 = vld [vmem:[#allocation3 + $0x162] sm:$0xff] }
 0x6ef   : > { %v5421_v3 = vadd.f32 %v5403_v54, %v5402_v15 }
 0x6f1   : > { %5422 = vadd.xlane.f32.xlu1 %v5421_v3 }
 0x6f5   : > { %5499 = vrot.lane.b32.xlu0 %v5471_v52, %s7169_s10 }
 0x6fd   : > { %5505 = vrot.lane.b32.xlu0 %v10035_v2, %s7169_s10 }
 0x6fe   : > { %5503 = vrot.lane.b32.xlu2 %v10039_v40, %s7169_s10 }
 0x705   : > { %5509 = vrot.lane.b32.xlu0 %v10043_v38, %s7169_s10 }
 0x706   : > { %5511 = vrot.lane.b32.xlu2 %v10047_v63, %s7169_s10 }
 0x70a   : > { %5501 = vrot.lane.b32.xlu1 %v10051_v30, %s7169_s10 }
 0x70d   : > { %5529 = vrot.lane.b32.xlu0 %v10055_v46, %s7169_s10 }
 0x70e   : > { %5531 = vrot.lane.b32.xlu2 %v10059_v47, %s7169_s10 }
 0x712   : > { %5507 = vrot.lane.b32.xlu1 %v10063_v36, %s7169_s10 }
 0x715   : > { %5535 = vrot.lane.b32.xlu0 %v10067_v22, %s7169_s10 }
 0x716   : > { %5537 = vrot.lane.b32.xlu2 %v5490_v49, %s7169_s10 }
 0x71a   : > { %5527 = vrot.lane.b32.xlu1 %v10072_v35, %s7169_s10 }
 0x722   : > { %5533 = vrot.lane.b32.xlu1 %v10076_v60, %s7169_s10 }
 0x72a   : > { %5539 = vrot.lane.b32.xlu1 %v10080_v16, %s7169_s10 }
 0x749   : > { %v5408_v8 = vpop.xlane.xlu2 %5407 }
 0x74a   : > { %v5427_v14 = vadd.f32 %v5408_v8, %v9488_v37  ;;  %v5562_v8 = vld [vmem:[#allocation10 + $0x1] ss:$2 sm:$0x3] }
 0x74c   : > { %v5411_v26 = vpop.xlane.xlu0 %5410 }
 0x74d   : > { %v5428_v5 = vadd.f32 %v5411_v26, %v9488_v37 }
 0x74f   : > { %6910 = vtanh.f32 %v5428_v5 }
 0x750   : > { %6912 = vtanh.f32 %v5427_v14 }
 0x751   : > { %v5417_v34 = vpop.xlane.xlu2 %5416 }
 0x752   : > { %v5430_v19 = vadd.f32 %v5417_v34, %v9488_v37 }
 0x754   : > { %v5420_v58 = vpop.xlane.xlu0 %5419 }
 0x755   : > { %v5431_v55 = vadd.f32 %v5420_v58, %v9488_v37  ;;  %v6911_v0 = vpop.eup %6910  ;;  %v5565_v58 = vperm.slane %v5562_v8, 1 }
 0x756   : > { %v6913_v25 = vpop.eup %6912  ;;  %v5449_v51 = vperm.slane %v6911_v0, %v9508_v24 }
 0x757   : > { %v5448_v53 = vperm.slane %v6913_v25, %v9508_v24 }
 0x759   : > { %v5426_v32 = vpop.xlane.xlu2 %5425  ;;  %v5455_v11 = vsel %vm3686_vm3, %v5449_v51, %v5448_v53 }
 0x75a   : > { %v5433_v23 = vadd.f32 %v5426_v32, %v9488_v37  ;;  %v5564_v32 = vperm.slane %v5562_v8, 0 }
 0x75c   : > { %v5414_v57 = vpop.xlane.xlu1 %5413 }
 0x75d   : > { %v5429_v18 = vadd.f32 %v5414_v57, %v9488_v37 }
 0x75f   : > { %6914 = vtanh.f32 %v5429_v18 }
 0x760   : > { %6916 = vtanh.f32 %v5430_v19 }
 0x761   : > { %v5504_v13 = vpop.permute.xlu2 %5503  ;;  %6918 = vtanh.f32 %v5431_v55 }
 0x762   : > { %6920 = vtanh.f32 %v5433_v23  ;;  %v5550_v18 = vsel %vm357_vm0, %v9846_v43, %v5504_v13 }
 0x763   : > { %v5572_v51 = vmul.f32 %v5564_v32, %v5550_v18 }
 0x764   : > { %v5423_v39 = vpop.xlane.xlu1 %5422 }
 0x765   : > { %v6915_v17 = vpop.eup %6914  ;;  %v5432_v4 = vadd.f32 %v5423_v39, %v9488_v37 }
 0x766   : > { %v5450_v50 = vperm.slane %v6915_v17, %v9508_v24  ;;  %v6917_v31 = vpop.eup %6916 }
 0x767   : > { %6922 = vtanh.f32 %v5432_v4  ;;  %v5500_v62 = vpop.permute.xlu0 %5499  ;;  %v6919_v54 = vpop.eup %6918  ;;  %v5451_v3 = vperm.slane %v6917_v31, %v9508_v24 }
 0x768   : > { %v5456_v29 = vsel %vm3688_vm4, %v5450_v50, %v5455_v11  ;;  %v6921_v52 = vpop.eup %6920  ;;  %v5452_v26 = vperm.slane %v6919_v54, %v9508_v24 }
 0x769   : > { %v10096_v15 = vpop.permute.xlu2 %5511  ;;  %v5457_v49 = vsel %vm3690_vm5, %v5451_v3, %v5456_v29  ;;  %v5454_v14 = vperm.slane %v6921_v52, %v9508_v24 }
 0x76a   : > { %v5458_v57 = vsel %vm3692_vm6, %v5452_v26, %v5457_v49 }
 0x76d   : > { %v6923_v34 = vpop.eup %6922 }
 0x76e   : > { %v5453_v5 = vperm.slane %v6923_v34, %v9508_v24 }
 0x76f   : > { %v5506_v19 = vpop.permute.xlu0 %5505 }
 0x770   : > { %v5459_v55 = vsel %vm3694_vm7, %v5453_v5, %v5458_v57 }
 0x771   : > { %v5460_v0 = vsel %vm3696_vm8, %v5454_v14, %v5459_v55  ;;  %v5532_v23 = vpop.permute.xlu2 %5531 }
 0x772   : > { %6656 = vst.msk [vmem:[%s9556_s14 + $0x50] sm:$0x7f] %vm3699_vm9, %v5460_v0  ;;  %v5557_v25 = vsel %vm357_vm0, %v9875_v10, %v5532_v23 }
 0x773   : > { %v5573_v39 = vmul.f32 %v5565_v58, %v5557_v25 }
 0x775   : > { %v5588_v17 = vadd.f32 %v5573_v39, %v5572_v51 }
 0x777   : > { %v5510_v4 = vpop.permute.xlu0 %5509  ;;  %5589 = vadd.xlane.f32.xlu1 %v5588_v17 }
 0x778   : > { %v5553_v53 = vsel %vm357_vm0, %v9970_v12, %v5510_v4 }
 0x779   : > { %v5538_v50 = vpop.permute.xlu2 %5537  ;;  %v5578_v13 = vmul.f32 %v5564_v32, %v5553_v53 }
 0x77a   : > { %v5560_v43 = vsel %vm357_vm0, %v9887_v41, %v5538_v50 }
 0x77b   : > { %v5579_v31 = vmul.f32 %v5565_v58, %v5560_v43 }
 0x77c   : > { %v5502_v11 = vpop.permute.xlu1 %5501 }
 0x77d   : > { %v5597_v29 = vadd.f32 %v5579_v31, %v5578_v13  ;;  %v5549_v54 = vsel %vm357_vm0, %v9850_v28, %v5502_v11  ;;  %v5548_v28 = vsel %vm357_vm0, %v9842_v33, %v5500_v62 }
 0x77e   : > { %v5570_v52 = vmul.f32 %v5564_v32, %v5549_v54  ;;  %v5568_v0 = vmul.f32 %v5564_v32, %v5548_v28 }
 0x77f   : > { %v5530_v10 = vpop.permute.xlu0 %5529  ;;  %5598 = vadd.xlane.f32.xlu1 %v5597_v29 }
 0x780   : > { %v5556_v3 = vsel %vm357_vm0, %v9871_v59, %v5530_v10 }
 0x781   : > { %v5571_v49 = vmul.f32 %v5565_v58, %v5556_v3 }
 0x783   : > { %v5585_v8 = vadd.f32 %v5571_v49, %v5570_v52 }
 0x784   : > { %v5508_v34 = vpop.permute.xlu1 %5507 }
 0x785   : > { %5586 = vadd.xlane.f32.xlu2 %v5585_v8  ;;  %v5552_v41 = vsel %vm357_vm0, %v9858_v45, %v5508_v34  ;;  %v5551_v45 = vsel %vm357_vm0, %v9854_v61, %v5506_v19 }
 0x786   : > { %v5576_v14 = vmul.f32 %v5564_v32, %v5552_v41  ;;  %v5574_v39 = vmul.f32 %v5564_v32, %v5551_v45  ;;  %v5740_v45 = vld [vmem:[#allocation10 + $0x4] ss:$2 sm:$0x3] }
 0x787   : > { %v5536_v26 = vpop.permute.xlu0 %5535 }
 0x788   : > { %v5559_v5 = vsel %vm357_vm0, %v9883_v6, %v5536_v26 }
 0x789   : > { %v5577_v57 = vmul.f32 %v5565_v58, %v5559_v5 }
 0x78b   : > { %v5594_v18 = vadd.f32 %v5577_v57, %v5576_v14 }
 0x78c   : > { %v5528_v55 = vpop.permute.xlu1 %5527 }
 0x78d   : > { %v5555_v59 = vsel %vm357_vm0, %v9867_v21, %v5528_v55  ;;  %5595 = vadd.xlane.f32.xlu2 %v5594_v18  ;;  %v5554_v21 = vsel %vm357_vm0, %v9863_v42, %v10096_v15  ;;  %v10149_v42 = vld [vmem:[#allocation3 + $0x61] sm:$0xff]  ;;  %v10163_v15 = vld [vmem:[#allocation3 + $0x191] sm:$0xff] }
 0x78e   : > { %v5569_v23 = vmul.f32 %v5565_v58, %v5555_v59  ;;  %v5580_v61 = vmul.f32 %v5564_v32, %v5554_v21  ;;  %v10173_v32 = vld [vmem:[#allocation3 + $0x51] sm:$0xff] }
 0x790   : > { %v5582_v25 = vadd.f32 %v5569_v23, %v5568_v0 }
 0x792   : > { %5583 = vadd.xlane.f32.xlu0 %v5582_v25 }
 0x794   : > { %v5534_v51 = vpop.permute.xlu1 %5533 }
 0x795   : > { %v5558_v6 = vsel %vm357_vm0, %v9879_v7, %v5534_v51 }
 0x796   : > { %v5575_v17 = vmul.f32 %v5565_v58, %v5558_v6 }
 0x798   : > { %5679 = vrot.lane.b32.xlu1 %v9919_v20, %s7169_s10  ;;  %v5591_v33 = vadd.f32 %v5575_v17, %v5574_v39  ;;  %v10143_v20 = vld [vmem:[#allocation3 + $0x31] sm:$0xff]  ;;  %v5641_v39 = vld [vmem:[#allocation3 + $0x200] sm:$0xff] }
 0x79a   : > { %5592 = vadd.xlane.f32.xlu0 %v5591_v33  ;;  %v10199_v33 = vperm.slane %v5740_v45, 1 }
 0x79c   : > { %v5540_v62 = vpop.permute.xlu1 %5539 }
 0x79d   : > { %v5561_v4 = vsel %vm357_vm0, %v9891_v27, %v5540_v62  ;;  %v10153_v27 = vld [vmem:[#allocation3 + $0x1b1] sm:$0xff] }
 0x79e   : > { %v5581_v19 = vmul.f32 %v5565_v58, %v5561_v4  ;;  %v10177_v58 = vld [vmem:[#allocation3 + $0x81] sm:$0xff]  ;;  %v10203_v4 = vperm.slane %v5740_v45, 0 }
 0x7a0   : > { %5687 = vrot.lane.b32.xlu1 %v9948_v48, %s7169_s10  ;;  %v5600_v7 = vadd.f32 %v5581_v19, %v5580_v61  ;;  %v5656_v19 = vld [vmem:[#allocation3 + $0xd0] sm:$0xff] }
 0x7a2   : > { %5601 = vadd.xlane.f32.xlu0 %v5600_v7 }
 0x7a5   : > { %5677 = vrot.lane.b32.xlu2 %v9928_v56, %s7169_s10  ;;  %v10159_v56 = vld [vmem:[#allocation3 + $0x41] sm:$0xff] }
 0x7a8   : > { %5707 = vrot.lane.b32.xlu1 %v10143_v20, %s7169_s10 }
 0x7ad   : > { %5683 = vrot.lane.b32.xlu2 %v9940_v1, %s7169_s10  ;;  %v10167_v1 = vld [vmem:[#allocation3 + $0x71] sm:$0xff] }
 0x7b0   : > { %5713 = vrot.lane.b32.xlu1 %v10149_v42, %s7169_s10 }
 0x7b5   : > { %5689 = vrot.lane.b32.xlu2 %v10153_v27, %s7169_s10 }
 0x7b6   : > { %5681 = vrot.lane.b32.xlu0 %v9934_v9, %s7169_s10 }
 0x7bd   : > { %5709 = vrot.lane.b32.xlu2 %v10159_v56, %s7169_s10 }
 0x7be   : > { %5685 = vrot.lane.b32.xlu0 %v10163_v15, %s7169_s10 }
 0x7c5   : > { %5715 = vrot.lane.b32.xlu2 %v10167_v1, %s7169_s10 }
 0x7c6   : > { %5705 = vrot.lane.b32.xlu0 %v10009_v44, %s7169_s10 }
 0x7ce   : > { %5711 = vrot.lane.b32.xlu0 %v10173_v32, %s7169_s10 }
 0x7d6   : > { %5717 = vrot.lane.b32.xlu0 %v10177_v58, %s7169_s10 }
 0x7ea   : > { %v5590_v53 = vpop.xlane.xlu1 %5589 }
 0x7eb   : > { %v5605_v10 = vadd.f32 %v5590_v53, %v9488_v37 }
 0x7f2   : > { %v5599_v13 = vpop.xlane.xlu1 %5598 }
 0x7f3   : > { %v5608_v5 = vadd.f32 %v5599_v13, %v9488_v37 }
 0x7f8   : > { %v5587_v50 = vpop.xlane.xlu2 %5586 }
 0x7f9   : > { %v5604_v29 = vadd.f32 %v5587_v50, %v9488_v37 }
 0x800   : > { %v5596_v43 = vpop.xlane.xlu2 %5595 }
 0x801   : > { %v5607_v49 = vadd.f32 %v5596_v43, %v9488_v37 }
 0x805   : > { %v5584_v31 = vpop.xlane.xlu0 %5583 }
 0x806   : > { %v5603_v11 = vadd.f32 %v5584_v31, %v9488_v37 }
 0x808   : > { %v10183_v54 = vpop.permute.xlu2 %5677  ;;  %6924 = vtanh.f32 %v5603_v11 }
 0x809   : > { %6926 = vtanh.f32 %v5604_v29 }
 0x80a   : > { %v5680_v3 = vpop.permute.xlu1 %5679  ;;  %6928 = vtanh.f32 %v5605_v10 }
 0x80b   : > { %v5727_v21 = vsel %vm357_vm0, %v5641_v39, %v5680_v3 }
 0x80c   : > { %v5748_v13 = vmul.f32 %v10203_v4, %v5727_v21 }
 0x80d   : > { %v5593_v52 = vpop.xlane.xlu0 %5592 }
 0x80e   : > { %v5606_v8 = vadd.f32 %v5593_v52, %v9488_v37  ;;  %v6925_v34 = vpop.eup %6924 }
 0x80f   : > { %v6927_v26 = vpop.eup %6926  ;;  %v5624_v14 = vperm.slane %v6925_v34, %v9508_v24 }
 0x810   : > { %6930 = vtanh.f32 %v5606_v8  ;;  %v10188_v41 = vpop.permute.xlu2 %5683  ;;  %v6929_v28 = vpop.eup %6928  ;;  %v5625_v18 = vperm.slane %v6927_v26, %v9508_v24  ;;  %v5657_v26 = vld [vmem:[#allocation3 + $0xe0] sm:$0xff] }
 0x811   : > { %6932 = vtanh.f32 %v5607_v49  ;;  %v5626_v25 = vperm.slane %v6929_v28, %v9508_v24 }
 0x812   : > { %v5688_v57 = vpop.permute.xlu1 %5687  ;;  %6934 = vtanh.f32 %v5608_v5  ;;  %v5631_v0 = vsel %vm3686_vm3, %v5625_v18, %v5624_v14  ;;  %v5642_v14 = vld [vmem:[#allocation3 + $0x210] sm:$0xff] }
 0x813   : > { %v5632_v62 = vsel %vm3688_vm4, %v5626_v25, %v5631_v0 }
 0x815   : > { %v5602_v55 = vpop.xlane.xlu0 %5601 }
 0x816   : > { %v6931_v59 = vpop.eup %6930  ;;  %v5609_v23 = vadd.f32 %v5602_v55, %v9488_v37 }
 0x817   : > { %v5627_v51 = vperm.slane %v6931_v59, %v9508_v24  ;;  %v6933_v6 = vpop.eup %6932 }
 0x818   : > { %6936 = vtanh.f32 %v5609_v23  ;;  %v10197_v17 = vpop.permute.xlu2 %5689  ;;  %v6935_v53 = vpop.eup %6934  ;;  %v5628_v50 = vperm.slane %v6933_v6, %v9508_v24  ;;  %v5660_v23 = vld [vmem:[#allocation3 + $0x110] sm:$0xff] }
 0x819   : > { %v5633_v61 = vsel %vm3690_vm5, %v5627_v51, %v5632_v62  ;;  %v5629_v10 = vperm.slane %v6935_v53, %v9508_v24  ;;  %v5645_v51 = vld [vmem:[#allocation3 + $0x240] sm:$0xff] }
 0x81a   : > { %v5708_v7 = vpop.permute.xlu1 %5707  ;;  %v5634_v11 = vsel %vm3692_vm6, %v5628_v50, %v5633_v61  ;;  %v5731_v6 = vsel %vm357_vm0, %v5645_v51, %v5688_v57  ;;  %v5655_v53 = vld [vmem:[#allocation3 + $0xc0] sm:$0xff] }
 0x81b   : > { %v5734_v43 = vsel %vm357_vm0, %v5656_v19, %v5708_v7  ;;  %v5635_v49 = vsel %vm3694_vm7, %v5629_v10, %v5634_v11  ;;  %v5756_v62 = vmul.f32 %v10203_v4, %v5731_v6  ;;  %v7016_v19 = vld [vmem:[#allocation3 + $0x1f0] sm:$0xff]  ;;  %v10242_v51 = vld [vmem:[#allocation3 + $0x201] sm:$0xff] }
 0x81c   : > { %v5749_v31 = vmul.f32 %v10199_v33, %v5734_v43  ;;  %v5726_v7 = vsel %vm357_vm0, %v7016_v19, %v10183_v54  ;;  %v5644_v11 = vld [vmem:[#allocation3 + $0x230] sm:$0xff] }
 0x81d   : > { %v10268_v19 = vld [vmem:[#allocation3 + $0x231] sm:$0xff] }
 0x81e   : > { %v6937_v29 = vpop.eup %6936  ;;  %v5763_v3 = vadd.f32 %v5749_v31, %v5748_v13  ;;  %v5746_v13 = vmul.f32 %v10203_v4, %v5726_v7  ;;  %v10272_v7 = vld [vmem:[#allocation3 + $0x111] sm:$0xff] }
 0x81f   : > { %v5630_v52 = vperm.slane %v6937_v29, %v9508_v24 }
 0x820   : > { %v5710_v8 = vpop.permute.xlu2 %5709  ;;  %5764 = vadd.xlane.f32.xlu2 %v5763_v3  ;;  %v5659_v3 = vld [vmem:[#allocation3 + $0x100] sm:$0xff] }
 0x821   : > { %v5636_v34 = vsel %vm3696_vm8, %v5630_v52, %v5635_v49  ;;  %v5735_v5 = vsel %vm357_vm0, %v5657_v26, %v5710_v8  ;;  %v7017_v52 = vld [vmem:[#allocation3 + $0x220] sm:$0xff] }
 0x822   : > { %6657 = vst.msk [vmem:[%s9556_s14 + $0x58] sm:$0x7f] %vm3699_vm9, %v5636_v34  ;;  %v5751_v55 = vmul.f32 %v10199_v33, %v5735_v5  ;;  %v5714_v57 = vpop.permute.xlu1 %5713  ;;  %v5729_v49 = vsel %vm357_vm0, %v7017_v52, %v10188_v41  ;;  %v5658_v34 = vld [vmem:[#allocation3 + $0xf0] sm:$0xff] }
 0x823   : > { %v5737_v54 = vsel %vm357_vm0, %v5659_v3, %v5714_v57  ;;  %v7018_v41 = vld [vmem:[#allocation3 + $0x250] sm:$0xff] }
 0x828   : > { %v5682_v28 = vpop.permute.xlu0 %5681  ;;  %v5716_v59 = vpop.permute.xlu2 %5715 }
 0x829   : > { %v5728_v18 = vsel %vm357_vm0, %v5642_v14, %v5682_v28  ;;  %v5738_v45 = vsel %vm357_vm0, %v5660_v23, %v5716_v59  ;;  %v5752_v14 = vmul.f32 %v10203_v4, %v5729_v49  ;;  %v5755_v28 = vmul.f32 %v10199_v33, %v5737_v54 }
 0x82a   : > { %v5750_v0 = vmul.f32 %v10203_v4, %v5728_v18  ;;  %v5757_v39 = vmul.f32 %v10199_v33, %v5738_v45  ;;  %v5732_v23 = vsel %vm357_vm0, %v7018_v41, %v10197_v17  ;;  %v10252_v17 = vld [vmem:[#allocation3 + $0x251] sm:$0xff] }
 0x82b   : > { %v5758_v6 = vmul.f32 %v10203_v4, %v5732_v23 }
 0x82c   : > { %v5766_v25 = vadd.f32 %v5751_v55, %v5750_v0  ;;  %v5775_v61 = vadd.f32 %v5757_v39, %v5756_v62  ;;  %v5661_v0 = vld [vmem:[#allocation3 + $0x120] sm:$0xff] }
 0x82d   : > { %v10248_v62 = vld [vmem:[#allocation3 + $0x221] sm:$0xff] }
 0x82e   : > { %5767 = vadd.xlane.f32.xlu0 %v5766_v25 }
 0x830   : > { %v5686_v21 = vpop.permute.xlu0 %5685 }
 0x831   : > { %v5730_v10 = vsel %vm357_vm0, %v5644_v11, %v5686_v21 }
 0x832   : > { %v5754_v8 = vmul.f32 %v10203_v4, %v5730_v10  ;;  %v10264_v4 = vld [vmem:[#allocation3 + $0x211] sm:$0xff] }
 0x834   : > { %v5772_v59 = vadd.f32 %v5755_v28, %v5754_v8 }
 0x836   : > { %5776 = vadd.xlane.f32.xlu0 %v5775_v61  ;;  %v10256_v61 = vld [vmem:[#allocation3 + $0x1f1] sm:$0xff] }
 0x838   : > { %v5706_v50 = vpop.permute.xlu0 %5705 }
 0x839   : > { %v5733_v43 = vsel %vm357_vm0, %v5655_v53, %v5706_v50  ;;  %v10276_v53 = vld [vmem:[#allocation3 + $0x241] sm:$0xff] }
 0x83a   : > { %v5747_v31 = vmul.f32 %v10199_v33, %v5733_v43  ;;  %v10280_v50 = vld [vmem:[#allocation3 + $0xc1] sm:$0xff]  ;;  %v10284_v43 = vld [vmem:[#allocation3 + $0xd1] sm:$0xff] }
 0x83c   : > { %v5760_v29 = vadd.f32 %v5747_v31, %v5746_v13  ;;  %v10288_v13 = vld [vmem:[#allocation3 + $0xf1] sm:$0xff]  ;;  %v10292_v31 = vld [vmem:[#allocation3 + $0x121] sm:$0xff] }
 0x83e   : > { %5761 = vadd.xlane.f32.xlu1 %v5760_v29 }
 0x840   : > { %v5712_v26 = vpop.permute.xlu0 %5711 }
 0x841   : > { %v5736_v5 = vsel %vm357_vm0, %v5658_v34, %v5712_v26 }
 0x842   : > { %v5753_v18 = vmul.f32 %v10199_v33, %v5736_v5 }
 0x844   : > { %v5769_v55 = vadd.f32 %v5753_v18, %v5752_v14 }
 0x846   : > { %5770 = vadd.xlane.f32.xlu2 %v5769_v55  ;;  %5773 = vadd.xlane.f32.xlu1 %v5772_v59 }
 0x848   : > { %v5718_v25 = vpop.permute.xlu0 %5717 }
 0x849   : > { %v5739_v45 = vsel %vm357_vm0, %v5661_v0, %v5718_v25 }
 0x84a   : > { %v5759_v39 = vmul.f32 %v10199_v33, %v5739_v45  ;;  %5855 = vrot.lane.b32.xlu0 %v10242_v51, %s7169_s10  ;;  %v10260_v33 = vld [vmem:[#allocation3 + $0xe1] sm:$0xff] }
 0x84c   : > { %v5778_v21 = vadd.f32 %v5759_v39, %v5758_v6 }
 0x84e   : > { %5779 = vadd.xlane.f32.xlu2 %v5778_v21 }
 0x852   : > { %5859 = vrot.lane.b32.xlu0 %v10248_v62, %s7169_s10 }
 0x85a   : > { %5865 = vrot.lane.b32.xlu0 %v10252_v17, %s7169_s10 }
 0x85f   : > { %5853 = vrot.lane.b32.xlu1 %v10256_v61, %s7169_s10 }
 0x862   : > { %5885 = vrot.lane.b32.xlu0 %v10260_v33, %s7169_s10 }
 0x866   : > { %5857 = vrot.lane.b32.xlu2 %v10264_v4, %s7169_s10 }
 0x867   : > { %5861 = vrot.lane.b32.xlu1 %v10268_v19, %s7169_s10 }
 0x86a   : > { %5891 = vrot.lane.b32.xlu0 %v10272_v7, %s7169_s10 }
 0x86e   : > { %5863 = vrot.lane.b32.xlu2 %v10276_v53, %s7169_s10 }
 0x86f   : > { %5881 = vrot.lane.b32.xlu1 %v10280_v50, %s7169_s10 }
 0x876   : > { %5883 = vrot.lane.b32.xlu2 %v10284_v43, %s7169_s10 }
 0x877   : > { %5887 = vrot.lane.b32.xlu1 %v10288_v13, %s7169_s10 }
 0x87e   : > { %5889 = vrot.lane.b32.xlu2 %v9970_v12, %s7169_s10 }
 0x87f   : > { %5893 = vrot.lane.b32.xlu1 %v10292_v31, %s7169_s10 }
 0x893   : > { %v5765_v11 = vpop.xlane.xlu2 %5764 }
 0x894   : > { %v5782_v3 = vadd.f32 %v5765_v11, %v9488_v37 }
 0x8a1   : > { %v5768_v57 = vpop.xlane.xlu0 %5767 }
 0x8a2   : > { %v5783_v49 = vadd.f32 %v5768_v57, %v9488_v37 }
 0x8a9   : > { %v5777_v52 = vpop.xlane.xlu0 %5776 }
 0x8aa   : > { %v5786_v28 = vadd.f32 %v5777_v52, %v9488_v37 }
 0x8b1   : > { %v5762_v29 = vpop.xlane.xlu1 %5761 }
 0x8b2   : > { %v5781_v10 = vadd.f32 %v5762_v29, %v9488_v37 }
 0x8b4   : > { %6938 = vtanh.f32 %v5781_v10 }
 0x8b5   : > { %6940 = vtanh.f32 %v5782_v3 }
 0x8b6   : > { %6942 = vtanh.f32 %v5783_v49 }
 0x8b9   : > { %v5771_v54 = vpop.xlane.xlu2 %5770  ;;  %v5774_v8 = vpop.xlane.xlu1 %5773 }
 0x8ba   : > { %v5784_v12 = vadd.f32 %v5771_v54, %v9488_v37  ;;  %v5785_v34 = vadd.f32 %v5774_v8, %v9488_v37  ;;  %v6939_v26 = vpop.eup %6938 }
 0x8bb   : > { %v6941_v14 = vpop.eup %6940  ;;  %v5802_v18 = vperm.slane %v6939_v26, %v9508_v24 }
 0x8bc   : > { %6944 = vtanh.f32 %v5784_v12  ;;  %v5856_v5 = vpop.permute.xlu0 %5855  ;;  %v6943_v55 = vpop.eup %6942  ;;  %v5803_v59 = vperm.slane %v6941_v14, %v9508_v24  ;;  %v5916_v14 = vld [vmem:[#allocation10 + $0x5] ss:$2 sm:$0x3] }
 0x8bd   : > { %6946 = vtanh.f32 %v5785_v34  ;;  %v5804_v6 = vperm.slane %v6943_v55, %v9508_v24  ;;  %v5919_v55 = vperm.slane %v5916_v14, 1 }
 0x8be   : > { %6948 = vtanh.f32 %v5786_v28  ;;  %v5809_v23 = vsel %vm3686_vm3, %v5803_v59, %v5802_v18 }
 0x8bf   : > { %v5810_v57 = vsel %vm3688_vm4, %v5804_v6, %v5809_v23  ;;  %v10324_v6 = vld [vmem:[#allocation3 + $0x161] sm:$0xff] }
 0x8c1   : > { %v5780_v0 = vpop.xlane.xlu2 %5779 }
 0x8c2   : > { %v6945_v41 = vpop.eup %6944  ;;  %v5787_v25 = vadd.f32 %v5780_v0, %v9488_v37  ;;  %v5918_v0 = vperm.slane %v5916_v14, 0 }
 0x8c3   : > { %v6947_v45 = vpop.eup %6946  ;;  %v5805_v39 = vperm.slane %v6945_v41, %v9508_v24 }
 0x8c4   : > { %6950 = vtanh.f32 %v5787_v25  ;;  %v5860_v21 = vpop.permute.xlu0 %5859  ;;  %v5806_v11 = vperm.slane %v6947_v45, %v9508_v24  ;;  %v6949_v10 = vpop.eup %6948 }
 0x8c5   : > { %v5811_v29 = vsel %vm3690_vm5, %v5805_v39, %v5810_v57  ;;  %v5807_v54 = vperm.slane %v6949_v10, %v9508_v24  ;;  %v5903_v39 = vsel %vm357_vm0, %v10324_v6, %v5856_v5  ;;  %v10334_v5 = vld [vmem:[#allocation3 + $0x151] sm:$0xff] }
 0x8c6   : > { %v5812_v3 = vsel %vm3692_vm6, %v5806_v11, %v5811_v29 }
 0x8c7   : > { %v5813_v12 = vsel %vm3694_vm7, %v5807_v54, %v5812_v3 }
 0x8c9   : > { %v5858_v52 = vpop.permute.xlu2 %5857 }
 0x8ca   : > { %v6951_v49 = vpop.eup %6950  ;;  %v5904_v59 = vsel %vm357_vm0, %v9934_v9, %v5858_v52  ;;  %v5924_v9 = vmul.f32 %v5918_v0, %v5903_v39 }
 0x8cb   : > { %v5808_v8 = vperm.slane %v6951_v49, %v9508_v24  ;;  %v5926_v25 = vmul.f32 %v5918_v0, %v5904_v59 }
 0x8cc   : > { %v5866_v34 = vpop.permute.xlu0 %5865 }
 0x8cd   : > { %v5814_v26 = vsel %vm3696_vm8, %v5808_v8, %v5813_v12 }
 0x8ce   : > { %6658 = vst.msk [vmem:[%s9556_s14 + $0x60] sm:$0x7f] %vm3699_vm9, %v5814_v26 }
 0x8d1   : > { %v5864_v28 = vpop.permute.xlu2 %5863  ;;  %v5854_v18 = vpop.permute.xlu1 %5853 }
 0x8d2   : > { %v5907_v3 = vsel %vm357_vm0, %v9948_v48, %v5864_v28  ;;  %v5902_v14 = vsel %vm357_vm0, %v10334_v5, %v5854_v18  ;;  %v7019_v18 = vld [vmem:[#allocation3 + $0x181] sm:$0xff] }
 0x8d3   : > { %v5932_v12 = vmul.f32 %v5918_v0, %v5907_v3 }
 0x8d4   : > { %v5886_v41 = vpop.permute.xlu0 %5885 }
 0x8d5   : > { %v5911_v23 = vsel %vm357_vm0, %v10159_v56, %v5886_v41 }
 0x8d6   : > { %v5927_v45 = vmul.f32 %v5919_v55, %v5911_v23 }
 0x8d8   : > { %v5942_v57 = vadd.f32 %v5927_v45, %v5926_v25  ;;  %v5922_v45 = vmul.f32 %v5918_v0, %v5902_v14 }
 0x8d9   : > { %v5884_v11 = vpop.permute.xlu2 %5883  ;;  %v5862_v29 = vpop.permute.xlu1 %5861 }
 0x8da   : > { %v5910_v10 = vsel %vm357_vm0, %v10143_v20, %v5884_v11  ;;  %5943 = vadd.xlane.f32.xlu1 %v5942_v57  ;;  %v5906_v59 = vsel %vm357_vm0, %v10163_v15, %v5862_v29  ;;  %v5905_v29 = vsel %vm357_vm0, %v7019_v18, %v5860_v21  ;;  %v10371_v21 = vld [vmem:[#allocation3 + $0x101] sm:$0xff] }
 0x8db   : > { %v5925_v52 = vmul.f32 %v5919_v55, %v5910_v10  ;;  %v5930_v39 = vmul.f32 %v5918_v0, %v5906_v59 }
 0x8dc   : > { %v5892_v49 = vpop.permute.xlu0 %5891 }
 0x8dd   : > { %v5914_v54 = vsel %vm357_vm0, %v10167_v1, %v5892_v49  ;;  %v5939_v8 = vadd.f32 %v5925_v52, %v5924_v9  ;;  %v5928_v49 = vmul.f32 %v5918_v0, %v5905_v29 }
 0x8de   : > { %v5933_v26 = vmul.f32 %v5919_v55, %v5914_v54 }
 0x8df   : > { %5940 = vadd.xlane.f32.xlu0 %v5939_v8 }
 0x8e0   : > { %v5951_v41 = vadd.f32 %v5933_v26, %v5932_v12 }
 0x8e1   : > { %v5890_v23 = vpop.permute.xlu2 %5889  ;;  %v5882_v48 = vpop.permute.xlu1 %5881 }
 0x8e2   : > { %v5913_v28 = vsel %vm357_vm0, %v10149_v42, %v5890_v23  ;;  %v5909_v25 = vsel %vm357_vm0, %v10009_v44, %v5882_v48  ;;  %5952 = vadd.xlane.f32.xlu1 %v5951_v41  ;;  %v5908_v44 = vsel %vm357_vm0, %v10153_v27, %v5866_v34 }
 0x8e3   : > { %v5931_v57 = vmul.f32 %v5919_v55, %v5913_v28  ;;  %v5923_v11 = vmul.f32 %v5919_v55, %v5909_v25  ;;  %v5934_v14 = vmul.f32 %v5918_v0, %v5908_v44  ;;  %v6092_v44 = vld [vmem:[#allocation10 + $0x4] ss:$2 sm:$0x3] }
 0x8e5   : > { %v5948_v10 = vadd.f32 %v5931_v57, %v5930_v39  ;;  %v5936_v9 = vadd.f32 %v5923_v11, %v5922_v45 }
 0x8e7   : > { %5949 = vadd.xlane.f32.xlu0 %v5948_v10  ;;  %5937 = vadd.xlane.f32.xlu2 %v5936_v9 }
 0x8e9   : > { %v5888_v3 = vpop.permute.xlu1 %5887 }
 0x8ea   : > { %v5912_v52 = vsel %vm357_vm0, %v10173_v32, %v5888_v3 }
 0x8eb   : > { %v5929_v54 = vmul.f32 %v5919_v55, %v5912_v52 }
 0x8ed   : > { %v5945_v8 = vadd.f32 %v5929_v54, %v5928_v49 }
 0x8ef   : > { %5946 = vadd.xlane.f32.xlu2 %v5945_v8 }
 0x8f1   : > { %v5894_v12 = vpop.permute.xlu1 %5893 }
 0x8f2   : > { %v5915_v26 = vsel %vm357_vm0, %v10177_v58, %v5894_v12 }
 0x8f3   : > { %v5935_v59 = vmul.f32 %v5919_v55, %v5915_v26 }
 0x8f5   : > { %v5954_v41 = vadd.f32 %v5935_v59, %v5934_v14 }
 0x8f7   : > { %5955 = vadd.xlane.f32.xlu2 %v5954_v41 }
 0x8fb   : > { %6031 = vrot.lane.b32.xlu1 %v10242_v51, %s7169_s10  ;;  %6029 = vrot.lane.b32.xlu0 %v10256_v61, %s7169_s10 }
 0x903   : > { %6037 = vrot.lane.b32.xlu1 %v10268_v19, %s7169_s10  ;;  %6035 = vrot.lane.b32.xlu0 %v10248_v62, %s7169_s10 }
 0x90b   : > { %6057 = vrot.lane.b32.xlu1 %v10280_v50, %s7169_s10  ;;  %6039 = vrot.lane.b32.xlu0 %v10276_v53, %s7169_s10 }
 0x90f   : > { %6033 = vrot.lane.b32.xlu2 %v10264_v4, %s7169_s10 }
 0x913   : > { %6063 = vrot.lane.b32.xlu1 %v10288_v13, %s7169_s10  ;;  %6059 = vrot.lane.b32.xlu0 %v10284_v43, %s7169_s10 }
 0x917   : > { %6041 = vrot.lane.b32.xlu2 %v10252_v17, %s7169_s10 }
 0x91b   : > { %6069 = vrot.lane.b32.xlu1 %v10292_v31, %s7169_s10  ;;  %6065 = vrot.lane.b32.xlu0 %v10371_v21, %s7169_s10 }
 0x91f   : > { %6061 = vrot.lane.b32.xlu2 %v10260_v33, %s7169_s10 }
 0x923   : > { %6207 = vrot.lane.b32.xlu1 %v10055_v46, %s7169_s10 }
 0x927   : > { %6067 = vrot.lane.b32.xlu2 %v10272_v7, %s7169_s10 }
 0x92b   : > { %6235 = vrot.lane.b32.xlu1 %v10039_v40, %s7169_s10 }
 0x92f   : > { %6205 = vrot.lane.b32.xlu2 %v10072_v35, %s7169_s10 }
 0x933   : > { %6237 = vrot.lane.b32.xlu1 %v10035_v2, %s7169_s10 }
 0x937   : > { %6233 = vrot.lane.b32.xlu2 %v10051_v30, %s7169_s10 }
 0x93b   : > { %6239 = vrot.lane.b32.xlu1 %v10063_v36, %s7169_s10 }
 0x93f   : > { %6209 = vrot.lane.b32.xlu2 %v10059_v47, %s7169_s10 }
 0x943   : > { %6241 = vrot.lane.b32.xlu1 %v10043_v38, %s7169_s10  ;;  %v6197_v38 = vld [vmem:[#allocation3 + $0x82] sm:$0xff] }
 0x947   : > { %6211 = vrot.lane.b32.xlu2 %v10076_v60, %s7169_s10 }
 0x94b   : > { %6217 = vrot.lane.b32.xlu1 %v10080_v16, %s7169_s10 }
 0x94d   : > { %v5944_v40 = vpop.xlane.xlu1 %5943 }
 0x94e   : > { %v5959_v36 = vadd.f32 %v5944_v40, %v9488_v37  ;;  %v5997_v40 = vld [vmem:[#allocation3 + $0x181] sm:$0xff] }
 0x94f   : > { %6213 = vrot.lane.b32.xlu2 %v10067_v22, %s7169_s10 }
 0x952   : > { %v5941_v2 = vpop.xlane.xlu0 %5940 }
 0x953   : > { %v5958_v47 = vadd.f32 %v5941_v2, %v9488_v37  ;;  %v10425_v2 = vperm.slane %v6092_v44, 0 }
 0x955   : > { %v5953_v22 = vpop.xlane.xlu1 %5952 }
 0x956   : > { %v5962_v0 = vadd.f32 %v5953_v22, %v9488_v37  ;;  %v10436_v22 = vperm.slane %v6092_v44, 1 }
 0x957   : > { %6243 = vrot.lane.b32.xlu2 %v10047_v63, %s7169_s10 }
 0x95a   : > { %v5938_v30 = vpop.xlane.xlu2 %5937  ;;  %v5950_v35 = vpop.xlane.xlu0 %5949 }
 0x95b   : > { %v5957_v46 = vadd.f32 %v5938_v30, %v9488_v37  ;;  %v5961_v16 = vadd.f32 %v5950_v35, %v9488_v37 }
 0x95d   : > { %6952 = vtanh.f32 %v5957_v46 }
 0x95e   : > { %6954 = vtanh.f32 %v5958_v47 }
 0x95f   : > { %6245 = vrot.lane.b32.xlu2 %v6197_v38, %s7169_s10  ;;  %6956 = vtanh.f32 %v5959_v36 }
 0x962   : > { %v5947_v60 = vpop.xlane.xlu2 %5946 }
 0x963   : > { %v5960_v63 = vadd.f32 %v5947_v60, %v9488_v37  ;;  %v6953_v34 = vpop.eup %6952 }
 0x964   : > { %v6955_v55 = vpop.eup %6954  ;;  %v5978_v23 = vperm.slane %v6953_v34, %v9508_v24 }
 0x965   : > { %6958 = vtanh.f32 %v5960_v63  ;;  %v6957_v48 = vpop.eup %6956  ;;  %v5979_v28 = vperm.slane %v6955_v55, %v9508_v24  ;;  %v6008_v55 = vld [vmem:[#allocation3 + $0x21] sm:$0xff] }
 0x966   : > { %6960 = vtanh.f32 %v5961_v16  ;;  %v5980_v11 = vperm.slane %v6957_v48, %v9508_v24 }
 0x967   : > { %6962 = vtanh.f32 %v5962_v0  ;;  %v5985_v39 = vsel %vm3686_vm3, %v5979_v28, %v5978_v23 }
 0x968   : > { %v5986_v3 = vsel %vm3688_vm4, %v5980_v11, %v5985_v39 }
 0x96a   : > { %v5956_v25 = vpop.xlane.xlu2 %5955 }
 0x96b   : > { %v6959_v45 = vpop.eup %6958  ;;  %v5963_v57 = vadd.f32 %v5956_v25, %v9488_v37 }
 0x96c   : > { %v5981_v10 = vperm.slane %v6959_v45, %v9508_v24  ;;  %v6961_v9 = vpop.eup %6960 }
 0x96d   : > { %6964 = vtanh.f32 %v5963_v57  ;;  %v6030_v18 = vpop.permute.xlu0 %6029  ;;  %v6032_v29 = vpop.permute.xlu1 %6031  ;;  %v5982_v54 = vperm.slane %v6961_v9, %v9508_v24 }
 0x96e   : > { %v5987_v52 = vsel %vm3690_vm5, %v5981_v10, %v5986_v3  ;;  %v6963_v49 = vpop.eup %6962  ;;  %v6078_v16 = vsel %vm357_vm0, %v10334_v5, %v6030_v18 }
 0x96f   : > { %v5988_v8 = vsel %vm3692_vm6, %v5982_v54, %v5987_v52  ;;  %v5983_v14 = vperm.slane %v6963_v49, %v9508_v24  ;;  %v6098_v48 = vmul.f32 %v10425_v2, %v6078_v16  ;;  %v5996_v49 = vld [vmem:[#allocation3 + $0x171] sm:$0xff] }
 0x971   : > { %v5989_v41 = vsel %vm3694_vm7, %v5983_v14, %v5988_v8 }
 0x972   : > { %v6034_v12 = vpop.permute.xlu2 %6033 }
 0x973   : > { %v6965_v26 = vpop.eup %6964 }
 0x974   : > { %v5984_v59 = vperm.slane %v6965_v26, %v9508_v24 }
 0x975   : > { %v6036_v30 = vpop.permute.xlu0 %6035  ;;  %v10427_v46 = vpop.permute.xlu1 %6037 }
 0x976   : > { %v5990_v47 = vsel %vm3696_vm8, %v5984_v59, %v5989_v41  ;;  %v6081_v38 = vsel %vm357_vm0, %v5997_v40, %v6036_v30  ;;  %v6182_v30 = vld [vmem:[#allocation3 + $0x1a2] sm:$0xff] }
 0x977   : > { %6659 = vst.msk [vmem:[%s9556_s14 + $0x68] sm:$0x7f] %vm3699_vm9, %v5990_v47  ;;  %v6104_v36 = vmul.f32 %v10425_v2, %v6081_v38 }
 0x97a   : > { %v6042_v35 = vpop.permute.xlu2 %6041 }
 0x97b   : > { %v6084_v60 = vsel %vm357_vm0, %v10153_v27, %v6042_v35  ;;  %v6079_v27 = vsel %vm357_vm0, %v10324_v6, %v6032_v29 }
 0x97c   : > { %v6110_v63 = vmul.f32 %v10425_v2, %v6084_v60  ;;  %v6100_v10 = vmul.f32 %v10425_v2, %v6079_v27 }
 0x97d   : > { %v10441_v34 = vpop.permute.xlu0 %6039  ;;  %v6058_v0 = vpop.permute.xlu1 %6057 }
 0x97e   : > { %v6085_v23 = vsel %vm357_vm0, %v6008_v55, %v6058_v0 }
 0x97f   : > { %v6099_v28 = vmul.f32 %v10436_v22, %v6085_v23 }
 0x981   : > { %v6112_v25 = vadd.f32 %v6099_v28, %v6098_v48 }
 0x982   : > { %v6062_v45 = vpop.permute.xlu2 %6061 }
 0x983   : > { %6113 = vadd.xlane.f32.xlu0 %v6112_v25  ;;  %v6087_v6 = vsel %vm357_vm0, %v10159_v56, %v6062_v45  ;;  %v6268_v56 = vld [vmem:[#allocation10 + $0x5] ss:$2 sm:$0x3] }
 0x984   : > { %v6103_v54 = vmul.f32 %v10436_v22, %v6087_v6  ;;  %v6271_v47 = vperm.slane %v6268_v56, 1 }
 0x985   : > { %v6060_v39 = vpop.permute.xlu0 %6059  ;;  %v6064_v5 = vpop.permute.xlu1 %6063 }
 0x986   : > { %v6086_v57 = vsel %vm357_vm0, %v10143_v20, %v6060_v39  ;;  %v6088_v11 = vsel %vm357_vm0, %v10173_v32, %v6064_v5  ;;  %v6080_v20 = vsel %vm357_vm0, %v5996_v49, %v6034_v12  ;;  %v10468_v12 = vperm.slane %v6268_v56, 0 }
 0x987   : > { %v6101_v9 = vmul.f32 %v10436_v22, %v6086_v57  ;;  %v6105_v18 = vmul.f32 %v10436_v22, %v6088_v11  ;;  %v6102_v44 = vmul.f32 %v10425_v2, %v6080_v20  ;;  %v6082_v39 = vsel %vm357_vm0, %v10163_v15, %v10427_v46  ;;  %v5999_v46 = vld [vmem:[#allocation3 + $0x1a1] sm:$0xff] }
 0x988   : > { %v6106_v11 = vmul.f32 %v10425_v2, %v6082_v39 }
 0x989   : > { %v6115_v3 = vadd.f32 %v6101_v9, %v6100_v10  ;;  %v10455_v52 = vadd.f32 %v6105_v18, %v6104_v36  ;;  %v6118_v14 = vadd.f32 %v6103_v54, %v6102_v44 }
 0x98a   : > { %v6068_v29 = vpop.permute.xlu2 %6067 }
 0x98b   : > { %6116 = vadd.xlane.f32.xlu1 %v6115_v3  ;;  %v6090_v3 = vsel %vm357_vm0, %v10167_v1, %v6068_v29 }
 0x98c   : > { %v6109_v6 = vmul.f32 %v10436_v22, %v6090_v3 }
 0x98d   : > { %v6070_v32 = vpop.permute.xlu1 %6069  ;;  %v6066_v28 = vpop.permute.xlu0 %6065 }
 0x98e   : > { %v6091_v8 = vsel %vm357_vm0, %v10177_v58, %v6070_v32 }
 0x98f   : > { %v6111_v26 = vmul.f32 %v10436_v22, %v6091_v8 }
 0x991   : > { %v10465_v59 = vadd.f32 %v6111_v26, %v6110_v63 }
 0x992   : > { %v6206_v41 = vpop.permute.xlu2 %6205 }
 0x993   : > { %6119 = vadd.xlane.f32.xlu1 %v6118_v14  ;;  %v6254_v58 = vsel %vm357_vm0, %v10256_v61, %v6206_v41 }
 0x994   : > { %v6274_v35 = vmul.f32 %v10468_v12, %v6254_v58 }
 0x995   : > { %v6208_v40 = vpop.permute.xlu1 %6207 }
 0x996   : > { %v6255_v32 = vsel %vm357_vm0, %v10242_v51, %v6208_v40 }
 0x997   : > { %6215 = vrot.lane.b32.xlu0 %v6182_v30, %s7169_s10 }
 0x99a   : > { %v6234_v38 = vpop.permute.xlu2 %6233 }
 0x99b   : > { %v6261_v36 = vsel %vm357_vm0, %v10280_v50, %v6234_v38  ;;  %v6089_v50 = vsel %vm357_vm0, %v10149_v42, %v6066_v28  ;;  %v3272_v38 = vld [vmem:[#allocation2 + $0x92] sm:$0xff] }
 0x99c   : > { %v6275_v60 = vmul.f32 %v6271_v47, %v6261_v36  ;;  %v6107_v5 = vmul.f32 %v10436_v22, %v6089_v50 }
 0x99d   : > { %v6236_v16 = vpop.permute.xlu1 %6235 }
 0x99e   : > { %v6288_v63 = vadd.f32 %v6275_v60, %v6274_v35  ;;  %v6124_v9 = vadd.f32 %v6107_v5, %v6106_v11  ;;  %v6262_v20 = vsel %vm357_vm0, %v10284_v43, %v6236_v16 }
 0x99f   : > { %v6277_v29 = vmul.f32 %v6271_v47, %v6262_v20 }
 0x9a0   : > { %6289 = vadd.xlane.f32.xlu2 %v6288_v63 }
 0x9a2   : > { %v6210_v55 = vpop.permute.xlu2 %6209 }
 0x9a3   : > { %v6256_v0 = vsel %vm357_vm0, %v10264_v4, %v6210_v55 }
 0x9a4   : > { %v6278_v61 = vmul.f32 %v10468_v12, %v6256_v0 }
 0x9a5   : > { %v6238_v23 = vpop.permute.xlu1 %6237 }
 0x9a6   : > { %v6263_v48 = vsel %vm357_vm0, %v10260_v33, %v6238_v23 }
 0x9a7   : > { %v6279_v25 = vmul.f32 %v6271_v47, %v6263_v48 }
 0x9a9   : > { %v6294_v45 = vadd.f32 %v6279_v25, %v6278_v61 }
 0x9aa   : > { %v6212_v27 = vpop.permute.xlu2 %6211 }
 0x9ab   : > { %6295 = vadd.xlane.f32.xlu2 %v6294_v45  ;;  %v6257_v4 = vsel %vm357_vm0, %v10248_v62, %v6212_v27  ;;  %v6083_v62 = vsel %vm357_vm0, %v5999_v46, %v10441_v34  ;;  %v6276_v34 = vmul.f32 %v10468_v12, %v6255_v32 }
 0x9ac   : > { %v6280_v10 = vmul.f32 %v10468_v12, %v6257_v4  ;;  %v6108_v49 = vmul.f32 %v10425_v2, %v6083_v62 }
 0x9ad   : > { %v6240_v33 = vpop.permute.xlu1 %6239  ;;  %v6291_v26 = vadd.f32 %v6277_v29, %v6276_v34 }
 0x9ae   : > { %v6264_v57 = vsel %vm357_vm0, %v10288_v13, %v6240_v33  ;;  %v6127_v54 = vadd.f32 %v6109_v6, %v6108_v49 }
 0x9af   : > { %v6281_v42 = vmul.f32 %v6271_v47, %v6264_v57 }
 0x9b1   : > { %v6297_v18 = vadd.f32 %v6281_v42, %v6280_v10 }
 0x9b2   : > { %v6214_v15 = vpop.permute.xlu2 %6213 }
 0x9b3   : > { %6125 = vadd.xlane.f32.xlu2 %v6124_v9  ;;  %6298 = vadd.xlane.f32.xlu1 %v6297_v18  ;;  %v6258_v40 = vsel %vm357_vm0, %v10268_v19, %v6214_v15 }
 0x9b5   : > { %v6242_v13 = vpop.permute.xlu1 %6241 }
 0x9ba   : > { %v6244_v1 = vpop.permute.xlu2 %6243 }
 0x9bb   : > { %v6266_v8 = vsel %vm357_vm0, %v10272_v7, %v6244_v1  ;;  %6128 = vadd.xlane.f32.xlu1 %v6127_v54  ;;  %v6265_v7 = vsel %vm357_vm0, %v10371_v21, %v6242_v13 }
 0x9bc   : > { %v6285_v44 = vmul.f32 %v6271_v47, %v6266_v8  ;;  %v6283_v30 = vmul.f32 %v6271_v47, %v6265_v7 }
 0x9bd   : > { %v6218_v22 = vpop.permute.xlu1 %6217 }
 0x9be   : > { %v6260_v2 = vsel %vm357_vm0, %v10252_v17, %v6218_v22  ;;  %v6282_v17 = vmul.f32 %v10468_v12, %v6258_v40 }
 0x9bf   : > { %v6286_v51 = vmul.f32 %v10468_v12, %v6260_v2 }
 0x9c0   : > { %v6300_v58 = vadd.f32 %v6283_v30, %v6282_v17 }
 0x9c1   : > { %6292 = vadd.xlane.f32.xlu0 %v6291_v26 }
 0x9c2   : > { %v6246_v43 = vpop.permute.xlu2 %6245 }
 0x9c3   : > { %v6267_v14 = vsel %vm357_vm0, %v10292_v31, %v6246_v43  ;;  %v3264_v31 = vld [vmem:[#allocation2 + $0x91] sm:$0xff] }
 0x9c4   : > { %v6287_v41 = vmul.f32 %v6271_v47, %v6267_v14  ;;  %3455 = vmatmul.f32.gmra.mxu3 %v3264_v31 }
 0x9c6   : > { %v6306_v56 = vadd.f32 %v6287_v41, %v6286_v51 }
 0x9c8   : > { %6307 = vadd.xlane.f32.xlu1 %v6306_v56 }
 0x9c9   : > { %6122 = vadd.xlane.f32.xlu0 %v10455_v52 }
 0x9cc   : > { %3495 = vmatmul.f32.vlgmr.msra.gmra.mxu3 %v3272_v38 }
 0x9d1   : > { %6301 = vadd.xlane.f32.xlu0 %v6300_v58 }
 0x9d9   : > { %6131 = vadd.xlane.f32.xlu0 %v10465_v59 }
 0x9f6   : > { %v6114_v36 = vpop.xlane.xlu0 %6113 }
 0x9fe   : > { %v6117_v19 = vpop.xlane.xlu1 %6116 }
 0xa06   : > { %v6120_v63 = vpop.xlane.xlu1 %6119 }
 0xa07   : > { %v6135_v50 = vadd.f32 %v6120_v63, %v9488_v37 }
 0xa09   : > { %v6216_v35 = vpop.permute.xlu0 %6215 }
 0xa0a   : > { %v6259_v21 = vsel %vm357_vm0, %v10276_v53, %v6216_v35  ;;  %v6133_v53 = vadd.f32 %v6114_v36, %v9488_v37 }
 0xa0b   : > { %v6284_v52 = vmul.f32 %v10468_v12, %v6259_v21  ;;  %v6134_v12 = vadd.f32 %v6117_v19, %v9488_v37 }
 0xa0d   : > { %v6303_v60 = vadd.f32 %v6285_v44, %v6284_v52 }
 0xa0f   : > { %6304 = vadd.xlane.f32.xlu2 %v6303_v60 }
 0xa13   : > { %v6290_v47 = vpop.xlane.xlu2 %6289 }
 0xa14   : > { %v6309_v16 = vadd.f32 %v6290_v47, %v9488_v37 }
 0xa16   : > { %6966 = vtanh.f32 %v6309_v16 }
 0xa1c   : > { %v6967_v23 = vpop.eup %6966 }
 0xa1d   : > { %v6330_v25 = vperm.slane %v6967_v23, %v9508_v24 }
 0xa1e   : > { %v6296_v0 = vpop.xlane.xlu2 %6295 }
 0xa1f   : > { %v6311_v51 = vadd.f32 %v6296_v0, %v9488_v37 }
 0xa26   : > { %v6299_v48 = vpop.xlane.xlu1 %6298  ;;  %v6126_v4 = vpop.xlane.xlu2 %6125 }
 0xa27   : > { %v6137_v33 = vadd.f32 %v6126_v4, %v9488_v37  ;;  %v6312_v56 = vadd.f32 %v6299_v48, %v9488_v37 }
 0xa2e   : > { %v6129_v57 = vpop.xlane.xlu1 %6128 }
 0xa2f   : > { %v6138_v42 = vadd.f32 %v6129_v57, %v9488_v37 }
 0xa34   : > { %v6293_v55 = vpop.xlane.xlu0 %6292 }
 0xa35   : > { %v6310_v59 = vadd.f32 %v6293_v55, %v9488_v37 }
 0xa37   : > { %6968 = vtanh.f32 %v6310_v59 }
 0xa38   : > { %6970 = vtanh.f32 %v6133_v53 }
 0xa39   : > { %6972 = vtanh.f32 %v6134_v12 }
 0xa3a   : > { %6974 = vtanh.f32 %v6135_v50 }
 0xa3b   : > { %v6308_v7 = vpop.xlane.xlu1 %6307 }
 0xa3c   : > { %v6123_v28 = vpop.xlane.xlu0 %6122  ;;  %v6315_v40 = vadd.f32 %v6308_v7, %v9488_v37 }
 0xa3d   : > { %v6969_v61 = vpop.eup %6968  ;;  %v6136_v39 = vadd.f32 %v6123_v28, %v9488_v37 }
 0xa3e   : > { %v6331_v45 = vperm.slane %v6969_v61, %v9508_v24  ;;  %v6971_v11 = vpop.eup %6970 }
 0xa3f   : > { %6976 = vtanh.f32 %v6136_v39  ;;  %v6973_v10 = vpop.eup %6972  ;;  %v6154_v62 = vperm.slane %v6971_v11, %v9508_v24 }
 0xa40   : > { %v6337_v27 = vsel %vm3686_vm3, %v6331_v45, %v6330_v25  ;;  %v6975_v9 = vpop.eup %6974  ;;  %6978 = vtanh.f32 %v6137_v33  ;;  %v6155_v3 = vperm.slane %v6973_v10, %v9508_v24 }
 0xa41   : > { %v6156_v15 = vperm.slane %v6975_v9, %v9508_v24  ;;  %6980 = vtanh.f32 %v6138_v42 }
 0xa42   : > { %v6161_v20 = vsel %vm3686_vm3, %v6155_v3, %v6154_v62 }
 0xa43   : > { %v6162_v54 = vsel %vm3688_vm4, %v6156_v15, %v6161_v20 }
 0xa44   : > { %v6302_v5 = vpop.xlane.xlu0 %6301 }
 0xa45   : > { %v6977_v18 = vpop.eup %6976  ;;  %v6313_v41 = vadd.f32 %v6302_v5, %v9488_v37 }
 0xa46   : > { %v6157_v6 = vperm.slane %v6977_v18, %v9508_v24  ;;  %v6979_v49 = vpop.eup %6978 }
 0xa47   : > { %v6981_v1 = vpop.eup %6980  ;;  %v6158_v29 = vperm.slane %v6979_v49, %v9508_v24  ;;  %v3456_v43 = vpop.f32.mrf.mxu3 }
 0xa48   : > { %v6163_v32 = vsel %vm3690_vm5, %v6157_v6, %v6162_v54  ;;  %v6159_v34 = vperm.slane %v6981_v1, %v9508_v24 }
 0xa49   : > { %v6164_v8 = vsel %vm3692_vm6, %v6158_v29, %v6163_v32 }
 0xa4a   : > { %v6165_v26 = vsel %vm3694_vm7, %v6159_v34, %v6164_v8 }
 0xa4c   : > { %v6132_v46 = vpop.xlane.xlu0 %6131 }
 0xa4d   : > { %v6139_v13 = vadd.f32 %v6132_v46, %v9488_v37 }
 0xa4f   : > { %6982 = vtanh.f32 %v6139_v13  ;;  %v3496_v14 = vpop.f32.mrf.mxu3 }
 0xa50   : > { %6984 = vtanh.f32 %v6311_v51 }
 0xa51   : > { %6986 = vtanh.f32 %v6313_v41 }
 0xa52   : > { %6988 = vtanh.f32 %v6312_v56 }
 0xa53   : > { %6990 = vtanh.f32 %v6315_v40 }
 0xa55   : > { %v6983_v44 = vpop.eup %6982 }
 0xa56   : > { %v6160_v22 = vperm.slane %v6983_v44, %v9508_v24  ;;  %v6985_v58 = vpop.eup %6984 }
 0xa57   : > { %v6987_v31 = vpop.eup %6986  ;;  %v6332_v36 = vperm.slane %v6985_v58, %v9508_v24 }
 0xa58   : > { %v6166_v2 = vsel %vm3696_vm8, %v6160_v22, %v6165_v26  ;;  %v6989_v38 = vpop.eup %6988  ;;  %v6334_v21 = vperm.slane %v6987_v31, %v9508_v24 }
 0xa59   : > { %6660 = vst.msk [vmem:[%s9556_s14 + $0x70] sm:$0x7f] %vm3699_vm9, %v6166_v2  ;;  %v6338_v35 = vsel %vm3688_vm4, %v6332_v36, %v6337_v27  ;;  %v6991_v52 = vpop.eup %6990  ;;  %v6333_v60 = vperm.slane %v6989_v38, %v9508_v24 }
 0xa5a   : > { %v6336_v16 = vperm.slane %v6991_v52, %v9508_v24 }
 0xa5b   : > { %v6339_v47 = vsel %vm3690_vm5, %v6333_v60, %v6338_v35 }
 0xa5c   : > { %v6340_v63 = vsel %vm3692_vm6, %v6334_v21, %v6339_v47 }
 0xa82   : > { %v6305_v30 = vpop.xlane.xlu2 %6304 }
 0xa83   : > { %v6314_v17 = vadd.f32 %v6305_v30, %v9488_v37 }
 0xa85   : > { %6992 = vtanh.f32 %v6314_v17 }
 0xa8b   : > { %v6993_v19 = vpop.eup %6992 }
 0xa8c   : > { %v6335_v37 = vperm.slane %v6993_v19, %v9508_v24 }
 0xa8e   : > { %v6341_v55 = vsel %vm3694_vm7, %v6335_v37, %v6340_v63 }
 0xa8f   : > { %v6342_v59 = vsel %vm3696_vm8, %v6336_v16, %v6341_v55 }
 0xa90   : > { %6661 = vst.msk [vmem:[%s9556_s14 + $0x78] sm:$0x7f] %vm3699_vm9, %v6342_v59 }
 0xa91 PF: > { %s21_s26 = sadd.s32 1, %s7158_s26  }
 0xa92   : > { %p18_p7 = scmp.ge.s32.totalorder %s21_s26, 4  }
 0xa94   :  { %20 = sbr.rel (!%p18_p7) target bundleno = 5 (0x5), region = 131 }
 0xa99   :  { %6367 = vsyncpa [#allocation6], 1 }
 0xa9a   :  { %6369 = vsyncpa [#allocation6 + $0x1], 1 }
 0xa9b   :  { %6370 = vsyncpa [#allocation8], 1 }
 0xa9c   :  { %6371 = vsyncpa [#allocation11], 1 }

</bundles_post_ra>
